<compile_context>
chip_gen: v5e
topology: v5e:2x2
jax: 0.10.0
libtpu: 0.0.40
codegen_flags: <defaults>
</compile_context>

<pallas_src>
import math

import jax
import jax.numpy as jnp
from jax.experimental import pallas as pl
from jax.experimental.pallas import tpu as pltpu

# ---- model hyper-parameters (small, consistent with the module) -------------
D_MODEL = 32
N_HEAD = 4
D_FF = 64
T_TGT = 8       # target (query) sequence length
S_MEM = 16      # memory sequence length
BATCH = 2
NUM_LAYERS = 3  # -> 1 input block, 1 middle block, 1 output block (+1 skip Linear)
EPS = 1e-5

# Row indices inside the packed per-layer "vecs" slab (lane width = D_FF = 64).
R_SA_BQK = 0      # [bq*scale | bk] for the fused self-attn QK projection (64 lanes)
R_SA_BV = 1
R_SA_BO = 2
R_CA_BQ = 3       # pre-scaled
R_CA_BK = 4
R_CA_BV = 5
R_CA_BO = 6
R_B1 = 7          # FFN bias 1 (length D_FF)
R_B2 = 8
R_LN = 9          # rows 9..14: (g1, b1), (g2, b2), (g3, b3)
N_VEC_ROWS = 16


# ------------------------- fused decoder-stack kernel ------------------------
def _make_kernel(batch):
    D = D_MODEL
    H = N_HEAD
    Dh = D // H

    def kernel(tgt_ref, qp_ref, mem_ref, pos_ref,
               w_attn_ref, w_ffn_ref, vecs_ref, w_skip_ref,
               out_ref, ctx_ref):
        B = batch
        BT = tgt_ref.shape[0]
        BS = mem_ref.shape[0]
        T = BT // B
        S = BS // B
        NB = w_skip_ref.shape[0]          # number of input (= output) blocks

        x = tgt_ref[...]                  # (B*T, D) fp32, stays VMEM-resident
        qp = qp_ref[...]
        mem = mem_ref[...]                # (B*S, D)
        mem_k = mem + pos_ref[...]        # cross-attention key input

        # ---- multi-head attention core (projections done by the caller) ----
        def attn_core(q, k, v, Tk):
            # q: (B*T, D) already scaled; k, v: (B*Tk, D); heads = Dh-wide lane blocks.
            for h in range(H):            # static, small head count
                sl = slice(h * Dh, (h + 1) * Dh)
                qh = q[:, sl].reshape(B, T, Dh)
                kh = k[:, sl].reshape(B, Tk, Dh)
                vh = v[:, sl].reshape(B, Tk, Dh)
                s = jnp.einsum('btd,bsd->bts', qh, kh,
                               preferred_element_type=jnp.float32)
                s = s - jnp.max(s, axis=-1, keepdims=True)
                p = jnp.exp(s)
                p = p * pl.reciprocal(jnp.sum(p, axis=-1, keepdims=True),
                                      approx=True)
                ch = jnp.einsum('bts,bsd->btd', p, vh,
                                preferred_element_type=jnp.float32)
                ctx_ref[:, sl] = ch.reshape(B * T, Dh)
            return ctx_ref[...]           # (B*T, D): heads re-packed along lanes

        def layer_norm(v, g, b):
            # single-pass variance: the two lane reductions are independent
            mu = jnp.mean(v, axis=-1, keepdims=True)
            m2 = jnp.mean(v * v, axis=-1, keepdims=True)
            return (v - mu) * jax.lax.rsqrt(m2 - mu * mu + EPS) * g + b

        def decoder_layer(x, l):
            # --- self-attention: q = k = x + query_pos, v = x (fused QK matmul) ---
            xqp = x + qp
            qk = (jnp.dot(xqp, w_attn_ref[l, :, 0:2 * D],
                          preferred_element_type=jnp.float32)
                  + vecs_ref[l, R_SA_BQK, :])               # (B*T, 2D), q pre-scaled
            v = (jnp.dot(x, w_attn_ref[l, :, 2 * D:3 * D],
                         preferred_element_type=jnp.float32)
                 + vecs_ref[l, R_SA_BV, :D])
            ctx = attn_core(qk[:, :D], qk[:, D:2 * D], v, T)
            sa = (jnp.dot(ctx, w_attn_ref[l, :, 3 * D:4 * D],
                          preferred_element_type=jnp.float32)
                  + vecs_ref[l, R_SA_BO, :D])
            x = layer_norm(x + sa,
                           vecs_ref[l, R_LN + 0, :D], vecs_ref[l, R_LN + 1, :D])

            # --- cross-attention: q = x + query_pos, k = memory + pos, v = memory ---
            xqp = x + qp
            q = (jnp.dot(xqp, w_attn_ref[l, :, 4 * D:5 * D],
                         preferred_element_type=jnp.float32)
                 + vecs_ref[l, R_CA_BQ, :D])                # pre-scaled
            k = (jnp.dot(mem_k, w_attn_ref[l, :, 5 * D:6 * D],
                         preferred_element_type=jnp.float32)
                 + vecs_ref[l, R_CA_BK, :D])
            vv = (jnp.dot(mem, w_attn_ref[l, :, 6 * D:7 * D],
                          preferred_element_type=jnp.float32)
                  + vecs_ref[l, R_CA_BV, :D])
            ctx = attn_core(q, k, vv, S)
            ca = (jnp.dot(ctx, w_attn_ref[l, :, 7 * D:8 * D],
                          preferred_element_type=jnp.float32)
                  + vecs_ref[l, R_CA_BO, :D])
            x = layer_norm(x + ca,
                           vecs_ref[l, R_LN + 2, :D], vecs_ref[l, R_LN + 3, :D])

            # --- FFN (linear1 -> ReLU -> linear2) ---
            hdn = jnp.maximum(
                jnp.dot(x, w_ffn_ref[l, :D, :],
                        preferred_element_type=jnp.float32)
                + vecs_ref[l, R_B1, :], 0.0)
            ffn = (jnp.dot(hdn, w_ffn_ref[l, D:, :D],
                           preferred_element_type=jnp.float32)
                   + vecs_ref[l, R_B2, :D])
            return layer_norm(x + ffn,
                              vecs_ref[l, R_LN + 4, :D], vecs_ref[l, R_LN + 5, :D])

        # ---- SkipTransformerDecoder structure (all inside one kernel) ----
        xs = []
        for i in range(NB):                       # input blocks
            x = decoder_layer(x, i)
            xs.append(x)
        x = decoder_layer(x, NB)                  # middle block
        for j in range(NB):                       # output blocks with skip Linear
            skip = xs.pop()
            # cat([x, skip], -1) @ W.T + b  ==  x @ Wx + skip @ Ws + b (pre-split)
            x = (jnp.dot(x, w_skip_ref[j, :D, :],
                         preferred_element_type=jnp.float32)
                 + jnp.dot(skip, w_skip_ref[j, D:2 * D, :],
                           preferred_element_type=jnp.float32)
                 + w_skip_ref[j, 2 * D, :])
            x = decoder_layer(x, NB + 1 + j)

        out_ref[...] = x.astype(out_ref.dtype)

    return kernel


@jax.jit
def skip_transformer_decoder(tgt, memory, query_pos, pos, kernel_params):
    """Single fused pallas_call: grid=(), 8 packed VMEM-resident inputs."""
    B, T, D = tgt.shape
    S = memory.shape[1]
    out2d = pl.pallas_call(
        _make_kernel(B),
        out_shape=jax.ShapeDtypeStruct((B * T, D), tgt.dtype),
        scratch_shapes=[pltpu.VMEM((B * T, D), jnp.float32)],   # per-attention ctx
    )(tgt.reshape(B * T, D), query_pos.reshape(B * T, D),
      memory.reshape(B * S, D), pos.reshape(B * S, D),
      kernel_params['w_attn'], kernel_params['w_ffn'],
      kernel_params['vecs'], kernel_params['w_skip'])
    return out2d.reshape(B, T, D)


# ----------------------------- parameter init --------------------------------
def _xavier(key, shape):
    fan_out, fan_in = shape
    limit = math.sqrt(6.0 / (fan_in + fan_out))
    return jax.random.uniform(key, shape, jnp.float32, -limit, limit)


def _init_decoder_layer(key):
    ks = jax.random.split(key, 6)
    d, dff = D_MODEL, D_FF
    return dict(
        sa_in_w=_xavier(ks[0], (3 * d, d)), sa_in_b=jnp.zeros((3 * d,), jnp.float32),
        sa_out_w=_xavier(ks[1], (d, d)), sa_out_b=jnp.zeros((d,), jnp.float32),
        ca_in_w=_xavier(ks[2], (3 * d, d)), ca_in_b=jnp.zeros((3 * d,), jnp.float32),
        ca_out_w=_xavier(ks[3], (d, d)), ca_out_b=jnp.zeros((d,), jnp.float32),
        w1=_xavier(ks[4], (dff, d)), b1=jnp.zeros((dff,), jnp.float32),
        w2=_xavier(ks[5], (d, dff)), b2=jnp.zeros((d,), jnp.float32),
        g1=jnp.ones((d,), jnp.float32), be1=jnp.zeros((d,), jnp.float32),
        g2=jnp.ones((d,), jnp.float32), be2=jnp.zeros((d,), jnp.float32),
        g3=jnp.ones((d,), jnp.float32), be3=jnp.zeros((d,), jnp.float32),
    )


def init_params(key, num_layers=NUM_LAYERS):
    if num_layers % 2 == 0:
        num_layers += 1
    num_block = (num_layers - 1) // 2
    keys = jax.random.split(key, 2 * num_block + 1 + num_block)
    ki = iter(keys)
    return dict(
        input_blocks=[_init_decoder_layer(next(ki)) for _ in range(num_block)],
        middle_block=_init_decoder_layer(next(ki)),
        output_blocks=[_init_decoder_layer(next(ki)) for _ in range(num_block)],
        linear_blocks=[dict(w=_xavier(next(ki), (D_MODEL, 2 * D_MODEL)),
                            b=jnp.zeros((D_MODEL,), jnp.float32))
                       for _ in range(num_block)],
    )


# ------------- host-side layout prep: pack into 4 lane-dense slabs -----------
def prepare_params(params):
    """PyTorch-layout params -> 4 packed kernel slabs (scale folded into Wq/bq)."""
    D, DFF = D_MODEL, D_FF
    scale = (D // N_HEAD) ** -0.5
    layers = (list(params['input_blocks']) + [params['middle_block']]
              + list(params['output_blocks']))

    def pad64(v):
        return jnp.pad(v, (0, DFF - v.shape[0]))

    w_attn, w_ffn, vecs = [], [], []
    for lp in layers:
        saw, sab = lp['sa_in_w'], lp['sa_in_b']
        caw, cab = lp['ca_in_w'], lp['ca_in_b']
        wq, wk, wv = saw[:D].T * scale, saw[D:2 * D].T, saw[2 * D:].T
        bq, bk, bv = sab[:D] * scale, sab[D:2 * D], sab[2 * D:]
        cwq, cwk, cwv = caw[:D].T * scale, caw[D:2 * D].T, caw[2 * D:].T
        cbq, cbk, cbv = cab[:D] * scale, cab[D:2 * D], cab[2 * D:]
        # (D, 8D) = 256 lanes: [sa_Wq|sa_Wk|sa_Wv|sa_Wo|ca_Wq|ca_Wk|ca_Wv|ca_Wo]
        w_attn.append(jnp.concatenate(
            [wq, wk, wv, lp['sa_out_w'].T, cwq, cwk, cwv, lp['ca_out_w'].T], axis=1))
        # (D+DFF, DFF): rows 0:D = W1 (D,DFF); rows D: = W2 (DFF,D) in lanes 0:D
        w_ffn.append(jnp.concatenate(
            [lp['w1'].T, jnp.pad(lp['w2'].T, ((0, 0), (0, DFF - D)))], axis=0))
        # (N_VEC_ROWS, DFF): every per-layer vector as its own lane-0-aligned row
        rows = [
            jnp.concatenate([bq, bk]),           # 0: fused self-attn QK bias
            pad64(bv),                           # 1
            pad64(lp['sa_out_b']),               # 2
            pad64(cbq),                          # 3 (pre-scaled)
            pad64(cbk),                          # 4
            pad64(cbv),                          # 5
            pad64(lp['ca_out_b']),               # 6
            lp['b1'],                            # 7 (length DFF)
            pad64(lp['b2']),                     # 8
            pad64(lp['g1']), pad64(lp['be1']),   # 9, 10
            pad64(lp['g2']), pad64(lp['be2']),   # 11, 12
            pad64(lp['g3']), pad64(lp['be3']),   # 13, 14
        ]
        rows += [jnp.zeros((DFF,), jnp.float32)] * (N_VEC_ROWS - len(rows))
        vecs.append(jnp.stack(rows))
    # skip Linear(2D -> D): rows 0:D = Wx, rows D:2D = Ws, row 2D = bias
    w_skip = [jnp.concatenate([lin['w'].T, lin['b'][None, :]], axis=0)
              for lin in params['linear_blocks']]
    return dict(w_attn=jnp.stack(w_attn), w_ffn=jnp.stack(w_ffn),
                vecs=jnp.stack(vecs), w_skip=jnp.stack(w_skip))


# --------------------- pure-JAX reference (PyTorch layout) -------------------
def _mha_ref(q_in, k_in, v_in, in_w, in_b, out_w, out_b):
    B, Tq, D = q_in.shape
    Tk = k_in.shape[1]
    Dh = D // N_HEAD
    wq, wk, wv = in_w[:D], in_w[D:2 * D], in_w[2 * D:]
    bq, bk, bv = in_b[:D], in_b[D:2 * D], in_b[2 * D:]
    q = jnp.einsum('btd,od->bto', q_in, wq, precision='highest') + bq
    k = jnp.einsum('btd,od->bto', k_in, wk, precision='highest') + bk
    v = jnp.einsum('btd,od->bto', v_in, wv, precision='highest') + bv
    q = q.reshape(B, Tq, N_HEAD, Dh).transpose(0, 2, 1, 3) * (Dh ** -0.5)
    k = k.reshape(B, Tk, N_HEAD, Dh).transpose(0, 2, 1, 3)
    v = v.reshape(B, Tk, N_HEAD, Dh).transpose(0, 2, 1, 3)
    s = jnp.einsum('bhtd,bhsd->bhts', q, k, precision='highest')
    p = jax.nn.softmax(s, axis=-1)
    ctx = jnp.einsum('bhts,bhsd->bhtd', p, v, precision='highest')
    ctx = ctx.transpose(0, 2, 1, 3).reshape(B, Tq, D)
    return jnp.einsum('btd,od->bto', ctx, out_w, precision='highest') + out_b


def _layer_norm_ref(x, g, b):
    mu = jnp.mean(x, -1, keepdims=True)
    var = jnp.mean((x - mu) ** 2, -1, keepdims=True)
    return (x - mu) * jax.lax.rsqrt(var + EPS) * g + b


def _decoder_layer_ref(x, memory, qp, pos, p):
    q = x + qp
    sa = _mha_ref(q, q, x, p['sa_in_w'], p['sa_in_b'], p['sa_out_w'], p['sa_out_b'])
    x = _layer_norm_ref(x + sa, p['g1'], p['be1'])
    ca = _mha_ref(x + qp, memory + pos, memory,
                  p['ca_in_w'], p['ca_in_b'], p['ca_out_w'], p['ca_out_b'])
    x = _layer_norm_ref(x + ca, p['g2'], p['be2'])
    h = jax.nn.relu(jnp.einsum('btd,fd->btf', x, p['w1'], precision='highest') + p['b1'])
    f = jnp.einsum('btf,df->btd', h, p['w2'], precision='highest') + p['b2']
    return _layer_norm_ref(x + f, p['g3'], p['be3'])


def skip_transformer_decoder_ref(tgt, memory, params, query_pos, pos):
    x = tgt
    xs = []
    for lp in params['input_blocks']:
        x = _decoder_layer_ref(x, memory, query_pos, pos, lp)
        xs.append(x)
    x = _decoder_layer_ref(x, memory, query_pos, pos, params['middle_block'])
    for lp, lin in zip(params['output_blocks'], params['linear_blocks']):
        skip = xs.pop()
        cat = jnp.concatenate([x, skip], axis=-1)
        x = jnp.einsum('btd,od->bto', cat, lin['w'], precision='highest') + lin['b']
        x = _decoder_layer_ref(x, memory, query_pos, pos, lp)
    return x   # self.norm is None in this configuration


# ------------------------------------ main -----------------------------------
if __name__ == "__main__":
    key = jax.random.PRNGKey(0)
    k_tgt, k_mem, k_qp, k_pos, k_par = jax.random.split(key, 5)
    tgt = jax.random.normal(k_tgt, (BATCH, T_TGT, D_MODEL), jnp.float32)
    memory = jax.random.normal(k_mem, (BATCH, S_MEM, D_MODEL), jnp.float32)
    query_pos = jax.random.normal(k_qp, (BATCH, T_TGT, D_MODEL), jnp.float32)
    pos = jax.random.normal(k_pos, (BATCH, S_MEM, D_MODEL), jnp.float32)

    params = init_params(k_par)          # PyTorch-layout parameters
    kp = prepare_params(params)          # host-side packing into 4 lane-dense slabs

    out = skip_transformer_decoder(tgt, memory, query_pos, pos, kp)
    jax.block_until_ready(out)
    assert out.shape == (BATCH, T_TGT, D_MODEL)
    assert bool(jnp.all(jnp.isfinite(out)))

    ref = skip_transformer_decoder_ref(tgt, memory, params, query_pos, pos)
    max_err = float(jnp.max(jnp.abs(out - ref)))
    assert max_err < 5e-2, f"max abs error vs reference: {max_err}"

    print("KERNEL_OK")
</pallas_src>

<mosaic_0001>
module attributes {stable_mosaic.version = 11 : i64} {
  func.func @kernel(%arg0: memref<16x32xf32, #tpu.memory_space<vmem>>, %arg1: memref<16x32xf32, #tpu.memory_space<vmem>>, %arg2: memref<32x32xf32, #tpu.memory_space<vmem>>, %arg3: memref<32x32xf32, #tpu.memory_space<vmem>>, %arg4: memref<3x32x256xf32, #tpu.memory_space<vmem>>, %arg5: memref<3x96x64xf32, #tpu.memory_space<vmem>>, %arg6: memref<3x16x64xf32, #tpu.memory_space<vmem>>, %arg7: memref<1x65x32xf32, #tpu.memory_space<vmem>>, %arg8: memref<16x32xf32, #tpu.memory_space<vmem>>, %arg9: memref<16x32xf32, #tpu.memory_space<vmem>>) attributes {dimension_semantics = [], scalar_prefetch = 0 : i64, scratch_operands = 1 : i64, tpu.core_type = #tpu.core_type<tc>} {
    %c0 = arith.constant 0 : index
    %c0_0 = arith.constant 0 : index
    %0 = vector.load %arg0[%c0, %c0_0] : memref<16x32xf32, #tpu.memory_space<vmem>>, vector<16x32xf32>
    %c0_1 = arith.constant 0 : index
    %c0_2 = arith.constant 0 : index
    %1 = vector.load %arg1[%c0_1, %c0_2] : memref<16x32xf32, #tpu.memory_space<vmem>>, vector<16x32xf32>
    %c0_3 = arith.constant 0 : index
    %c0_4 = arith.constant 0 : index
    %2 = vector.load %arg2[%c0_3, %c0_4] : memref<32x32xf32, #tpu.memory_space<vmem>>, vector<32x32xf32>
    %c0_5 = arith.constant 0 : index
    %c0_6 = arith.constant 0 : index
    %3 = vector.load %arg3[%c0_5, %c0_6] : memref<32x32xf32, #tpu.memory_space<vmem>>, vector<32x32xf32>
    %4 = arith.addf %2, %3 : vector<32x32xf32>
    %5 = arith.addf %0, %1 : vector<16x32xf32>
    %c0_7 = arith.constant 0 : index
    %c0_8 = arith.constant 0 : index
    %c0_9 = arith.constant 0 : index
    %6 = vector.load %arg4[%c0_7, %c0_8, %c0_9] : memref<3x32x256xf32, #tpu.memory_space<vmem>>, vector<1x32x64xf32>
    %7 = vector.shape_cast %6 : vector<1x32x64xf32> to vector<32x64xf32>
    %cst = arith.constant dense<0.000000e+00> : vector<16x64xf32>
    %8 = tpu.matmul %5, %7, %cst {dimension_numbers = #tpu.dot_dimension_numbers<[1], [0], [0], [1], [0, 0, 1, 1], [], []>} : vector<16x32xf32>, vector<32x64xf32>, vector<16x64xf32> -> vector<16x64xf32>
    %c0_10 = arith.constant 0 : index
    %c0_11 = arith.constant 0 : index
    %c0_12 = arith.constant 0 : index
    %9 = vector.load %arg6[%c0_10, %c0_11, %c0_12] : memref<3x16x64xf32, #tpu.memory_space<vmem>>, vector<1x1x64xf32>
    %10 = vector.shape_cast %9 : vector<1x1x64xf32> to vector<64xf32>
    %11 = vector.shape_cast %10 : vector<64xf32> to vector<1x64xf32>
    %12 = vector.broadcast %11 : vector<1x64xf32> to vector<16x64xf32>
    %13 = arith.addf %8, %12 : vector<16x64xf32>
    %c0_13 = arith.constant 0 : index
    %c0_14 = arith.constant 0 : index
    %c64 = arith.constant 64 : index
    %14 = vector.load %arg4[%c0_13, %c0_14, %c64] : memref<3x32x256xf32, #tpu.memory_space<vmem>>, vector<1x32x32xf32>
    %15 = vector.shape_cast %14 : vector<1x32x32xf32> to vector<32x32xf32>
    %cst_15 = arith.constant dense<0.000000e+00> : vector<16x32xf32>
    %16 = tpu.matmul %0, %15, %cst_15 {dimension_numbers = #tpu.dot_dimension_numbers<[1], [0], [0], [1], [0, 0, 1, 1], [], []>} : vector<16x32xf32>, vector<32x32xf32>, vector<16x32xf32> -> vector<16x32xf32>
    %c0_16 = arith.constant 0 : index
    %c1 = arith.constant 1 : index
    %c0_17 = arith.constant 0 : index
    %17 = vector.load %arg6[%c0_16, %c1, %c0_17] : memref<3x16x64xf32, #tpu.memory_space<vmem>>, vector<1x1x32xf32>
    %18 = vector.shape_cast %17 : vector<1x1x32xf32> to vector<32xf32>
    %19 = vector.shape_cast %18 : vector<32xf32> to vector<1x32xf32>
    %20 = vector.broadcast %19 : vector<1x32xf32> to vector<16x32xf32>
    %21 = arith.addf %16, %20 : vector<16x32xf32>
    %22 = vector.extract_strided_slice %13 {offsets = [0, 0], sizes = [16, 32], strides = [1, 1]} : vector<16x64xf32> to vector<16x32xf32>
    %23 = vector.extract_strided_slice %13 {offsets = [0, 32], sizes = [16, 32], strides = [1, 1]} : vector<16x64xf32> to vector<16x32xf32>
    %24 = vector.extract_strided_slice %22 {offsets = [0, 0], sizes = [16, 8], strides = [1, 1]} : vector<16x32xf32> to vector<16x8xf32>
    %25 = vector.shape_cast %24 : vector<16x8xf32> to vector<2x8x8xf32>
    %26 = vector.extract_strided_slice %23 {offsets = [0, 0], sizes = [16, 8], strides = [1, 1]} : vector<16x32xf32> to vector<16x8xf32>
    %27 = vector.shape_cast %26 : vector<16x8xf32> to vector<2x8x8xf32>
    %28 = vector.extract_strided_slice %21 {offsets = [0, 0], sizes = [16, 8], strides = [1, 1]} : vector<16x32xf32> to vector<16x8xf32>
    %29 = vector.shape_cast %28 : vector<16x8xf32> to vector<2x8x8xf32>
    "tpu.trace_start"() <{level = 10 : i32, message = "btd,bsd->bts"}> : () -> ()
    %cst_18 = arith.constant dense<0.000000e+00> : vector<2x8x8xf32>
    %30 = tpu.matmul %25, %27, %cst_18 {dimension_numbers = #tpu.dot_dimension_numbers<[2], [2], [1], [1], [0, 0, 0, 1, 1, 1], [0], [0]>} : vector<2x8x8xf32>, vector<2x8x8xf32>, vector<2x8x8xf32> -> vector<2x8x8xf32>
    "tpu.trace_stop"() : () -> ()
    %cst_19 = arith.constant dense<0xFF800000> : vector<2x8xf32>
    %31 = vector.multi_reduction <maximumf>, %30, %cst_19 [2] : vector<2x8x8xf32> to vector<2x8xf32>
    %32 = vector.shape_cast %31 : vector<2x8xf32> to vector<2x8x1xf32>
    %33 = vector.broadcast %32 : vector<2x8x1xf32> to vector<2x8x8xf32>
    %34 = arith.subf %30, %33 : vector<2x8x8xf32>
    %35 = math.exp %34 : vector<2x8x8xf32>
    %cst_20 = arith.constant dense<0.000000e+00> : vector<2x8xf32>
    %36 = vector.multi_reduction <add>, %35, %cst_20 [2] : vector<2x8x8xf32> to vector<2x8xf32>
    %37 = vector.shape_cast %36 : vector<2x8xf32> to vector<2x8x1xf32>
    %38 = tpu.reciprocal %37 {approx = true} : vector<2x8x1xf32> -> vector<2x8x1xf32>
    %39 = vector.broadcast %38 : vector<2x8x1xf32> to vector<2x8x8xf32>
    %40 = arith.mulf %35, %39 : vector<2x8x8xf32>
    "tpu.trace_start"() <{level = 10 : i32, message = "bts,bsd->btd"}> : () -> ()
    %cst_21 = arith.constant dense<0.000000e+00> : vector<2x8x8xf32>
    %41 = tpu.matmul %40, %29, %cst_21 {dimension_numbers = #tpu.dot_dimension_numbers<[2], [1], [1], [2], [0, 0, 0, 1, 1, 2], [0], [0]>} : vector<2x8x8xf32>, vector<2x8x8xf32>, vector<2x8x8xf32> -> vector<2x8x8xf32>
    "tpu.trace_stop"() : () -> ()
    %42 = vector.shape_cast %41 : vector<2x8x8xf32> to vector<16x8xf32>
    %c0_22 = arith.constant 0 : index
    %c0_23 = arith.constant 0 : index
    %43 = vector.load %arg9[%c0_22, %c0_23] : memref<16x32xf32, #tpu.memory_space<vmem>>, vector<16x8xf32>
    tpu.vector_store %arg9[%c0_22, %c0_23], %42 {strides = array<i32>} : memref<16x32xf32, #tpu.memory_space<vmem>>, vector<16x8xf32>,
    %44 = vector.extract_strided_slice %22 {offsets = [0, 8], sizes = [16, 8], strides = [1, 1]} : vector<16x32xf32> to vector<16x8xf32>
    %45 = vector.shape_cast %44 : vector<16x8xf32> to vector<2x8x8xf32>
    %46 = vector.extract_strided_slice %23 {offsets = [0, 8], sizes = [16, 8], strides = [1, 1]} : vector<16x32xf32> to vector<16x8xf32>
    %47 = vector.shape_cast %46 : vector<16x8xf32> to vector<2x8x8xf32>
    %48 = vector.extract_strided_slice %21 {offsets = [0, 8], sizes = [16, 8], strides = [1, 1]} : vector<16x32xf32> to vector<16x8xf32>
    %49 = vector.shape_cast %48 : vector<16x8xf32> to vector<2x8x8xf32>
    "tpu.trace_start"() <{level = 10 : i32, message = "btd,bsd->bts"}> : () -> ()
    %cst_24 = arith.constant dense<0.000000e+00> : vector<2x8x8xf32>
    %50 = tpu.matmul %45, %47, %cst_24 {dimension_numbers = #tpu.dot_dimension_numbers<[2], [2], [1], [1], [0, 0, 0, 1, 1, 1], [0], [0]>} : vector<2x8x8xf32>, vector<2x8x8xf32>, vector<2x8x8xf32> -> vector<2x8x8xf32>
    "tpu.trace_stop"() : () -> ()
    %cst_25 = arith.constant dense<0xFF800000> : vector<2x8xf32>
    %51 = vector.multi_reduction <maximumf>, %50, %cst_25 [2] : vector<2x8x8xf32> to vector<2x8xf32>
    %52 = vector.shape_cast %51 : vector<2x8xf32> to vector<2x8x1xf32>
    %53 = vector.broadcast %52 : vector<2x8x1xf32> to vector<2x8x8xf32>
    %54 = arith.subf %50, %53 : vector<2x8x8xf32>
    %55 = math.exp %54 : vector<2x8x8xf32>
    %cst_26 = arith.constant dense<0.000000e+00> : vector<2x8xf32>
    %56 = vector.multi_reduction <add>, %55, %cst_26 [2] : vector<2x8x8xf32> to vector<2x8xf32>
    %57 = vector.shape_cast %56 : vector<2x8xf32> to vector<2x8x1xf32>
    %58 = tpu.reciprocal %57 {approx = true} : vector<2x8x1xf32> -> vector<2x8x1xf32>
    %59 = vector.broadcast %58 : vector<2x8x1xf32> to vector<2x8x8xf32>
    %60 = arith.mulf %55, %59 : vector<2x8x8xf32>
    "tpu.trace_start"() <{level = 10 : i32, message = "bts,bsd->btd"}> : () -> ()
    %cst_27 = arith.constant dense<0.000000e+00> : vector<2x8x8xf32>
    %61 = tpu.matmul %60, %49, %cst_27 {dimension_numbers = #tpu.dot_dimension_numbers<[2], [1], [1], [2], [0, 0, 0, 1, 1, 2], [0], [0]>} : vector<2x8x8xf32>, vector<2x8x8xf32>, vector<2x8x8xf32> -> vector<2x8x8xf32>
    "tpu.trace_stop"() : () -> ()
    %62 = vector.shape_cast %61 : vector<2x8x8xf32> to vector<16x8xf32>
    %c0_28 = arith.constant 0 : index
    %c8 = arith.constant 8 : index
    %63 = vector.load %arg9[%c0_28, %c8] : memref<16x32xf32, #tpu.memory_space<vmem>>, vector<16x8xf32>
    tpu.vector_store %arg9[%c0_28, %c8], %62 {strides = array<i32>} : memref<16x32xf32, #tpu.memory_space<vmem>>, vector<16x8xf32>,
    %64 = vector.extract_strided_slice %22 {offsets = [0, 16], sizes = [16, 8], strides = [1, 1]} : vector<16x32xf32> to vector<16x8xf32>
    %65 = vector.shape_cast %64 : vector<16x8xf32> to vector<2x8x8xf32>
    %66 = vector.extract_strided_slice %23 {offsets = [0, 16], sizes = [16, 8], strides = [1, 1]} : vector<16x32xf32> to vector<16x8xf32>
    %67 = vector.shape_cast %66 : vector<16x8xf32> to vector<2x8x8xf32>
    %68 = vector.extract_strided_slice %21 {offsets = [0, 16], sizes = [16, 8], strides = [1, 1]} : vector<16x32xf32> to vector<16x8xf32>
    %69 = vector.shape_cast %68 : vector<16x8xf32> to vector<2x8x8xf32>
    "tpu.trace_start"() <{level = 10 : i32, message = "btd,bsd->bts"}> : () -> ()
    %cst_29 = arith.constant dense<0.000000e+00> : vector<2x8x8xf32>
    %70 = tpu.matmul %65, %67, %cst_29 {dimension_numbers = #tpu.dot_dimension_numbers<[2], [2], [1], [1], [0, 0, 0, 1, 1, 1], [0], [0]>} : vector<2x8x8xf32>, vector<2x8x8xf32>, vector<2x8x8xf32> -> vector<2x8x8xf32>
    "tpu.trace_stop"() : () -> ()
    %cst_30 = arith.constant dense<0xFF800000> : vector<2x8xf32>
    %71 = vector.multi_reduction <maximumf>, %70, %cst_30 [2] : vector<2x8x8xf32> to vector<2x8xf32>
    %72 = vector.shape_cast %71 : vector<2x8xf32> to vector<2x8x1xf32>
    %73 = vector.broadcast %72 : vector<2x8x1xf32> to vector<2x8x8xf32>
    %74 = arith.subf %70, %73 : vector<2x8x8xf32>
    %75 = math.exp %74 : vector<2x8x8xf32>
    %cst_31 = arith.constant dense<0.000000e+00> : vector<2x8xf32>
    %76 = vector.multi_reduction <add>, %75, %cst_31 [2] : vector<2x8x8xf32> to vector<2x8xf32>
    %77 = vector.shape_cast %76 : vector<2x8xf32> to vector<2x8x1xf32>
    %78 = tpu.reciprocal %77 {approx = true} : vector<2x8x1xf32> -> vector<2x8x1xf32>
    %79 = vector.broadcast %78 : vector<2x8x1xf32> to vector<2x8x8xf32>
    %80 = arith.mulf %75, %79 : vector<2x8x8xf32>
    "tpu.trace_start"() <{level = 10 : i32, message = "bts,bsd->btd"}> : () -> ()
    %cst_32 = arith.constant dense<0.000000e+00> : vector<2x8x8xf32>
    %81 = tpu.matmul %80, %69, %cst_32 {dimension_numbers = #tpu.dot_dimension_numbers<[2], [1], [1], [2], [0, 0, 0, 1, 1, 2], [0], [0]>} : vector<2x8x8xf32>, vector<2x8x8xf32>, vector<2x8x8xf32> -> vector<2x8x8xf32>
    "tpu.trace_stop"() : () -> ()
    %82 = vector.shape_cast %81 : vector<2x8x8xf32> to vector<16x8xf32>
    %c0_33 = arith.constant 0 : index
    %c16 = arith.constant 16 : index
    %83 = vector.load %arg9[%c0_33, %c16] : memref<16x32xf32, #tpu.memory_space<vmem>>, vector<16x8xf32>
    tpu.vector_store %arg9[%c0_33, %c16], %82 {strides = array<i32>} : memref<16x32xf32, #tpu.memory_space<vmem>>, vector<16x8xf32>,
    %84 = vector.extract_strided_slice %22 {offsets = [0, 24], sizes = [16, 8], strides = [1, 1]} : vector<16x32xf32> to vector<16x8xf32>
    %85 = vector.shape_cast %84 : vector<16x8xf32> to vector<2x8x8xf32>
    %86 = vector.extract_strided_slice %23 {offsets = [0, 24], sizes = [16, 8], strides = [1, 1]} : vector<16x32xf32> to vector<16x8xf32>
    %87 = vector.shape_cast %86 : vector<16x8xf32> to vector<2x8x8xf32>
    %88 = vector.extract_strided_slice %21 {offsets = [0, 24], sizes = [16, 8], strides = [1, 1]} : vector<16x32xf32> to vector<16x8xf32>
    %89 = vector.shape_cast %88 : vector<16x8xf32> to vector<2x8x8xf32>
    "tpu.trace_start"() <{level = 10 : i32, message = "btd,bsd->bts"}> : () -> ()
    %cst_34 = arith.constant dense<0.000000e+00> : vector<2x8x8xf32>
    %90 = tpu.matmul %85, %87, %cst_34 {dimension_numbers = #tpu.dot_dimension_numbers<[2], [2], [1], [1], [0, 0, 0, 1, 1, 1], [0], [0]>} : vector<2x8x8xf32>, vector<2x8x8xf32>, vector<2x8x8xf32> -> vector<2x8x8xf32>
    "tpu.trace_stop"() : () -> ()
    %cst_35 = arith.constant dense<0xFF800000> : vector<2x8xf32>
    %91 = vector.multi_reduction <maximumf>, %90, %cst_35 [2] : vector<2x8x8xf32> to vector<2x8xf32>
    %92 = vector.shape_cast %91 : vector<2x8xf32> to vector<2x8x1xf32>
    %93 = vector.broadcast %92 : vector<2x8x1xf32> to vector<2x8x8xf32>
    %94 = arith.subf %90, %93 : vector<2x8x8xf32>
    %95 = math.exp %94 : vector<2x8x8xf32>
    %cst_36 = arith.constant dense<0.000000e+00> : vector<2x8xf32>
    %96 = vector.multi_reduction <add>, %95, %cst_36 [2] : vector<2x8x8xf32> to vector<2x8xf32>
    %97 = vector.shape_cast %96 : vector<2x8xf32> to vector<2x8x1xf32>
    %98 = tpu.reciprocal %97 {approx = true} : vector<2x8x1xf32> -> vector<2x8x1xf32>
    %99 = vector.broadcast %98 : vector<2x8x1xf32> to vector<2x8x8xf32>
    %100 = arith.mulf %95, %99 : vector<2x8x8xf32>
    "tpu.trace_start"() <{level = 10 : i32, message = "bts,bsd->btd"}> : () -> ()
    %cst_37 = arith.constant dense<0.000000e+00> : vector<2x8x8xf32>
    %101 = tpu.matmul %100, %89, %cst_37 {dimension_numbers = #tpu.dot_dimension_numbers<[2], [1], [1], [2], [0, 0, 0, 1, 1, 2], [0], [0]>} : vector<2x8x8xf32>, vector<2x8x8xf32>, vector<2x8x8xf32> -> vector<2x8x8xf32>
    "tpu.trace_stop"() : () -> ()
    %102 = vector.shape_cast %101 : vector<2x8x8xf32> to vector<16x8xf32>
    %c0_38 = arith.constant 0 : index
    %c24 = arith.constant 24 : index
    %103 = vector.load %arg9[%c0_38, %c24] : memref<16x32xf32, #tpu.memory_space<vmem>>, vector<16x8xf32>
    tpu.vector_store %arg9[%c0_38, %c24], %102 {strides = array<i32>} : memref<16x32xf32, #tpu.memory_space<vmem>>, vector<16x8xf32>,
    %c0_39 = arith.constant 0 : index
    %c0_40 = arith.constant 0 : index
    %104 = vector.load %arg9[%c0_39, %c0_40] : memref<16x32xf32, #tpu.memory_space<vmem>>, vector<16x32xf32>
    %c0_41 = arith.constant 0 : index
    %c0_42 = arith.constant 0 : index
    %c96 = arith.constant 96 : index
    %105 = vector.load %arg4[%c0_41, %c0_42, %c96] : memref<3x32x256xf32, #tpu.memory_space<vmem>>, vector<1x32x32xf32>
    %106 = vector.shape_cast %105 : vector<1x32x32xf32> to vector<32x32xf32>
    %cst_43 = arith.constant dense<0.000000e+00> : vector<16x32xf32>
    %107 = tpu.matmul %104, %106, %cst_43 {dimension_numbers = #tpu.dot_dimension_numbers<[1], [0], [0], [1], [0, 0, 1, 1], [], []>} : vector<16x32xf32>, vector<32x32xf32>, vector<16x32xf32> -> vector<16x32xf32>
    %c0_44 = arith.constant 0 : index
    %c2 = arith.constant 2 : index
    %c0_45 = arith.constant 0 : index
    %108 = vector.load %arg6[%c0_44, %c2, %c0_45] : memref<3x16x64xf32, #tpu.memory_space<vmem>>, vector<1x1x32xf32>
    %109 = vector.shape_cast %108 : vector<1x1x32xf32> to vector<32xf32>
    %110 = vector.shape_cast %109 : vector<32xf32> to vector<1x32xf32>
    %111 = vector.broadcast %110 : vector<1x32xf32> to vector<16x32xf32>
    %112 = arith.addf %107, %111 : vector<16x32xf32>
    %113 = arith.addf %0, %112 : vector<16x32xf32>
    %c0_46 = arith.constant 0 : index
    %c9 = arith.constant 9 : index
    %c0_47 = arith.constant 0 : index
    %114 = vector.load %arg6[%c0_46, %c9, %c0_47] : memref<3x16x64xf32, #tpu.memory_space<vmem>>, vector<1x1x32xf32>
    %115 = vector.shape_cast %114 : vector<1x1x32xf32> to vector<32xf32>
    %c0_48 = arith.constant 0 : index
    %c10 = arith.constant 10 : index
    %c0_49 = arith.constant 0 : index
    %116 = vector.load %arg6[%c0_48, %c10, %c0_49] : memref<3x16x64xf32, #tpu.memory_space<vmem>>, vector<1x1x32xf32>
    %117 = vector.shape_cast %116 : vector<1x1x32xf32> to vector<32xf32>
    %cst_50 = arith.constant dense<0.000000e+00> : vector<16xf32>
    %118 = vector.multi_reduction <add>, %113, %cst_50 [1] : vector<16x32xf32> to vector<16xf32>
    %119 = vector.shape_cast %118 : vector<16xf32> to vector<16x1xf32>
    %cst_51 = arith.constant 3.200000e+01 : f32
    %120 = vector.broadcast %cst_51 : f32 to vector<16x1xf32>
    %121 = arith.divf %119, %120 : vector<16x1xf32>
    %122 = arith.mulf %113, %113 : vector<16x32xf32>
    %cst_52 = arith.constant dense<0.000000e+00> : vector<16xf32>
    %123 = vector.multi_reduction <add>, %122, %cst_52 [1] : vector<16x32xf32> to vector<16xf32>
    %124 = vector.shape_cast %123 : vector<16xf32> to vector<16x1xf32>
    %cst_53 = arith.constant 3.200000e+01 : f32
    %125 = vector.broadcast %cst_53 : f32 to vector<16x1xf32>
    %126 = arith.divf %124, %125 : vector<16x1xf32>
    %127 = vector.broadcast %121 : vector<16x1xf32> to vector<16x32xf32>
    %128 = arith.subf %113, %127 : vector<16x32xf32>
    %129 = arith.mulf %121, %121 : vector<16x1xf32>
    %130 = arith.subf %126, %129 : vector<16x1xf32>
    %cst_54 = arith.constant 9.99999974E-6 : f32
    %131 = vector.broadcast %cst_54 : f32 to vector<16x1xf32>
    %132 = arith.addf %130, %131 : vector<16x1xf32>
    %133 = math.rsqrt %132 : vector<16x1xf32>
    %134 = vector.broadcast %133 : vector<16x1xf32> to vector<16x32xf32>
    %135 = arith.mulf %128, %134 : vector<16x32xf32>
    %136 = vector.shape_cast %115 : vector<32xf32> to vector<1x32xf32>
    %137 = vector.broadcast %136 : vector<1x32xf32> to vector<16x32xf32>
    %138 = arith.mulf %135, %137 : vector<16x32xf32>
    %139 = vector.shape_cast %117 : vector<32xf32> to vector<1x32xf32>
    %140 = vector.broadcast %139 : vector<1x32xf32> to vector<16x32xf32>
    %141 = arith.addf %138, %140 : vector<16x32xf32>
    %142 = arith.addf %141, %1 : vector<16x32xf32>
    %c0_55 = arith.constant 0 : index
    %c0_56 = arith.constant 0 : index
    %c128 = arith.constant 128 : index
    %143 = vector.load %arg4[%c0_55, %c0_56, %c128] : memref<3x32x256xf32, #tpu.memory_space<vmem>>, vector<1x32x32xf32>
    %144 = vector.shape_cast %143 : vector<1x32x32xf32> to vector<32x32xf32>
    %cst_57 = arith.constant dense<0.000000e+00> : vector<16x32xf32>
    %145 = tpu.matmul %142, %144, %cst_57 {dimension_numbers = #tpu.dot_dimension_numbers<[1], [0], [0], [1], [0, 0, 1, 1], [], []>} : vector<16x32xf32>, vector<32x32xf32>, vector<16x32xf32> -> vector<16x32xf32>
    %c0_58 = arith.constant 0 : index
    %c3 = arith.constant 3 : index
    %c0_59 = arith.constant 0 : index
    %146 = vector.load %arg6[%c0_58, %c3, %c0_59] : memref<3x16x64xf32, #tpu.memory_space<vmem>>, vector<1x1x32xf32>
    %147 = vector.shape_cast %146 : vector<1x1x32xf32> to vector<32xf32>
    %148 = vector.shape_cast %147 : vector<32xf32> to vector<1x32xf32>
    %149 = vector.broadcast %148 : vector<1x32xf32> to vector<16x32xf32>
    %150 = arith.addf %145, %149 : vector<16x32xf32>
    %c0_60 = arith.constant 0 : index
    %c0_61 = arith.constant 0 : index
    %c160 = arith.constant 160 : index
    %151 = vector.load %arg4[%c0_60, %c0_61, %c160] : memref<3x32x256xf32, #tpu.memory_space<vmem>>, vector<1x32x32xf32>
    %152 = vector.shape_cast %151 : vector<1x32x32xf32> to vector<32x32xf32>
    %cst_62 = arith.constant dense<0.000000e+00> : vector<32x32xf32>
    %153 = tpu.matmul %4, %152, %cst_62 {dimension_numbers = #tpu.dot_dimension_numbers<[1], [0], [0], [1], [0, 0, 1, 1], [], []>} : vector<32x32xf32>, vector<32x32xf32>, vector<32x32xf32> -> vector<32x32xf32>
    %c0_63 = arith.constant 0 : index
    %c4 = arith.constant 4 : index
    %c0_64 = arith.constant 0 : index
    %154 = vector.load %arg6[%c0_63, %c4, %c0_64] : memref<3x16x64xf32, #tpu.memory_space<vmem>>, vector<1x1x32xf32>
    %155 = vector.shape_cast %154 : vector<1x1x32xf32> to vector<32xf32>
    %156 = vector.shape_cast %155 : vector<32xf32> to vector<1x32xf32>
    %157 = vector.broadcast %156 : vector<1x32xf32> to vector<32x32xf32>
    %158 = arith.addf %153, %157 : vector<32x32xf32>
    %c0_65 = arith.constant 0 : index
    %c0_66 = arith.constant 0 : index
    %c192 = arith.constant 192 : index
    %159 = vector.load %arg4[%c0_65, %c0_66, %c192] : memref<3x32x256xf32, #tpu.memory_space<vmem>>, vector<1x32x32xf32>
    %160 = vector.shape_cast %159 : vector<1x32x32xf32> to vector<32x32xf32>
    %cst_67 = arith.constant dense<0.000000e+00> : vector<32x32xf32>
    %161 = tpu.matmul %2, %160, %cst_67 {dimension_numbers = #tpu.dot_dimension_numbers<[1], [0], [0], [1], [0, 0, 1, 1], [], []>} : vector<32x32xf32>, vector<32x32xf32>, vector<32x32xf32> -> vector<32x32xf32>
    %c0_68 = arith.constant 0 : index
    %c5 = arith.constant 5 : index
    %c0_69 = arith.constant 0 : index
    %162 = vector.load %arg6[%c0_68, %c5, %c0_69] : memref<3x16x64xf32, #tpu.memory_space<vmem>>, vector<1x1x32xf32>
    %163 = vector.shape_cast %162 : vector<1x1x32xf32> to vector<32xf32>
    %164 = vector.shape_cast %163 : vector<32xf32> to vector<1x32xf32>
    %165 = vector.broadcast %164 : vector<1x32xf32> to vector<32x32xf32>
    %166 = arith.addf %161, %165 : vector<32x32xf32>
    %167 = vector.extract_strided_slice %150 {offsets = [0, 0], sizes = [16, 8], strides = [1, 1]} : vector<16x32xf32> to vector<16x8xf32>
    %168 = vector.shape_cast %167 : vector<16x8xf32> to vector<2x8x8xf32>
    %169 = vector.extract_strided_slice %158 {offsets = [0, 0], sizes = [32, 8], strides = [1, 1]} : vector<32x32xf32> to vector<32x8xf32>
    %170 = vector.shape_cast %169 : vector<32x8xf32> to vector<2x16x8xf32>
    %171 = vector.extract_strided_slice %166 {offsets = [0, 0], sizes = [32, 8], strides = [1, 1]} : vector<32x32xf32> to vector<32x8xf32>
    %172 = vector.shape_cast %171 : vector<32x8xf32> to vector<2x16x8xf32>
    "tpu.trace_start"() <{level = 10 : i32, message = "btd,bsd->bts"}> : () -> ()
    %cst_70 = arith.constant dense<0.000000e+00> : vector<2x8x16xf32>
    %173 = tpu.matmul %168, %170, %cst_70 {dimension_numbers = #tpu.dot_dimension_numbers<[2], [2], [1], [1], [0, 0, 0, 1, 1, 1], [0], [0]>} : vector<2x8x8xf32>, vector<2x16x8xf32>, vector<2x8x16xf32> -> vector<2x8x16xf32>
    "tpu.trace_stop"() : () -> ()
    %cst_71 = arith.constant dense<0xFF800000> : vector<2x8xf32>
    %174 = vector.multi_reduction <maximumf>, %173, %cst_71 [2] : vector<2x8x16xf32> to vector<2x8xf32>
    %175 = vector.shape_cast %174 : vector<2x8xf32> to vector<2x8x1xf32>
    %176 = vector.broadcast %175 : vector<2x8x1xf32> to vector<2x8x16xf32>
    %177 = arith.subf %173, %176 : vector<2x8x16xf32>
    %178 = math.exp %177 : vector<2x8x16xf32>
    %cst_72 = arith.constant dense<0.000000e+00> : vector<2x8xf32>
    %179 = vector.multi_reduction <add>, %178, %cst_72 [2] : vector<2x8x16xf32> to vector<2x8xf32>
    %180 = vector.shape_cast %179 : vector<2x8xf32> to vector<2x8x1xf32>
    %181 = tpu.reciprocal %180 {approx = true} : vector<2x8x1xf32> -> vector<2x8x1xf32>
    %182 = vector.broadcast %181 : vector<2x8x1xf32> to vector<2x8x16xf32>
    %183 = arith.mulf %178, %182 : vector<2x8x16xf32>
    "tpu.trace_start"() <{level = 10 : i32, message = "bts,bsd->btd"}> : () -> ()
    %cst_73 = arith.constant dense<0.000000e+00> : vector<2x8x8xf32>
    %184 = tpu.matmul %183, %172, %cst_73 {dimension_numbers = #tpu.dot_dimension_numbers<[2], [1], [1], [2], [0, 0, 0, 1, 1, 2], [0], [0]>} : vector<2x8x16xf32>, vector<2x16x8xf32>, vector<2x8x8xf32> -> vector<2x8x8xf32>
    "tpu.trace_stop"() : () -> ()
    %185 = vector.shape_cast %184 : vector<2x8x8xf32> to vector<16x8xf32>
    %c0_74 = arith.constant 0 : index
    %c0_75 = arith.constant 0 : index
    %186 = vector.load %arg9[%c0_74, %c0_75] : memref<16x32xf32, #tpu.memory_space<vmem>>, vector<16x8xf32>
    tpu.vector_store %arg9[%c0_74, %c0_75], %185 {strides = array<i32>} : memref<16x32xf32, #tpu.memory_space<vmem>>, vector<16x8xf32>,
    %187 = vector.extract_strided_slice %150 {offsets = [0, 8], sizes = [16, 8], strides = [1, 1]} : vector<16x32xf32> to vector<16x8xf32>
    %188 = vector.shape_cast %187 : vector<16x8xf32> to vector<2x8x8xf32>
    %189 = vector.extract_strided_slice %158 {offsets = [0, 8], sizes = [32, 8], strides = [1, 1]} : vector<32x32xf32> to vector<32x8xf32>
    %190 = vector.shape_cast %189 : vector<32x8xf32> to vector<2x16x8xf32>
    %191 = vector.extract_strided_slice %166 {offsets = [0, 8], sizes = [32, 8], strides = [1, 1]} : vector<32x32xf32> to vector<32x8xf32>
    %192 = vector.shape_cast %191 : vector<32x8xf32> to vector<2x16x8xf32>
    "tpu.trace_start"() <{level = 10 : i32, message = "btd,bsd->bts"}> : () -> ()
    %cst_76 = arith.constant dense<0.000000e+00> : vector<2x8x16xf32>
    %193 = tpu.matmul %188, %190, %cst_76 {dimension_numbers = #tpu.dot_dimension_numbers<[2], [2], [1], [1], [0, 0, 0, 1, 1, 1], [0], [0]>} : vector<2x8x8xf32>, vector<2x16x8xf32>, vector<2x8x16xf32> -> vector<2x8x16xf32>
    "tpu.trace_stop"() : () -> ()
    %cst_77 = arith.constant dense<0xFF800000> : vector<2x8xf32>
    %194 = vector.multi_reduction <maximumf>, %193, %cst_77 [2] : vector<2x8x16xf32> to vector<2x8xf32>
    %195 = vector.shape_cast %194 : vector<2x8xf32> to vector<2x8x1xf32>
    %196 = vector.broadcast %195 : vector<2x8x1xf32> to vector<2x8x16xf32>
    %197 = arith.subf %193, %196 : vector<2x8x16xf32>
    %198 = math.exp %197 : vector<2x8x16xf32>
    %cst_78 = arith.constant dense<0.000000e+00> : vector<2x8xf32>
    %199 = vector.multi_reduction <add>, %198, %cst_78 [2] : vector<2x8x16xf32> to vector<2x8xf32>
    %200 = vector.shape_cast %199 : vector<2x8xf32> to vector<2x8x1xf32>
    %201 = tpu.reciprocal %200 {approx = true} : vector<2x8x1xf32> -> vector<2x8x1xf32>
    %202 = vector.broadcast %201 : vector<2x8x1xf32> to vector<2x8x16xf32>
    %203 = arith.mulf %198, %202 : vector<2x8x16xf32>
    "tpu.trace_start"() <{level = 10 : i32, message = "bts,bsd->btd"}> : () -> ()
    %cst_79 = arith.constant dense<0.000000e+00> : vector<2x8x8xf32>
    %204 = tpu.matmul %203, %192, %cst_79 {dimension_numbers = #tpu.dot_dimension_numbers<[2], [1], [1], [2], [0, 0, 0, 1, 1, 2], [0], [0]>} : vector<2x8x16xf32>, vector<2x16x8xf32>, vector<2x8x8xf32> -> vector<2x8x8xf32>
    "tpu.trace_stop"() : () -> ()
    %205 = vector.shape_cast %204 : vector<2x8x8xf32> to vector<16x8xf32>
    %c0_80 = arith.constant 0 : index
    %c8_81 = arith.constant 8 : index
    %206 = vector.load %arg9[%c0_80, %c8_81] : memref<16x32xf32, #tpu.memory_space<vmem>>, vector<16x8xf32>
    tpu.vector_store %arg9[%c0_80, %c8_81], %205 {strides = array<i32>} : memref<16x32xf32, #tpu.memory_space<vmem>>, vector<16x8xf32>,
    %207 = vector.extract_strided_slice %150 {offsets = [0, 16], sizes = [16, 8], strides = [1, 1]} : vector<16x32xf32> to vector<16x8xf32>
    %208 = vector.shape_cast %207 : vector<16x8xf32> to vector<2x8x8xf32>
    %209 = vector.extract_strided_slice %158 {offsets = [0, 16], sizes = [32, 8], strides = [1, 1]} : vector<32x32xf32> to vector<32x8xf32>
    %210 = vector.shape_cast %209 : vector<32x8xf32> to vector<2x16x8xf32>
    %211 = vector.extract_strided_slice %166 {offsets = [0, 16], sizes = [32, 8], strides = [1, 1]} : vector<32x32xf32> to vector<32x8xf32>
    %212 = vector.shape_cast %211 : vector<32x8xf32> to vector<2x16x8xf32>
    "tpu.trace_start"() <{level = 10 : i32, message = "btd,bsd->bts"}> : () -> ()
    %cst_82 = arith.constant dense<0.000000e+00> : vector<2x8x16xf32>
    %213 = tpu.matmul %208, %210, %cst_82 {dimension_numbers = #tpu.dot_dimension_numbers<[2], [2], [1], [1], [0, 0, 0, 1, 1, 1], [0], [0]>} : vector<2x8x8xf32>, vector<2x16x8xf32>, vector<2x8x16xf32> -> vector<2x8x16xf32>
    "tpu.trace_stop"() : () -> ()
    %cst_83 = arith.constant dense<0xFF800000> : vector<2x8xf32>
    %214 = vector.multi_reduction <maximumf>, %213, %cst_83 [2] : vector<2x8x16xf32> to vector<2x8xf32>
    %215 = vector.shape_cast %214 : vector<2x8xf32> to vector<2x8x1xf32>
    %216 = vector.broadcast %215 : vector<2x8x1xf32> to vector<2x8x16xf32>
    %217 = arith.subf %213, %216 : vector<2x8x16xf32>
    %218 = math.exp %217 : vector<2x8x16xf32>
    %cst_84 = arith.constant dense<0.000000e+00> : vector<2x8xf32>
    %219 = vector.multi_reduction <add>, %218, %cst_84 [2] : vector<2x8x16xf32> to vector<2x8xf32>
    %220 = vector.shape_cast %219 : vector<2x8xf32> to vector<2x8x1xf32>
    %221 = tpu.reciprocal %220 {approx = true} : vector<2x8x1xf32> -> vector<2x8x1xf32>
    %222 = vector.broadcast %221 : vector<2x8x1xf32> to vector<2x8x16xf32>
    %223 = arith.mulf %218, %222 : vector<2x8x16xf32>
    "tpu.trace_start"() <{level = 10 : i32, message = "bts,bsd->btd"}> : () -> ()
    %cst_85 = arith.constant dense<0.000000e+00> : vector<2x8x8xf32>
    %224 = tpu.matmul %223, %212, %cst_85 {dimension_numbers = #tpu.dot_dimension_numbers<[2], [1], [1], [2], [0, 0, 0, 1, 1, 2], [0], [0]>} : vector<2x8x16xf32>, vector<2x16x8xf32>, vector<2x8x8xf32> -> vector<2x8x8xf32>
    "tpu.trace_stop"() : () -> ()
    %225 = vector.shape_cast %224 : vector<2x8x8xf32> to vector<16x8xf32>
    %c0_86 = arith.constant 0 : index
    %c16_87 = arith.constant 16 : index
    %226 = vector.load %arg9[%c0_86, %c16_87] : memref<16x32xf32, #tpu.memory_space<vmem>>, vector<16x8xf32>
    tpu.vector_store %arg9[%c0_86, %c16_87], %225 {strides = array<i32>} : memref<16x32xf32, #tpu.memory_space<vmem>>, vector<16x8xf32>,
    %227 = vector.extract_strided_slice %150 {offsets = [0, 24], sizes = [16, 8], strides = [1, 1]} : vector<16x32xf32> to vector<16x8xf32>
    %228 = vector.shape_cast %227 : vector<16x8xf32> to vector<2x8x8xf32>
    %229 = vector.extract_strided_slice %158 {offsets = [0, 24], sizes = [32, 8], strides = [1, 1]} : vector<32x32xf32> to vector<32x8xf32>
    %230 = vector.shape_cast %229 : vector<32x8xf32> to vector<2x16x8xf32>
    %231 = vector.extract_strided_slice %166 {offsets = [0, 24], sizes = [32, 8], strides = [1, 1]} : vector<32x32xf32> to vector<32x8xf32>
    %232 = vector.shape_cast %231 : vector<32x8xf32> to vector<2x16x8xf32>
    "tpu.trace_start"() <{level = 10 : i32, message = "btd,bsd->bts"}> : () -> ()
    %cst_88 = arith.constant dense<0.000000e+00> : vector<2x8x16xf32>
    %233 = tpu.matmul %228, %230, %cst_88 {dimension_numbers = #tpu.dot_dimension_numbers<[2], [2], [1], [1], [0, 0, 0, 1, 1, 1], [0], [0]>} : vector<2x8x8xf32>, vector<2x16x8xf32>, vector<2x8x16xf32> -> vector<2x8x16xf32>
    "tpu.trace_stop"() : () -> ()
    %cst_89 = arith.constant dense<0xFF800000> : vector<2x8xf32>
    %234 = vector.multi_reduction <maximumf>, %233, %cst_89 [2] : vector<2x8x16xf32> to vector<2x8xf32>
    %235 = vector.shape_cast %234 : vector<2x8xf32> to vector<2x8x1xf32>
    %236 = vector.broadcast %235 : vector<2x8x1xf32> to vector<2x8x16xf32>
    %237 = arith.subf %233, %236 : vector<2x8x16xf32>
    %238 = math.exp %237 : vector<2x8x16xf32>
    %cst_90 = arith.constant dense<0.000000e+00> : vector<2x8xf32>
    %239 = vector.multi_reduction <add>, %238, %cst_90 [2] : vector<2x8x16xf32> to vector<2x8xf32>
    %240 = vector.shape_cast %239 : vector<2x8xf32> to vector<2x8x1xf32>
    %241 = tpu.reciprocal %240 {approx = true} : vector<2x8x1xf32> -> vector<2x8x1xf32>
    %242 = vector.broadcast %241 : vector<2x8x1xf32> to vector<2x8x16xf32>
    %243 = arith.mulf %238, %242 : vector<2x8x16xf32>
    "tpu.trace_start"() <{level = 10 : i32, message = "bts,bsd->btd"}> : () -> ()
    %cst_91 = arith.constant dense<0.000000e+00> : vector<2x8x8xf32>
    %244 = tpu.matmul %243, %232, %cst_91 {dimension_numbers = #tpu.dot_dimension_numbers<[2], [1], [1], [2], [0, 0, 0, 1, 1, 2], [0], [0]>} : vector<2x8x16xf32>, vector<2x16x8xf32>, vector<2x8x8xf32> -> vector<2x8x8xf32>
    "tpu.trace_stop"() : () -> ()
    %245 = vector.shape_cast %244 : vector<2x8x8xf32> to vector<16x8xf32>
    %c0_92 = arith.constant 0 : index
    %c24_93 = arith.constant 24 : index
    %246 = vector.load %arg9[%c0_92, %c24_93] : memref<16x32xf32, #tpu.memory_space<vmem>>, vector<16x8xf32>
    tpu.vector_store %arg9[%c0_92, %c24_93], %245 {strides = array<i32>} : memref<16x32xf32, #tpu.memory_space<vmem>>, vector<16x8xf32>,
    %c0_94 = arith.constant 0 : index
    %c0_95 = arith.constant 0 : index
    %247 = vector.load %arg9[%c0_94, %c0_95] : memref<16x32xf32, #tpu.memory_space<vmem>>, vector<16x32xf32>
    %c0_96 = arith.constant 0 : index
    %c0_97 = arith.constant 0 : index
    %c224 = arith.constant 224 : index
    %248 = vector.load %arg4[%c0_96, %c0_97, %c224] : memref<3x32x256xf32, #tpu.memory_space<vmem>>, vector<1x32x32xf32>
    %249 = vector.shape_cast %248 : vector<1x32x32xf32> to vector<32x32xf32>
    %cst_98 = arith.constant dense<0.000000e+00> : vector<16x32xf32>
    %250 = tpu.matmul %247, %249, %cst_98 {dimension_numbers = #tpu.dot_dimension_numbers<[1], [0], [0], [1], [0, 0, 1, 1], [], []>} : vector<16x32xf32>, vector<32x32xf32>, vector<16x32xf32> -> vector<16x32xf32>
    %c0_99 = arith.constant 0 : index
    %c6 = arith.constant 6 : index
    %c0_100 = arith.constant 0 : index
    %251 = vector.load %arg6[%c0_99, %c6, %c0_100] : memref<3x16x64xf32, #tpu.memory_space<vmem>>, vector<1x1x32xf32>
    %252 = vector.shape_cast %251 : vector<1x1x32xf32> to vector<32xf32>
    %253 = vector.shape_cast %252 : vector<32xf32> to vector<1x32xf32>
    %254 = vector.broadcast %253 : vector<1x32xf32> to vector<16x32xf32>
    %255 = arith.addf %250, %254 : vector<16x32xf32>
    %256 = arith.addf %141, %255 : vector<16x32xf32>
    %c0_101 = arith.constant 0 : index
    %c11 = arith.constant 11 : index
    %c0_102 = arith.constant 0 : index
    %257 = vector.load %arg6[%c0_101, %c11, %c0_102] : memref<3x16x64xf32, #tpu.memory_space<vmem>>, vector<1x1x32xf32>
    %258 = vector.shape_cast %257 : vector<1x1x32xf32> to vector<32xf32>
    %c0_103 = arith.constant 0 : index
    %c12 = arith.constant 12 : index
    %c0_104 = arith.constant 0 : index
    %259 = vector.load %arg6[%c0_103, %c12, %c0_104] : memref<3x16x64xf32, #tpu.memory_space<vmem>>, vector<1x1x32xf32>
    %260 = vector.shape_cast %259 : vector<1x1x32xf32> to vector<32xf32>
    %cst_105 = arith.constant dense<0.000000e+00> : vector<16xf32>
    %261 = vector.multi_reduction <add>, %256, %cst_105 [1] : vector<16x32xf32> to vector<16xf32>
    %262 = vector.shape_cast %261 : vector<16xf32> to vector<16x1xf32>
    %cst_106 = arith.constant 3.200000e+01 : f32
    %263 = vector.broadcast %cst_106 : f32 to vector<16x1xf32>
    %264 = arith.divf %262, %263 : vector<16x1xf32>
    %265 = arith.mulf %256, %256 : vector<16x32xf32>
    %cst_107 = arith.constant dense<0.000000e+00> : vector<16xf32>
    %266 = vector.multi_reduction <add>, %265, %cst_107 [1] : vector<16x32xf32> to vector<16xf32>
    %267 = vector.shape_cast %266 : vector<16xf32> to vector<16x1xf32>
    %cst_108 = arith.constant 3.200000e+01 : f32
    %268 = vector.broadcast %cst_108 : f32 to vector<16x1xf32>
    %269 = arith.divf %267, %268 : vector<16x1xf32>
    %270 = vector.broadcast %264 : vector<16x1xf32> to vector<16x32xf32>
    %271 = arith.subf %256, %270 : vector<16x32xf32>
    %272 = arith.mulf %264, %264 : vector<16x1xf32>
    %273 = arith.subf %269, %272 : vector<16x1xf32>
    %cst_109 = arith.constant 9.99999974E-6 : f32
    %274 = vector.broadcast %cst_109 : f32 to vector<16x1xf32>
    %275 = arith.addf %273, %274 : vector<16x1xf32>
    %276 = math.rsqrt %275 : vector<16x1xf32>
    %277 = vector.broadcast %276 : vector<16x1xf32> to vector<16x32xf32>
    %278 = arith.mulf %271, %277 : vector<16x32xf32>
    %279 = vector.shape_cast %258 : vector<32xf32> to vector<1x32xf32>
    %280 = vector.broadcast %279 : vector<1x32xf32> to vector<16x32xf32>
    %281 = arith.mulf %278, %280 : vector<16x32xf32>
    %282 = vector.shape_cast %260 : vector<32xf32> to vector<1x32xf32>
    %283 = vector.broadcast %282 : vector<1x32xf32> to vector<16x32xf32>
    %284 = arith.addf %281, %283 : vector<16x32xf32>
    %c0_110 = arith.constant 0 : index
    %c0_111 = arith.constant 0 : index
    %c0_112 = arith.constant 0 : index
    %285 = vector.load %arg5[%c0_110, %c0_111, %c0_112] : memref<3x96x64xf32, #tpu.memory_space<vmem>>, vector<1x32x64xf32>
    %286 = vector.shape_cast %285 : vector<1x32x64xf32> to vector<32x64xf32>
    %cst_113 = arith.constant dense<0.000000e+00> : vector<16x64xf32>
    %287 = tpu.matmul %284, %286, %cst_113 {dimension_numbers = #tpu.dot_dimension_numbers<[1], [0], [0], [1], [0, 0, 1, 1], [], []>} : vector<16x32xf32>, vector<32x64xf32>, vector<16x64xf32> -> vector<16x64xf32>
    %c0_114 = arith.constant 0 : index
    %c7 = arith.constant 7 : index
    %c0_115 = arith.constant 0 : index
    %288 = vector.load %arg6[%c0_114, %c7, %c0_115] : memref<3x16x64xf32, #tpu.memory_space<vmem>>, vector<1x1x64xf32>
    %289 = vector.shape_cast %288 : vector<1x1x64xf32> to vector<64xf32>
    %290 = vector.shape_cast %289 : vector<64xf32> to vector<1x64xf32>
    %291 = vector.broadcast %290 : vector<1x64xf32> to vector<16x64xf32>
    %292 = arith.addf %287, %291 : vector<16x64xf32>
    %cst_116 = arith.constant 0.000000e+00 : f32
    %293 = vector.broadcast %cst_116 : f32 to vector<16x64xf32>
    %294 = arith.maximumf %292, %293 : vector<16x64xf32>
    %c0_117 = arith.constant 0 : index
    %c32 = arith.constant 32 : index
    %c0_118 = arith.constant 0 : index
    %295 = vector.load %arg5[%c0_117, %c32, %c0_118] : memref<3x96x64xf32, #tpu.memory_space<vmem>>, vector<1x64x32xf32>
    %296 = vector.shape_cast %295 : vector<1x64x32xf32> to vector<64x32xf32>
    %cst_119 = arith.constant dense<0.000000e+00> : vector<16x32xf32>
    %297 = tpu.matmul %294, %296, %cst_119 {dimension_numbers = #tpu.dot_dimension_numbers<[1], [0], [0], [1], [0, 0, 1, 1], [], []>} : vector<16x64xf32>, vector<64x32xf32>, vector<16x32xf32> -> vector<16x32xf32>
    %c0_120 = arith.constant 0 : index
    %c8_121 = arith.constant 8 : index
    %c0_122 = arith.constant 0 : index
    %298 = vector.load %arg6[%c0_120, %c8_121, %c0_122] : memref<3x16x64xf32, #tpu.memory_space<vmem>>, vector<1x1x32xf32>
    %299 = vector.shape_cast %298 : vector<1x1x32xf32> to vector<32xf32>
    %300 = vector.shape_cast %299 : vector<32xf32> to vector<1x32xf32>
    %301 = vector.broadcast %300 : vector<1x32xf32> to vector<16x32xf32>
    %302 = arith.addf %297, %301 : vector<16x32xf32>
    %303 = arith.addf %284, %302 : vector<16x32xf32>
    %c0_123 = arith.constant 0 : index
    %c13 = arith.constant 13 : index
    %c0_124 = arith.constant 0 : index
    %304 = vector.load %arg6[%c0_123, %c13, %c0_124] : memref<3x16x64xf32, #tpu.memory_space<vmem>>, vector<1x1x32xf32>
    %305 = vector.shape_cast %304 : vector<1x1x32xf32> to vector<32xf32>
    %c0_125 = arith.constant 0 : index
    %c14 = arith.constant 14 : index
    %c0_126 = arith.constant 0 : index
    %306 = vector.load %arg6[%c0_125, %c14, %c0_126] : memref<3x16x64xf32, #tpu.memory_space<vmem>>, vector<1x1x32xf32>
    %307 = vector.shape_cast %306 : vector<1x1x32xf32> to vector<32xf32>
    %cst_127 = arith.constant dense<0.000000e+00> : vector<16xf32>
    %308 = vector.multi_reduction <add>, %303, %cst_127 [1] : vector<16x32xf32> to vector<16xf32>
    %309 = vector.shape_cast %308 : vector<16xf32> to vector<16x1xf32>
    %cst_128 = arith.constant 3.200000e+01 : f32
    %310 = vector.broadcast %cst_128 : f32 to vector<16x1xf32>
    %311 = arith.divf %309, %310 : vector<16x1xf32>
    %312 = arith.mulf %303, %303 : vector<16x32xf32>
    %cst_129 = arith.constant dense<0.000000e+00> : vector<16xf32>
    %313 = vector.multi_reduction <add>, %312, %cst_129 [1] : vector<16x32xf32> to vector<16xf32>
    %314 = vector.shape_cast %313 : vector<16xf32> to vector<16x1xf32>
    %cst_130 = arith.constant 3.200000e+01 : f32
    %315 = vector.broadcast %cst_130 : f32 to vector<16x1xf32>
    %316 = arith.divf %314, %315 : vector<16x1xf32>
    %317 = vector.broadcast %311 : vector<16x1xf32> to vector<16x32xf32>
    %318 = arith.subf %303, %317 : vector<16x32xf32>
    %319 = arith.mulf %311, %311 : vector<16x1xf32>
    %320 = arith.subf %316, %319 : vector<16x1xf32>
    %cst_131 = arith.constant 9.99999974E-6 : f32
    %321 = vector.broadcast %cst_131 : f32 to vector<16x1xf32>
    %322 = arith.addf %320, %321 : vector<16x1xf32>
    %323 = math.rsqrt %322 : vector<16x1xf32>
    %324 = vector.broadcast %323 : vector<16x1xf32> to vector<16x32xf32>
    %325 = arith.mulf %318, %324 : vector<16x32xf32>
    %326 = vector.shape_cast %305 : vector<32xf32> to vector<1x32xf32>
    %327 = vector.broadcast %326 : vector<1x32xf32> to vector<16x32xf32>
    %328 = arith.mulf %325, %327 : vector<16x32xf32>
    %329 = vector.shape_cast %307 : vector<32xf32> to vector<1x32xf32>
    %330 = vector.broadcast %329 : vector<1x32xf32> to vector<16x32xf32>
    %331 = arith.addf %328, %330 : vector<16x32xf32>
    %332 = arith.addf %331, %1 : vector<16x32xf32>
    %c1_132 = arith.constant 1 : index
    %c0_133 = arith.constant 0 : index
    %c0_134 = arith.constant 0 : index
    %333 = vector.load %arg4[%c1_132, %c0_133, %c0_134] : memref<3x32x256xf32, #tpu.memory_space<vmem>>, vector<1x32x64xf32>
    %334 = vector.shape_cast %333 : vector<1x32x64xf32> to vector<32x64xf32>
    %cst_135 = arith.constant dense<0.000000e+00> : vector<16x64xf32>
    %335 = tpu.matmul %332, %334, %cst_135 {dimension_numbers = #tpu.dot_dimension_numbers<[1], [0], [0], [1], [0, 0, 1, 1], [], []>} : vector<16x32xf32>, vector<32x64xf32>, vector<16x64xf32> -> vector<16x64xf32>
    %c1_136 = arith.constant 1 : index
    %c0_137 = arith.constant 0 : index
    %c0_138 = arith.constant 0 : index
    %336 = vector.load %arg6[%c1_136, %c0_137, %c0_138] : memref<3x16x64xf32, #tpu.memory_space<vmem>>, vector<1x1x64xf32>
    %337 = vector.shape_cast %336 : vector<1x1x64xf32> to vector<64xf32>
    %338 = vector.shape_cast %337 : vector<64xf32> to vector<1x64xf32>
    %339 = vector.broadcast %338 : vector<1x64xf32> to vector<16x64xf32>
    %340 = arith.addf %335, %339 : vector<16x64xf32>
    %c1_139 = arith.constant 1 : index
    %c0_140 = arith.constant 0 : index
    %c64_141 = arith.constant 64 : index
    %341 = vector.load %arg4[%c1_139, %c0_140, %c64_141] : memref<3x32x256xf32, #tpu.memory_space<vmem>>, vector<1x32x32xf32>
    %342 = vector.shape_cast %341 : vector<1x32x32xf32> to vector<32x32xf32>
    %cst_142 = arith.constant dense<0.000000e+00> : vector<16x32xf32>
    %343 = tpu.matmul %331, %342, %cst_142 {dimension_numbers = #tpu.dot_dimension_numbers<[1], [0], [0], [1], [0, 0, 1, 1], [], []>} : vector<16x32xf32>, vector<32x32xf32>, vector<16x32xf32> -> vector<16x32xf32>
    %c1_143 = arith.constant 1 : index
    %c1_144 = arith.constant 1 : index
    %c0_145 = arith.constant 0 : index
    %344 = vector.load %arg6[%c1_143, %c1_144, %c0_145] : memref<3x16x64xf32, #tpu.memory_space<vmem>>, vector<1x1x32xf32>
    %345 = vector.shape_cast %344 : vector<1x1x32xf32> to vector<32xf32>
    %346 = vector.shape_cast %345 : vector<32xf32> to vector<1x32xf32>
    %347 = vector.broadcast %346 : vector<1x32xf32> to vector<16x32xf32>
    %348 = arith.addf %343, %347 : vector<16x32xf32>
    %349 = vector.extract_strided_slice %340 {offsets = [0, 0], sizes = [16, 32], strides = [1, 1]} : vector<16x64xf32> to vector<16x32xf32>
    %350 = vector.extract_strided_slice %340 {offsets = [0, 32], sizes = [16, 32], strides = [1, 1]} : vector<16x64xf32> to vector<16x32xf32>
    %351 = vector.extract_strided_slice %349 {offsets = [0, 0], sizes = [16, 8], strides = [1, 1]} : vector<16x32xf32> to vector<16x8xf32>
    %352 = vector.shape_cast %351 : vector<16x8xf32> to vector<2x8x8xf32>
    %353 = vector.extract_strided_slice %350 {offsets = [0, 0], sizes = [16, 8], strides = [1, 1]} : vector<16x32xf32> to vector<16x8xf32>
    %354 = vector.shape_cast %353 : vector<16x8xf32> to vector<2x8x8xf32>
    %355 = vector.extract_strided_slice %348 {offsets = [0, 0], sizes = [16, 8], strides = [1, 1]} : vector<16x32xf32> to vector<16x8xf32>
    %356 = vector.shape_cast %355 : vector<16x8xf32> to vector<2x8x8xf32>
    "tpu.trace_start"() <{level = 10 : i32, message = "btd,bsd->bts"}> : () -> ()
    %cst_146 = arith.constant dense<0.000000e+00> : vector<2x8x8xf32>
    %357 = tpu.matmul %352, %354, %cst_146 {dimension_numbers = #tpu.dot_dimension_numbers<[2], [2], [1], [1], [0, 0, 0, 1, 1, 1], [0], [0]>} : vector<2x8x8xf32>, vector<2x8x8xf32>, vector<2x8x8xf32> -> vector<2x8x8xf32>
    "tpu.trace_stop"() : () -> ()
    %cst_147 = arith.constant dense<0xFF800000> : vector<2x8xf32>
    %358 = vector.multi_reduction <maximumf>, %357, %cst_147 [2] : vector<2x8x8xf32> to vector<2x8xf32>
    %359 = vector.shape_cast %358 : vector<2x8xf32> to vector<2x8x1xf32>
    %360 = vector.broadcast %359 : vector<2x8x1xf32> to vector<2x8x8xf32>
    %361 = arith.subf %357, %360 : vector<2x8x8xf32>
    %362 = math.exp %361 : vector<2x8x8xf32>
    %cst_148 = arith.constant dense<0.000000e+00> : vector<2x8xf32>
    %363 = vector.multi_reduction <add>, %362, %cst_148 [2] : vector<2x8x8xf32> to vector<2x8xf32>
    %364 = vector.shape_cast %363 : vector<2x8xf32> to vector<2x8x1xf32>
    %365 = tpu.reciprocal %364 {approx = true} : vector<2x8x1xf32> -> vector<2x8x1xf32>
    %366 = vector.broadcast %365 : vector<2x8x1xf32> to vector<2x8x8xf32>
    %367 = arith.mulf %362, %366 : vector<2x8x8xf32>
    "tpu.trace_start"() <{level = 10 : i32, message = "bts,bsd->btd"}> : () -> ()
    %cst_149 = arith.constant dense<0.000000e+00> : vector<2x8x8xf32>
    %368 = tpu.matmul %367, %356, %cst_149 {dimension_numbers = #tpu.dot_dimension_numbers<[2], [1], [1], [2], [0, 0, 0, 1, 1, 2], [0], [0]>} : vector<2x8x8xf32>, vector<2x8x8xf32>, vector<2x8x8xf32> -> vector<2x8x8xf32>
    "tpu.trace_stop"() : () -> ()
    %369 = vector.shape_cast %368 : vector<2x8x8xf32> to vector<16x8xf32>
    %c0_150 = arith.constant 0 : index
    %c0_151 = arith.constant 0 : index
    %370 = vector.load %arg9[%c0_150, %c0_151] : memref<16x32xf32, #tpu.memory_space<vmem>>, vector<16x8xf32>
    tpu.vector_store %arg9[%c0_150, %c0_151], %369 {strides = array<i32>} : memref<16x32xf32, #tpu.memory_space<vmem>>, vector<16x8xf32>,
    %371 = vector.extract_strided_slice %349 {offsets = [0, 8], sizes = [16, 8], strides = [1, 1]} : vector<16x32xf32> to vector<16x8xf32>
    %372 = vector.shape_cast %371 : vector<16x8xf32> to vector<2x8x8xf32>
    %373 = vector.extract_strided_slice %350 {offsets = [0, 8], sizes = [16, 8], strides = [1, 1]} : vector<16x32xf32> to vector<16x8xf32>
    %374 = vector.shape_cast %373 : vector<16x8xf32> to vector<2x8x8xf32>
    %375 = vector.extract_strided_slice %348 {offsets = [0, 8], sizes = [16, 8], strides = [1, 1]} : vector<16x32xf32> to vector<16x8xf32>
    %376 = vector.shape_cast %375 : vector<16x8xf32> to vector<2x8x8xf32>
    "tpu.trace_start"() <{level = 10 : i32, message = "btd,bsd->bts"}> : () -> ()
    %cst_152 = arith.constant dense<0.000000e+00> : vector<2x8x8xf32>
    %377 = tpu.matmul %372, %374, %cst_152 {dimension_numbers = #tpu.dot_dimension_numbers<[2], [2], [1], [1], [0, 0, 0, 1, 1, 1], [0], [0]>} : vector<2x8x8xf32>, vector<2x8x8xf32>, vector<2x8x8xf32> -> vector<2x8x8xf32>
    "tpu.trace_stop"() : () -> ()
    %cst_153 = arith.constant dense<0xFF800000> : vector<2x8xf32>
    %378 = vector.multi_reduction <maximumf>, %377, %cst_153 [2] : vector<2x8x8xf32> to vector<2x8xf32>
    %379 = vector.shape_cast %378 : vector<2x8xf32> to vector<2x8x1xf32>
    %380 = vector.broadcast %379 : vector<2x8x1xf32> to vector<2x8x8xf32>
    %381 = arith.subf %377, %380 : vector<2x8x8xf32>
    %382 = math.exp %381 : vector<2x8x8xf32>
    %cst_154 = arith.constant dense<0.000000e+00> : vector<2x8xf32>
    %383 = vector.multi_reduction <add>, %382, %cst_154 [2] : vector<2x8x8xf32> to vector<2x8xf32>
    %384 = vector.shape_cast %383 : vector<2x8xf32> to vector<2x8x1xf32>
    %385 = tpu.reciprocal %384 {approx = true} : vector<2x8x1xf32> -> vector<2x8x1xf32>
    %386 = vector.broadcast %385 : vector<2x8x1xf32> to vector<2x8x8xf32>
    %387 = arith.mulf %382, %386 : vector<2x8x8xf32>
    "tpu.trace_start"() <{level = 10 : i32, message = "bts,bsd->btd"}> : () -> ()
    %cst_155 = arith.constant dense<0.000000e+00> : vector<2x8x8xf32>
    %388 = tpu.matmul %387, %376, %cst_155 {dimension_numbers = #tpu.dot_dimension_numbers<[2], [1], [1], [2], [0, 0, 0, 1, 1, 2], [0], [0]>} : vector<2x8x8xf32>, vector<2x8x8xf32>, vector<2x8x8xf32> -> vector<2x8x8xf32>
    "tpu.trace_stop"() : () -> ()
    %389 = vector.shape_cast %388 : vector<2x8x8xf32> to vector<16x8xf32>
    %c0_156 = arith.constant 0 : index
    %c8_157 = arith.constant 8 : index
    %390 = vector.load %arg9[%c0_156, %c8_157] : memref<16x32xf32, #tpu.memory_space<vmem>>, vector<16x8xf32>
    tpu.vector_store %arg9[%c0_156, %c8_157], %389 {strides = array<i32>} : memref<16x32xf32, #tpu.memory_space<vmem>>, vector<16x8xf32>,
    %391 = vector.extract_strided_slice %349 {offsets = [0, 16], sizes = [16, 8], strides = [1, 1]} : vector<16x32xf32> to vector<16x8xf32>
    %392 = vector.shape_cast %391 : vector<16x8xf32> to vector<2x8x8xf32>
    %393 = vector.extract_strided_slice %350 {offsets = [0, 16], sizes = [16, 8], strides = [1, 1]} : vector<16x32xf32> to vector<16x8xf32>
    %394 = vector.shape_cast %393 : vector<16x8xf32> to vector<2x8x8xf32>
    %395 = vector.extract_strided_slice %348 {offsets = [0, 16], sizes = [16, 8], strides = [1, 1]} : vector<16x32xf32> to vector<16x8xf32>
    %396 = vector.shape_cast %395 : vector<16x8xf32> to vector<2x8x8xf32>
    "tpu.trace_start"() <{level = 10 : i32, message = "btd,bsd->bts"}> : () -> ()
    %cst_158 = arith.constant dense<0.000000e+00> : vector<2x8x8xf32>
    %397 = tpu.matmul %392, %394, %cst_158 {dimension_numbers = #tpu.dot_dimension_numbers<[2], [2], [1], [1], [0, 0, 0, 1, 1, 1], [0], [0]>} : vector<2x8x8xf32>, vector<2x8x8xf32>, vector<2x8x8xf32> -> vector<2x8x8xf32>
    "tpu.trace_stop"() : () -> ()
    %cst_159 = arith.constant dense<0xFF800000> : vector<2x8xf32>
    %398 = vector.multi_reduction <maximumf>, %397, %cst_159 [2] : vector<2x8x8xf32> to vector<2x8xf32>
    %399 = vector.shape_cast %398 : vector<2x8xf32> to vector<2x8x1xf32>
    %400 = vector.broadcast %399 : vector<2x8x1xf32> to vector<2x8x8xf32>
    %401 = arith.subf %397, %400 : vector<2x8x8xf32>
    %402 = math.exp %401 : vector<2x8x8xf32>
    %cst_160 = arith.constant dense<0.000000e+00> : vector<2x8xf32>
    %403 = vector.multi_reduction <add>, %402, %cst_160 [2] : vector<2x8x8xf32> to vector<2x8xf32>
    %404 = vector.shape_cast %403 : vector<2x8xf32> to vector<2x8x1xf32>
    %405 = tpu.reciprocal %404 {approx = true} : vector<2x8x1xf32> -> vector<2x8x1xf32>
    %406 = vector.broadcast %405 : vector<2x8x1xf32> to vector<2x8x8xf32>
    %407 = arith.mulf %402, %406 : vector<2x8x8xf32>
    "tpu.trace_start"() <{level = 10 : i32, message = "bts,bsd->btd"}> : () -> ()
    %cst_161 = arith.constant dense<0.000000e+00> : vector<2x8x8xf32>
    %408 = tpu.matmul %407, %396, %cst_161 {dimension_numbers = #tpu.dot_dimension_numbers<[2], [1], [1], [2], [0, 0, 0, 1, 1, 2], [0], [0]>} : vector<2x8x8xf32>, vector<2x8x8xf32>, vector<2x8x8xf32> -> vector<2x8x8xf32>
    "tpu.trace_stop"() : () -> ()
    %409 = vector.shape_cast %408 : vector<2x8x8xf32> to vector<16x8xf32>
    %c0_162 = arith.constant 0 : index
    %c16_163 = arith.constant 16 : index
    %410 = vector.load %arg9[%c0_162, %c16_163] : memref<16x32xf32, #tpu.memory_space<vmem>>, vector<16x8xf32>
    tpu.vector_store %arg9[%c0_162, %c16_163], %409 {strides = array<i32>} : memref<16x32xf32, #tpu.memory_space<vmem>>, vector<16x8xf32>,
    %411 = vector.extract_strided_slice %349 {offsets = [0, 24], sizes = [16, 8], strides = [1, 1]} : vector<16x32xf32> to vector<16x8xf32>
    %412 = vector.shape_cast %411 : vector<16x8xf32> to vector<2x8x8xf32>
    %413 = vector.extract_strided_slice %350 {offsets = [0, 24], sizes = [16, 8], strides = [1, 1]} : vector<16x32xf32> to vector<16x8xf32>
    %414 = vector.shape_cast %413 : vector<16x8xf32> to vector<2x8x8xf32>
    %415 = vector.extract_strided_slice %348 {offsets = [0, 24], sizes = [16, 8], strides = [1, 1]} : vector<16x32xf32> to vector<16x8xf32>
    %416 = vector.shape_cast %415 : vector<16x8xf32> to vector<2x8x8xf32>
    "tpu.trace_start"() <{level = 10 : i32, message = "btd,bsd->bts"}> : () -> ()
    %cst_164 = arith.constant dense<0.000000e+00> : vector<2x8x8xf32>
    %417 = tpu.matmul %412, %414, %cst_164 {dimension_numbers = #tpu.dot_dimension_numbers<[2], [2], [1], [1], [0, 0, 0, 1, 1, 1], [0], [0]>} : vector<2x8x8xf32>, vector<2x8x8xf32>, vector<2x8x8xf32> -> vector<2x8x8xf32>
    "tpu.trace_stop"() : () -> ()
    %cst_165 = arith.constant dense<0xFF800000> : vector<2x8xf32>
    %418 = vector.multi_reduction <maximumf>, %417, %cst_165 [2] : vector<2x8x8xf32> to vector<2x8xf32>
    %419 = vector.shape_cast %418 : vector<2x8xf32> to vector<2x8x1xf32>
    %420 = vector.broadcast %419 : vector<2x8x1xf32> to vector<2x8x8xf32>
    %421 = arith.subf %417, %420 : vector<2x8x8xf32>
    %422 = math.exp %421 : vector<2x8x8xf32>
    %cst_166 = arith.constant dense<0.000000e+00> : vector<2x8xf32>
    %423 = vector.multi_reduction <add>, %422, %cst_166 [2] : vector<2x8x8xf32> to vector<2x8xf32>
    %424 = vector.shape_cast %423 : vector<2x8xf32> to vector<2x8x1xf32>
    %425 = tpu.reciprocal %424 {approx = true} : vector<2x8x1xf32> -> vector<2x8x1xf32>
    %426 = vector.broadcast %425 : vector<2x8x1xf32> to vector<2x8x8xf32>
    %427 = arith.mulf %422, %426 : vector<2x8x8xf32>
    "tpu.trace_start"() <{level = 10 : i32, message = "bts,bsd->btd"}> : () -> ()
    %cst_167 = arith.constant dense<0.000000e+00> : vector<2x8x8xf32>
    %428 = tpu.matmul %427, %416, %cst_167 {dimension_numbers = #tpu.dot_dimension_numbers<[2], [1], [1], [2], [0, 0, 0, 1, 1, 2], [0], [0]>} : vector<2x8x8xf32>, vector<2x8x8xf32>, vector<2x8x8xf32> -> vector<2x8x8xf32>
    "tpu.trace_stop"() : () -> ()
    %429 = vector.shape_cast %428 : vector<2x8x8xf32> to vector<16x8xf32>
    %c0_168 = arith.constant 0 : index
    %c24_169 = arith.constant 24 : index
    %430 = vector.load %arg9[%c0_168, %c24_169] : memref<16x32xf32, #tpu.memory_space<vmem>>, vector<16x8xf32>
    tpu.vector_store %arg9[%c0_168, %c24_169], %429 {strides = array<i32>} : memref<16x32xf32, #tpu.memory_space<vmem>>, vector<16x8xf32>,
    %c0_170 = arith.constant 0 : index
    %c0_171 = arith.constant 0 : index
    %431 = vector.load %arg9[%c0_170, %c0_171] : memref<16x32xf32, #tpu.memory_space<vmem>>, vector<16x32xf32>
    %c1_172 = arith.constant 1 : index
    %c0_173 = arith.constant 0 : index
    %c96_174 = arith.constant 96 : index
    %432 = vector.load %arg4[%c1_172, %c0_173, %c96_174] : memref<3x32x256xf32, #tpu.memory_space<vmem>>, vector<1x32x32xf32>
    %433 = vector.shape_cast %432 : vector<1x32x32xf32> to vector<32x32xf32>
    %cst_175 = arith.constant dense<0.000000e+00> : vector<16x32xf32>
    %434 = tpu.matmul %431, %433, %cst_175 {dimension_numbers = #tpu.dot_dimension_numbers<[1], [0], [0], [1], [0, 0, 1, 1], [], []>} : vector<16x32xf32>, vector<32x32xf32>, vector<16x32xf32> -> vector<16x32xf32>
    %c1_176 = arith.constant 1 : index
    %c2_177 = arith.constant 2 : index
    %c0_178 = arith.constant 0 : index
    %435 = vector.load %arg6[%c1_176, %c2_177, %c0_178] : memref<3x16x64xf32, #tpu.memory_space<vmem>>, vector<1x1x32xf32>
    %436 = vector.shape_cast %435 : vector<1x1x32xf32> to vector<32xf32>
    %437 = vector.shape_cast %436 : vector<32xf32> to vector<1x32xf32>
    %438 = vector.broadcast %437 : vector<1x32xf32> to vector<16x32xf32>
    %439 = arith.addf %434, %438 : vector<16x32xf32>
    %440 = arith.addf %331, %439 : vector<16x32xf32>
    %c1_179 = arith.constant 1 : index
    %c9_180 = arith.constant 9 : index
    %c0_181 = arith.constant 0 : index
    %441 = vector.load %arg6[%c1_179, %c9_180, %c0_181] : memref<3x16x64xf32, #tpu.memory_space<vmem>>, vector<1x1x32xf32>
    %442 = vector.shape_cast %441 : vector<1x1x32xf32> to vector<32xf32>
    %c1_182 = arith.constant 1 : index
    %c10_183 = arith.constant 10 : index
    %c0_184 = arith.constant 0 : index
    %443 = vector.load %arg6[%c1_182, %c10_183, %c0_184] : memref<3x16x64xf32, #tpu.memory_space<vmem>>, vector<1x1x32xf32>
    %444 = vector.shape_cast %443 : vector<1x1x32xf32> to vector<32xf32>
    %cst_185 = arith.constant dense<0.000000e+00> : vector<16xf32>
    %445 = vector.multi_reduction <add>, %440, %cst_185 [1] : vector<16x32xf32> to vector<16xf32>
    %446 = vector.shape_cast %445 : vector<16xf32> to vector<16x1xf32>
    %cst_186 = arith.constant 3.200000e+01 : f32
    %447 = vector.broadcast %cst_186 : f32 to vector<16x1xf32>
    %448 = arith.divf %446, %447 : vector<16x1xf32>
    %449 = arith.mulf %440, %440 : vector<16x32xf32>
    %cst_187 = arith.constant dense<0.000000e+00> : vector<16xf32>
    %450 = vector.multi_reduction <add>, %449, %cst_187 [1] : vector<16x32xf32> to vector<16xf32>
    %451 = vector.shape_cast %450 : vector<16xf32> to vector<16x1xf32>
    %cst_188 = arith.constant 3.200000e+01 : f32
    %452 = vector.broadcast %cst_188 : f32 to vector<16x1xf32>
    %453 = arith.divf %451, %452 : vector<16x1xf32>
    %454 = vector.broadcast %448 : vector<16x1xf32> to vector<16x32xf32>
    %455 = arith.subf %440, %454 : vector<16x32xf32>
    %456 = arith.mulf %448, %448 : vector<16x1xf32>
    %457 = arith.subf %453, %456 : vector<16x1xf32>
    %cst_189 = arith.constant 9.99999974E-6 : f32
    %458 = vector.broadcast %cst_189 : f32 to vector<16x1xf32>
    %459 = arith.addf %457, %458 : vector<16x1xf32>
    %460 = math.rsqrt %459 : vector<16x1xf32>
    %461 = vector.broadcast %460 : vector<16x1xf32> to vector<16x32xf32>
    %462 = arith.mulf %455, %461 : vector<16x32xf32>
    %463 = vector.shape_cast %442 : vector<32xf32> to vector<1x32xf32>
    %464 = vector.broadcast %463 : vector<1x32xf32> to vector<16x32xf32>
    %465 = arith.mulf %462, %464 : vector<16x32xf32>
    %466 = vector.shape_cast %444 : vector<32xf32> to vector<1x32xf32>
    %467 = vector.broadcast %466 : vector<1x32xf32> to vector<16x32xf32>
    %468 = arith.addf %465, %467 : vector<16x32xf32>
    %469 = arith.addf %468, %1 : vector<16x32xf32>
    %c1_190 = arith.constant 1 : index
    %c0_191 = arith.constant 0 : index
    %c128_192 = arith.constant 128 : index
    %470 = vector.load %arg4[%c1_190, %c0_191, %c128_192] : memref<3x32x256xf32, #tpu.memory_space<vmem>>, vector<1x32x32xf32>
    %471 = vector.shape_cast %470 : vector<1x32x32xf32> to vector<32x32xf32>
    %cst_193 = arith.constant dense<0.000000e+00> : vector<16x32xf32>
    %472 = tpu.matmul %469, %471, %cst_193 {dimension_numbers = #tpu.dot_dimension_numbers<[1], [0], [0], [1], [0, 0, 1, 1], [], []>} : vector<16x32xf32>, vector<32x32xf32>, vector<16x32xf32> -> vector<16x32xf32>
    %c1_194 = arith.constant 1 : index
    %c3_195 = arith.constant 3 : index
    %c0_196 = arith.constant 0 : index
    %473 = vector.load %arg6[%c1_194, %c3_195, %c0_196] : memref<3x16x64xf32, #tpu.memory_space<vmem>>, vector<1x1x32xf32>
    %474 = vector.shape_cast %473 : vector<1x1x32xf32> to vector<32xf32>
    %475 = vector.shape_cast %474 : vector<32xf32> to vector<1x32xf32>
    %476 = vector.broadcast %475 : vector<1x32xf32> to vector<16x32xf32>
    %477 = arith.addf %472, %476 : vector<16x32xf32>
    %c1_197 = arith.constant 1 : index
    %c0_198 = arith.constant 0 : index
    %c160_199 = arith.constant 160 : index
    %478 = vector.load %arg4[%c1_197, %c0_198, %c160_199] : memref<3x32x256xf32, #tpu.memory_space<vmem>>, vector<1x32x32xf32>
    %479 = vector.shape_cast %478 : vector<1x32x32xf32> to vector<32x32xf32>
    %cst_200 = arith.constant dense<0.000000e+00> : vector<32x32xf32>
    %480 = tpu.matmul %4, %479, %cst_200 {dimension_numbers = #tpu.dot_dimension_numbers<[1], [0], [0], [1], [0, 0, 1, 1], [], []>} : vector<32x32xf32>, vector<32x32xf32>, vector<32x32xf32> -> vector<32x32xf32>
    %c1_201 = arith.constant 1 : index
    %c4_202 = arith.constant 4 : index
    %c0_203 = arith.constant 0 : index
    %481 = vector.load %arg6[%c1_201, %c4_202, %c0_203] : memref<3x16x64xf32, #tpu.memory_space<vmem>>, vector<1x1x32xf32>
    %482 = vector.shape_cast %481 : vector<1x1x32xf32> to vector<32xf32>
    %483 = vector.shape_cast %482 : vector<32xf32> to vector<1x32xf32>
    %484 = vector.broadcast %483 : vector<1x32xf32> to vector<32x32xf32>
    %485 = arith.addf %480, %484 : vector<32x32xf32>
    %c1_204 = arith.constant 1 : index
    %c0_205 = arith.constant 0 : index
    %c192_206 = arith.constant 192 : index
    %486 = vector.load %arg4[%c1_204, %c0_205, %c192_206] : memref<3x32x256xf32, #tpu.memory_space<vmem>>, vector<1x32x32xf32>
    %487 = vector.shape_cast %486 : vector<1x32x32xf32> to vector<32x32xf32>
    %cst_207 = arith.constant dense<0.000000e+00> : vector<32x32xf32>
    %488 = tpu.matmul %2, %487, %cst_207 {dimension_numbers = #tpu.dot_dimension_numbers<[1], [0], [0], [1], [0, 0, 1, 1], [], []>} : vector<32x32xf32>, vector<32x32xf32>, vector<32x32xf32> -> vector<32x32xf32>
    %c1_208 = arith.constant 1 : index
    %c5_209 = arith.constant 5 : index
    %c0_210 = arith.constant 0 : index
    %489 = vector.load %arg6[%c1_208, %c5_209, %c0_210] : memref<3x16x64xf32, #tpu.memory_space<vmem>>, vector<1x1x32xf32>
    %490 = vector.shape_cast %489 : vector<1x1x32xf32> to vector<32xf32>
    %491 = vector.shape_cast %490 : vector<32xf32> to vector<1x32xf32>
    %492 = vector.broadcast %491 : vector<1x32xf32> to vector<32x32xf32>
    %493 = arith.addf %488, %492 : vector<32x32xf32>
    %494 = vector.extract_strided_slice %477 {offsets = [0, 0], sizes = [16, 8], strides = [1, 1]} : vector<16x32xf32> to vector<16x8xf32>
    %495 = vector.shape_cast %494 : vector<16x8xf32> to vector<2x8x8xf32>
    %496 = vector.extract_strided_slice %485 {offsets = [0, 0], sizes = [32, 8], strides = [1, 1]} : vector<32x32xf32> to vector<32x8xf32>
    %497 = vector.shape_cast %496 : vector<32x8xf32> to vector<2x16x8xf32>
    %498 = vector.extract_strided_slice %493 {offsets = [0, 0], sizes = [32, 8], strides = [1, 1]} : vector<32x32xf32> to vector<32x8xf32>
    %499 = vector.shape_cast %498 : vector<32x8xf32> to vector<2x16x8xf32>
    "tpu.trace_start"() <{level = 10 : i32, message = "btd,bsd->bts"}> : () -> ()
    %cst_211 = arith.constant dense<0.000000e+00> : vector<2x8x16xf32>
    %500 = tpu.matmul %495, %497, %cst_211 {dimension_numbers = #tpu.dot_dimension_numbers<[2], [2], [1], [1], [0, 0, 0, 1, 1, 1], [0], [0]>} : vector<2x8x8xf32>, vector<2x16x8xf32>, vector<2x8x16xf32> -> vector<2x8x16xf32>
    "tpu.trace_stop"() : () -> ()
    %cst_212 = arith.constant dense<0xFF800000> : vector<2x8xf32>
    %501 = vector.multi_reduction <maximumf>, %500, %cst_212 [2] : vector<2x8x16xf32> to vector<2x8xf32>
    %502 = vector.shape_cast %501 : vector<2x8xf32> to vector<2x8x1xf32>
    %503 = vector.broadcast %502 : vector<2x8x1xf32> to vector<2x8x16xf32>
    %504 = arith.subf %500, %503 : vector<2x8x16xf32>
    %505 = math.exp %504 : vector<2x8x16xf32>
    %cst_213 = arith.constant dense<0.000000e+00> : vector<2x8xf32>
    %506 = vector.multi_reduction <add>, %505, %cst_213 [2] : vector<2x8x16xf32> to vector<2x8xf32>
    %507 = vector.shape_cast %506 : vector<2x8xf32> to vector<2x8x1xf32>
    %508 = tpu.reciprocal %507 {approx = true} : vector<2x8x1xf32> -> vector<2x8x1xf32>
    %509 = vector.broadcast %508 : vector<2x8x1xf32> to vector<2x8x16xf32>
    %510 = arith.mulf %505, %509 : vector<2x8x16xf32>
    "tpu.trace_start"() <{level = 10 : i32, message = "bts,bsd->btd"}> : () -> ()
    %cst_214 = arith.constant dense<0.000000e+00> : vector<2x8x8xf32>
    %511 = tpu.matmul %510, %499, %cst_214 {dimension_numbers = #tpu.dot_dimension_numbers<[2], [1], [1], [2], [0, 0, 0, 1, 1, 2], [0], [0]>} : vector<2x8x16xf32>, vector<2x16x8xf32>, vector<2x8x8xf32> -> vector<2x8x8xf32>
    "tpu.trace_stop"() : () -> ()
    %512 = vector.shape_cast %511 : vector<2x8x8xf32> to vector<16x8xf32>
    %c0_215 = arith.constant 0 : index
    %c0_216 = arith.constant 0 : index
    %513 = vector.load %arg9[%c0_215, %c0_216] : memref<16x32xf32, #tpu.memory_space<vmem>>, vector<16x8xf32>
    tpu.vector_store %arg9[%c0_215, %c0_216], %512 {strides = array<i32>} : memref<16x32xf32, #tpu.memory_space<vmem>>, vector<16x8xf32>,
    %514 = vector.extract_strided_slice %477 {offsets = [0, 8], sizes = [16, 8], strides = [1, 1]} : vector<16x32xf32> to vector<16x8xf32>
    %515 = vector.shape_cast %514 : vector<16x8xf32> to vector<2x8x8xf32>
    %516 = vector.extract_strided_slice %485 {offsets = [0, 8], sizes = [32, 8], strides = [1, 1]} : vector<32x32xf32> to vector<32x8xf32>
    %517 = vector.shape_cast %516 : vector<32x8xf32> to vector<2x16x8xf32>
    %518 = vector.extract_strided_slice %493 {offsets = [0, 8], sizes = [32, 8], strides = [1, 1]} : vector<32x32xf32> to vector<32x8xf32>
    %519 = vector.shape_cast %518 : vector<32x8xf32> to vector<2x16x8xf32>
    "tpu.trace_start"() <{level = 10 : i32, message = "btd,bsd->bts"}> : () -> ()
    %cst_217 = arith.constant dense<0.000000e+00> : vector<2x8x16xf32>
    %520 = tpu.matmul %515, %517, %cst_217 {dimension_numbers = #tpu.dot_dimension_numbers<[2], [2], [1], [1], [0, 0, 0, 1, 1, 1], [0], [0]>} : vector<2x8x8xf32>, vector<2x16x8xf32>, vector<2x8x16xf32> -> vector<2x8x16xf32>
    "tpu.trace_stop"() : () -> ()
    %cst_218 = arith.constant dense<0xFF800000> : vector<2x8xf32>
    %521 = vector.multi_reduction <maximumf>, %520, %cst_218 [2] : vector<2x8x16xf32> to vector<2x8xf32>
    %522 = vector.shape_cast %521 : vector<2x8xf32> to vector<2x8x1xf32>
    %523 = vector.broadcast %522 : vector<2x8x1xf32> to vector<2x8x16xf32>
    %524 = arith.subf %520, %523 : vector<2x8x16xf32>
    %525 = math.exp %524 : vector<2x8x16xf32>
    %cst_219 = arith.constant dense<0.000000e+00> : vector<2x8xf32>
    %526 = vector.multi_reduction <add>, %525, %cst_219 [2] : vector<2x8x16xf32> to vector<2x8xf32>
    %527 = vector.shape_cast %526 : vector<2x8xf32> to vector<2x8x1xf32>
    %528 = tpu.reciprocal %527 {approx = true} : vector<2x8x1xf32> -> vector<2x8x1xf32>
    %529 = vector.broadcast %528 : vector<2x8x1xf32> to vector<2x8x16xf32>
    %530 = arith.mulf %525, %529 : vector<2x8x16xf32>
    "tpu.trace_start"() <{level = 10 : i32, message = "bts,bsd->btd"}> : () -> ()
    %cst_220 = arith.constant dense<0.000000e+00> : vector<2x8x8xf32>
    %531 = tpu.matmul %530, %519, %cst_220 {dimension_numbers = #tpu.dot_dimension_numbers<[2], [1], [1], [2], [0, 0, 0, 1, 1, 2], [0], [0]>} : vector<2x8x16xf32>, vector<2x16x8xf32>, vector<2x8x8xf32> -> vector<2x8x8xf32>
    "tpu.trace_stop"() : () -> ()
    %532 = vector.shape_cast %531 : vector<2x8x8xf32> to vector<16x8xf32>
    %c0_221 = arith.constant 0 : index
    %c8_222 = arith.constant 8 : index
    %533 = vector.load %arg9[%c0_221, %c8_222] : memref<16x32xf32, #tpu.memory_space<vmem>>, vector<16x8xf32>
    tpu.vector_store %arg9[%c0_221, %c8_222], %532 {strides = array<i32>} : memref<16x32xf32, #tpu.memory_space<vmem>>, vector<16x8xf32>,
    %534 = vector.extract_strided_slice %477 {offsets = [0, 16], sizes = [16, 8], strides = [1, 1]} : vector<16x32xf32> to vector<16x8xf32>
    %535 = vector.shape_cast %534 : vector<16x8xf32> to vector<2x8x8xf32>
    %536 = vector.extract_strided_slice %485 {offsets = [0, 16], sizes = [32, 8], strides = [1, 1]} : vector<32x32xf32> to vector<32x8xf32>
    %537 = vector.shape_cast %536 : vector<32x8xf32> to vector<2x16x8xf32>
    %538 = vector.extract_strided_slice %493 {offsets = [0, 16], sizes = [32, 8], strides = [1, 1]} : vector<32x32xf32> to vector<32x8xf32>
    %539 = vector.shape_cast %538 : vector<32x8xf32> to vector<2x16x8xf32>
    "tpu.trace_start"() <{level = 10 : i32, message = "btd,bsd->bts"}> : () -> ()
    %cst_223 = arith.constant dense<0.000000e+00> : vector<2x8x16xf32>
    %540 = tpu.matmul %535, %537, %cst_223 {dimension_numbers = #tpu.dot_dimension_numbers<[2], [2], [1], [1], [0, 0, 0, 1, 1, 1], [0], [0]>} : vector<2x8x8xf32>, vector<2x16x8xf32>, vector<2x8x16xf32> -> vector<2x8x16xf32>
    "tpu.trace_stop"() : () -> ()
    %cst_224 = arith.constant dense<0xFF800000> : vector<2x8xf32>
    %541 = vector.multi_reduction <maximumf>, %540, %cst_224 [2] : vector<2x8x16xf32> to vector<2x8xf32>
    %542 = vector.shape_cast %541 : vector<2x8xf32> to vector<2x8x1xf32>
    %543 = vector.broadcast %542 : vector<2x8x1xf32> to vector<2x8x16xf32>
    %544 = arith.subf %540, %543 : vector<2x8x16xf32>
    %545 = math.exp %544 : vector<2x8x16xf32>
    %cst_225 = arith.constant dense<0.000000e+00> : vector<2x8xf32>
    %546 = vector.multi_reduction <add>, %545, %cst_225 [2] : vector<2x8x16xf32> to vector<2x8xf32>
    %547 = vector.shape_cast %546 : vector<2x8xf32> to vector<2x8x1xf32>
    %548 = tpu.reciprocal %547 {approx = true} : vector<2x8x1xf32> -> vector<2x8x1xf32>
    %549 = vector.broadcast %548 : vector<2x8x1xf32> to vector<2x8x16xf32>
    %550 = arith.mulf %545, %549 : vector<2x8x16xf32>
    "tpu.trace_start"() <{level = 10 : i32, message = "bts,bsd->btd"}> : () -> ()
    %cst_226 = arith.constant dense<0.000000e+00> : vector<2x8x8xf32>
    %551 = tpu.matmul %550, %539, %cst_226 {dimension_numbers = #tpu.dot_dimension_numbers<[2], [1], [1], [2], [0, 0, 0, 1, 1, 2], [0], [0]>} : vector<2x8x16xf32>, vector<2x16x8xf32>, vector<2x8x8xf32> -> vector<2x8x8xf32>
    "tpu.trace_stop"() : () -> ()
    %552 = vector.shape_cast %551 : vector<2x8x8xf32> to vector<16x8xf32>
    %c0_227 = arith.constant 0 : index
    %c16_228 = arith.constant 16 : index
    %553 = vector.load %arg9[%c0_227, %c16_228] : memref<16x32xf32, #tpu.memory_space<vmem>>, vector<16x8xf32>
    tpu.vector_store %arg9[%c0_227, %c16_228], %552 {strides = array<i32>} : memref<16x32xf32, #tpu.memory_space<vmem>>, vector<16x8xf32>,
    %554 = vector.extract_strided_slice %477 {offsets = [0, 24], sizes = [16, 8], strides = [1, 1]} : vector<16x32xf32> to vector<16x8xf32>
    %555 = vector.shape_cast %554 : vector<16x8xf32> to vector<2x8x8xf32>
    %556 = vector.extract_strided_slice %485 {offsets = [0, 24], sizes = [32, 8], strides = [1, 1]} : vector<32x32xf32> to vector<32x8xf32>
    %557 = vector.shape_cast %556 : vector<32x8xf32> to vector<2x16x8xf32>
    %558 = vector.extract_strided_slice %493 {offsets = [0, 24], sizes = [32, 8], strides = [1, 1]} : vector<32x32xf32> to vector<32x8xf32>
    %559 = vector.shape_cast %558 : vector<32x8xf32> to vector<2x16x8xf32>
    "tpu.trace_start"() <{level = 10 : i32, message = "btd,bsd->bts"}> : () -> ()
    %cst_229 = arith.constant dense<0.000000e+00> : vector<2x8x16xf32>
    %560 = tpu.matmul %555, %557, %cst_229 {dimension_numbers = #tpu.dot_dimension_numbers<[2], [2], [1], [1], [0, 0, 0, 1, 1, 1], [0], [0]>} : vector<2x8x8xf32>, vector<2x16x8xf32>, vector<2x8x16xf32> -> vector<2x8x16xf32>
    "tpu.trace_stop"() : () -> ()
    %cst_230 = arith.constant dense<0xFF800000> : vector<2x8xf32>
    %561 = vector.multi_reduction <maximumf>, %560, %cst_230 [2] : vector<2x8x16xf32> to vector<2x8xf32>
    %562 = vector.shape_cast %561 : vector<2x8xf32> to vector<2x8x1xf32>
    %563 = vector.broadcast %562 : vector<2x8x1xf32> to vector<2x8x16xf32>
    %564 = arith.subf %560, %563 : vector<2x8x16xf32>
    %565 = math.exp %564 : vector<2x8x16xf32>
    %cst_231 = arith.constant dense<0.000000e+00> : vector<2x8xf32>
    %566 = vector.multi_reduction <add>, %565, %cst_231 [2] : vector<2x8x16xf32> to vector<2x8xf32>
    %567 = vector.shape_cast %566 : vector<2x8xf32> to vector<2x8x1xf32>
    %568 = tpu.reciprocal %567 {approx = true} : vector<2x8x1xf32> -> vector<2x8x1xf32>
    %569 = vector.broadcast %568 : vector<2x8x1xf32> to vector<2x8x16xf32>
    %570 = arith.mulf %565, %569 : vector<2x8x16xf32>
    "tpu.trace_start"() <{level = 10 : i32, message = "bts,bsd->btd"}> : () -> ()
    %cst_232 = arith.constant dense<0.000000e+00> : vector<2x8x8xf32>
    %571 = tpu.matmul %570, %559, %cst_232 {dimension_numbers = #tpu.dot_dimension_numbers<[2], [1], [1], [2], [0, 0, 0, 1, 1, 2], [0], [0]>} : vector<2x8x16xf32>, vector<2x16x8xf32>, vector<2x8x8xf32> -> vector<2x8x8xf32>
    "tpu.trace_stop"() : () -> ()
    %572 = vector.shape_cast %571 : vector<2x8x8xf32> to vector<16x8xf32>
    %c0_233 = arith.constant 0 : index
    %c24_234 = arith.constant 24 : index
    %573 = vector.load %arg9[%c0_233, %c24_234] : memref<16x32xf32, #tpu.memory_space<vmem>>, vector<16x8xf32>
    tpu.vector_store %arg9[%c0_233, %c24_234], %572 {strides = array<i32>} : memref<16x32xf32, #tpu.memory_space<vmem>>, vector<16x8xf32>,
    %c0_235 = arith.constant 0 : index
    %c0_236 = arith.constant 0 : index
    %574 = vector.load %arg9[%c0_235, %c0_236] : memref<16x32xf32, #tpu.memory_space<vmem>>, vector<16x32xf32>
    %c1_237 = arith.constant 1 : index
    %c0_238 = arith.constant 0 : index
    %c224_239 = arith.constant 224 : index
    %575 = vector.load %arg4[%c1_237, %c0_238, %c224_239] : memref<3x32x256xf32, #tpu.memory_space<vmem>>, vector<1x32x32xf32>
    %576 = vector.shape_cast %575 : vector<1x32x32xf32> to vector<32x32xf32>
    %cst_240 = arith.constant dense<0.000000e+00> : vector<16x32xf32>
    %577 = tpu.matmul %574, %576, %cst_240 {dimension_numbers = #tpu.dot_dimension_numbers<[1], [0], [0], [1], [0, 0, 1, 1], [], []>} : vector<16x32xf32>, vector<32x32xf32>, vector<16x32xf32> -> vector<16x32xf32>
    %c1_241 = arith.constant 1 : index
    %c6_242 = arith.constant 6 : index
    %c0_243 = arith.constant 0 : index
    %578 = vector.load %arg6[%c1_241, %c6_242, %c0_243] : memref<3x16x64xf32, #tpu.memory_space<vmem>>, vector<1x1x32xf32>
    %579 = vector.shape_cast %578 : vector<1x1x32xf32> to vector<32xf32>
    %580 = vector.shape_cast %579 : vector<32xf32> to vector<1x32xf32>
    %581 = vector.broadcast %580 : vector<1x32xf32> to vector<16x32xf32>
    %582 = arith.addf %577, %581 : vector<16x32xf32>
    %583 = arith.addf %468, %582 : vector<16x32xf32>
    %c1_244 = arith.constant 1 : index
    %c11_245 = arith.constant 11 : index
    %c0_246 = arith.constant 0 : index
    %584 = vector.load %arg6[%c1_244, %c11_245, %c0_246] : memref<3x16x64xf32, #tpu.memory_space<vmem>>, vector<1x1x32xf32>
    %585 = vector.shape_cast %584 : vector<1x1x32xf32> to vector<32xf32>
    %c1_247 = arith.constant 1 : index
    %c12_248 = arith.constant 12 : index
    %c0_249 = arith.constant 0 : index
    %586 = vector.load %arg6[%c1_247, %c12_248, %c0_249] : memref<3x16x64xf32, #tpu.memory_space<vmem>>, vector<1x1x32xf32>
    %587 = vector.shape_cast %586 : vector<1x1x32xf32> to vector<32xf32>
    %cst_250 = arith.constant dense<0.000000e+00> : vector<16xf32>
    %588 = vector.multi_reduction <add>, %583, %cst_250 [1] : vector<16x32xf32> to vector<16xf32>
    %589 = vector.shape_cast %588 : vector<16xf32> to vector<16x1xf32>
    %cst_251 = arith.constant 3.200000e+01 : f32
    %590 = vector.broadcast %cst_251 : f32 to vector<16x1xf32>
    %591 = arith.divf %589, %590 : vector<16x1xf32>
    %592 = arith.mulf %583, %583 : vector<16x32xf32>
    %cst_252 = arith.constant dense<0.000000e+00> : vector<16xf32>
    %593 = vector.multi_reduction <add>, %592, %cst_252 [1] : vector<16x32xf32> to vector<16xf32>
    %594 = vector.shape_cast %593 : vector<16xf32> to vector<16x1xf32>
    %cst_253 = arith.constant 3.200000e+01 : f32
    %595 = vector.broadcast %cst_253 : f32 to vector<16x1xf32>
    %596 = arith.divf %594, %595 : vector<16x1xf32>
    %597 = vector.broadcast %591 : vector<16x1xf32> to vector<16x32xf32>
    %598 = arith.subf %583, %597 : vector<16x32xf32>
    %599 = arith.mulf %591, %591 : vector<16x1xf32>
    %600 = arith.subf %596, %599 : vector<16x1xf32>
    %cst_254 = arith.constant 9.99999974E-6 : f32
    %601 = vector.broadcast %cst_254 : f32 to vector<16x1xf32>
    %602 = arith.addf %600, %601 : vector<16x1xf32>
    %603 = math.rsqrt %602 : vector<16x1xf32>
    %604 = vector.broadcast %603 : vector<16x1xf32> to vector<16x32xf32>
    %605 = arith.mulf %598, %604 : vector<16x32xf32>
    %606 = vector.shape_cast %585 : vector<32xf32> to vector<1x32xf32>
    %607 = vector.broadcast %606 : vector<1x32xf32> to vector<16x32xf32>
    %608 = arith.mulf %605, %607 : vector<16x32xf32>
    %609 = vector.shape_cast %587 : vector<32xf32> to vector<1x32xf32>
    %610 = vector.broadcast %609 : vector<1x32xf32> to vector<16x32xf32>
    %611 = arith.addf %608, %610 : vector<16x32xf32>
    %c1_255 = arith.constant 1 : index
    %c0_256 = arith.constant 0 : index
    %c0_257 = arith.constant 0 : index
    %612 = vector.load %arg5[%c1_255, %c0_256, %c0_257] : memref<3x96x64xf32, #tpu.memory_space<vmem>>, vector<1x32x64xf32>
    %613 = vector.shape_cast %612 : vector<1x32x64xf32> to vector<32x64xf32>
    %cst_258 = arith.constant dense<0.000000e+00> : vector<16x64xf32>
    %614 = tpu.matmul %611, %613, %cst_258 {dimension_numbers = #tpu.dot_dimension_numbers<[1], [0], [0], [1], [0, 0, 1, 1], [], []>} : vector<16x32xf32>, vector<32x64xf32>, vector<16x64xf32> -> vector<16x64xf32>
    %c1_259 = arith.constant 1 : index
    %c7_260 = arith.constant 7 : index
    %c0_261 = arith.constant 0 : index
    %615 = vector.load %arg6[%c1_259, %c7_260, %c0_261] : memref<3x16x64xf32, #tpu.memory_space<vmem>>, vector<1x1x64xf32>
    %616 = vector.shape_cast %615 : vector<1x1x64xf32> to vector<64xf32>
    %617 = vector.shape_cast %616 : vector<64xf32> to vector<1x64xf32>
    %618 = vector.broadcast %617 : vector<1x64xf32> to vector<16x64xf32>
    %619 = arith.addf %614, %618 : vector<16x64xf32>
    %cst_262 = arith.constant 0.000000e+00 : f32
    %620 = vector.broadcast %cst_262 : f32 to vector<16x64xf32>
    %621 = arith.maximumf %619, %620 : vector<16x64xf32>
    %c1_263 = arith.constant 1 : index
    %c32_264 = arith.constant 32 : index
    %c0_265 = arith.constant 0 : index
    %622 = vector.load %arg5[%c1_263, %c32_264, %c0_265] : memref<3x96x64xf32, #tpu.memory_space<vmem>>, vector<1x64x32xf32>
    %623 = vector.shape_cast %622 : vector<1x64x32xf32> to vector<64x32xf32>
    %cst_266 = arith.constant dense<0.000000e+00> : vector<16x32xf32>
    %624 = tpu.matmul %621, %623, %cst_266 {dimension_numbers = #tpu.dot_dimension_numbers<[1], [0], [0], [1], [0, 0, 1, 1], [], []>} : vector<16x64xf32>, vector<64x32xf32>, vector<16x32xf32> -> vector<16x32xf32>
    %c1_267 = arith.constant 1 : index
    %c8_268 = arith.constant 8 : index
    %c0_269 = arith.constant 0 : index
    %625 = vector.load %arg6[%c1_267, %c8_268, %c0_269] : memref<3x16x64xf32, #tpu.memory_space<vmem>>, vector<1x1x32xf32>
    %626 = vector.shape_cast %625 : vector<1x1x32xf32> to vector<32xf32>
    %627 = vector.shape_cast %626 : vector<32xf32> to vector<1x32xf32>
    %628 = vector.broadcast %627 : vector<1x32xf32> to vector<16x32xf32>
    %629 = arith.addf %624, %628 : vector<16x32xf32>
    %630 = arith.addf %611, %629 : vector<16x32xf32>
    %c1_270 = arith.constant 1 : index
    %c13_271 = arith.constant 13 : index
    %c0_272 = arith.constant 0 : index
    %631 = vector.load %arg6[%c1_270, %c13_271, %c0_272] : memref<3x16x64xf32, #tpu.memory_space<vmem>>, vector<1x1x32xf32>
    %632 = vector.shape_cast %631 : vector<1x1x32xf32> to vector<32xf32>
    %c1_273 = arith.constant 1 : index
    %c14_274 = arith.constant 14 : index
    %c0_275 = arith.constant 0 : index
    %633 = vector.load %arg6[%c1_273, %c14_274, %c0_275] : memref<3x16x64xf32, #tpu.memory_space<vmem>>, vector<1x1x32xf32>
    %634 = vector.shape_cast %633 : vector<1x1x32xf32> to vector<32xf32>
    %cst_276 = arith.constant dense<0.000000e+00> : vector<16xf32>
    %635 = vector.multi_reduction <add>, %630, %cst_276 [1] : vector<16x32xf32> to vector<16xf32>
    %636 = vector.shape_cast %635 : vector<16xf32> to vector<16x1xf32>
    %cst_277 = arith.constant 3.200000e+01 : f32
    %637 = vector.broadcast %cst_277 : f32 to vector<16x1xf32>
    %638 = arith.divf %636, %637 : vector<16x1xf32>
    %639 = arith.mulf %630, %630 : vector<16x32xf32>
    %cst_278 = arith.constant dense<0.000000e+00> : vector<16xf32>
    %640 = vector.multi_reduction <add>, %639, %cst_278 [1] : vector<16x32xf32> to vector<16xf32>
    %641 = vector.shape_cast %640 : vector<16xf32> to vector<16x1xf32>
    %cst_279 = arith.constant 3.200000e+01 : f32
    %642 = vector.broadcast %cst_279 : f32 to vector<16x1xf32>
    %643 = arith.divf %641, %642 : vector<16x1xf32>
    %644 = vector.broadcast %638 : vector<16x1xf32> to vector<16x32xf32>
    %645 = arith.subf %630, %644 : vector<16x32xf32>
    %646 = arith.mulf %638, %638 : vector<16x1xf32>
    %647 = arith.subf %643, %646 : vector<16x1xf32>
    %cst_280 = arith.constant 9.99999974E-6 : f32
    %648 = vector.broadcast %cst_280 : f32 to vector<16x1xf32>
    %649 = arith.addf %647, %648 : vector<16x1xf32>
    %650 = math.rsqrt %649 : vector<16x1xf32>
    %651 = vector.broadcast %650 : vector<16x1xf32> to vector<16x32xf32>
    %652 = arith.mulf %645, %651 : vector<16x32xf32>
    %653 = vector.shape_cast %632 : vector<32xf32> to vector<1x32xf32>
    %654 = vector.broadcast %653 : vector<1x32xf32> to vector<16x32xf32>
    %655 = arith.mulf %652, %654 : vector<16x32xf32>
    %656 = vector.shape_cast %634 : vector<32xf32> to vector<1x32xf32>
    %657 = vector.broadcast %656 : vector<1x32xf32> to vector<16x32xf32>
    %658 = arith.addf %655, %657 : vector<16x32xf32>
    %c0_281 = arith.constant 0 : index
    %c0_282 = arith.constant 0 : index
    %c0_283 = arith.constant 0 : index
    %659 = vector.load %arg7[%c0_281, %c0_282, %c0_283] : memref<1x65x32xf32, #tpu.memory_space<vmem>>, vector<1x32x32xf32>
    %660 = vector.shape_cast %659 : vector<1x32x32xf32> to vector<32x32xf32>
    %cst_284 = arith.constant dense<0.000000e+00> : vector<16x32xf32>
    %661 = tpu.matmul %658, %660, %cst_284 {dimension_numbers = #tpu.dot_dimension_numbers<[1], [0], [0], [1], [0, 0, 1, 1], [], []>} : vector<16x32xf32>, vector<32x32xf32>, vector<16x32xf32> -> vector<16x32xf32>
    %c0_285 = arith.constant 0 : index
    %c32_286 = arith.constant 32 : index
    %c0_287 = arith.constant 0 : index
    %662 = vector.load %arg7[%c0_285, %c32_286, %c0_287] : memref<1x65x32xf32, #tpu.memory_space<vmem>>, vector<1x32x32xf32>
    %663 = vector.shape_cast %662 : vector<1x32x32xf32> to vector<32x32xf32>
    %cst_288 = arith.constant dense<0.000000e+00> : vector<16x32xf32>
    %664 = tpu.matmul %331, %663, %cst_288 {dimension_numbers = #tpu.dot_dimension_numbers<[1], [0], [0], [1], [0, 0, 1, 1], [], []>} : vector<16x32xf32>, vector<32x32xf32>, vector<16x32xf32> -> vector<16x32xf32>
    %665 = arith.addf %661, %664 : vector<16x32xf32>
    %c0_289 = arith.constant 0 : index
    %c64_290 = arith.constant 64 : index
    %c0_291 = arith.constant 0 : index
    %666 = vector.load %arg7[%c0_289, %c64_290, %c0_291] : memref<1x65x32xf32, #tpu.memory_space<vmem>>, vector<1x1x32xf32>
    %667 = vector.shape_cast %666 : vector<1x1x32xf32> to vector<32xf32>
    %668 = vector.shape_cast %667 : vector<32xf32> to vector<1x32xf32>
    %669 = vector.broadcast %668 : vector<1x32xf32> to vector<16x32xf32>
    %670 = arith.addf %665, %669 : vector<16x32xf32>
    %671 = arith.addf %670, %1 : vector<16x32xf32>
    %c2_292 = arith.constant 2 : index
    %c0_293 = arith.constant 0 : index
    %c0_294 = arith.constant 0 : index
    %672 = vector.load %arg4[%c2_292, %c0_293, %c0_294] : memref<3x32x256xf32, #tpu.memory_space<vmem>>, vector<1x32x64xf32>
    %673 = vector.shape_cast %672 : vector<1x32x64xf32> to vector<32x64xf32>
    %cst_295 = arith.constant dense<0.000000e+00> : vector<16x64xf32>
    %674 = tpu.matmul %671, %673, %cst_295 {dimension_numbers = #tpu.dot_dimension_numbers<[1], [0], [0], [1], [0, 0, 1, 1], [], []>} : vector<16x32xf32>, vector<32x64xf32>, vector<16x64xf32> -> vector<16x64xf32>
    %c2_296 = arith.constant 2 : index
    %c0_297 = arith.constant 0 : index
    %c0_298 = arith.constant 0 : index
    %675 = vector.load %arg6[%c2_296, %c0_297, %c0_298] : memref<3x16x64xf32, #tpu.memory_space<vmem>>, vector<1x1x64xf32>
    %676 = vector.shape_cast %675 : vector<1x1x64xf32> to vector<64xf32>
    %677 = vector.shape_cast %676 : vector<64xf32> to vector<1x64xf32>
    %678 = vector.broadcast %677 : vector<1x64xf32> to vector<16x64xf32>
    %679 = arith.addf %674, %678 : vector<16x64xf32>
    %c2_299 = arith.constant 2 : index
    %c0_300 = arith.constant 0 : index
    %c64_301 = arith.constant 64 : index
    %680 = vector.load %arg4[%c2_299, %c0_300, %c64_301] : memref<3x32x256xf32, #tpu.memory_space<vmem>>, vector<1x32x32xf32>
    %681 = vector.shape_cast %680 : vector<1x32x32xf32> to vector<32x32xf32>
    %cst_302 = arith.constant dense<0.000000e+00> : vector<16x32xf32>
    %682 = tpu.matmul %670, %681, %cst_302 {dimension_numbers = #tpu.dot_dimension_numbers<[1], [0], [0], [1], [0, 0, 1, 1], [], []>} : vector<16x32xf32>, vector<32x32xf32>, vector<16x32xf32> -> vector<16x32xf32>
    %c2_303 = arith.constant 2 : index
    %c1_304 = arith.constant 1 : index
    %c0_305 = arith.constant 0 : index
    %683 = vector.load %arg6[%c2_303, %c1_304, %c0_305] : memref<3x16x64xf32, #tpu.memory_space<vmem>>, vector<1x1x32xf32>
    %684 = vector.shape_cast %683 : vector<1x1x32xf32> to vector<32xf32>
    %685 = vector.shape_cast %684 : vector<32xf32> to vector<1x32xf32>
    %686 = vector.broadcast %685 : vector<1x32xf32> to vector<16x32xf32>
    %687 = arith.addf %682, %686 : vector<16x32xf32>
    %688 = vector.extract_strided_slice %679 {offsets = [0, 0], sizes = [16, 32], strides = [1, 1]} : vector<16x64xf32> to vector<16x32xf32>
    %689 = vector.extract_strided_slice %679 {offsets = [0, 32], sizes = [16, 32], strides = [1, 1]} : vector<16x64xf32> to vector<16x32xf32>
    %690 = vector.extract_strided_slice %688 {offsets = [0, 0], sizes = [16, 8], strides = [1, 1]} : vector<16x32xf32> to vector<16x8xf32>
    %691 = vector.shape_cast %690 : vector<16x8xf32> to vector<2x8x8xf32>
    %692 = vector.extract_strided_slice %689 {offsets = [0, 0], sizes = [16, 8], strides = [1, 1]} : vector<16x32xf32> to vector<16x8xf32>
    %693 = vector.shape_cast %692 : vector<16x8xf32> to vector<2x8x8xf32>
    %694 = vector.extract_strided_slice %687 {offsets = [0, 0], sizes = [16, 8], strides = [1, 1]} : vector<16x32xf32> to vector<16x8xf32>
    %695 = vector.shape_cast %694 : vector<16x8xf32> to vector<2x8x8xf32>
    "tpu.trace_start"() <{level = 10 : i32, message = "btd,bsd->bts"}> : () -> ()
    %cst_306 = arith.constant dense<0.000000e+00> : vector<2x8x8xf32>
    %696 = tpu.matmul %691, %693, %cst_306 {dimension_numbers = #tpu.dot_dimension_numbers<[2], [2], [1], [1], [0, 0, 0, 1, 1, 1], [0], [0]>} : vector<2x8x8xf32>, vector<2x8x8xf32>, vector<2x8x8xf32> -> vector<2x8x8xf32>
    "tpu.trace_stop"() : () -> ()
    %cst_307 = arith.constant dense<0xFF800000> : vector<2x8xf32>
    %697 = vector.multi_reduction <maximumf>, %696, %cst_307 [2] : vector<2x8x8xf32> to vector<2x8xf32>
    %698 = vector.shape_cast %697 : vector<2x8xf32> to vector<2x8x1xf32>
    %699 = vector.broadcast %698 : vector<2x8x1xf32> to vector<2x8x8xf32>
    %700 = arith.subf %696, %699 : vector<2x8x8xf32>
    %701 = math.exp %700 : vector<2x8x8xf32>
    %cst_308 = arith.constant dense<0.000000e+00> : vector<2x8xf32>
    %702 = vector.multi_reduction <add>, %701, %cst_308 [2] : vector<2x8x8xf32> to vector<2x8xf32>
    %703 = vector.shape_cast %702 : vector<2x8xf32> to vector<2x8x1xf32>
    %704 = tpu.reciprocal %703 {approx = true} : vector<2x8x1xf32> -> vector<2x8x1xf32>
    %705 = vector.broadcast %704 : vector<2x8x1xf32> to vector<2x8x8xf32>
    %706 = arith.mulf %701, %705 : vector<2x8x8xf32>
    "tpu.trace_start"() <{level = 10 : i32, message = "bts,bsd->btd"}> : () -> ()
    %cst_309 = arith.constant dense<0.000000e+00> : vector<2x8x8xf32>
    %707 = tpu.matmul %706, %695, %cst_309 {dimension_numbers = #tpu.dot_dimension_numbers<[2], [1], [1], [2], [0, 0, 0, 1, 1, 2], [0], [0]>} : vector<2x8x8xf32>, vector<2x8x8xf32>, vector<2x8x8xf32> -> vector<2x8x8xf32>
    "tpu.trace_stop"() : () -> ()
    %708 = vector.shape_cast %707 : vector<2x8x8xf32> to vector<16x8xf32>
    %c0_310 = arith.constant 0 : index
    %c0_311 = arith.constant 0 : index
    %709 = vector.load %arg9[%c0_310, %c0_311] : memref<16x32xf32, #tpu.memory_space<vmem>>, vector<16x8xf32>
    tpu.vector_store %arg9[%c0_310, %c0_311], %708 {strides = array<i32>} : memref<16x32xf32, #tpu.memory_space<vmem>>, vector<16x8xf32>,
    %710 = vector.extract_strided_slice %688 {offsets = [0, 8], sizes = [16, 8], strides = [1, 1]} : vector<16x32xf32> to vector<16x8xf32>
    %711 = vector.shape_cast %710 : vector<16x8xf32> to vector<2x8x8xf32>
    %712 = vector.extract_strided_slice %689 {offsets = [0, 8], sizes = [16, 8], strides = [1, 1]} : vector<16x32xf32> to vector<16x8xf32>
    %713 = vector.shape_cast %712 : vector<16x8xf32> to vector<2x8x8xf32>
    %714 = vector.extract_strided_slice %687 {offsets = [0, 8], sizes = [16, 8], strides = [1, 1]} : vector<16x32xf32> to vector<16x8xf32>
    %715 = vector.shape_cast %714 : vector<16x8xf32> to vector<2x8x8xf32>
    "tpu.trace_start"() <{level = 10 : i32, message = "btd,bsd->bts"}> : () -> ()
    %cst_312 = arith.constant dense<0.000000e+00> : vector<2x8x8xf32>
    %716 = tpu.matmul %711, %713, %cst_312 {dimension_numbers = #tpu.dot_dimension_numbers<[2], [2], [1], [1], [0, 0, 0, 1, 1, 1], [0], [0]>} : vector<2x8x8xf32>, vector<2x8x8xf32>, vector<2x8x8xf32> -> vector<2x8x8xf32>
    "tpu.trace_stop"() : () -> ()
    %cst_313 = arith.constant dense<0xFF800000> : vector<2x8xf32>
    %717 = vector.multi_reduction <maximumf>, %716, %cst_313 [2] : vector<2x8x8xf32> to vector<2x8xf32>
    %718 = vector.shape_cast %717 : vector<2x8xf32> to vector<2x8x1xf32>
    %719 = vector.broadcast %718 : vector<2x8x1xf32> to vector<2x8x8xf32>
    %720 = arith.subf %716, %719 : vector<2x8x8xf32>
    %721 = math.exp %720 : vector<2x8x8xf32>
    %cst_314 = arith.constant dense<0.000000e+00> : vector<2x8xf32>
    %722 = vector.multi_reduction <add>, %721, %cst_314 [2] : vector<2x8x8xf32> to vector<2x8xf32>
    %723 = vector.shape_cast %722 : vector<2x8xf32> to vector<2x8x1xf32>
    %724 = tpu.reciprocal %723 {approx = true} : vector<2x8x1xf32> -> vector<2x8x1xf32>
    %725 = vector.broadcast %724 : vector<2x8x1xf32> to vector<2x8x8xf32>
    %726 = arith.mulf %721, %725 : vector<2x8x8xf32>
    "tpu.trace_start"() <{level = 10 : i32, message = "bts,bsd->btd"}> : () -> ()
    %cst_315 = arith.constant dense<0.000000e+00> : vector<2x8x8xf32>
    %727 = tpu.matmul %726, %715, %cst_315 {dimension_numbers = #tpu.dot_dimension_numbers<[2], [1], [1], [2], [0, 0, 0, 1, 1, 2], [0], [0]>} : vector<2x8x8xf32>, vector<2x8x8xf32>, vector<2x8x8xf32> -> vector<2x8x8xf32>
    "tpu.trace_stop"() : () -> ()
    %728 = vector.shape_cast %727 : vector<2x8x8xf32> to vector<16x8xf32>
    %c0_316 = arith.constant 0 : index
    %c8_317 = arith.constant 8 : index
    %729 = vector.load %arg9[%c0_316, %c8_317] : memref<16x32xf32, #tpu.memory_space<vmem>>, vector<16x8xf32>
    tpu.vector_store %arg9[%c0_316, %c8_317], %728 {strides = array<i32>} : memref<16x32xf32, #tpu.memory_space<vmem>>, vector<16x8xf32>,
    %730 = vector.extract_strided_slice %688 {offsets = [0, 16], sizes = [16, 8], strides = [1, 1]} : vector<16x32xf32> to vector<16x8xf32>
    %731 = vector.shape_cast %730 : vector<16x8xf32> to vector<2x8x8xf32>
    %732 = vector.extract_strided_slice %689 {offsets = [0, 16], sizes = [16, 8], strides = [1, 1]} : vector<16x32xf32> to vector<16x8xf32>
    %733 = vector.shape_cast %732 : vector<16x8xf32> to vector<2x8x8xf32>
    %734 = vector.extract_strided_slice %687 {offsets = [0, 16], sizes = [16, 8], strides = [1, 1]} : vector<16x32xf32> to vector<16x8xf32>
    %735 = vector.shape_cast %734 : vector<16x8xf32> to vector<2x8x8xf32>
    "tpu.trace_start"() <{level = 10 : i32, message = "btd,bsd->bts"}> : () -> ()
    %cst_318 = arith.constant dense<0.000000e+00> : vector<2x8x8xf32>
    %736 = tpu.matmul %731, %733, %cst_318 {dimension_numbers = #tpu.dot_dimension_numbers<[2], [2], [1], [1], [0, 0, 0, 1, 1, 1], [0], [0]>} : vector<2x8x8xf32>, vector<2x8x8xf32>, vector<2x8x8xf32> -> vector<2x8x8xf32>
    "tpu.trace_stop"() : () -> ()
    %cst_319 = arith.constant dense<0xFF800000> : vector<2x8xf32>
    %737 = vector.multi_reduction <maximumf>, %736, %cst_319 [2] : vector<2x8x8xf32> to vector<2x8xf32>
    %738 = vector.shape_cast %737 : vector<2x8xf32> to vector<2x8x1xf32>
    %739 = vector.broadcast %738 : vector<2x8x1xf32> to vector<2x8x8xf32>
    %740 = arith.subf %736, %739 : vector<2x8x8xf32>
    %741 = math.exp %740 : vector<2x8x8xf32>
    %cst_320 = arith.constant dense<0.000000e+00> : vector<2x8xf32>
    %742 = vector.multi_reduction <add>, %741, %cst_320 [2] : vector<2x8x8xf32> to vector<2x8xf32>
    %743 = vector.shape_cast %742 : vector<2x8xf32> to vector<2x8x1xf32>
    %744 = tpu.reciprocal %743 {approx = true} : vector<2x8x1xf32> -> vector<2x8x1xf32>
    %745 = vector.broadcast %744 : vector<2x8x1xf32> to vector<2x8x8xf32>
    %746 = arith.mulf %741, %745 : vector<2x8x8xf32>
    "tpu.trace_start"() <{level = 10 : i32, message = "bts,bsd->btd"}> : () -> ()
    %cst_321 = arith.constant dense<0.000000e+00> : vector<2x8x8xf32>
    %747 = tpu.matmul %746, %735, %cst_321 {dimension_numbers = #tpu.dot_dimension_numbers<[2], [1], [1], [2], [0, 0, 0, 1, 1, 2], [0], [0]>} : vector<2x8x8xf32>, vector<2x8x8xf32>, vector<2x8x8xf32> -> vector<2x8x8xf32>
    "tpu.trace_stop"() : () -> ()
    %748 = vector.shape_cast %747 : vector<2x8x8xf32> to vector<16x8xf32>
    %c0_322 = arith.constant 0 : index
    %c16_323 = arith.constant 16 : index
    %749 = vector.load %arg9[%c0_322, %c16_323] : memref<16x32xf32, #tpu.memory_space<vmem>>, vector<16x8xf32>
    tpu.vector_store %arg9[%c0_322, %c16_323], %748 {strides = array<i32>} : memref<16x32xf32, #tpu.memory_space<vmem>>, vector<16x8xf32>,
    %750 = vector.extract_strided_slice %688 {offsets = [0, 24], sizes = [16, 8], strides = [1, 1]} : vector<16x32xf32> to vector<16x8xf32>
    %751 = vector.shape_cast %750 : vector<16x8xf32> to vector<2x8x8xf32>
    %752 = vector.extract_strided_slice %689 {offsets = [0, 24], sizes = [16, 8], strides = [1, 1]} : vector<16x32xf32> to vector<16x8xf32>
    %753 = vector.shape_cast %752 : vector<16x8xf32> to vector<2x8x8xf32>
    %754 = vector.extract_strided_slice %687 {offsets = [0, 24], sizes = [16, 8], strides = [1, 1]} : vector<16x32xf32> to vector<16x8xf32>
    %755 = vector.shape_cast %754 : vector<16x8xf32> to vector<2x8x8xf32>
    "tpu.trace_start"() <{level = 10 : i32, message = "btd,bsd->bts"}> : () -> ()
    %cst_324 = arith.constant dense<0.000000e+00> : vector<2x8x8xf32>
    %756 = tpu.matmul %751, %753, %cst_324 {dimension_numbers = #tpu.dot_dimension_numbers<[2], [2], [1], [1], [0, 0, 0, 1, 1, 1], [0], [0]>} : vector<2x8x8xf32>, vector<2x8x8xf32>, vector<2x8x8xf32> -> vector<2x8x8xf32>
    "tpu.trace_stop"() : () -> ()
    %cst_325 = arith.constant dense<0xFF800000> : vector<2x8xf32>
    %757 = vector.multi_reduction <maximumf>, %756, %cst_325 [2] : vector<2x8x8xf32> to vector<2x8xf32>
    %758 = vector.shape_cast %757 : vector<2x8xf32> to vector<2x8x1xf32>
    %759 = vector.broadcast %758 : vector<2x8x1xf32> to vector<2x8x8xf32>
    %760 = arith.subf %756, %759 : vector<2x8x8xf32>
    %761 = math.exp %760 : vector<2x8x8xf32>
    %cst_326 = arith.constant dense<0.000000e+00> : vector<2x8xf32>
    %762 = vector.multi_reduction <add>, %761, %cst_326 [2] : vector<2x8x8xf32> to vector<2x8xf32>
    %763 = vector.shape_cast %762 : vector<2x8xf32> to vector<2x8x1xf32>
    %764 = tpu.reciprocal %763 {approx = true} : vector<2x8x1xf32> -> vector<2x8x1xf32>
    %765 = vector.broadcast %764 : vector<2x8x1xf32> to vector<2x8x8xf32>
    %766 = arith.mulf %761, %765 : vector<2x8x8xf32>
    "tpu.trace_start"() <{level = 10 : i32, message = "bts,bsd->btd"}> : () -> ()
    %cst_327 = arith.constant dense<0.000000e+00> : vector<2x8x8xf32>
    %767 = tpu.matmul %766, %755, %cst_327 {dimension_numbers = #tpu.dot_dimension_numbers<[2], [1], [1], [2], [0, 0, 0, 1, 1, 2], [0], [0]>} : vector<2x8x8xf32>, vector<2x8x8xf32>, vector<2x8x8xf32> -> vector<2x8x8xf32>
    "tpu.trace_stop"() : () -> ()
    %768 = vector.shape_cast %767 : vector<2x8x8xf32> to vector<16x8xf32>
    %c0_328 = arith.constant 0 : index
    %c24_329 = arith.constant 24 : index
    %769 = vector.load %arg9[%c0_328, %c24_329] : memref<16x32xf32, #tpu.memory_space<vmem>>, vector<16x8xf32>
    tpu.vector_store %arg9[%c0_328, %c24_329], %768 {strides = array<i32>} : memref<16x32xf32, #tpu.memory_space<vmem>>, vector<16x8xf32>,
    %c0_330 = arith.constant 0 : index
    %c0_331 = arith.constant 0 : index
    %770 = vector.load %arg9[%c0_330, %c0_331] : memref<16x32xf32, #tpu.memory_space<vmem>>, vector<16x32xf32>
    %c2_332 = arith.constant 2 : index
    %c0_333 = arith.constant 0 : index
    %c96_334 = arith.constant 96 : index
    %771 = vector.load %arg4[%c2_332, %c0_333, %c96_334] : memref<3x32x256xf32, #tpu.memory_space<vmem>>, vector<1x32x32xf32>
    %772 = vector.shape_cast %771 : vector<1x32x32xf32> to vector<32x32xf32>
    %cst_335 = arith.constant dense<0.000000e+00> : vector<16x32xf32>
    %773 = tpu.matmul %770, %772, %cst_335 {dimension_numbers = #tpu.dot_dimension_numbers<[1], [0], [0], [1], [0, 0, 1, 1], [], []>} : vector<16x32xf32>, vector<32x32xf32>, vector<16x32xf32> -> vector<16x32xf32>
    %c2_336 = arith.constant 2 : index
    %c2_337 = arith.constant 2 : index
    %c0_338 = arith.constant 0 : index
    %774 = vector.load %arg6[%c2_336, %c2_337, %c0_338] : memref<3x16x64xf32, #tpu.memory_space<vmem>>, vector<1x1x32xf32>
    %775 = vector.shape_cast %774 : vector<1x1x32xf32> to vector<32xf32>
    %776 = vector.shape_cast %775 : vector<32xf32> to vector<1x32xf32>
    %777 = vector.broadcast %776 : vector<1x32xf32> to vector<16x32xf32>
    %778 = arith.addf %773, %777 : vector<16x32xf32>
    %779 = arith.addf %670, %778 : vector<16x32xf32>
    %c2_339 = arith.constant 2 : index
    %c9_340 = arith.constant 9 : index
    %c0_341 = arith.constant 0 : index
    %780 = vector.load %arg6[%c2_339, %c9_340, %c0_341] : memref<3x16x64xf32, #tpu.memory_space<vmem>>, vector<1x1x32xf32>
    %781 = vector.shape_cast %780 : vector<1x1x32xf32> to vector<32xf32>
    %c2_342 = arith.constant 2 : index
    %c10_343 = arith.constant 10 : index
    %c0_344 = arith.constant 0 : index
    %782 = vector.load %arg6[%c2_342, %c10_343, %c0_344] : memref<3x16x64xf32, #tpu.memory_space<vmem>>, vector<1x1x32xf32>
    %783 = vector.shape_cast %782 : vector<1x1x32xf32> to vector<32xf32>
    %cst_345 = arith.constant dense<0.000000e+00> : vector<16xf32>
    %784 = vector.multi_reduction <add>, %779, %cst_345 [1] : vector<16x32xf32> to vector<16xf32>
    %785 = vector.shape_cast %784 : vector<16xf32> to vector<16x1xf32>
    %cst_346 = arith.constant 3.200000e+01 : f32
    %786 = vector.broadcast %cst_346 : f32 to vector<16x1xf32>
    %787 = arith.divf %785, %786 : vector<16x1xf32>
    %788 = arith.mulf %779, %779 : vector<16x32xf32>
    %cst_347 = arith.constant dense<0.000000e+00> : vector<16xf32>
    %789 = vector.multi_reduction <add>, %788, %cst_347 [1] : vector<16x32xf32> to vector<16xf32>
    %790 = vector.shape_cast %789 : vector<16xf32> to vector<16x1xf32>
    %cst_348 = arith.constant 3.200000e+01 : f32
    %791 = vector.broadcast %cst_348 : f32 to vector<16x1xf32>
    %792 = arith.divf %790, %791 : vector<16x1xf32>
    %793 = vector.broadcast %787 : vector<16x1xf32> to vector<16x32xf32>
    %794 = arith.subf %779, %793 : vector<16x32xf32>
    %795 = arith.mulf %787, %787 : vector<16x1xf32>
    %796 = arith.subf %792, %795 : vector<16x1xf32>
    %cst_349 = arith.constant 9.99999974E-6 : f32
    %797 = vector.broadcast %cst_349 : f32 to vector<16x1xf32>
    %798 = arith.addf %796, %797 : vector<16x1xf32>
    %799 = math.rsqrt %798 : vector<16x1xf32>
    %800 = vector.broadcast %799 : vector<16x1xf32> to vector<16x32xf32>
    %801 = arith.mulf %794, %800 : vector<16x32xf32>
    %802 = vector.shape_cast %781 : vector<32xf32> to vector<1x32xf32>
    %803 = vector.broadcast %802 : vector<1x32xf32> to vector<16x32xf32>
    %804 = arith.mulf %801, %803 : vector<16x32xf32>
    %805 = vector.shape_cast %783 : vector<32xf32> to vector<1x32xf32>
    %806 = vector.broadcast %805 : vector<1x32xf32> to vector<16x32xf32>
    %807 = arith.addf %804, %806 : vector<16x32xf32>
    %808 = arith.addf %807, %1 : vector<16x32xf32>
    %c2_350 = arith.constant 2 : index
    %c0_351 = arith.constant 0 : index
    %c128_352 = arith.constant 128 : index
    %809 = vector.load %arg4[%c2_350, %c0_351, %c128_352] : memref<3x32x256xf32, #tpu.memory_space<vmem>>, vector<1x32x32xf32>
    %810 = vector.shape_cast %809 : vector<1x32x32xf32> to vector<32x32xf32>
    %cst_353 = arith.constant dense<0.000000e+00> : vector<16x32xf32>
    %811 = tpu.matmul %808, %810, %cst_353 {dimension_numbers = #tpu.dot_dimension_numbers<[1], [0], [0], [1], [0, 0, 1, 1], [], []>} : vector<16x32xf32>, vector<32x32xf32>, vector<16x32xf32> -> vector<16x32xf32>
    %c2_354 = arith.constant 2 : index
    %c3_355 = arith.constant 3 : index
    %c0_356 = arith.constant 0 : index
    %812 = vector.load %arg6[%c2_354, %c3_355, %c0_356] : memref<3x16x64xf32, #tpu.memory_space<vmem>>, vector<1x1x32xf32>
    %813 = vector.shape_cast %812 : vector<1x1x32xf32> to vector<32xf32>
    %814 = vector.shape_cast %813 : vector<32xf32> to vector<1x32xf32>
    %815 = vector.broadcast %814 : vector<1x32xf32> to vector<16x32xf32>
    %816 = arith.addf %811, %815 : vector<16x32xf32>
    %c2_357 = arith.constant 2 : index
    %c0_358 = arith.constant 0 : index
    %c160_359 = arith.constant 160 : index
    %817 = vector.load %arg4[%c2_357, %c0_358, %c160_359] : memref<3x32x256xf32, #tpu.memory_space<vmem>>, vector<1x32x32xf32>
    %818 = vector.shape_cast %817 : vector<1x32x32xf32> to vector<32x32xf32>
    %cst_360 = arith.constant dense<0.000000e+00> : vector<32x32xf32>
    %819 = tpu.matmul %4, %818, %cst_360 {dimension_numbers = #tpu.dot_dimension_numbers<[1], [0], [0], [1], [0, 0, 1, 1], [], []>} : vector<32x32xf32>, vector<32x32xf32>, vector<32x32xf32> -> vector<32x32xf32>
    %c2_361 = arith.constant 2 : index
    %c4_362 = arith.constant 4 : index
    %c0_363 = arith.constant 0 : index
    %820 = vector.load %arg6[%c2_361, %c4_362, %c0_363] : memref<3x16x64xf32, #tpu.memory_space<vmem>>, vector<1x1x32xf32>
    %821 = vector.shape_cast %820 : vector<1x1x32xf32> to vector<32xf32>
    %822 = vector.shape_cast %821 : vector<32xf32> to vector<1x32xf32>
    %823 = vector.broadcast %822 : vector<1x32xf32> to vector<32x32xf32>
    %824 = arith.addf %819, %823 : vector<32x32xf32>
    %c2_364 = arith.constant 2 : index
    %c0_365 = arith.constant 0 : index
    %c192_366 = arith.constant 192 : index
    %825 = vector.load %arg4[%c2_364, %c0_365, %c192_366] : memref<3x32x256xf32, #tpu.memory_space<vmem>>, vector<1x32x32xf32>
    %826 = vector.shape_cast %825 : vector<1x32x32xf32> to vector<32x32xf32>
    %cst_367 = arith.constant dense<0.000000e+00> : vector<32x32xf32>
    %827 = tpu.matmul %2, %826, %cst_367 {dimension_numbers = #tpu.dot_dimension_numbers<[1], [0], [0], [1], [0, 0, 1, 1], [], []>} : vector<32x32xf32>, vector<32x32xf32>, vector<32x32xf32> -> vector<32x32xf32>
    %c2_368 = arith.constant 2 : index
    %c5_369 = arith.constant 5 : index
    %c0_370 = arith.constant 0 : index
    %828 = vector.load %arg6[%c2_368, %c5_369, %c0_370] : memref<3x16x64xf32, #tpu.memory_space<vmem>>, vector<1x1x32xf32>
    %829 = vector.shape_cast %828 : vector<1x1x32xf32> to vector<32xf32>
    %830 = vector.shape_cast %829 : vector<32xf32> to vector<1x32xf32>
    %831 = vector.broadcast %830 : vector<1x32xf32> to vector<32x32xf32>
    %832 = arith.addf %827, %831 : vector<32x32xf32>
    %833 = vector.extract_strided_slice %816 {offsets = [0, 0], sizes = [16, 8], strides = [1, 1]} : vector<16x32xf32> to vector<16x8xf32>
    %834 = vector.shape_cast %833 : vector<16x8xf32> to vector<2x8x8xf32>
    %835 = vector.extract_strided_slice %824 {offsets = [0, 0], sizes = [32, 8], strides = [1, 1]} : vector<32x32xf32> to vector<32x8xf32>
    %836 = vector.shape_cast %835 : vector<32x8xf32> to vector<2x16x8xf32>
    %837 = vector.extract_strided_slice %832 {offsets = [0, 0], sizes = [32, 8], strides = [1, 1]} : vector<32x32xf32> to vector<32x8xf32>
    %838 = vector.shape_cast %837 : vector<32x8xf32> to vector<2x16x8xf32>
    "tpu.trace_start"() <{level = 10 : i32, message = "btd,bsd->bts"}> : () -> ()
    %cst_371 = arith.constant dense<0.000000e+00> : vector<2x8x16xf32>
    %839 = tpu.matmul %834, %836, %cst_371 {dimension_numbers = #tpu.dot_dimension_numbers<[2], [2], [1], [1], [0, 0, 0, 1, 1, 1], [0], [0]>} : vector<2x8x8xf32>, vector<2x16x8xf32>, vector<2x8x16xf32> -> vector<2x8x16xf32>
    "tpu.trace_stop"() : () -> ()
    %cst_372 = arith.constant dense<0xFF800000> : vector<2x8xf32>
    %840 = vector.multi_reduction <maximumf>, %839, %cst_372 [2] : vector<2x8x16xf32> to vector<2x8xf32>
    %841 = vector.shape_cast %840 : vector<2x8xf32> to vector<2x8x1xf32>
    %842 = vector.broadcast %841 : vector<2x8x1xf32> to vector<2x8x16xf32>
    %843 = arith.subf %839, %842 : vector<2x8x16xf32>
    %844 = math.exp %843 : vector<2x8x16xf32>
    %cst_373 = arith.constant dense<0.000000e+00> : vector<2x8xf32>
    %845 = vector.multi_reduction <add>, %844, %cst_373 [2] : vector<2x8x16xf32> to vector<2x8xf32>
    %846 = vector.shape_cast %845 : vector<2x8xf32> to vector<2x8x1xf32>
    %847 = tpu.reciprocal %846 {approx = true} : vector<2x8x1xf32> -> vector<2x8x1xf32>
    %848 = vector.broadcast %847 : vector<2x8x1xf32> to vector<2x8x16xf32>
    %849 = arith.mulf %844, %848 : vector<2x8x16xf32>
    "tpu.trace_start"() <{level = 10 : i32, message = "bts,bsd->btd"}> : () -> ()
    %cst_374 = arith.constant dense<0.000000e+00> : vector<2x8x8xf32>
    %850 = tpu.matmul %849, %838, %cst_374 {dimension_numbers = #tpu.dot_dimension_numbers<[2], [1], [1], [2], [0, 0, 0, 1, 1, 2], [0], [0]>} : vector<2x8x16xf32>, vector<2x16x8xf32>, vector<2x8x8xf32> -> vector<2x8x8xf32>
    "tpu.trace_stop"() : () -> ()
    %851 = vector.shape_cast %850 : vector<2x8x8xf32> to vector<16x8xf32>
    %c0_375 = arith.constant 0 : index
    %c0_376 = arith.constant 0 : index
    %852 = vector.load %arg9[%c0_375, %c0_376] : memref<16x32xf32, #tpu.memory_space<vmem>>, vector<16x8xf32>
    tpu.vector_store %arg9[%c0_375, %c0_376], %851 {strides = array<i32>} : memref<16x32xf32, #tpu.memory_space<vmem>>, vector<16x8xf32>,
    %853 = vector.extract_strided_slice %816 {offsets = [0, 8], sizes = [16, 8], strides = [1, 1]} : vector<16x32xf32> to vector<16x8xf32>
    %854 = vector.shape_cast %853 : vector<16x8xf32> to vector<2x8x8xf32>
    %855 = vector.extract_strided_slice %824 {offsets = [0, 8], sizes = [32, 8], strides = [1, 1]} : vector<32x32xf32> to vector<32x8xf32>
    %856 = vector.shape_cast %855 : vector<32x8xf32> to vector<2x16x8xf32>
    %857 = vector.extract_strided_slice %832 {offsets = [0, 8], sizes = [32, 8], strides = [1, 1]} : vector<32x32xf32> to vector<32x8xf32>
    %858 = vector.shape_cast %857 : vector<32x8xf32> to vector<2x16x8xf32>
    "tpu.trace_start"() <{level = 10 : i32, message = "btd,bsd->bts"}> : () -> ()
    %cst_377 = arith.constant dense<0.000000e+00> : vector<2x8x16xf32>
    %859 = tpu.matmul %854, %856, %cst_377 {dimension_numbers = #tpu.dot_dimension_numbers<[2], [2], [1], [1], [0, 0, 0, 1, 1, 1], [0], [0]>} : vector<2x8x8xf32>, vector<2x16x8xf32>, vector<2x8x16xf32> -> vector<2x8x16xf32>
    "tpu.trace_stop"() : () -> ()
    %cst_378 = arith.constant dense<0xFF800000> : vector<2x8xf32>
    %860 = vector.multi_reduction <maximumf>, %859, %cst_378 [2] : vector<2x8x16xf32> to vector<2x8xf32>
    %861 = vector.shape_cast %860 : vector<2x8xf32> to vector<2x8x1xf32>
    %862 = vector.broadcast %861 : vector<2x8x1xf32> to vector<2x8x16xf32>
    %863 = arith.subf %859, %862 : vector<2x8x16xf32>
    %864 = math.exp %863 : vector<2x8x16xf32>
    %cst_379 = arith.constant dense<0.000000e+00> : vector<2x8xf32>
    %865 = vector.multi_reduction <add>, %864, %cst_379 [2] : vector<2x8x16xf32> to vector<2x8xf32>
    %866 = vector.shape_cast %865 : vector<2x8xf32> to vector<2x8x1xf32>
    %867 = tpu.reciprocal %866 {approx = true} : vector<2x8x1xf32> -> vector<2x8x1xf32>
    %868 = vector.broadcast %867 : vector<2x8x1xf32> to vector<2x8x16xf32>
    %869 = arith.mulf %864, %868 : vector<2x8x16xf32>
    "tpu.trace_start"() <{level = 10 : i32, message = "bts,bsd->btd"}> : () -> ()
    %cst_380 = arith.constant dense<0.000000e+00> : vector<2x8x8xf32>
    %870 = tpu.matmul %869, %858, %cst_380 {dimension_numbers = #tpu.dot_dimension_numbers<[2], [1], [1], [2], [0, 0, 0, 1, 1, 2], [0], [0]>} : vector<2x8x16xf32>, vector<2x16x8xf32>, vector<2x8x8xf32> -> vector<2x8x8xf32>
    "tpu.trace_stop"() : () -> ()
    %871 = vector.shape_cast %870 : vector<2x8x8xf32> to vector<16x8xf32>
    %c0_381 = arith.constant 0 : index
    %c8_382 = arith.constant 8 : index
    %872 = vector.load %arg9[%c0_381, %c8_382] : memref<16x32xf32, #tpu.memory_space<vmem>>, vector<16x8xf32>
    tpu.vector_store %arg9[%c0_381, %c8_382], %871 {strides = array<i32>} : memref<16x32xf32, #tpu.memory_space<vmem>>, vector<16x8xf32>,
    %873 = vector.extract_strided_slice %816 {offsets = [0, 16], sizes = [16, 8], strides = [1, 1]} : vector<16x32xf32> to vector<16x8xf32>
    %874 = vector.shape_cast %873 : vector<16x8xf32> to vector<2x8x8xf32>
    %875 = vector.extract_strided_slice %824 {offsets = [0, 16], sizes = [32, 8], strides = [1, 1]} : vector<32x32xf32> to vector<32x8xf32>
    %876 = vector.shape_cast %875 : vector<32x8xf32> to vector<2x16x8xf32>
    %877 = vector.extract_strided_slice %832 {offsets = [0, 16], sizes = [32, 8], strides = [1, 1]} : vector<32x32xf32> to vector<32x8xf32>
    %878 = vector.shape_cast %877 : vector<32x8xf32> to vector<2x16x8xf32>
    "tpu.trace_start"() <{level = 10 : i32, message = "btd,bsd->bts"}> : () -> ()
    %cst_383 = arith.constant dense<0.000000e+00> : vector<2x8x16xf32>
    %879 = tpu.matmul %874, %876, %cst_383 {dimension_numbers = #tpu.dot_dimension_numbers<[2], [2], [1], [1], [0, 0, 0, 1, 1, 1], [0], [0]>} : vector<2x8x8xf32>, vector<2x16x8xf32>, vector<2x8x16xf32> -> vector<2x8x16xf32>
    "tpu.trace_stop"() : () -> ()
    %cst_384 = arith.constant dense<0xFF800000> : vector<2x8xf32>
    %880 = vector.multi_reduction <maximumf>, %879, %cst_384 [2] : vector<2x8x16xf32> to vector<2x8xf32>
    %881 = vector.shape_cast %880 : vector<2x8xf32> to vector<2x8x1xf32>
    %882 = vector.broadcast %881 : vector<2x8x1xf32> to vector<2x8x16xf32>
    %883 = arith.subf %879, %882 : vector<2x8x16xf32>
    %884 = math.exp %883 : vector<2x8x16xf32>
    %cst_385 = arith.constant dense<0.000000e+00> : vector<2x8xf32>
    %885 = vector.multi_reduction <add>, %884, %cst_385 [2] : vector<2x8x16xf32> to vector<2x8xf32>
    %886 = vector.shape_cast %885 : vector<2x8xf32> to vector<2x8x1xf32>
    %887 = tpu.reciprocal %886 {approx = true} : vector<2x8x1xf32> -> vector<2x8x1xf32>
    %888 = vector.broadcast %887 : vector<2x8x1xf32> to vector<2x8x16xf32>
    %889 = arith.mulf %884, %888 : vector<2x8x16xf32>
    "tpu.trace_start"() <{level = 10 : i32, message = "bts,bsd->btd"}> : () -> ()
    %cst_386 = arith.constant dense<0.000000e+00> : vector<2x8x8xf32>
    %890 = tpu.matmul %889, %878, %cst_386 {dimension_numbers = #tpu.dot_dimension_numbers<[2], [1], [1], [2], [0, 0, 0, 1, 1, 2], [0], [0]>} : vector<2x8x16xf32>, vector<2x16x8xf32>, vector<2x8x8xf32> -> vector<2x8x8xf32>
    "tpu.trace_stop"() : () -> ()
    %891 = vector.shape_cast %890 : vector<2x8x8xf32> to vector<16x8xf32>
    %c0_387 = arith.constant 0 : index
    %c16_388 = arith.constant 16 : index
    %892 = vector.load %arg9[%c0_387, %c16_388] : memref<16x32xf32, #tpu.memory_space<vmem>>, vector<16x8xf32>
    tpu.vector_store %arg9[%c0_387, %c16_388], %891 {strides = array<i32>} : memref<16x32xf32, #tpu.memory_space<vmem>>, vector<16x8xf32>,
    %893 = vector.extract_strided_slice %816 {offsets = [0, 24], sizes = [16, 8], strides = [1, 1]} : vector<16x32xf32> to vector<16x8xf32>
    %894 = vector.shape_cast %893 : vector<16x8xf32> to vector<2x8x8xf32>
    %895 = vector.extract_strided_slice %824 {offsets = [0, 24], sizes = [32, 8], strides = [1, 1]} : vector<32x32xf32> to vector<32x8xf32>
    %896 = vector.shape_cast %895 : vector<32x8xf32> to vector<2x16x8xf32>
    %897 = vector.extract_strided_slice %832 {offsets = [0, 24], sizes = [32, 8], strides = [1, 1]} : vector<32x32xf32> to vector<32x8xf32>
    %898 = vector.shape_cast %897 : vector<32x8xf32> to vector<2x16x8xf32>
    "tpu.trace_start"() <{level = 10 : i32, message = "btd,bsd->bts"}> : () -> ()
    %cst_389 = arith.constant dense<0.000000e+00> : vector<2x8x16xf32>
    %899 = tpu.matmul %894, %896, %cst_389 {dimension_numbers = #tpu.dot_dimension_numbers<[2], [2], [1], [1], [0, 0, 0, 1, 1, 1], [0], [0]>} : vector<2x8x8xf32>, vector<2x16x8xf32>, vector<2x8x16xf32> -> vector<2x8x16xf32>
    "tpu.trace_stop"() : () -> ()
    %cst_390 = arith.constant dense<0xFF800000> : vector<2x8xf32>
    %900 = vector.multi_reduction <maximumf>, %899, %cst_390 [2] : vector<2x8x16xf32> to vector<2x8xf32>
    %901 = vector.shape_cast %900 : vector<2x8xf32> to vector<2x8x1xf32>
    %902 = vector.broadcast %901 : vector<2x8x1xf32> to vector<2x8x16xf32>
    %903 = arith.subf %899, %902 : vector<2x8x16xf32>
    %904 = math.exp %903 : vector<2x8x16xf32>
    %cst_391 = arith.constant dense<0.000000e+00> : vector<2x8xf32>
    %905 = vector.multi_reduction <add>, %904, %cst_391 [2] : vector<2x8x16xf32> to vector<2x8xf32>
    %906 = vector.shape_cast %905 : vector<2x8xf32> to vector<2x8x1xf32>
    %907 = tpu.reciprocal %906 {approx = true} : vector<2x8x1xf32> -> vector<2x8x1xf32>
    %908 = vector.broadcast %907 : vector<2x8x1xf32> to vector<2x8x16xf32>
    %909 = arith.mulf %904, %908 : vector<2x8x16xf32>
    "tpu.trace_start"() <{level = 10 : i32, message = "bts,bsd->btd"}> : () -> ()
    %cst_392 = arith.constant dense<0.000000e+00> : vector<2x8x8xf32>
    %910 = tpu.matmul %909, %898, %cst_392 {dimension_numbers = #tpu.dot_dimension_numbers<[2], [1], [1], [2], [0, 0, 0, 1, 1, 2], [0], [0]>} : vector<2x8x16xf32>, vector<2x16x8xf32>, vector<2x8x8xf32> -> vector<2x8x8xf32>
    "tpu.trace_stop"() : () -> ()
    %911 = vector.shape_cast %910 : vector<2x8x8xf32> to vector<16x8xf32>
    %c0_393 = arith.constant 0 : index
    %c24_394 = arith.constant 24 : index
    %912 = vector.load %arg9[%c0_393, %c24_394] : memref<16x32xf32, #tpu.memory_space<vmem>>, vector<16x8xf32>
    tpu.vector_store %arg9[%c0_393, %c24_394], %911 {strides = array<i32>} : memref<16x32xf32, #tpu.memory_space<vmem>>, vector<16x8xf32>,
    %c0_395 = arith.constant 0 : index
    %c0_396 = arith.constant 0 : index
    %913 = vector.load %arg9[%c0_395, %c0_396] : memref<16x32xf32, #tpu.memory_space<vmem>>, vector<16x32xf32>
    %c2_397 = arith.constant 2 : index
    %c0_398 = arith.constant 0 : index
    %c224_399 = arith.constant 224 : index
    %914 = vector.load %arg4[%c2_397, %c0_398, %c224_399] : memref<3x32x256xf32, #tpu.memory_space<vmem>>, vector<1x32x32xf32>
    %915 = vector.shape_cast %914 : vector<1x32x32xf32> to vector<32x32xf32>
    %cst_400 = arith.constant dense<0.000000e+00> : vector<16x32xf32>
    %916 = tpu.matmul %913, %915, %cst_400 {dimension_numbers = #tpu.dot_dimension_numbers<[1], [0], [0], [1], [0, 0, 1, 1], [], []>} : vector<16x32xf32>, vector<32x32xf32>, vector<16x32xf32> -> vector<16x32xf32>
    %c2_401 = arith.constant 2 : index
    %c6_402 = arith.constant 6 : index
    %c0_403 = arith.constant 0 : index
    %917 = vector.load %arg6[%c2_401, %c6_402, %c0_403] : memref<3x16x64xf32, #tpu.memory_space<vmem>>, vector<1x1x32xf32>
    %918 = vector.shape_cast %917 : vector<1x1x32xf32> to vector<32xf32>
    %919 = vector.shape_cast %918 : vector<32xf32> to vector<1x32xf32>
    %920 = vector.broadcast %919 : vector<1x32xf32> to vector<16x32xf32>
    %921 = arith.addf %916, %920 : vector<16x32xf32>
    %922 = arith.addf %807, %921 : vector<16x32xf32>
    %c2_404 = arith.constant 2 : index
    %c11_405 = arith.constant 11 : index
    %c0_406 = arith.constant 0 : index
    %923 = vector.load %arg6[%c2_404, %c11_405, %c0_406] : memref<3x16x64xf32, #tpu.memory_space<vmem>>, vector<1x1x32xf32>
    %924 = vector.shape_cast %923 : vector<1x1x32xf32> to vector<32xf32>
    %c2_407 = arith.constant 2 : index
    %c12_408 = arith.constant 12 : index
    %c0_409 = arith.constant 0 : index
    %925 = vector.load %arg6[%c2_407, %c12_408, %c0_409] : memref<3x16x64xf32, #tpu.memory_space<vmem>>, vector<1x1x32xf32>
    %926 = vector.shape_cast %925 : vector<1x1x32xf32> to vector<32xf32>
    %cst_410 = arith.constant dense<0.000000e+00> : vector<16xf32>
    %927 = vector.multi_reduction <add>, %922, %cst_410 [1] : vector<16x32xf32> to vector<16xf32>
    %928 = vector.shape_cast %927 : vector<16xf32> to vector<16x1xf32>
    %cst_411 = arith.constant 3.200000e+01 : f32
    %929 = vector.broadcast %cst_411 : f32 to vector<16x1xf32>
    %930 = arith.divf %928, %929 : vector<16x1xf32>
    %931 = arith.mulf %922, %922 : vector<16x32xf32>
    %cst_412 = arith.constant dense<0.000000e+00> : vector<16xf32>
    %932 = vector.multi_reduction <add>, %931, %cst_412 [1] : vector<16x32xf32> to vector<16xf32>
    %933 = vector.shape_cast %932 : vector<16xf32> to vector<16x1xf32>
    %cst_413 = arith.constant 3.200000e+01 : f32
    %934 = vector.broadcast %cst_413 : f32 to vector<16x1xf32>
    %935 = arith.divf %933, %934 : vector<16x1xf32>
    %936 = vector.broadcast %930 : vector<16x1xf32> to vector<16x32xf32>
    %937 = arith.subf %922, %936 : vector<16x32xf32>
    %938 = arith.mulf %930, %930 : vector<16x1xf32>
    %939 = arith.subf %935, %938 : vector<16x1xf32>
    %cst_414 = arith.constant 9.99999974E-6 : f32
    %940 = vector.broadcast %cst_414 : f32 to vector<16x1xf32>
    %941 = arith.addf %939, %940 : vector<16x1xf32>
    %942 = math.rsqrt %941 : vector<16x1xf32>
    %943 = vector.broadcast %942 : vector<16x1xf32> to vector<16x32xf32>
    %944 = arith.mulf %937, %943 : vector<16x32xf32>
    %945 = vector.shape_cast %924 : vector<32xf32> to vector<1x32xf32>
    %946 = vector.broadcast %945 : vector<1x32xf32> to vector<16x32xf32>
    %947 = arith.mulf %944, %946 : vector<16x32xf32>
    %948 = vector.shape_cast %926 : vector<32xf32> to vector<1x32xf32>
    %949 = vector.broadcast %948 : vector<1x32xf32> to vector<16x32xf32>
    %950 = arith.addf %947, %949 : vector<16x32xf32>
    %c2_415 = arith.constant 2 : index
    %c0_416 = arith.constant 0 : index
    %c0_417 = arith.constant 0 : index
    %951 = vector.load %arg5[%c2_415, %c0_416, %c0_417] : memref<3x96x64xf32, #tpu.memory_space<vmem>>, vector<1x32x64xf32>
    %952 = vector.shape_cast %951 : vector<1x32x64xf32> to vector<32x64xf32>
    %cst_418 = arith.constant dense<0.000000e+00> : vector<16x64xf32>
    %953 = tpu.matmul %950, %952, %cst_418 {dimension_numbers = #tpu.dot_dimension_numbers<[1], [0], [0], [1], [0, 0, 1, 1], [], []>} : vector<16x32xf32>, vector<32x64xf32>, vector<16x64xf32> -> vector<16x64xf32>
    %c2_419 = arith.constant 2 : index
    %c7_420 = arith.constant 7 : index
    %c0_421 = arith.constant 0 : index
    %954 = vector.load %arg6[%c2_419, %c7_420, %c0_421] : memref<3x16x64xf32, #tpu.memory_space<vmem>>, vector<1x1x64xf32>
    %955 = vector.shape_cast %954 : vector<1x1x64xf32> to vector<64xf32>
    %956 = vector.shape_cast %955 : vector<64xf32> to vector<1x64xf32>
    %957 = vector.broadcast %956 : vector<1x64xf32> to vector<16x64xf32>
    %958 = arith.addf %953, %957 : vector<16x64xf32>
    %cst_422 = arith.constant 0.000000e+00 : f32
    %959 = vector.broadcast %cst_422 : f32 to vector<16x64xf32>
    %960 = arith.maximumf %958, %959 : vector<16x64xf32>
    %c2_423 = arith.constant 2 : index
    %c32_424 = arith.constant 32 : index
    %c0_425 = arith.constant 0 : index
    %961 = vector.load %arg5[%c2_423, %c32_424, %c0_425] : memref<3x96x64xf32, #tpu.memory_space<vmem>>, vector<1x64x32xf32>
    %962 = vector.shape_cast %961 : vector<1x64x32xf32> to vector<64x32xf32>
    %cst_426 = arith.constant dense<0.000000e+00> : vector<16x32xf32>
    %963 = tpu.matmul %960, %962, %cst_426 {dimension_numbers = #tpu.dot_dimension_numbers<[1], [0], [0], [1], [0, 0, 1, 1], [], []>} : vector<16x64xf32>, vector<64x32xf32>, vector<16x32xf32> -> vector<16x32xf32>
    %c2_427 = arith.constant 2 : index
    %c8_428 = arith.constant 8 : index
    %c0_429 = arith.constant 0 : index
    %964 = vector.load %arg6[%c2_427, %c8_428, %c0_429] : memref<3x16x64xf32, #tpu.memory_space<vmem>>, vector<1x1x32xf32>
    %965 = vector.shape_cast %964 : vector<1x1x32xf32> to vector<32xf32>
    %966 = vector.shape_cast %965 : vector<32xf32> to vector<1x32xf32>
    %967 = vector.broadcast %966 : vector<1x32xf32> to vector<16x32xf32>
    %968 = arith.addf %963, %967 : vector<16x32xf32>
    %969 = arith.addf %950, %968 : vector<16x32xf32>
    %c2_430 = arith.constant 2 : index
    %c13_431 = arith.constant 13 : index
    %c0_432 = arith.constant 0 : index
    %970 = vector.load %arg6[%c2_430, %c13_431, %c0_432] : memref<3x16x64xf32, #tpu.memory_space<vmem>>, vector<1x1x32xf32>
    %971 = vector.shape_cast %970 : vector<1x1x32xf32> to vector<32xf32>
    %c2_433 = arith.constant 2 : index
    %c14_434 = arith.constant 14 : index
    %c0_435 = arith.constant 0 : index
    %972 = vector.load %arg6[%c2_433, %c14_434, %c0_435] : memref<3x16x64xf32, #tpu.memory_space<vmem>>, vector<1x1x32xf32>
    %973 = vector.shape_cast %972 : vector<1x1x32xf32> to vector<32xf32>
    %cst_436 = arith.constant dense<0.000000e+00> : vector<16xf32>
    %974 = vector.multi_reduction <add>, %969, %cst_436 [1] : vector<16x32xf32> to vector<16xf32>
    %975 = vector.shape_cast %974 : vector<16xf32> to vector<16x1xf32>
    %cst_437 = arith.constant 3.200000e+01 : f32
    %976 = vector.broadcast %cst_437 : f32 to vector<16x1xf32>
    %977 = arith.divf %975, %976 : vector<16x1xf32>
    %978 = arith.mulf %969, %969 : vector<16x32xf32>
    %cst_438 = arith.constant dense<0.000000e+00> : vector<16xf32>
    %979 = vector.multi_reduction <add>, %978, %cst_438 [1] : vector<16x32xf32> to vector<16xf32>
    %980 = vector.shape_cast %979 : vector<16xf32> to vector<16x1xf32>
    %cst_439 = arith.constant 3.200000e+01 : f32
    %981 = vector.broadcast %cst_439 : f32 to vector<16x1xf32>
    %982 = arith.divf %980, %981 : vector<16x1xf32>
    %983 = vector.broadcast %977 : vector<16x1xf32> to vector<16x32xf32>
    %984 = arith.subf %969, %983 : vector<16x32xf32>
    %985 = arith.mulf %977, %977 : vector<16x1xf32>
    %986 = arith.subf %982, %985 : vector<16x1xf32>
    %cst_440 = arith.constant 9.99999974E-6 : f32
    %987 = vector.broadcast %cst_440 : f32 to vector<16x1xf32>
    %988 = arith.addf %986, %987 : vector<16x1xf32>
    %989 = math.rsqrt %988 : vector<16x1xf32>
    %990 = vector.broadcast %989 : vector<16x1xf32> to vector<16x32xf32>
    %991 = arith.mulf %984, %990 : vector<16x32xf32>
    %992 = vector.shape_cast %971 : vector<32xf32> to vector<1x32xf32>
    %993 = vector.broadcast %992 : vector<1x32xf32> to vector<16x32xf32>
    %994 = arith.mulf %991, %993 : vector<16x32xf32>
    %995 = vector.shape_cast %973 : vector<32xf32> to vector<1x32xf32>
    %996 = vector.broadcast %995 : vector<1x32xf32> to vector<16x32xf32>
    %997 = arith.addf %994, %996 : vector<16x32xf32>
    %c0_441 = arith.constant 0 : index
    %c0_442 = arith.constant 0 : index
    %998 = vector.load %arg8[%c0_441, %c0_442] : memref<16x32xf32, #tpu.memory_space<vmem>>, vector<16x32xf32>
    tpu.vector_store %arg8[%c0_441, %c0_442], %997 {strides = array<i32>} : memref<16x32xf32, #tpu.memory_space<vmem>>, vector<16x32xf32>,
    return
  }
}

</mosaic_0001>

<bundles_post_ra>
// kernel: skip_transformer_decoder.1
= control target key start
LH: loop header
LB: loop body
LE: loop exit
PB: predicated region body
PF: predicated region fallthrough
CT: control target
= control target key end

     0   :  { %vm54_vm0 = vcmask 261120   ;;  %s6213_s17 = smov 64   ;;  %s7696_s0 = inlined_call_operand.vmem [shape: f32[16,32], index: 0, kind: input, shape index: {}]   ;;  %s7697_s1 = inlined_call_operand.vmem [shape: f32[16,32], index: 1, kind: input, shape index: {}]   ;;  %s7698_s2 = inlined_call_operand.vmem [shape: f32[32,32], index: 2, kind: input, shape index: {}]   ;;  %s7699_s3 = inlined_call_operand.vmem [shape: f32[32,32], index: 3, kind: input, shape index: {}]   ;;  %s7700_s4 = inlined_call_operand.vmem [shape: f32[3,32,256], index: 4, kind: input, shape index: {}]   ;;  %s7701_s5 = inlined_call_operand.vmem [shape: f32[3,96,64], index: 5, kind: input, shape index: {}]   ;;  %s7702_s6 = inlined_call_operand.vmem [shape: f32[3,16,64], index: 6, kind: input, shape index: {}]   ;;  %s7703_s7 = inlined_call_operand.vmem [shape: f32[1,65,32], index: 7, kind: input, shape index: {}]   ;;  %s7704_s8 = inlined_call_operand.hbm [shape: f32[16,32], index: 8, kind: output, shape index: {}]  }
   0x1   :  { %v51_v0 = vld [vmem:[%s7700_s4 + $0x30] sm:$0xff]  ;;  %v50_v1 = vld [vmem:[%s7700_s4 + $0x20] sm:$0xff]  ;;  %v6306_v9 = vld [vmem:[%s7696_s0 + $0x8] sm:$0xff] }
   0x2   :  { %73 = vmatpush.msra.mxu0 %v51_v0  ;;  %v6279_v2 = vpack.i.bf16 %v50_v1, %v51_v0  ;;  %v6284_v3 = vld [vmem:[%s7696_s0] sm:$0xff]  ;;  %v49_v5 = vld [vmem:[%s7700_s4 + $0x10] sm:$0xff]  ;;  %v6311_v10 = vld [vmem:[%s7697_s1 + $0x8] sm:$0xff] }
   0x3   :  { %v6289_v4 = vld [vmem:[%s7697_s1] sm:$0xff]  ;;  %v47_v11 = vadd.f32 %v6311_v10, %v6306_v9 }
   0x4   :  { %v48_v6 = vld [vmem:[%s7700_s4] sm:$0xff]  ;;  %5635 = vrot.lane.b32.xlu1 %v6279_v2, %s6213_s17  ;;  %74 = vmatpush.msra.mxu0 %v50_v1  ;;  %v46_v7 = vadd.f32 %v6289_v4, %v6284_v3 }
   0x5   :  { %v6301_v8 = vpack.i.bf16 %v48_v6, %v49_v5 }
   0x6   :  { %75 = vmatpush.msra.mxu0 %v49_v5 }
   0x8   :  { %76 = vmatpush.msra.mxu0 %v48_v6 }
   0x9   :  { %5295 = vmatmul.msk.f32.vlgmr.msra.gmra.mxu0 %vm54_vm0, %v46_v7 }
   0xc   :  { %5640 = vrot.lane.b32.xlu1 %v6301_v8, %s6213_s17 }
  0x11   :  { %5296 = vmatmul.msk.f32.gmra.mxu0 %vm54_vm0, %v47_v11 }
  0x12   :  { %13 = vsyncpa [#allocation4], 0  ;;  %v5899_v18 = vld [vmem:[%s7702_s6] ss:$0 sm:$0xff]  ;;  %s6214_s23 = smov 112   ;;  %s6215_s24 = smov 88  }
  0x13   :  { %s6216_s25 = smov 96   ;;  %s6217_s26 = smov 120   ;;  %vm134_vm1 = vcmask 64512   ;;  %v5900_v24 = vld [vmem:[%s7702_s6 + $0x1] ss:$0 sm:$0xff]  ;;  %vm396_vm2 = vcmask 130112  }
  0x14   :  { %s6218_s29 = smov 80   ;;  %s6219_s30 = smov 72   ;;  %vm537_vm3 = vcmask 195712   ;;  %vm678_vm4 = vcmask 261312   ;;  %vm1008_vm12 = vcmask 130048  }
  0x15   :  { %s6220_s9 = smov 104   ;;  %s6221_s10 = smov 32  }
  0x16   :  { %s6222_s11 = smov 8   ;;  %s6223_s12 = smov 16  }
  0x17   :  { %s6224_s13 = smov 24   ;;  %s6227_s21 = smov 128  }
  0x76   :  { %v5636_v12 = vpop.permute.xlu1 %5635 }
  0x77   :  { %v5637_v13 = vunpack.i.l.bf16 %v5636_v12  ;;  %v5638_v14 = vunpack.i.h.bf16 %v5636_v12 }
  0x79   :  { %120 = vmatpush.msra.mxu1 %v5637_v13 }
  0x7b   :  { %121 = vmatpush.msra.mxu1 %v5638_v14 }
  0x7e   :  { %v5641_v15 = vpop.permute.xlu1 %5640 }
  0x7f   :  { %v5642_v16 = vunpack.i.l.bf16 %v5641_v15  ;;  %v5643_v17 = vunpack.i.h.bf16 %v5641_v15 }
  0x81   :  { %122 = vmatpush.msra.mxu1 %v5642_v16 }
  0x83   :  { %123 = vmatpush.msra.mxu1 %v5643_v17 }
  0x84   :  { %5297 = vmatmul.msk.f32.vlgmr.msra.gmra.mxu1 %vm54_vm0, %v6284_v3 }
  0x86   :  { %v78_v19 = vpop.f32.mrf.mxu0 }
  0x87   :  { %v79_v20 = vadd.f32 %v5899_v18, %v78_v19 }
  0x89   :  { %399 = vrot.lane.b32.xlu1 %v79_v20, %s6214_s23  ;;  %258 = vrot.lane.b32.xlu2 %v79_v20, %s6215_s24 }
  0x8a   :  { %132 = vrot.lane.b32.xlu0 %v79_v20, %s6216_s25 }
  0x8c   :  { %5298 = vmatmul.msk.f32.gmra.mxu1 %vm54_vm0, %v6306_v9 }
  0x8e   :  { %v81_v21 = vpop.f32.mrf.mxu0 }
  0x8f   :  { %v82_v22 = vadd.f32 %v5899_v18, %v81_v21 }
  0x92   :  { %160 = vrot.lane.b32.xlu0 %v82_v22, %s6216_s25 }
  0x9a   :  { %284 = vrot.lane.b32.xlu0 %v82_v22, %s6217_s26 }
  0xa2   :  { %427 = vrot.lane.b32.xlu0 %v82_v22, %s6214_s23 }
  0xe3   :  { %v259_v27 = vpop.permute.xlu2 %258 }
  0xfb   :  { %v400_v50 = vpop.permute.xlu1 %399 }
  0xfc   :  { %v133_v23 = vpop.permute.xlu0 %132 }
  0xfd   :  { %5299 = vmatpush.xpose.msk.msra.mxu2 %vm134_vm1, %v133_v23 }
 0x100   :  { %5300 = vmatmul.msk.f32.vlgmr.msra.gmra.mxu2 %vm134_vm1, %v79_v20 }
 0x101   :  { %v125_v25 = vpop.f32.mrf.mxu1 }
 0x102   :  { %v6337_v26 = vadd.f32 %v5900_v24, %v125_v25 }
 0x104   :  { %v161_v28 = vpop.permute.xlu0 %160  ;;  %226 = vmatpush.msrb.mxu2 %v6337_v26 }
 0x105   :  { %5301 = vmatpush.xpose.msk.msra.mxu3 %vm134_vm1, %v161_v28 }
 0x106   :  { %5305 = vmatpush.xpose.msk.msra.mxu2 %vm134_vm1, %v259_v27 }
 0x108   :  { %5302 = vmatmul.msk.f32.vlgmr.msra.gmra.mxu3 %vm134_vm1, %v82_v22 }
 0x109   :  { %v128_v33 = vpop.f32.mrf.mxu1 }
 0x10a   :  { %v6351_v34 = vadd.f32 %v5900_v24, %v128_v33 }
 0x10c   :  { %249 = vmatpush.msrb.mxu3 %v6351_v34  ;;  %v285_v47 = vpop.permute.xlu0 %284  ;;  %v5644_v18 = vpack.i.bf16 %v6351_v34, %v6337_v26 }
 0x114   :  { %v428_v48 = vpop.permute.xlu0 %427 }
 0x183   :  { %v156_v29 = vpop.f32.mrf.mxu2 }
 0x184   :  { %v186_v30 = vsel %vm134_vm1, %v156_v29, -inf }
 0x185   :  { %187 = vmax.xlane.f32.xlu2 %v186_v30 }
 0x18b   :  { %v183_v31 = vpop.f32.mrf.mxu3 }
 0x18c   :  { %v189_v32 = vsel %vm134_vm1, %v183_v31, -inf }
 0x18d   :  { %190 = vmax.xlane.f32.xlu2 %v189_v32 }
 0x1a5   :  { %256 = vrot.lane.b32.xlu2 %v79_v20, %s6217_s26 }
 0x1ad   :  { %286 = vrot.lane.b32.xlu2 %v82_v22, %s6215_s24 }
 0x1b5   :  { %401 = vrot.lane.b32.xlu2 %v79_v20, %s6218_s29 }
 0x1bd   :  { %429 = vrot.lane.b32.xlu2 %v82_v22, %s6218_s29 }
 0x1c5   :  { %542 = vrot.lane.b32.xlu2 %v79_v20, %s6219_s30 }
 0x1cd   :  { %540 = vrot.lane.b32.xlu2 %v79_v20, %s6220_s9 }
 0x1f8   :  { %v188_v35 = vpop.xlane.xlu2 %187 }
 0x1f9   :  { %v192_v36 = vsub.f32 %v156_v29, %v188_v35 }
 0x1fb   :  { %v194_v37 = vmul.f32 1.442695, %v192_v36 }
 0x1fd   :  { %5945 = vpow2.f32 %v194_v37 }
 0x200   :  { %v191_v38 = vpop.xlane.xlu2 %190 }
 0x201   :  { %v193_v39 = vsub.f32 %v183_v31, %v191_v38 }
 0x203   :  { %v5946_v40 = vpop.eup %5945  ;;  %v196_v41 = vmul.f32 1.442695, %v193_v39 }
 0x204   :  { %v198_v42 = vsel %vm134_vm1, %v5946_v40, 0.0 }
 0x205   :  { %5947 = vpow2.f32 %v196_v41  ;;  %199 = vadd.xlane.f32.xlu0 %v198_v42 }
 0x208   :  { %v257_v43 = vpop.permute.xlu2 %256 }
 0x20b   :  { %v5948_v44 = vpop.eup %5947 }
 0x20c   :  { %v201_v45 = vsel %vm134_vm1, %v5948_v44, 0.0 }
 0x20d   :  { %202 = vadd.xlane.f32.xlu1 %v201_v45 }
 0x210   :  { %v287_v46 = vpop.permute.xlu2 %286 }
 0x211   :  { %5307 = vmatpush.xpose.msk.msra.mxu3 %vm134_vm1, %v287_v46 }
 0x218   :  { %v402_v49 = vpop.permute.xlu2 %401 }
 0x219   :  { %568 = vrot.lane.b32.xlu0 %v82_v22, %s6220_s9 }
 0x220   :  { %v430_v53 = vpop.permute.xlu2 %429 }
 0x226   :  { %570 = vrot.lane.b32.xlu1 %v82_v22, %s6219_s30 }
 0x228   :  { %v543_v58 = vpop.permute.xlu2 %542 }
 0x230   :  { %v541_v60 = vpop.permute.xlu2 %540 }
 0x278   :  { %v200_v51 = vpop.xlane.xlu0 %199 }
 0x279   :  { %5949 = vrcp.f32 %v200_v51 }
 0x27f   :  { %v5950_v52 = vpop.eup %5949 }
 0x280   :  { %v203_v54 = vpop.xlane.xlu1 %202  ;;  %v206_v55 = vmul.f32 %v5950_v52, %v5946_v40 }
 0x281   :  { %5951 = vrcp.f32 %v203_v54 }
 0x282   :  { %5303 = vmatmul.msk.f32.vlgmr.msrb.gmra.mxu2 %vm134_vm1, %v206_v55 }
 0x283   :  { %5311 = vmatpush.xpose.msk.msrb.mxu2 %vm134_vm1, %v402_v49 }
 0x287   :  { %v5952_v56 = vpop.eup %5951 }
 0x288   :  { %v207_v57 = vmul.f32 %v5952_v56, %v5948_v44 }
 0x28a   :  { %5304 = vmatmul.msk.f32.vlgmr.msrb.gmra.mxu3 %vm134_vm1, %v207_v57  ;;  %5306 = vmatmul.msk.f32.vlgmr.msra.gmra.mxu2 %vm134_vm1, %v257_v43 }
 0x28b   :  { %5313 = vmatpush.xpose.msk.msrb.mxu3 %vm134_vm1, %v430_v53  ;;  %5317 = vmatpush.xpose.msk.msra.mxu2 %vm134_vm1, %v543_v58  ;;  %v569_v61 = vpop.permute.xlu0 %568 }
 0x292   :  { %5308 = vmatmul.msk.f32.vlgmr.msra.gmra.mxu3 %vm134_vm1, %v285_v47  ;;  %5312 = vmatmul.msk.f32.vlgmr.msrb.gmra.mxu2 %vm134_vm1, %v400_v50 }
 0x298   :  { %v571_v59 = vpop.permute.xlu1 %570 }
 0x299   :  { %5319 = vmatpush.xpose.msk.msra.mxu3 %vm134_vm1, %v571_v59 }
 0x29a   :  { %5314 = vmatmul.msk.f32.vlgmr.msrb.gmra.mxu3 %vm134_vm1, %v428_v48  ;;  %5318 = vmatmul.msk.f32.vlgmr.msra.gmra.mxu2 %vm134_vm1, %v541_v60 }
 0x2a2   :  { %5320 = vmatmul.msk.f32.vlgmr.msra.gmra.mxu3 %vm134_vm1, %v569_v61 }
 0x305   :  { %v228_v62 = vpop.f32.mrf.mxu2 }
 0x306   :  { %254 = vst.msk [vmem:[#allocation2] sm:$0xff] %vm134_vm1, %v228_v62 }
 0x30d   :  { %v251_v63 = vpop.f32.mrf.mxu3  ;;  %v281_v0 = vpop.f32.mrf.mxu2 }
 0x30e   :  { %255 = vst.msk [vmem:[#allocation2 + $0x8] sm:$0xff] %vm134_vm1, %v251_v63  ;;  %v312_v1 = vsel %vm134_vm1, %v281_v0, -inf }
 0x30f   :  { %313 = vmax.xlane.f32.xlu2 %v312_v1 }
 0x315   :  { %v309_v5 = vpop.f32.mrf.mxu3  ;;  %v424_v6 = vpop.f32.mrf.mxu2 }
 0x316   :  { %v315_v7 = vsel %vm134_vm1, %v309_v5, -inf  ;;  %v455_v11 = vsel %vm134_vm1, %v424_v6, -inf }
 0x317   :  { %316 = vmax.xlane.f32.xlu1 %v315_v7  ;;  %456 = vmax.xlane.f32.xlu0 %v455_v11 }
 0x31d   :  { %v452_v12 = vpop.f32.mrf.mxu3  ;;  %v565_v13 = vpop.f32.mrf.mxu2 }
 0x31e   :  { %v596_v14 = vsel %vm134_vm1, %v565_v13, -inf  ;;  %v458_v15 = vsel %vm134_vm1, %v452_v12, -inf }
 0x31f   :  { %597 = vmax.xlane.f32.xlu1 %v596_v14  ;;  %459 = vmax.xlane.f32.xlu2 %v458_v15 }
 0x325   :  { %v593_v16 = vpop.f32.mrf.mxu3 }
 0x326   :  { %v599_v17 = vsel %vm134_vm1, %v593_v16, -inf }
 0x327   :  { %600 = vmax.xlane.f32.xlu0 %v599_v17 }
 0x337   :  { %5645 = vrot.lane.b32.xlu2 %v5644_v18, %s6217_s26 }
 0x382   :  { %v314_v19 = vpop.xlane.xlu2 %313 }
 0x383   :  { %v318_v20 = vsub.f32 %v281_v0, %v314_v19 }
 0x385   :  { %v320_v21 = vmul.f32 1.442695, %v318_v20 }
 0x387   :  { %5953 = vpow2.f32 %v320_v21 }
 0x38a   :  { %v317_v22 = vpop.xlane.xlu1 %316  ;;  %v457_v23 = vpop.xlane.xlu0 %456 }
 0x38b   :  { %v319_v24 = vsub.f32 %v309_v5, %v317_v22  ;;  %v461_v25 = vsub.f32 %v424_v6, %v457_v23 }
 0x38d   :  { %v5954_v27 = vpop.eup %5953  ;;  %v322_v28 = vmul.f32 1.442695, %v319_v24  ;;  %v463_v29 = vmul.f32 1.442695, %v461_v25 }
 0x38e   :  { %v324_v30 = vsel %vm134_vm1, %v5954_v27, 0.0 }
 0x38f   :  { %5955 = vpow2.f32 %v322_v28  ;;  %325 = vadd.xlane.f32.xlu2 %v324_v30 }
 0x390   :  { %5957 = vpow2.f32 %v463_v29 }
 0x392   :  { %v598_v31 = vpop.xlane.xlu1 %597  ;;  %v460_v32 = vpop.xlane.xlu2 %459 }
 0x393   :  { %v602_v33 = vsub.f32 %v565_v13, %v598_v31  ;;  %v462_v35 = vsub.f32 %v452_v12, %v460_v32 }
 0x395   :  { %v5956_v36 = vpop.eup %5955  ;;  %v604_v37 = vmul.f32 1.442695, %v602_v33  ;;  %v465_v38 = vmul.f32 1.442695, %v462_v35 }
 0x396   :  { %v5958_v39 = vpop.eup %5957  ;;  %v327_v40 = vsel %vm134_vm1, %v5956_v36, 0.0 }
 0x397   :  { %5959 = vpow2.f32 %v604_v37  ;;  %328 = vadd.xlane.f32.xlu1 %v327_v40  ;;  %v467_v41 = vsel %vm134_vm1, %v5958_v39, 0.0  ;;  %v804_v37 = vld [vmem:[%s7700_s4 + $0x38] sm:$0xff]  ;;  %v5901_v40 = vld [vmem:[%s7702_s6 + $0x2] ss:$0 sm:$0xff] }
 0x398   :  { %5961 = vpow2.f32 %v465_v38  ;;  %468 = vadd.xlane.f32.xlu0 %v467_v41  ;;  %825 = vmatpush.msrb.mxu3 %v804_v37  ;;  %v803_v38 = vld [vmem:[%s7700_s4 + $0x28] sm:$0xff] }
 0x399   :  { %v801_v41 = vld [vmem:[%s7700_s4 + $0x8] sm:$0xff] }
 0x39a   :  { %v5646_v42 = vpop.permute.xlu2 %5645  ;;  %v601_v43 = vpop.xlane.xlu0 %600  ;;  %826 = vmatpush.msrb.mxu3 %v803_v38 }
 0x39b   :  { %v603_v44 = vsub.f32 %v593_v16, %v601_v43  ;;  %v5647_v45 = vunpack.i.l.bf16 %v5646_v42  ;;  %v5648_v46 = vunpack.i.h.bf16 %v5646_v42 }
 0x39d   :  { %v5960_v47 = vpop.eup %5959  ;;  %v606_v48 = vmul.f32 1.442695, %v603_v44  ;;  %356 = vmatpush.msrb.mxu0 %v5647_v45  ;;  %383 = vmatpush.msrb.mxu1 %v5648_v46 }
 0x39e   :  { %v5962_v49 = vpop.eup %5961  ;;  %v608_v50 = vsel %vm134_vm1, %v5960_v47, 0.0 }
 0x39f   :  { %5963 = vpow2.f32 %v606_v48  ;;  %v470_v51 = vsel %vm134_vm1, %v5962_v49, 0.0 }
 0x3a0   :  { %471 = vadd.xlane.f32.xlu1 %v470_v51  ;;  %609 = vadd.xlane.f32.xlu0 %v608_v50 }
 0x3a5   :  { %v5964_v52 = vpop.eup %5963 }
 0x3a6   :  { %v611_v53 = vsel %vm134_vm1, %v5964_v52, 0.0 }
 0x3a7   :  { %644 = vrot.lane.b32.xlu2 %v6351_v34, %s6220_s9 }
 0x3a8   :  { %612 = vadd.xlane.f32.xlu0 %v611_v53  ;;  %v6448_v53 = vpack.i.bf16 %v803_v38, %v804_v37 }
 0x3b9   :  { %5650 = vrot.lane.b32.xlu1 %v5644_v18, %s6214_s23 }
 0x3bc   :  { %618 = vrot.lane.b32.xlu0 %v6337_v26, %s6220_s9 }
 0x3c4   :  { %5655 = vrot.lane.b32.xlu0 %v6279_v2, %s6221_s10 }
 0x402   :  { %v326_v54 = vpop.xlane.xlu2 %325 }
 0x403   :  { %5965 = vrcp.f32 %v326_v54 }
 0x409   :  { %v5966_v55 = vpop.eup %5965 }
 0x40a   :  { %v329_v56 = vpop.xlane.xlu1 %328  ;;  %v332_v57 = vmul.f32 %v5966_v55, %v5954_v27  ;;  %v645_v2 = vpop.permute.xlu2 %644 }
 0x40b   :  { %5967 = vrcp.f32 %v329_v56  ;;  %v469_v59 = vpop.xlane.xlu0 %468 }
 0x40c   :  { %5309 = vmatmul.msk.f32.vlgmr.msrb.gmra.mxu0 %vm134_vm1, %v332_v57  ;;  %5969 = vrcp.f32 %v469_v59 }
 0x411   :  { %v5968_v58 = vpop.eup %5967 }
 0x412   :  { %v333_v60 = vmul.f32 %v5968_v58, %v5956_v36  ;;  %v5970_v62 = vpop.eup %5969 }
 0x413   :  { %v610_v34 = vpop.xlane.xlu0 %609  ;;  %v472_v61 = vpop.xlane.xlu1 %471  ;;  %v475_v6 = vmul.f32 %v5970_v62, %v5958_v39  ;;  %v802_v39 = vld [vmem:[%s7700_s4 + $0x18] sm:$0xff] }
 0x414   :  { %5310 = vmatmul.msk.f32.vlgmr.msrb.gmra.mxu1 %vm134_vm1, %v333_v60  ;;  %5971 = vrcp.f32 %v472_v61  ;;  %827 = vmatpush.msrb.mxu3 %v802_v39  ;;  %v6452_v54 = vpack.i.bf16 %v801_v41, %v802_v39  ;;  %v34_v39 = vld [vmem:[%s7698_s2] sm:$0xff] }
 0x415   :  { %5973 = vrcp.f32 %v610_v34 }
 0x416   :  { %828 = vmatpush.msrb.mxu3 %v801_v41 }
 0x41a   :  { %v5972_v63 = vpop.eup %5971 }
 0x41b   :  { %v613_v26 = vpop.xlane.xlu0 %612  ;;  %v476_v7 = vmul.f32 %v5972_v63, %v5962_v49  ;;  %v5974_v12 = vpop.eup %5973 }
 0x41c   :  { %5975 = vrcp.f32 %v613_v26  ;;  %v616_v14 = vmul.f32 %v5974_v12, %v5960_v47 }
 0x422   :  { %v5976_v13 = vpop.eup %5975 }
 0x423   :  { %v617_v15 = vmul.f32 %v5976_v13, %v5964_v52 }
 0x42b   :  { %v5651_v0 = vpop.permute.xlu1 %5650 }
 0x42c   :  { %v5653_v1 = vunpack.i.h.bf16 %v5651_v0  ;;  %v5652_v5 = vunpack.i.l.bf16 %v5651_v0 }
 0x42e   :  { %498 = vmatpush.msra.mxu0 %v5652_v5  ;;  %524 = vmatpush.msra.mxu1 %v5653_v1  ;;  %v619_v11 = vpop.permute.xlu0 %618 }
 0x42f   :  { %5315 = vmatmul.msk.f32.vlgmr.msra.gmra.mxu0 %vm134_vm1, %v475_v6  ;;  %5316 = vmatmul.msk.f32.vlgmr.msra.gmra.mxu1 %vm134_vm1, %v476_v7 }
 0x430   :  { %639 = vmatpush.msrb.mxu0 %v619_v11  ;;  %665 = vmatpush.msrb.mxu1 %v645_v2 }
 0x436   :  { %v5656_v23 = vpop.permute.xlu0 %5655 }
 0x437   :  { %5321 = vmatmul.msk.f32.vlgmr.msrb.gmra.mxu0 %vm134_vm1, %v616_v14  ;;  %5322 = vmatmul.msk.f32.vlgmr.msrb.gmra.mxu1 %vm134_vm1, %v617_v15  ;;  %v5658_v24 = vunpack.i.h.bf16 %v5656_v23  ;;  %v5657_v25 = vunpack.i.l.bf16 %v5656_v23 }
 0x439   :  { %723 = vmatpush.msrb.mxu2 %v5657_v25 }
 0x43b   :  { %724 = vmatpush.msrb.mxu2 %v5658_v24  ;;  %v5902_v24 = vld [vmem:[%s7702_s6 + $0x9] ss:$0 sm:$0xff] }
 0x489   :  { %v358_v16 = vpop.f32.mrf.mxu0 }
 0x48a   :  { %390 = vrot.lane.b32.xlu2 %v358_v16, %s6222_s11 }
 0x491   :  { %v385_v17 = vpop.f32.mrf.mxu1 }
 0x4ac   :  { %v500_v18 = vpop.f32.mrf.mxu0  ;;  %v526_v19 = vpop.f32.mrf.mxu1 }
 0x4ad   :  { %533 = vrot.lane.b32.xlu0 %v526_v19, %s6223_s12  ;;  %531 = vrot.lane.b32.xlu1 %v500_v18, %s6223_s12 }
 0x4b4   :  { %v641_v20 = vpop.f32.mrf.mxu0  ;;  %v667_v21 = vpop.f32.mrf.mxu1 }
 0x4b5   :  { %5660 = vrot.lane.b32.xlu1 %v6301_v8, %s6221_s10  ;;  %672 = vrot.lane.b32.xlu2 %v641_v20, %s6224_s13 }
 0x4bd   :  { %674 = vrot.lane.b32.xlu1 %v667_v21, %s6224_s13  ;;  %392 = vrot.lane.b32.xlu2 %v385_v17, %s6222_s11 }
 0x4e4   :  { %v391_v22 = vpop.permute.xlu2 %390 }
 0x4e5   :  { %397 = vst.msk [vmem:[#allocation2] sm:$0xff] %vm396_vm2, %v391_v22 }
 0x50f   :  { %v673_v27 = vpop.permute.xlu2 %672 }
 0x517   :  { %v393_v28 = vpop.permute.xlu2 %392 }
 0x518   :  { %398 = vst.msk [vmem:[#allocation2 + $0x8] sm:$0xff] %vm396_vm2, %v393_v28 }
 0x51f   :  { %v532_v8 = vpop.permute.xlu1 %531  ;;  %v534_v29 = vpop.permute.xlu0 %533 }
 0x520   :  { %538 = vst.msk [vmem:[#allocation2] sm:$0xff] %vm537_vm3, %v532_v8 }
 0x521   :  { %679 = vst.msk [vmem:[#allocation2] sm:$0xff] %vm678_vm4, %v673_v27 }
 0x522   :  { %539 = vst.msk [vmem:[#allocation2 + $0x8] sm:$0xff] %vm537_vm3, %v534_v29  ;;  %v5903_v29 = vld [vmem:[%s7702_s6 + $0xa] ss:$0 sm:$0xff] }
 0x527   :  { %v5661_v30 = vpop.permute.xlu1 %5660 }
 0x528   :  { %v5662_v31 = vunpack.i.l.bf16 %v5661_v30  ;;  %v5663_v32 = vunpack.i.h.bf16 %v5661_v30  ;;  %v681_v33 = vld [vmem:[#allocation2] sm:$0xff] }
 0x52a   :  { %725 = vmatpush.msrb.mxu2 %v5662_v31 }
 0x52c   :  { %726 = vmatpush.msrb.mxu2 %v5663_v32 }
 0x52d   :  { %5323 = vmatmul.msk.f32.vlgmr.msrb.gmra.mxu2 %vm54_vm0, %v681_v33 }
 0x52f   :  { %v675_v35 = vpop.permute.xlu1 %674 }
 0x530   :  { %680 = vst.msk [vmem:[#allocation2 + $0x8] sm:$0xff] %vm678_vm4, %v675_v35 }
 0x537   :  { %v682_v36 = vld [vmem:[#allocation2 + $0x8] sm:$0xff] }
 0x538   :  { %5324 = vmatmul.msk.f32.gmra.mxu2 %vm54_vm0, %v682_v36 }
 0x5b0   :  { %v728_v42 = vpop.f32.mrf.mxu2 }
 0x5b1   :  { %v729_v43 = vadd.f32 %v5901_v40, %v728_v42 }
 0x5b3   :  { %v6433_v44 = vadd.f32 %v729_v43, %v6284_v3 }
 0x5b5   :  { %v738_v45 = vsel %vm54_vm0, %v6433_v44, 0.0  ;;  %v753_v46 = vmul.f32 %v6433_v44, %v6433_v44 }
 0x5b6   :  { %739 = vadd.xlane.f32.xlu2 %v738_v45 }
 0x5b7   :  { %v755_v47 = vsel %vm54_vm0, %v753_v46, 0.0 }
 0x5b8   :  { %756 = vadd.xlane.f32.xlu0 %v755_v47 }
 0x5bb   :  { %v731_v48 = vpop.f32.mrf.mxu2 }
 0x5bc   :  { %v732_v49 = vadd.f32 %v5901_v40, %v731_v48  ;;  %v38_v40 = vld [vmem:[%s7699_s3] sm:$0xff] }
 0x5bd   :  { %v6485_v47 = vadd.f32 %v38_v40, %v34_v39 }
 0x5be   :  { %v6441_v50 = vadd.f32 %v732_v49, %v6306_v9  ;;  %v6225_v9 = vmov 32.0  }
 0x5bf   :  { %5977 = vrcp.f32 %v6225_v9 }
 0x5c0   :  { %v741_v51 = vsel %vm54_vm0, %v6441_v50, 0.0  ;;  %v754_v3 = vmul.f32 %v6441_v50, %v6441_v50 }
 0x5c1   :  { %742 = vadd.xlane.f32.xlu1 %v741_v51 }
 0x5c2   :  { %v758_v52 = vsel %vm54_vm0, %v754_v3, 0.0 }
 0x5c3   :  { %759 = vadd.xlane.f32.xlu2 %v758_v52 }
 0x5c5   :  { %v5978_v55 = vpop.eup %5977 }
 0x5c6   :  { %v745_v56 = vmul.f32 32.0, %v5978_v55  ;;  %vm749_vm5 = vweird.f32 %v5978_v55 }
 0x5c8   :  { %v746_v57 = vsub.f32 1.0, %v745_v56 }
 0x5ca   :  { %v747_v58 = vmul.f32 %v5978_v55, %v746_v57 }
 0x5cc   :  { %5665 = vrot.lane.b32.xlu0 %v6448_v53, %s6216_s25  ;;  %v748_v59 = vadd.f32 %v5978_v55, %v747_v58  ;;  %v36_v58 = vld [vmem:[%s7698_s2 + $0x10] sm:$0xff] }
 0x5ce   :  { %v6460_v60 = vsel %vm749_vm5, %v5978_v55, %v748_v59  ;;  %v39_v55 = vld [vmem:[%s7699_s3 + $0x8] sm:$0xff]  ;;  %v40_v59 = vld [vmem:[%s7699_s3 + $0x10] sm:$0xff] }
 0x5d4   :  { %5680 = vrot.lane.b32.xlu0 %v6452_v54, %s6213_s17 }
 0x5da   :  { %5670 = vrot.lane.b32.xlu1 %v6452_v54, %s6216_s25 }
 0x5db   :  { %5675 = vrot.lane.b32.xlu2 %v6448_v53, %s6213_s17 }
 0x629   :  { %v740_v34 = vpop.xlane.xlu2 %739 }
 0x62a   :  { %v751_v61 = vmul.f32 %v6460_v60, %v740_v34  ;;  %v6512_v34 = vadd.f32 %v40_v59, %v36_v58 }
 0x62b   :  { %v757_v26 = vpop.xlane.xlu0 %756 }
 0x62c   :  { %v765_v62 = vmul.f32 %v751_v61, %v751_v61  ;;  %v761_v63 = vmul.f32 %v757_v26, %v6460_v60  ;;  %v763_v23 = vsub.f32 %v6433_v44, %v751_v61  ;;  %v41_v61 = vld [vmem:[%s7699_s3 + $0x18] sm:$0xff] }
 0x62e   :  { %v767_v0 = vsub.f32 %v761_v63, %v765_v62  ;;  %v5905_v63 = vld [vmem:[%s7702_s6 + $0x4] ss:$0 sm:$0xff] }
 0x630   :  { %v769_v1 = vadd.f32 1e-05, %v767_v0 }
 0x632   :  { %5979 = vrsqrt.f32 %v769_v1  ;;  %vm777_vm7 = vweird.f32 %v769_v1 }
 0x634   :  { %v743_v5 = vpop.xlane.xlu1 %742 }
 0x635   :  { %v752_v6 = vmul.f32 %v6460_v60, %v743_v5 }
 0x636   :  { %v760_v7 = vpop.xlane.xlu2 %759 }
 0x637   :  { %v766_v11 = vmul.f32 %v752_v6, %v752_v6  ;;  %v762_v2 = vmul.f32 %v760_v7, %v6460_v60  ;;  %v764_v45 = vsub.f32 %v6441_v50, %v752_v6  ;;  %v35_v50 = vld [vmem:[%s7698_s2 + $0x8] sm:$0xff]  ;;  %v5904_v6 = vld [vmem:[%s7702_s6 + $0x3] ss:$0 sm:$0xff] }
 0x638   :  { %v5980_v12 = vpop.eup %5979  ;;  %v6500_v57 = vadd.f32 %v39_v55, %v35_v50 }
 0x639   :  { %v772_v13 = vmul.f32 %v5980_v12, %v769_v1  ;;  %v768_v14 = vsub.f32 %v762_v2, %v766_v11  ;;  %vm778_vm6 = vweird.f32 %v5980_v12 }
 0x63a   :  { %vm779_vm8 = vmor %vm777_vm7, %vm778_vm6 }
 0x63b   :  { %v773_v15 = vmul.f32 %v5980_v12, %v772_v13  ;;  %v770_v16 = vadd.f32 1e-05, %v768_v14  ;;  %v5906_v13 = vld [vmem:[%s7702_s6 + $0x5] ss:$0 sm:$0xff] }
 0x63d   :  { %v774_v17 = vmul.f32 0.5, %v773_v15  ;;  %5981 = vrsqrt.f32 %v770_v16  ;;  %vm787_vm10 = vweird.f32 %v770_v16 }
 0x63e   :  { %v5666_v18 = vpop.permute.xlu0 %5665  ;;  %v5676_v37 = vpop.permute.xlu2 %5675 }
 0x63f   :  { %v775_v19 = vsub.f32 1.5, %v774_v17  ;;  %v5668_v20 = vunpack.i.h.bf16 %v5666_v18  ;;  %v5667_v21 = vunpack.i.l.bf16 %v5666_v18  ;;  %v5678_v41 = vunpack.i.h.bf16 %v5676_v37 }
 0x640   :  { %v5677_v42 = vunpack.i.l.bf16 %v5676_v37 }
 0x641   :  { %v776_v22 = vmul.f32 %v5980_v12, %v775_v19  ;;  %878 = vmatpush.msra.mxu0 %v5667_v21 }
 0x642   :  { %933 = vmatpush.msra.mxu1 %v5677_v42 }
 0x643   :  { %v5982_v25 = vpop.eup %5981  ;;  %v780_v27 = vsel %vm779_vm8, %v5980_v12, %v776_v22  ;;  %879 = vmatpush.msra.mxu0 %v5668_v20  ;;  %vm1703_vm8 = vcmask 523264  }
 0x644   :  { %v791_v28 = vmul.f32 %v780_v27, %v763_v23  ;;  %v782_v8 = vmul.f32 %v5982_v25, %v770_v16  ;;  %vm788_vm9 = vweird.f32 %v5982_v25  ;;  %934 = vmatpush.msra.mxu1 %v5678_v41 }
 0x645   :  { %vm789_vm11 = vmor %vm787_vm10, %vm788_vm9 }
 0x646   :  { %v794_v30 = vmul.f32 %v5902_v24, %v791_v28  ;;  %v783_v31 = vmul.f32 %v5982_v25, %v782_v8  ;;  %v5681_v38 = vpop.permute.xlu0 %5680 }
 0x647   :  { %v5682_v46 = vunpack.i.l.bf16 %v5681_v38  ;;  %v5683_v3 = vunpack.i.h.bf16 %v5681_v38 }
 0x648   :  { %v784_v32 = vmul.f32 0.5, %v783_v31  ;;  %v6473_v33 = vadd.f32 %v5903_v29, %v794_v30 }
 0x649   :  { %935 = vmatpush.msra.mxu1 %v5682_v46 }
 0x64a   :  { %v785_v35 = vsub.f32 1.5, %v784_v32  ;;  %v799_v36 = vadd.f32 %v6473_v33, %v6289_v4 }
 0x64b   :  { %936 = vmatpush.msra.mxu1 %v5683_v3 }
 0x64c   :  { %v786_v43 = vmul.f32 %v5982_v25, %v785_v35  ;;  %v5671_v44 = vpop.permute.xlu1 %5670  ;;  %5325 = vmatmul.msk.f32.vlgmr.msrb.gmra.mxu3 %vm54_vm0, %v799_v36  ;;  %5331 = vmatmul.msk.f32.vlgmr.msra.gmra.mxu1 %vm54_vm0, %v34_v39 }
 0x64d   :  { %v5672_v4 = vunpack.i.l.bf16 %v5671_v44  ;;  %v5673_v49 = vunpack.i.h.bf16 %v5671_v44 }
 0x64e   :  { %v790_v48 = vsel %vm789_vm11, %v5982_v25, %v786_v43 }
 0x64f   :  { %880 = vmatpush.msra.mxu0 %v5672_v4  ;;  %v792_v51 = vmul.f32 %v790_v48, %v764_v45 }
 0x651   :  { %881 = vmatpush.msra.mxu0 %v5673_v49  ;;  %v795_v52 = vmul.f32 %v5902_v24, %v792_v51 }
 0x652   :  { %5327 = vmatmul.msk.f32.vlgmr.msra.gmra.mxu0 %vm54_vm0, %v6485_v47 }
 0x653   :  { %v6489_v9 = vadd.f32 %v5903_v29, %v795_v52 }
 0x654   :  { %5332 = vmatmul.msk.f32.gmra.mxu1 %vm54_vm0, %v35_v50 }
 0x655   :  { %v800_v56 = vadd.f32 %v6489_v9, %v6311_v10  ;;  %v37_v10 = vld [vmem:[%s7698_s2 + $0x18] sm:$0xff] }
 0x656   :  { %v6523_v26 = vadd.f32 %v41_v61, %v37_v10 }
 0x657   :  { %5326 = vmatmul.msk.f32.gmra.mxu3 %vm54_vm0, %v800_v56 }
 0x65a   :  { %5328 = vmatmul.msk.f32.gmra.mxu0 %vm54_vm0, %v6500_v57 }
 0x65c   :  { %5333 = vmatmul.msk.f32.gmra.mxu1 %vm54_vm0, %v36_v58 }
 0x662   :  { %5329 = vmatmul.msk.f32.gmra.mxu0 %vm54_vm0, %v6512_v34 }
 0x664   :  { %5334 = vmatmul.msk.f32.gmra.mxu1 %vm54_vm0, %v37_v10 }
 0x66a   :  { %5330 = vmatmul.msk.f32.gmra.mxu0 %vm54_vm0, %v6523_v26 }
 0x6c9   :  { %v938_v5 = vpop.f32.mrf.mxu1 }
 0x6ca   :  { %v6542_v15 = vadd.f32 %v5906_v13, %v938_v5 }
 0x6cf   :  { %v883_v62 = vpop.f32.mrf.mxu0  ;;  %v830_v7 = vpop.f32.mrf.mxu3 }
 0x6d0   :  { %v884_v11 = vadd.f32 %v5905_v63, %v883_v62  ;;  %v831_v2 = vadd.f32 %v5904_v6, %v830_v7 }
 0x6d1   :  { %v941_v14 = vpop.f32.mrf.mxu1 }
 0x6d2   :  { %v6544_v16 = vadd.f32 %v5906_v13, %v941_v14 }
 0x6d7   :  { %v886_v0 = vpop.f32.mrf.mxu0 }
 0x6d8   :  { %v887_v1 = vadd.f32 %v5905_v63, %v886_v0 }
 0x6d9   :  { %v944_v28 = vpop.f32.mrf.mxu1 }
 0x6da   :  { %5335 = vmatpush.xpose.msk.msra.mxu2 %vm134_vm1, %v887_v1  ;;  %1083 = vrot.lane.b32.xlu2 %v887_v1, %s6217_s26  ;;  %v833_v20 = vpop.f32.mrf.mxu3  ;;  %v6568_v32 = vadd.f32 %v5906_v13, %v944_v28 }
 0x6db   :  { %v834_v21 = vadd.f32 %v5904_v6, %v833_v20 }
 0x6de   :  { %5336 = vmatpush.xpose.msk.msra.mxu2 %vm134_vm1, %v884_v11 }
 0x6df   :  { %v889_v12 = vpop.f32.mrf.mxu0 }
 0x6e0   :  { %v890_v19 = vadd.f32 %v5905_v63, %v889_v12 }
 0x6e1   :  { %5337 = vmatmul.msk.f32.vlgmr.msra.gmra.mxu2 %vm134_vm1, %v831_v2  ;;  %v947_v31 = vpop.f32.mrf.mxu1 }
 0x6e2   :  { %1241 = vrot.lane.b32.xlu2 %v887_v1, %s6214_s23  ;;  %1048 = vmatpush.msrb.mxu2 %v6544_v16  ;;  %v6570_v35 = vadd.f32 %v5906_v13, %v947_v31 }
 0x6e4   :  { %1049 = vmatpush.msrb.mxu2 %v6542_v15 }
 0x6e7   :  { %v892_v17 = vpop.f32.mrf.mxu0 }
 0x6e8   :  { %v893_v18 = vadd.f32 %v5905_v63, %v892_v17 }
 0x6ea   :  { %5338 = vmatpush.xpose.msk.msra.mxu3 %vm134_vm1, %v893_v18  ;;  %1239 = vrot.lane.b32.xlu2 %v884_v11, %s6214_s23 }
 0x6ee   :  { %5339 = vmatpush.xpose.msk.msra.mxu3 %vm134_vm1, %v890_v19 }
 0x6f1   :  { %5340 = vmatmul.msk.f32.vlgmr.msra.gmra.mxu3 %vm134_vm1, %v834_v21 }
 0x6f2   :  { %1273 = vrot.lane.b32.xlu2 %v893_v18, %s6214_s23  ;;  %1071 = vmatpush.msrb.mxu3 %v6570_v35 }
 0x6f4   :  { %1072 = vmatpush.msrb.mxu3 %v6568_v32 }
 0x6fa   :  { %1393 = vrot.lane.b32.xlu2 %v884_v11, %s6220_s9 }
 0x734   :  { %v1084_v22 = vpop.permute.xlu2 %1083 }
 0x735   :  { %5343 = vmatpush.xpose.msk.msra.mxu2 %vm134_vm1, %v1084_v22 }
 0x73c   :  { %v1242_v4 = vpop.permute.xlu2 %1241 }
 0x744   :  { %v1240_v46 = vpop.permute.xlu2 %1239 }
 0x74c   :  { %v1274_v49 = vpop.permute.xlu2 %1273 }
 0x754   :  { %v1394_v3 = vpop.permute.xlu2 %1393 }
 0x764   :  { %v976_v23 = vpop.f32.mrf.mxu2 }
 0x765   :  { %v1009_v24 = vsel %vm1008_vm12, %v976_v23, -inf }
 0x766   :  { %1010 = vmax.xlane.f32.xlu1 %v1009_v24 }
 0x774   :  { %v1005_v25 = vpop.f32.mrf.mxu3 }
 0x775   :  { %v1012_v27 = vsel %vm1008_vm12, %v1005_v25, -inf }
 0x776   :  { %1013 = vmax.xlane.f32.xlu0 %v1012_v27  ;;  %v5689_v27 = vpack.i.bf16 %v6568_v32, %v6570_v35 }
 0x77f   :  { %1079 = vrot.lane.b32.xlu1 %v831_v2, %s6217_s26 }
 0x787   :  { %1111 = vrot.lane.b32.xlu1 %v834_v21, %s6217_s26 }
 0x78a   :  { %1081 = vrot.lane.b32.xlu0 %v884_v11, %s6217_s26 }
 0x78f   :  { %1395 = vrot.lane.b32.xlu1 %v887_v1, %s6220_s9 }
 0x792   :  { %1115 = vrot.lane.b32.xlu0 %v893_v18, %s6217_s26 }
 0x797   :  { %1269 = vrot.lane.b32.xlu1 %v834_v21, %s6214_s23 }
 0x79a   :  { %1113 = vrot.lane.b32.xlu0 %v890_v19, %s6217_s26 }
 0x7a2   :  { %1237 = vrot.lane.b32.xlu0 %v831_v2, %s6214_s23 }
 0x7aa   :  { %1271 = vrot.lane.b32.xlu0 %v890_v19, %s6214_s23 }
 0x7b2   :  { %1391 = vrot.lane.b32.xlu0 %v831_v2, %s6220_s9 }
 0x7ba   :  { %1423 = vrot.lane.b32.xlu0 %v834_v21, %s6220_s9 }
 0x7d9   :  { %v1011_v8 = vpop.xlane.xlu1 %1010 }
 0x7da   :  { %v1015_v29 = vsub.f32 %v976_v23, %v1011_v8 }
 0x7dc   :  { %v1017_v30 = vmul.f32 1.442695, %v1015_v29 }
 0x7de   :  { %5983 = vpow2.f32 %v1017_v30 }
 0x7e4   :  { %v5984_v36 = vpop.eup %5983 }
 0x7e5   :  { %v1021_v37 = vsel %vm1008_vm12, %v5984_v36, 0.0 }
 0x7e6   :  { %1022 = vadd.xlane.f32.xlu2 %v1021_v37 }
 0x7e9   :  { %v1014_v38 = vpop.xlane.xlu0 %1013 }
 0x7ea   :  { %v1016_v39 = vsub.f32 %v1005_v25, %v1014_v38  ;;  %v5694_v25 = vpack.i.bf16 %v6542_v15, %v6544_v16 }
 0x7ec   :  { %v1019_v40 = vmul.f32 1.442695, %v1016_v39 }
 0x7ee   :  { %5985 = vpow2.f32 %v1019_v40 }
 0x7f1   :  { %v1080_v48 = vpop.permute.xlu1 %1079 }
 0x7f4   :  { %v5986_v41 = vpop.eup %5985 }
 0x7f5   :  { %v1024_v42 = vsel %vm1008_vm12, %v5986_v41, 0.0 }
 0x7f6   :  { %1025 = vadd.xlane.f32.xlu1 %v1024_v42 }
 0x7f9   :  { %v1112_v51 = vpop.permute.xlu1 %1111 }
 0x7fc   :  { %v1082_v43 = vpop.permute.xlu0 %1081 }
 0x7fd   :  { %5344 = vmatpush.xpose.msk.msra.mxu2 %vm134_vm1, %v1082_v43 }
 0x7fe   :  { %1427 = vrot.lane.b32.xlu2 %v893_v18, %s6220_s9 }
 0x801   :  { %v1396_v52 = vpop.permute.xlu1 %1395 }
 0x804   :  { %v1116_v44 = vpop.permute.xlu0 %1115 }
 0x805   :  { %5346 = vmatpush.xpose.msk.msra.mxu3 %vm134_vm1, %v1116_v44 }
 0x809   :  { %v1270_v56 = vpop.permute.xlu1 %1269 }
 0x80c   :  { %v1114_v45 = vpop.permute.xlu0 %1113 }
 0x80d   :  { %5347 = vmatpush.xpose.msk.msra.mxu3 %vm134_vm1, %v1114_v45 }
 0x80f   :  { %1425 = vrot.lane.b32.xlu1 %v890_v19, %s6220_s9 }
 0x814   :  { %v1238_v59 = vpop.permute.xlu0 %1237 }
 0x81c   :  { %v1272_v62 = vpop.permute.xlu0 %1271 }
 0x824   :  { %v1392_v0 = vpop.permute.xlu0 %1391 }
 0x82c   :  { %v1424_v6 = vpop.permute.xlu0 %1423 }
 0x859   :  { %v1023_v50 = vpop.xlane.xlu2 %1022 }
 0x85a   :  { %5987 = vrcp.f32 %v1023_v50 }
 0x860   :  { %v5988_v55 = vpop.eup %5987 }
 0x861   :  { %v1029_v58 = vmul.f32 %v5988_v55, %v5984_v36  ;;  %v1428_v1 = vpop.permute.xlu2 %1427 }
 0x863   :  { %5341 = vmatmul.msk.f32.vlgmr.msrb.gmra.mxu2 %vm1008_vm12, %v1029_v58 }
 0x864   :  { %5351 = vmatpush.xpose.msk.msrb.mxu2 %vm134_vm1, %v1242_v4 }
 0x868   :  { %5352 = vmatpush.xpose.msk.msrb.mxu2 %vm134_vm1, %v1240_v46 }
 0x869   :  { %v1026_v10 = vpop.xlane.xlu1 %1025 }
 0x86a   :  { %5989 = vrcp.f32 %v1026_v10 }
 0x86b   :  { %5345 = vmatmul.msk.f32.vlgmr.msra.gmra.mxu2 %vm134_vm1, %v1080_v48 }
 0x86c   :  { %5359 = vmatpush.xpose.msk.msra.mxu2 %vm134_vm1, %v1396_v52 }
 0x870   :  { %v5990_v61 = vpop.eup %5989  ;;  %5360 = vmatpush.xpose.msk.msra.mxu2 %vm134_vm1, %v1394_v3 }
 0x871   :  { %v1030_v63 = vmul.f32 %v5990_v61, %v5986_v41 }
 0x873   :  { %5342 = vmatmul.msk.f32.vlgmr.msrb.gmra.mxu3 %vm1008_vm12, %v1030_v63  ;;  %5353 = vmatmul.msk.f32.vlgmr.msrb.gmra.mxu2 %vm134_vm1, %v1238_v59 }
 0x874   :  { %5354 = vmatpush.xpose.msk.msrb.mxu3 %vm134_vm1, %v1274_v49 }
 0x878   :  { %5355 = vmatpush.xpose.msk.msrb.mxu3 %vm134_vm1, %v1272_v62 }
 0x87b   :  { %5348 = vmatmul.msk.f32.vlgmr.msra.gmra.mxu3 %vm134_vm1, %v1112_v51  ;;  %5361 = vmatmul.msk.f32.vlgmr.msra.gmra.mxu2 %vm134_vm1, %v1392_v0 }
 0x87c   :  { %5362 = vmatpush.xpose.msk.msra.mxu3 %vm134_vm1, %v1428_v1 }
 0x881   :  { %v1426_v5 = vpop.permute.xlu1 %1425 }
 0x882   :  { %5363 = vmatpush.xpose.msk.msra.mxu3 %vm134_vm1, %v1426_v5 }
 0x883   :  { %5356 = vmatmul.msk.f32.vlgmr.msrb.gmra.mxu3 %vm134_vm1, %v1270_v56 }
 0x88b   :  { %5364 = vmatmul.msk.f32.vlgmr.msra.gmra.mxu3 %vm134_vm1, %v1424_v6 }
 0x8e6   :  { %v1051_v7 = vpop.f32.mrf.mxu2 }
 0x8e7   :  { %1077 = vst.msk [vmem:[#allocation2] sm:$0xff] %vm134_vm1, %v1051_v7 }
 0x8ee   :  { %v1108_v11 = vpop.f32.mrf.mxu2 }
 0x8ef   :  { %v1143_v2 = vsel %vm1008_vm12, %v1108_v11, -inf }
 0x8f0   :  { %1144 = vmax.xlane.f32.xlu2 %v1143_v2 }
 0x8f6   :  { %v1074_v12 = vpop.f32.mrf.mxu3  ;;  %v1266_v13 = vpop.f32.mrf.mxu2 }
 0x8f7   :  { %1078 = vst.msk [vmem:[#allocation2 + $0x8] sm:$0xff] %vm134_vm1, %v1074_v12  ;;  %v1301_v14 = vsel %vm1008_vm12, %v1266_v13, -inf }
 0x8f8   :  { %1302 = vmax.xlane.f32.xlu0 %v1301_v14 }
 0x8fe   :  { %v1140_v17 = vpop.f32.mrf.mxu3  ;;  %v1420_v19 = vpop.f32.mrf.mxu2 }
 0x8ff   :  { %v1146_v18 = vsel %vm1008_vm12, %v1140_v17, -inf  ;;  %v1455_v21 = vsel %vm1008_vm12, %v1420_v19, -inf }
 0x900   :  { %1147 = vmax.xlane.f32.xlu1 %v1146_v18 }
 0x906   :  { %v1298_v20 = vpop.f32.mrf.mxu3 }
 0x907   :  { %v1304_v22 = vsel %vm1008_vm12, %v1298_v20, -inf }
 0x908   :  { %1456 = vmax.xlane.f32.xlu1 %v1455_v21  ;;  %1305 = vmax.xlane.f32.xlu2 %v1304_v22 }
 0x90e   :  { %v6604_v23 = vpop.f32.mrf.mxu3 }
 0x90f   :  { %v1458_v24 = vsel %vm1008_vm12, %v6604_v23, -inf }
 0x910   :  { %1459 = vmax.xlane.f32.xlu0 %v1458_v24 }
 0x920   :  { %5695 = vrot.lane.b32.xlu2 %v5694_v25, %s6214_s23 }
 0x921   :  { %5685 = vrot.lane.b32.xlu1 %v5694_v25, %s6217_s26 }
 0x924   :  { %5690 = vrot.lane.b32.xlu0 %v5689_v27, %s6217_s26 }
 0x963   :  { %v1145_v28 = vpop.xlane.xlu2 %1144 }
 0x964   :  { %v1149_v8 = vsub.f32 %v1108_v11, %v1145_v28 }
 0x966   :  { %v1151_v29 = vmul.f32 1.442695, %v1149_v8 }
 0x968   :  { %5991 = vpow2.f32 %v1151_v29 }
 0x96b   :  { %v1303_v30 = vpop.xlane.xlu0 %1302 }
 0x96c   :  { %v1307_v31 = vsub.f32 %v1266_v13, %v1303_v30 }
 0x96e   :  { %v5992_v36 = vpop.eup %5991  ;;  %v1309_v37 = vmul.f32 1.442695, %v1307_v31 }
 0x96f   :  { %v1155_v38 = vsel %vm1008_vm12, %v5992_v36, 0.0 }
 0x970   :  { %5993 = vpow2.f32 %v1309_v37  ;;  %1156 = vadd.xlane.f32.xlu2 %v1155_v38 }
 0x973   :  { %v1148_v15 = vpop.xlane.xlu1 %1147 }
 0x974   :  { %v1150_v16 = vsub.f32 %v1140_v17, %v1148_v15 }
 0x976   :  { %v5994_v39 = vpop.eup %5993  ;;  %v1153_v40 = vmul.f32 1.442695, %v1150_v16 }
 0x977   :  { %v1313_v32 = vsel %vm1008_vm12, %v5994_v39, 0.0 }
 0x978   :  { %5995 = vpow2.f32 %v1153_v40  ;;  %1314 = vadd.xlane.f32.xlu2 %v1313_v32 }
 0x97b   :  { %v1457_v35 = vpop.xlane.xlu1 %1456  ;;  %v1306_v41 = vpop.xlane.xlu2 %1305 }
 0x97c   :  { %v1461_v42 = vsub.f32 %v1420_v19, %v1457_v35  ;;  %v1308_v43 = vsub.f32 %v1298_v20, %v1306_v41 }
 0x97e   :  { %v5996_v44 = vpop.eup %5995  ;;  %v1463_v45 = vmul.f32 1.442695, %v1461_v42  ;;  %v1311_v4 = vmul.f32 1.442695, %v1308_v43 }
 0x97f   :  { %v1158_v46 = vsel %vm1008_vm12, %v5996_v44, 0.0 }
 0x980   :  { %5997 = vpow2.f32 %v1463_v45  ;;  %1159 = vadd.xlane.f32.xlu0 %v1158_v46 }
 0x981   :  { %5999 = vpow2.f32 %v1311_v4 }
 0x983   :  { %v1460_v52 = vpop.xlane.xlu0 %1459  ;;  %v5696_v55 = vpop.permute.xlu2 %5695 }
 0x984   :  { %v5697_v10 = vunpack.i.l.bf16 %v5696_v55  ;;  %v5698_v62 = vunpack.i.h.bf16 %v5696_v55  ;;  %v1462_v0 = vsub.f32 %v6604_v23, %v1460_v52 }
 0x986   :  { %v6618_v48 = vpop.eup %5997  ;;  %v1465_v1 = vmul.f32 1.442695, %v1462_v0 }
 0x987   :  { %v6620_v49 = vpop.eup %5999  ;;  %v1467_v51 = vsel %vm1008_vm12, %v6618_v48, 0.0 }
 0x988   :  { %1468 = vadd.xlane.f32.xlu0 %v1467_v51  ;;  %v1316_v3 = vsel %vm1008_vm12, %v6620_v49, 0.0  ;;  %6001 = vpow2.f32 %v1465_v1 }
 0x989   :  { %1317 = vadd.xlane.f32.xlu1 %v1316_v3 }
 0x98e   :  { %v6002_v5 = vpop.eup %6001 }
 0x98f   :  { %v1470_v6 = vsel %vm1008_vm12, %v6002_v5, 0.0 }
 0x990   :  { %5700 = vrot.lane.b32.xlu2 %v5689_v27, %s6214_s23 }
 0x993   :  { %v5686_v50 = vpop.permute.xlu1 %5685 }
 0x994   :  { %v5687_v56 = vunpack.i.l.bf16 %v5686_v50  ;;  %v5688_v58 = vunpack.i.h.bf16 %v5686_v50 }
 0x996   :  { %1190 = vmatpush.msrb.mxu0 %v5687_v56  ;;  %v5691_v59 = vpop.permute.xlu0 %5690 }
 0x997   :  { %v5692_v61 = vunpack.i.l.bf16 %v5691_v59  ;;  %v5693_v63 = vunpack.i.h.bf16 %v5691_v59 }
 0x998   :  { %1191 = vmatpush.msrb.mxu0 %v5688_v58  ;;  %5705 = vrot.lane.b32.xlu2 %v5694_v25, %s6220_s9  ;;  %v5907_v58 = vld [vmem:[%s7702_s6 + $0x6] ss:$0 sm:$0xff] }
 0x999   :  { %1221 = vmatpush.msrb.mxu1 %v5692_v61 }
 0x99a   :  { %1346 = vmatpush.msra.mxu0 %v5697_v10 }
 0x99b   :  { %1222 = vmatpush.msrb.mxu1 %v5693_v63 }
 0x99c   :  { %1347 = vmatpush.msra.mxu0 %v5698_v62 }
 0x9a2   :  { %5710 = vrot.lane.b32.xlu1 %v5689_v27, %s6220_s9 }
 0x9aa   :  { %5720 = vrot.lane.b32.xlu1 %v6452_v54, %s6221_s10 }
 0x9c1   :  { %1471 = vadd.xlane.f32.xlu2 %v1470_v6 }
 0x9d9   :  { %5715 = vrot.lane.b32.xlu2 %v6448_v53, %s6221_s10 }
 0x9e3   :  { %v1157_v7 = vpop.xlane.xlu2 %1156 }
 0x9e4   :  { %6003 = vrcp.f32 %v1157_v7 }
 0x9ea   :  { %v6004_v11 = vpop.eup %6003 }
 0x9eb   :  { %v1163_v2 = vmul.f32 %v6004_v11, %v5992_v36  ;;  %v1315_v12 = vpop.xlane.xlu2 %1314 }
 0x9ec   :  { %6005 = vrcp.f32 %v1315_v12  ;;  %v1658_v12 = vld [vmem:[%s7701_s5 + $0x10] sm:$0xff] }
 0x9ed   :  { %5349 = vmatmul.msk.f32.vlgmr.msrb.gmra.mxu0 %vm1008_vm12, %v1163_v2  ;;  %v1659_v2 = vld [vmem:[%s7701_s5 + $0x18] sm:$0xff] }
 0x9ee   :  { %1680 = vmatpush.msrb.mxu3 %v1659_v2 }
 0x9f0   :  { %1681 = vmatpush.msrb.mxu3 %v1658_v12 }
 0x9f2   :  { %v6006_v54 = vpop.eup %6005 }
 0x9f3   :  { %v1321_v13 = vmul.f32 %v6006_v54, %v5994_v39  ;;  %v1160_v14 = vpop.xlane.xlu0 %1159  ;;  %v5701_v17 = vpop.permute.xlu2 %5700  ;;  %v1656_v54 = vld [vmem:[%s7701_s5] sm:$0xff] }
 0x9f4   :  { %6007 = vrcp.f32 %v1160_v14  ;;  %v5702_v18 = vunpack.i.l.bf16 %v5701_v17  ;;  %v5703_v19 = vunpack.i.h.bf16 %v5701_v17 }
 0x9f5   :  { %5357 = vmatmul.msk.f32.vlgmr.msra.gmra.mxu0 %vm1008_vm12, %v1321_v13 }
 0x9f6   :  { %1375 = vmatpush.msra.mxu1 %v5702_v18 }
 0x9f8   :  { %1376 = vmatpush.msra.mxu1 %v5703_v19 }
 0x9fa   :  { %v6008_v53 = vpop.eup %6007 }
 0x9fb   :  { %v1164_v20 = vmul.f32 %v6008_v53, %v5996_v44  ;;  %v1469_v21 = vpop.xlane.xlu0 %1468  ;;  %v5706_v22 = vpop.permute.xlu2 %5705 }
 0x9fc   :  { %6009 = vrcp.f32 %v1469_v21  ;;  %v1318_v23 = vpop.xlane.xlu1 %1317  ;;  %v5707_v24 = vunpack.i.l.bf16 %v5706_v22  ;;  %v5708_v25 = vunpack.i.h.bf16 %v5706_v22 }
 0x9fd   :  { %6011 = vrcp.f32 %v1318_v23  ;;  %5350 = vmatmul.msk.f32.vlgmr.msrb.gmra.mxu1 %vm1008_vm12, %v1164_v20 }
 0x9fe   :  { %1500 = vmatpush.msrb.mxu0 %v5707_v24 }
 0xa00   :  { %1501 = vmatpush.msrb.mxu0 %v5708_v25 }
 0xa02   :  { %v6010_v27 = vpop.eup %6009 }
 0xa03   :  { %v6012_v28 = vpop.eup %6011  ;;  %v1475_v8 = vmul.f32 %v6010_v27, %v6618_v48 }
 0xa04   :  { %v1322_v29 = vmul.f32 %v6012_v28, %v6620_v49 }
 0xa05   :  { %5365 = vmatmul.msk.f32.vlgmr.msrb.gmra.mxu0 %vm1008_vm12, %v1475_v8  ;;  %v5908_v8 = vld [vmem:[%s7702_s6 + $0xb] ss:$0 sm:$0xff] }
 0xa06   :  { %5358 = vmatmul.msk.f32.vlgmr.msra.gmra.mxu1 %vm1008_vm12, %v1322_v29 }
 0xa14   :  { %v5711_v30 = vpop.permute.xlu1 %5710 }
 0xa15   :  { %v5712_v31 = vunpack.i.l.bf16 %v5711_v30  ;;  %v5713_v36 = vunpack.i.h.bf16 %v5711_v30 }
 0xa17   :  { %1529 = vmatpush.msrb.mxu1 %v5712_v31  ;;  %v5909_v31 = vld [vmem:[%s7702_s6 + $0xc] ss:$0 sm:$0xff] }
 0xa19   :  { %1530 = vmatpush.msrb.mxu1 %v5713_v36 }
 0xa1c   :  { %v5721_v45 = vpop.permute.xlu1 %5720 }
 0xa1d   :  { %v5722_v4 = vunpack.i.l.bf16 %v5721_v45  ;;  %v5723_v46 = vunpack.i.h.bf16 %v5721_v45  ;;  %v1696_v45 = vld [vmem:[%s7701_s5 + $0x38] sm:$0xff] }
 0xa34   :  { %v1472_v37 = vpop.xlane.xlu2 %1471 }
 0xa35   :  { %6013 = vrcp.f32 %v1472_v37 }
 0xa3b   :  { %v6014_v38 = vpop.eup %6013 }
 0xa3c   :  { %v1476_v15 = vmul.f32 %v6014_v38, %v6002_v5  ;;  %v5716_v42 = vpop.permute.xlu2 %5715 }
 0xa3d   :  { %v5718_v43 = vunpack.i.h.bf16 %v5716_v42  ;;  %v5717_v44 = vunpack.i.l.bf16 %v5716_v42 }
 0xa3e   :  { %5366 = vmatmul.msk.f32.vlgmr.msrb.gmra.mxu1 %vm1008_vm12, %v1476_v15 }
 0xa3f   :  { %1587 = vmatpush.msrb.mxu2 %v5717_v44 }
 0xa41   :  { %1588 = vmatpush.msrb.mxu2 %v5718_v43  ;;  %v1697_v43 = vld [vmem:[%s7701_s5 + $0x40] sm:$0xff] }
 0xa43   :  { %1589 = vmatpush.msrb.mxu2 %v5722_v4 }
 0xa45   :  { %1590 = vmatpush.msrb.mxu2 %v5723_v46 }
 0xa6a   :  { %v1193_v16 = vpop.f32.mrf.mxu0 }
 0xa6b   :  { %1229 = vrot.lane.b32.xlu0 %v1193_v16, %s6222_s11  ;;  %v1700_v16 = vld [vmem:[%s7701_s5 + $0x58] sm:$0xff] }
 0xa6c   :  { %1718 = vmatpush.msra.mxu0 %v1700_v16 }
 0xa72   :  { %v1349_v39 = vpop.f32.mrf.mxu0 }
 0xa73   :  { %1383 = vrot.lane.b32.xlu1 %v1349_v39, %s6223_s12  ;;  %v1699_v39 = vld [vmem:[%s7701_s5 + $0x50] sm:$0xff] }
 0xa74   :  { %1719 = vmatpush.msra.mxu0 %v1699_v39 }
 0xa7a   :  { %v1224_v40 = vpop.f32.mrf.mxu1 }
 0xa7b   :  { %1231 = vrot.lane.b32.xlu0 %v1224_v40, %s6222_s11 }
 0xa82   :  { %v1503_v32 = vpop.f32.mrf.mxu0 }
 0xa83   :  { %v1378_v35 = vpop.f32.mrf.mxu1  ;;  %1537 = vrot.lane.b32.xlu0 %v1503_v32, %s6224_s13 }
 0xa84   :  { %1385 = vrot.lane.b32.xlu1 %v1378_v35, %s6223_s12 }
 0xabb   :  { %v1532_v41 = vpop.f32.mrf.mxu1 }
 0xabc   :  { %1539 = vrot.lane.b32.xlu0 %v1532_v41, %s6224_s13  ;;  %v1698_v41 = vld [vmem:[%s7701_s5 + $0x48] sm:$0xff] }
 0xabd   :  { %1720 = vmatpush.msra.mxu0 %v1698_v41  ;;  %v5912_v41 = vld [vmem:[%s7702_s6 + $0xd] ss:$0 sm:$0xff] }
 0xabf   :  { %1721 = vmatpush.msra.mxu0 %v1697_v43  ;;  %v5913_v43 = vld [vmem:[%s7702_s6 + $0xe] ss:$0 sm:$0xff] }
 0xac1   :  { %1722 = vmatpush.msra.mxu0 %v1696_v45 }
 0xadd   :  { %v1230_v48 = vpop.permute.xlu0 %1229 }
 0xade   :  { %1235 = vst.msk [vmem:[#allocation2] sm:$0xff] %vm396_vm2, %v1230_v48 }
 0xae5   :  { %v1384_v49 = vpop.permute.xlu1 %1383 }
 0xae6   :  { %1389 = vst.msk [vmem:[#allocation2] sm:$0xff] %vm537_vm3, %v1384_v49 }
 0xaed   :  { %v1232_v51 = vpop.permute.xlu0 %1231 }
 0xaee   :  { %1236 = vst.msk [vmem:[#allocation2 + $0x8] sm:$0xff] %vm396_vm2, %v1232_v51 }
 0xaf5   :  { %v1538_v3 = vpop.permute.xlu0 %1537 }
 0xaf6   :  { %v1386_v52 = vpop.permute.xlu1 %1385  ;;  %1543 = vst.msk [vmem:[#allocation2] sm:$0xff] %vm678_vm4, %v1538_v3 }
 0xaf7   :  { %1390 = vst.msk [vmem:[#allocation2 + $0x8] sm:$0xff] %vm537_vm3, %v1386_v52 }
 0xafd   :  { %v1545_v50 = vld [vmem:[#allocation2] sm:$0xff] }
 0xafe   :  { %5367 = vmatmul.msk.f32.vlgmr.msrb.gmra.mxu2 %vm54_vm0, %v1545_v50 }
 0xb2e   :  { %v1540_v55 = vpop.permute.xlu0 %1539 }
 0xb2f   :  { %1544 = vst.msk [vmem:[#allocation2 + $0x8] sm:$0xff] %vm678_vm4, %v1540_v55 }
 0xb36   :  { %v1546_v56 = vld [vmem:[#allocation2 + $0x8] sm:$0xff] }
 0xb37   :  { %5368 = vmatmul.msk.f32.gmra.mxu2 %vm54_vm0, %v1546_v56 }
 0xb81   :  { %v1592_v59 = vpop.f32.mrf.mxu2 }
 0xb82   :  { %v1593_v10 = vadd.f32 %v5907_v58, %v1592_v59  ;;  %v1695_v59 = vld [vmem:[%s7701_s5 + $0x30] sm:$0xff] }
 0xb83   :  { %1723 = vmatpush.msra.mxu0 %v1695_v59 }
 0xb84   :  { %v1598_v61 = vadd.f32 %v1593_v10, %v6473_v33  ;;  %v1694_v10 = vld [vmem:[%s7701_s5 + $0x28] sm:$0xff] }
 0xb85   :  { %1724 = vmatpush.msra.mxu0 %v1694_v10 }
 0xb86   :  { %v1602_v62 = vsel %vm54_vm0, %v1598_v61, 0.0  ;;  %v1610_v63 = vmul.f32 %v1598_v61, %v1598_v61 }
 0xb87   :  { %1603 = vadd.xlane.f32.xlu1 %v1602_v62  ;;  %v5910_v62 = vld [vmem:[%s7702_s6 + $0x7] ss:$0 sm:$0xff] }
 0xb88   :  { %v1612_v0 = vsel %vm54_vm0, %v1610_v63, 0.0 }
 0xb89   :  { %1613 = vadd.xlane.f32.xlu0 %v1612_v0 }
 0xbba   :  { %v1595_v1 = vpop.f32.mrf.mxu2 }
 0xbbb   :  { %v1596_v5 = vadd.f32 %v5907_v58, %v1595_v1 }
 0xbbd   :  { %v6664_v6 = vadd.f32 %v1596_v5, %v6489_v9  ;;  %v1657_v9 = vld [vmem:[%s7701_s5 + $0x8] sm:$0xff] }
 0xbbe   :  { %1682 = vmatpush.msrb.mxu3 %v1657_v9 }
 0xbbf   :  { %v1605_v7 = vsel %vm54_vm0, %v6664_v6, 0.0  ;;  %v1611_v11 = vmul.f32 %v6664_v6, %v6664_v6 }
 0xbc0   :  { %1606 = vadd.xlane.f32.xlu2 %v1605_v7  ;;  %1683 = vmatpush.msrb.mxu3 %v1656_v54 }
 0xbc1   :  { %v1615_v33 = vsel %vm54_vm0, %v1611_v11, 0.0  ;;  %v5911_v11 = vld [vmem:[%s7702_s6 + $0x8] ss:$0 sm:$0xff] }
 0xbc2   :  { %1616 = vadd.xlane.f32.xlu1 %v1615_v33 }
 0xbfa   :  { %v1604_v13 = vpop.xlane.xlu1 %1603 }
 0xbfb   :  { %v1608_v14 = vmul.f32 %v1604_v13, %v6460_v60 }
 0xbfc   :  { %v1614_v17 = vpop.xlane.xlu0 %1613 }
 0xbfd   :  { %v1622_v18 = vmul.f32 %v1608_v14, %v1608_v14  ;;  %v1618_v19 = vmul.f32 %v1614_v17, %v6460_v60  ;;  %v1620_v28 = vsub.f32 %v1598_v61, %v1608_v14  ;;  %v1693_v61 = vld [vmem:[%s7701_s5 + $0x20] sm:$0xff]  ;;  %v5376_v14 = vld [vmem:[%s7700_s4 + $0x70] sm:$0xff] }
 0xbfe   :  { %1725 = vmatpush.msra.mxu0 %v1693_v61  ;;  %1819 = vmatpush.msra.mxu1 %v5376_v14  ;;  %v5375_v17 = vld [vmem:[%s7700_s4 + $0x60] sm:$0xff] }
 0xbff   :  { %v1624_v53 = vsub.f32 %v1618_v19, %v1622_v18  ;;  %v5374_v18 = vld [vmem:[%s7700_s4 + $0x50] sm:$0xff] }
 0xc00   :  { %1820 = vmatpush.msra.mxu1 %v5375_v17 }
 0xc01   :  { %v1626_v20 = vadd.f32 1e-05, %v1624_v53 }
 0xc02   :  { %1821 = vmatpush.msra.mxu1 %v5374_v18 }
 0xc03   :  { %6015 = vrsqrt.f32 %v1626_v20  ;;  %vm1634_vm14 = vweird.f32 %v1626_v20 }
 0xc09   :  { %v6016_v21 = vpop.eup %6015 }
 0xc0a   :  { %v1629_v22 = vmul.f32 %v6016_v21, %v1626_v20  ;;  %vm1635_vm13 = vweird.f32 %v6016_v21  ;;  %v5373_v20 = vld [vmem:[%s7700_s4 + $0x40] sm:$0xff] }
 0xc0b   :  { %vm1636_vm15 = vmor %vm1634_vm14, %vm1635_vm13  ;;  %1822 = vmatpush.msra.mxu1 %v5373_v20 }
 0xc0c   :  { %v1630_v23 = vmul.f32 %v6016_v21, %v1629_v22 }
 0xc0e   :  { %v1631_v24 = vmul.f32 0.5, %v1630_v23 }
 0xc10   :  { %v1632_v25 = vsub.f32 1.5, %v1631_v24 }
 0xc12   :  { %v1633_v27 = vmul.f32 %v6016_v21, %v1632_v25  ;;  %v6744_v25 = vpack.i.bf16 %v5373_v20, %v5374_v18 }
 0xc14   :  { %v1637_v29 = vsel %vm1636_vm15, %v6016_v21, %v1633_v27  ;;  %v6746_v27 = vpack.i.bf16 %v5375_v17, %v5376_v14  ;;  %v5914_v17 = vld [vmem:[%s7702_s6 + $0x10] ss:$0 sm:$0xff] }
 0xc15   :  { %v1648_v30 = vmul.f32 %v1637_v29, %v1620_v28 }
 0xc17   :  { %v1651_v36 = vmul.f32 %v5908_v8, %v1648_v30 }
 0xc19   :  { %v1654_v37 = vadd.f32 %v5909_v31, %v1651_v36 }
 0xc1b   :  { %5369 = vmatmul.msk.f32.vlgmr.msrb.gmra.mxu3 %vm54_vm0, %v1654_v37 }
 0xc33   :  { %v1607_v38 = vpop.xlane.xlu2 %1606 }
 0xc34   :  { %v1609_v15 = vmul.f32 %v1607_v38, %v6460_v60 }
 0xc35   :  { %v1617_v40 = vpop.xlane.xlu1 %1616 }
 0xc36   :  { %v1623_v32 = vmul.f32 %v1609_v15, %v1609_v15  ;;  %v1619_v35 = vmul.f32 %v1617_v40, %v6460_v60  ;;  %v1621_v52 = vsub.f32 %v6664_v6, %v1609_v15 }
 0xc38   :  { %v1625_v42 = vsub.f32 %v1619_v35, %v1623_v32 }
 0xc3a   :  { %v1627_v44 = vadd.f32 1e-05, %v1625_v42 }
 0xc3c   :  { %6017 = vrsqrt.f32 %v1627_v44  ;;  %vm1644_vm6 = vweird.f32 %v1627_v44 }
 0xc42   :  { %v6018_v4 = vpop.eup %6017 }
 0xc43   :  { %v1639_v46 = vmul.f32 %v6018_v4, %v1627_v44  ;;  %vm1645_vm5 = vweird.f32 %v6018_v4 }
 0xc44   :  { %vm1646_vm7 = vmor %vm1644_vm6, %vm1645_vm5 }
 0xc45   :  { %v1640_v48 = vmul.f32 %v6018_v4, %v1639_v46  ;;  %v6765_v46 = vld [vmem:[%s7697_s1] sm:$0xff] }
 0xc47   :  { %v1641_v49 = vmul.f32 0.5, %v1640_v48 }
 0xc49   :  { %v1642_v51 = vsub.f32 1.5, %v1641_v49 }
 0xc4b   :  { %v1643_v3 = vmul.f32 %v6018_v4, %v1642_v51 }
 0xc4d   :  { %v1647_v50 = vsel %vm1646_vm7, %v6018_v4, %v1643_v3 }
 0xc4e   :  { %v1649_v55 = vmul.f32 %v1647_v50, %v1621_v52 }
 0xc50   :  { %v1652_v56 = vmul.f32 %v5908_v8, %v1649_v55 }
 0xc52   :  { %v1655_v58 = vadd.f32 %v5909_v31, %v1652_v56 }
 0xc54   :  { %5370 = vmatmul.msk.f32.gmra.mxu3 %vm54_vm0, %v1655_v58 }
 0xc9e   :  { %v1685_v63 = vpop.f32.mrf.mxu3 }
 0xc9f   :  { %v1686_v0 = vadd.f32 %v5910_v62, %v1685_v63 }
 0xca1   :  { %v1691_v1 = vmax.f32 %v1686_v0, 0.0 }
 0xca3   :  { %5371 = vmatmul.msk.f32.vlgmr.msra.gmra.mxu0 %vm1703_vm8, %v1691_v1 }
 0xcd7   :  { %v1688_v5 = vpop.f32.mrf.mxu3 }
 0xcd8   :  { %v1689_v6 = vadd.f32 %v5910_v62, %v1688_v5 }
 0xcda   :  { %v1692_v7 = vmax.f32 %v1689_v6, 0.0 }
 0xcdc   :  { %5372 = vmatmul.msk.f32.gmra.mxu0 %vm1703_vm8, %v1692_v7 }
 0xd20   :  { %v1727_v33 = vpop.f32.mrf.mxu0 }
 0xd21   :  { %v1728_v2 = vadd.f32 %v5911_v11, %v1727_v33 }
 0xd23   :  { %v1733_v12 = vadd.f32 %v1728_v2, %v1654_v37 }
 0xd25   :  { %v1737_v9 = vsel %vm54_vm0, %v1733_v12, 0.0  ;;  %v1745_v54 = vmul.f32 %v1733_v12, %v1733_v12 }
 0xd26   :  { %1738 = vadd.xlane.f32.xlu0 %v1737_v9 }
 0xd27   :  { %v1747_v13 = vsel %vm54_vm0, %v1745_v54, 0.0 }
 0xd28   :  { %1748 = vadd.xlane.f32.xlu2 %v1747_v13  ;;  %v6777_v13 = vld [vmem:[%s7697_s1 + $0x8] sm:$0xff] }
 0xd59   :  { %v1730_v19 = vpop.f32.mrf.mxu0 }
 0xd5a   :  { %v1731_v53 = vadd.f32 %v5911_v11, %v1730_v19 }
 0xd5c   :  { %v1734_v21 = vadd.f32 %v1731_v53, %v1655_v58 }
 0xd5e   :  { %v1740_v22 = vsel %vm54_vm0, %v1734_v21, 0.0  ;;  %v1746_v23 = vmul.f32 %v1734_v21, %v1734_v21 }
 0xd5f   :  { %1741 = vadd.xlane.f32.xlu1 %v1740_v22  ;;  %v5915_v22 = vld [vmem:[%s7702_s6 + $0x11] ss:$0 sm:$0xff] }
 0xd60   :  { %v1750_v24 = vsel %vm54_vm0, %v1746_v23, 0.0 }
 0xd61   :  { %1751 = vadd.xlane.f32.xlu0 %v1750_v24 }
 0xd75   :  { %5730 = vrot.lane.b32.xlu0 %v6744_v25, %s6213_s17 }
 0xd78   :  { %5725 = vrot.lane.b32.xlu1 %v6746_v27, %s6213_s17 }
 0xd99   :  { %v1739_v28 = vpop.xlane.xlu0 %1738 }
 0xd9a   :  { %v1743_v8 = vmul.f32 %v1739_v28, %v6460_v60 }
 0xd9b   :  { %v1749_v29 = vpop.xlane.xlu2 %1748 }
 0xd9c   :  { %v1757_v30 = vmul.f32 %v1743_v8, %v1743_v8  ;;  %v1753_v31 = vmul.f32 %v1749_v29, %v6460_v60  ;;  %v1755_v35 = vsub.f32 %v1733_v12, %v1743_v8 }
 0xd9e   :  { %v1759_v36 = vsub.f32 %v1753_v31, %v1757_v30 }
 0xda0   :  { %v1761_v37 = vadd.f32 1e-05, %v1759_v36 }
 0xda2   :  { %6019 = vrsqrt.f32 %v1761_v37  ;;  %vm1769_vm10 = vweird.f32 %v1761_v37 }
 0xda8   :  { %v6020_v38 = vpop.eup %6019 }
 0xda9   :  { %v1764_v15 = vmul.f32 %v6020_v38, %v1761_v37  ;;  %vm1770_vm9 = vweird.f32 %v6020_v38 }
 0xdaa   :  { %vm1771_vm11 = vmor %vm1769_vm10, %vm1770_vm9 }
 0xdab   :  { %v1765_v16 = vmul.f32 %v6020_v38, %v1764_v15 }
 0xdad   :  { %v1766_v39 = vmul.f32 0.5, %v1765_v16 }
 0xdaf   :  { %v1767_v40 = vsub.f32 1.5, %v1766_v39 }
 0xdb1   :  { %v1768_v32 = vmul.f32 %v6020_v38, %v1767_v40 }
 0xdb3   :  { %v1772_v42 = vsel %vm1771_vm11, %v6020_v38, %v1768_v32 }
 0xdb4   :  { %v1783_v44 = vmul.f32 %v1772_v42, %v1755_v35 }
 0xdb6   :  { %v1786_v45 = vmul.f32 %v5912_v41, %v1783_v44 }
 0xdb8   :  { %v6760_v4 = vadd.f32 %v5913_v43, %v1786_v45 }
 0xdba   :  { %v1791_v48 = vadd.f32 %v6765_v46, %v6760_v4 }
 0xdbc   :  { %5378 = vmatmul.msk.f32.vlgmr.msra.gmra.mxu1 %vm54_vm0, %v1791_v48 }
 0xdd2   :  { %v1742_v49 = vpop.xlane.xlu1 %1741 }
 0xdd3   :  { %v1744_v51 = vmul.f32 %v1742_v49, %v6460_v60 }
 0xdd4   :  { %v1752_v3 = vpop.xlane.xlu0 %1751 }
 0xdd5   :  { %v1758_v52 = vmul.f32 %v1744_v51, %v1744_v51  ;;  %v1754_v50 = vmul.f32 %v1752_v3, %v6460_v60  ;;  %v1756_v5 = vsub.f32 %v1734_v21, %v1744_v51 }
 0xdd7   :  { %v1760_v55 = vsub.f32 %v1754_v50, %v1758_v52 }
 0xdd9   :  { %v1762_v56 = vadd.f32 1e-05, %v1760_v55 }
 0xddb   :  { %6021 = vrsqrt.f32 %v1762_v56  ;;  %vm1779_vm14 = vweird.f32 %v1762_v56 }
 0xde1   :  { %v6022_v58 = vpop.eup %6021 }
 0xde2   :  { %v1774_v59 = vmul.f32 %v6022_v58, %v1762_v56  ;;  %vm1780_vm13 = vweird.f32 %v6022_v58 }
 0xde3   :  { %vm1781_vm15 = vmor %vm1779_vm14, %vm1780_vm13 }
 0xde4   :  { %v1775_v10 = vmul.f32 %v6022_v58, %v1774_v59 }
 0xde6   :  { %v1776_v61 = vmul.f32 0.5, %v1775_v10 }
 0xde7   :  { %v5731_v1 = vpop.permute.xlu0 %5730 }
 0xde8   :  { %v1777_v62 = vsub.f32 1.5, %v1776_v61  ;;  %v5732_v2 = vunpack.i.l.bf16 %v5731_v1  ;;  %v5733_v12 = vunpack.i.h.bf16 %v5731_v1 }
 0xdea   :  { %v1778_v63 = vmul.f32 %v6022_v58, %v1777_v62  ;;  %v5726_v0 = vpop.permute.xlu1 %5725 }
 0xdeb   :  { %v5728_v6 = vunpack.i.h.bf16 %v5726_v0  ;;  %v5727_v7 = vunpack.i.l.bf16 %v5726_v0 }
 0xdec   :  { %v1782_v11 = vsel %vm1781_vm15, %v6022_v58, %v1778_v63 }
 0xded   :  { %v1784_v33 = vmul.f32 %v1782_v11, %v1756_v5  ;;  %1866 = vmatpush.msra.mxu2 %v5727_v7 }
 0xdef   :  { %1867 = vmatpush.msra.mxu2 %v5728_v6  ;;  %v1787_v9 = vmul.f32 %v5912_v41, %v1784_v33 }
 0xdf1   :  { %1868 = vmatpush.msra.mxu2 %v5732_v2  ;;  %v6772_v54 = vadd.f32 %v5913_v43, %v1787_v9 }
 0xdf3   :  { %1869 = vmatpush.msra.mxu2 %v5733_v12  ;;  %v1792_v14 = vadd.f32 %v6777_v13, %v6772_v54 }
 0xdf4   :  { %5381 = vmatmul.msk.f32.vlgmr.msra.gmra.mxu2 %vm54_vm0, %v6760_v4 }
 0xdf5   :  { %5379 = vmatmul.msk.f32.gmra.mxu1 %vm54_vm0, %v1792_v14 }
 0xdfc   :  { %5382 = vmatmul.msk.f32.gmra.mxu2 %vm54_vm0, %v6772_v54 }
 0xe39   :  { %v1824_v18 = vpop.f32.mrf.mxu1 }
 0xe3a   :  { %v1825_v19 = vadd.f32 %v5914_v17, %v1824_v18 }
 0xe3c   :  { %1878 = vrot.lane.b32.xlu2 %v1825_v19, %s6216_s25  ;;  %2003 = vrot.lane.b32.xlu0 %v1825_v19, %s6215_s24 }
 0xe3d   :  { %2001 = vrot.lane.b32.xlu1 %v1825_v19, %s6217_s26 }
 0xe44   :  { %2145 = vrot.lane.b32.xlu0 %v1825_v19, %s6218_s29 }
 0xe72   :  { %v1827_v53 = vpop.f32.mrf.mxu1 }
 0xe73   :  { %v1828_v20 = vadd.f32 %v5914_v17, %v1827_v53 }
 0xe75   :  { %2173 = vrot.lane.b32.xlu0 %v1828_v20, %s6218_s29  ;;  %2029 = vrot.lane.b32.xlu1 %v1828_v20, %s6217_s26 }
 0xe76   :  { %1905 = vrot.lane.b32.xlu2 %v1828_v20, %s6216_s25 }
 0xe77   :  { %v1871_v21 = vpop.f32.mrf.mxu2 }
 0xe78   :  { %v6808_v28 = vadd.f32 %v5915_v22, %v1871_v21 }
 0xe7d   :  { %2283 = vrot.lane.b32.xlu0 %v1825_v19, %s6220_s9  ;;  %2285 = vrot.lane.b32.xlu1 %v1825_v19, %s6219_s30 }
 0xe7e   :  { %2031 = vrot.lane.b32.xlu2 %v1828_v20, %s6215_s24 }
 0xe7f   :  { %v1874_v23 = vpop.f32.mrf.mxu2 }
 0xe80   :  { %v6802_v24 = vadd.f32 %v5915_v22, %v1874_v23 }
 0xe82   :  { %1994 = vmatpush.msrb.mxu0 %v6802_v24 }
 0xe85   :  { %2313 = vrot.lane.b32.xlu1 %v1828_v20, %s6219_s30 }
 0xe86   :  { %2143 = vrot.lane.b32.xlu2 %v1825_v19, %s6214_s23 }
 0xe8e   :  { %2171 = vrot.lane.b32.xlu2 %v1828_v20, %s6214_s23 }
 0xe96   :  { %2311 = vrot.lane.b32.xlu2 %v1828_v20, %s6220_s9  ;;  %v1879_v8 = vpop.permute.xlu2 %1878 }
 0xe97   :  { %5383 = vmatpush.xpose.msk.msra.mxu3 %vm134_vm1, %v1879_v8 }
 0xe9a   :  { %5384 = vmatmul.msk.f32.vlgmr.msra.gmra.mxu3 %vm134_vm1, %v1825_v19 }
 0xe9b   :  { %1971 = vmatpush.msrb.mxu3 %v6808_v28 }
 0xeae   :  { %v2004_v29 = vpop.permute.xlu0 %2003 }
 0xeaf   :  { %v2002_v37 = vpop.permute.xlu1 %2001 }
 0xeb6   :  { %v2146_v31 = vpop.permute.xlu0 %2145 }
 0xed0   :  { %v1906_v30 = vpop.permute.xlu2 %1905 }
 0xed1   :  { %5385 = vmatpush.xpose.msk.msrb.mxu1 %vm134_vm1, %v1906_v30 }
 0xed4   :  { %5386 = vmatmul.msk.f32.vlgmr.msrb.gmra.mxu1 %vm134_vm1, %v1828_v20 }
 0xed5   :  { %5389 = vmatpush.xpose.msk.msra.mxu1 %vm134_vm1, %v2004_v29 }
 0xed8   :  { %v2032_v36 = vpop.permute.xlu2 %2031 }
 0xed9   :  { %5395 = vmatpush.xpose.msk.msrb.mxu1 %vm134_vm1, %v2146_v31  ;;  %5391 = vmatpush.xpose.msk.msrb.mxu2 %vm134_vm1, %v2032_v36  ;;  %v5734_v36 = vpack.i.bf16 %v6802_v24, %v6808_v28 }
 0xedc   :  { %5390 = vmatmul.msk.f32.vlgmr.msra.gmra.mxu1 %vm134_vm1, %v2002_v37 }
 0xee0   :  { %v2144_v38 = vpop.permute.xlu2 %2143 }
 0xee4   :  { %5396 = vmatmul.msk.f32.vlgmr.msrb.gmra.mxu1 %vm134_vm1, %v2144_v38 }
 0xee7   :  { %v2174_v15 = vpop.permute.xlu0 %2173  ;;  %v2030_v16 = vpop.permute.xlu1 %2029 }
 0xee8   :  { %5392 = vmatmul.msk.f32.vlgmr.msrb.gmra.mxu2 %vm134_vm1, %v2030_v16  ;;  %v2172_v39 = vpop.permute.xlu2 %2171 }
 0xee9   :  { %5397 = vmatpush.xpose.msk.msra.mxu2 %vm134_vm1, %v2174_v15 }
 0xeef   :  { %v2286_v40 = vpop.permute.xlu1 %2285  ;;  %v2284_v32 = vpop.permute.xlu0 %2283 }
 0xef0   :  { %5398 = vmatmul.msk.f32.vlgmr.msra.gmra.mxu2 %vm134_vm1, %v2172_v39  ;;  %5401 = vmatpush.xpose.msk.msra.mxu1 %vm134_vm1, %v2286_v40  ;;  %v2312_v41 = vpop.permute.xlu2 %2311 }
 0xef3   :  { %5402 = vmatmul.msk.f32.vlgmr.msra.gmra.mxu1 %vm134_vm1, %v2284_v32 }
 0xef7   :  { %v2314_v35 = vpop.permute.xlu1 %2313 }
 0xef8   :  { %5403 = vmatpush.xpose.msk.msrb.mxu2 %vm134_vm1, %v2314_v35 }
 0xefb   :  { %5404 = vmatmul.msk.f32.vlgmr.msrb.gmra.mxu2 %vm134_vm1, %v2312_v41 }
 0xf1d   :  { %v1901_v42 = vpop.f32.mrf.mxu3 }
 0xf1e   :  { %v1931_v43 = vsel %vm134_vm1, %v1901_v42, -inf }
 0xf1f   :  { %1932 = vmax.xlane.f32.xlu0 %v1931_v43 }
 0xf51   :  { %v1928_v44 = vpop.f32.mrf.mxu1 }
 0xf52   :  { %v1934_v45 = vsel %vm134_vm1, %v1928_v44, -inf }
 0xf53   :  { %1935 = vmax.xlane.f32.xlu2 %v1934_v45 }
 0xf59   :  { %v2026_v48 = vpop.f32.mrf.mxu1 }
 0xf5a   :  { %v2057_v49 = vsel %vm134_vm1, %v2026_v48, -inf }
 0xf5b   :  { %2058 = vmax.xlane.f32.xlu1 %v2057_v49 }
 0xf61   :  { %v2168_v51 = vpop.f32.mrf.mxu1 }
 0xf62   :  { %v2199_v3 = vsel %vm134_vm1, %v2168_v51, -inf }
 0xf63   :  { %2200 = vmax.xlane.f32.xlu0 %v2199_v3 }
 0xf6b   :  { %v2054_v52 = vpop.f32.mrf.mxu2 }
 0xf6c   :  { %v2060_v50 = vsel %vm134_vm1, %v2054_v52, -inf }
 0xf6d   :  { %2061 = vmax.xlane.f32.xlu1 %v2060_v50 }
 0xf70   :  { %v2308_v55 = vpop.f32.mrf.mxu1 }
 0xf71   :  { %v2339_v56 = vsel %vm134_vm1, %v2308_v55, -inf }
 0xf72   :  { %2340 = vmax.xlane.f32.xlu2 %v2339_v56 }
 0xf73   :  { %v2196_v58 = vpop.f32.mrf.mxu2 }
 0xf74   :  { %v2202_v59 = vsel %vm134_vm1, %v2196_v58, -inf }
 0xf75   :  { %2203 = vmax.xlane.f32.xlu0 %v2202_v59 }
 0xf7e   :  { %v2336_v10 = vpop.f32.mrf.mxu2 }
 0xf7f   :  { %v2342_v61 = vsel %vm134_vm1, %v2336_v10, -inf }
 0xf80   :  { %2343 = vmax.xlane.f32.xlu1 %v2342_v61 }
 0xf92   :  { %v1933_v62 = vpop.xlane.xlu0 %1932 }
 0xf93   :  { %v1937_v63 = vsub.f32 %v1901_v42, %v1933_v62 }
 0xf95   :  { %v1939_v0 = vmul.f32 1.442695, %v1937_v63 }
 0xf97   :  { %6023 = vpow2.f32 %v1939_v0 }
 0xf9d   :  { %v6024_v1 = vpop.eup %6023 }
 0xf9e   :  { %v1943_v5 = vsel %vm134_vm1, %v6024_v1, 0.0 }
 0xf9f   :  { %1944 = vadd.xlane.f32.xlu2 %v1943_v5 }
 0xfb7   :  { %2361 = vrot.lane.b32.xlu2 %v6808_v28, %s6220_s9 }
 0xfc6   :  { %v1936_v6 = vpop.xlane.xlu2 %1935 }
 0xfc7   :  { %v1938_v7 = vsub.f32 %v1928_v44, %v1936_v6 }
 0xfc9   :  { %v1941_v11 = vmul.f32 1.442695, %v1938_v7 }
 0xfcb   :  { %6025 = vpow2.f32 %v1941_v11 }
 0xfce   :  { %v2059_v33 = vpop.xlane.xlu1 %2058 }
 0xfcf   :  { %v2063_v2 = vsub.f32 %v2026_v48, %v2059_v33 }
 0xfd1   :  { %v6026_v12 = vpop.eup %6025  ;;  %v2065_v9 = vmul.f32 1.442695, %v2063_v2 }
 0xfd2   :  { %v1946_v14 = vsel %vm134_vm1, %v6026_v12, 0.0 }
 0xfd3   :  { %6027 = vpow2.f32 %v2065_v9  ;;  %1947 = vadd.xlane.f32.xlu1 %v1946_v14 }
 0xfd6   :  { %v2201_v19 = vpop.xlane.xlu0 %2200 }
 0xfd7   :  { %v2205_v29 = vsub.f32 %v2168_v51, %v2201_v19 }
 0xfd9   :  { %v6840_v17 = vpop.eup %6027  ;;  %v2207_v37 = vmul.f32 1.442695, %v2205_v29 }
 0xfda   :  { %v2069_v18 = vsel %vm134_vm1, %v6840_v17, 0.0 }
 0xfdb   :  { %2070 = vadd.xlane.f32.xlu0 %v2069_v18 }
 0xfe0   :  { %v2062_v53 = vpop.xlane.xlu1 %2061 }
 0xfe1   :  { %v2064_v20 = vsub.f32 %v2054_v52, %v2062_v53 }
 0xfe3   :  { %v2067_v21 = vmul.f32 1.442695, %v2064_v20 }
 0xfe5   :  { %6029 = vpow2.f32 %v2067_v21  ;;  %v2341_v38 = vpop.xlane.xlu2 %2340 }
 0xfe6   :  { %v2345_v16 = vsub.f32 %v2308_v55, %v2341_v38 }
 0xfe8   :  { %v2204_v22 = vpop.xlane.xlu0 %2203  ;;  %v2347_v40 = vmul.f32 1.442695, %v2345_v16 }
 0xfe9   :  { %v2206_v23 = vsub.f32 %v2196_v58, %v2204_v22 }
 0xfeb   :  { %v6030_v8 = vpop.eup %6029  ;;  %v2209_v30 = vmul.f32 1.442695, %v2206_v23 }
 0xfec   :  { %v2072_v31 = vsel %vm134_vm1, %v6030_v8, 0.0 }
 0xfed   :  { %6031 = vpow2.f32 %v2209_v30  ;;  %2073 = vadd.xlane.f32.xlu1 %v2072_v31 }
 0xfee   :  { %6033 = vpow2.f32 %v2207_v37 }
 0xfef   :  { %5735 = vrot.lane.b32.xlu0 %v5734_v36, %s6217_s26  ;;  %6035 = vpow2.f32 %v2347_v40 }
 0xff3   :  { %v6848_v15 = vpop.eup %6031  ;;  %v2344_v42 = vpop.xlane.xlu1 %2343 }
 0xff4   :  { %v2214_v39 = vsel %vm134_vm1, %v6848_v15, 0.0  ;;  %v6034_v32 = vpop.eup %6033  ;;  %v2346_v44 = vsub.f32 %v2336_v10, %v2344_v42  ;;  %v5418_v42 = vld [vmem:[%s7700_s4 + $0x68] sm:$0xff] }
 0xff5   :  { %2215 = vadd.xlane.f32.xlu2 %v2214_v39  ;;  %v2211_v35 = vsel %vm134_vm1, %v6034_v32, 0.0  ;;  %v6036_v41 = vpop.eup %6035 }
 0xff6   :  { %v2351_v43 = vsel %vm134_vm1, %v6036_v41, 0.0  ;;  %v2349_v45 = vmul.f32 1.442695, %v2346_v44 }
 0xff8   :  { %6037 = vpow2.f32 %v2349_v45 }
 0xffd   :  { %2212 = vadd.xlane.f32.xlu2 %v2211_v35 }
 0xffe   :  { %v6038_v49 = vpop.eup %6037 }
 0xfff   :  { %v2354_v51 = vsel %vm134_vm1, %v6038_v49, 0.0 }
0x1005   :  { %2352 = vadd.xlane.f32.xlu2 %v2351_v43  ;;  %v5419_v43 = vld [vmem:[%s7700_s4 + $0x78] sm:$0xff] }
0x1006   :  { %2221 = vrot.lane.b32.xlu1 %v6808_v28, %s6214_s23  ;;  %v6893_v44 = vpack.i.bf16 %v5418_v42, %v5419_v43  ;;  %2560 = vmatpush.msra.mxu2 %v5419_v43 }
0x1008   :  { %2561 = vmatpush.msra.mxu2 %v5418_v42 }
0x100e   :  { %2247 = vrot.lane.b32.xlu1 %v6802_v24, %s6214_s23 }
0x1012   :  { %v1945_v48 = vpop.xlane.xlu2 %1944 }
0x1013   :  { %6039 = vrcp.f32 %v1945_v48 }
0x1016   :  { %5745 = vrot.lane.b32.xlu1 %v6744_v25, %s6221_s10 }
0x1019   :  { %v6040_v3 = vpop.eup %6039  ;;  %2355 = vadd.xlane.f32.xlu0 %v2354_v51 }
0x101a   :  { %v1951_v52 = vmul.f32 %v6040_v3, %v6024_v1  ;;  %v2362_v58 = vpop.permute.xlu2 %2361  ;;  %v5417_v3 = vld [vmem:[%s7700_s4 + $0x58] sm:$0xff] }
0x101b   :  { %2562 = vmatpush.msra.mxu2 %v5417_v3 }
0x101c   :  { %5387 = vmatmul.msk.f32.vlgmr.msrb.gmra.mxu3 %vm134_vm1, %v1951_v52  ;;  %v5416_v52 = vld [vmem:[%s7700_s4 + $0x48] sm:$0xff] }
0x101d   :  { %2387 = vrot.lane.b32.xlu2 %v6802_v24, %s6220_s9  ;;  %2563 = vmatpush.msra.mxu2 %v5416_v52 }
0x1025   :  { %5740 = vrot.lane.b32.xlu2 %v6746_v27, %s6221_s10 }
0x1046   :  { %v1948_v28 = vpop.xlane.xlu1 %1947 }
0x1047   :  { %6041 = vrcp.f32 %v1948_v28  ;;  %v5916_v28 = vld [vmem:[%s7702_s6 + $0x12] ss:$0 sm:$0xff] }
0x104d   :  { %v6042_v50 = vpop.eup %6041 }
0x104e   :  { %v1952_v55 = vmul.f32 %v6042_v50, %v6026_v12  ;;  %v2071_v25 = vpop.xlane.xlu0 %2070 }
0x104f   :  { %6043 = vrcp.f32 %v2071_v25 }
0x1050   :  { %5388 = vmatmul.msk.f32.vlgmr.msrb.gmra.mxu0 %vm134_vm1, %v1952_v55 }
0x1055   :  { %v6044_v56 = vpop.eup %6043 }
0x1056   :  { %v2077_v24 = vmul.f32 %v6044_v56, %v6840_v17 }
0x1060   :  { %v2074_v59 = vpop.xlane.xlu1 %2073 }
0x1061   :  { %6045 = vrcp.f32 %v2074_v59  ;;  %v5736_v10 = vpop.permute.xlu0 %5735 }
0x1062   :  { %v5738_v61 = vunpack.i.h.bf16 %v5736_v10  ;;  %v5737_v62 = vunpack.i.l.bf16 %v5736_v10 }
0x1064   :  { %2101 = vmatpush.msra.mxu3 %v5737_v62  ;;  %2128 = vmatpush.msra.mxu0 %v5738_v61 }
0x1065   :  { %5393 = vmatmul.msk.f32.vlgmr.msra.gmra.mxu3 %vm134_vm1, %v2077_v24 }
0x1067   :  { %v6046_v27 = vpop.eup %6045 }
0x1068   :  { %v2078_v63 = vmul.f32 %v6046_v27, %v6030_v8  ;;  %v2216_v0 = vpop.xlane.xlu2 %2215 }
0x106a   :  { %5394 = vmatmul.msk.f32.vlgmr.msra.gmra.mxu0 %vm134_vm1, %v2078_v63 }
0x1070   :  { %v2213_v1 = vpop.xlane.xlu2 %2212 }
0x1071   :  { %6047 = vrcp.f32 %v2213_v1 }
0x1072   :  { %6049 = vrcp.f32 %v2216_v0  ;;  %v6921_v0 = vpack.i.bf16 %v5416_v52, %v5417_v3 }
0x1077   :  { %v6048_v5 = vpop.eup %6047 }
0x1078   :  { %v2219_v6 = vmul.f32 %v6048_v5, %v6034_v32  ;;  %v2353_v7 = vpop.xlane.xlu2 %2352  ;;  %v2222_v11 = vpop.permute.xlu1 %2221 }
0x1079   :  { %6051 = vrcp.f32 %v2353_v7  ;;  %2242 = vmatpush.msrb.mxu3 %v2222_v11  ;;  %v6050_v33 = vpop.eup %6049 }
0x107a   :  { %5399 = vmatmul.msk.f32.vlgmr.msrb.gmra.mxu3 %vm134_vm1, %v2219_v6  ;;  %v2220_v12 = vmul.f32 %v6050_v33, %v6848_v15 }
0x107b   :  { %2382 = vmatpush.msra.mxu3 %v2362_v58 }
0x107f   :  { %v6052_v2 = vpop.eup %6051 }
0x1080   :  { %v2359_v9 = vmul.f32 %v6052_v2, %v6036_v41  ;;  %v2388_v14 = vpop.permute.xlu2 %2387  ;;  %v2248_v17 = vpop.permute.xlu1 %2247 }
0x1081   :  { %2268 = vmatpush.msrb.mxu0 %v2248_v17 }
0x1082   :  { %5400 = vmatmul.msk.f32.vlgmr.msrb.gmra.mxu0 %vm134_vm1, %v2220_v12  ;;  %5405 = vmatmul.msk.f32.vlgmr.msra.gmra.mxu3 %vm134_vm1, %v2359_v9 }
0x1083   :  { %2408 = vmatpush.msra.mxu0 %v2388_v14 }
0x1088   :  { %v5741_v8 = vpop.permute.xlu2 %5740  ;;  %v5746_v31 = vpop.permute.xlu1 %5745 }
0x1089   :  { %v5743_v29 = vunpack.i.h.bf16 %v5741_v8  ;;  %v5742_v30 = vunpack.i.l.bf16 %v5741_v8  ;;  %v5747_v36 = vunpack.i.l.bf16 %v5746_v31  ;;  %v5748_v37 = vunpack.i.h.bf16 %v5746_v31 }
0x108b   :  { %2465 = vmatpush.msrb.mxu1 %v5742_v30 }
0x108c   :  { %v2356_v18 = vpop.xlane.xlu0 %2355 }
0x108d   :  { %6053 = vrcp.f32 %v2356_v18  ;;  %2466 = vmatpush.msrb.mxu1 %v5743_v29 }
0x108f   :  { %2467 = vmatpush.msrb.mxu1 %v5747_v36 }
0x1091   :  { %2468 = vmatpush.msrb.mxu1 %v5748_v37 }
0x1093   :  { %v6054_v19 = vpop.eup %6053 }
0x1094   :  { %v2360_v53 = vmul.f32 %v6054_v19, %v6038_v49 }
0x1096   :  { %5406 = vmatmul.msk.f32.vlgmr.msra.gmra.mxu0 %vm134_vm1, %v2360_v53 }
0x109f   :  { %v1973_v20 = vpop.f32.mrf.mxu3 }
0x10a0   :  { %1999 = vst.msk [vmem:[#allocation2] sm:$0xff] %vm134_vm1, %v1973_v20 }
0x10cd   :  { %v1996_v21 = vpop.f32.mrf.mxu0 }
0x10ce   :  { %2000 = vst.msk [vmem:[#allocation2 + $0x8] sm:$0xff] %vm134_vm1, %v1996_v21 }
0x10e7   :  { %v2130_v22 = vpop.f32.mrf.mxu0 }
0x10e8   :  { %v2103_v23 = vpop.f32.mrf.mxu3  ;;  %2137 = vrot.lane.b32.xlu0 %v2130_v22, %s6222_s11 }
0x10e9   :  { %2135 = vrot.lane.b32.xlu1 %v2103_v23, %s6222_s11 }
0x10f0   :  { %5750 = vrot.lane.b32.xlu0 %v6893_v44, %s6216_s25 }
0x10fd   :  { %v2244_v38 = vpop.f32.mrf.mxu3 }
0x10fe   :  { %2275 = vrot.lane.b32.xlu2 %v2244_v38, %s6223_s12 }
0x10ff   :  { %v2270_v15 = vpop.f32.mrf.mxu0 }
0x1105   :  { %v2384_v16 = vpop.f32.mrf.mxu3 }
0x1106   :  { %2277 = vrot.lane.b32.xlu2 %v2270_v15, %s6223_s12  ;;  %2415 = vrot.lane.b32.xlu1 %v2384_v16, %s6224_s13 }
0x1113   :  { %v2410_v39 = vpop.f32.mrf.mxu0 }
0x1114   :  { %2417 = vrot.lane.b32.xlu1 %v2410_v39, %s6224_s13  ;;  %v5917_v39 = vld [vmem:[%s7702_s6 + $0x19] ss:$0 sm:$0xff] }
0x1158   :  { %v2276_v40 = vpop.permute.xlu2 %2275 }
0x115a   :  { %v2138_v32 = vpop.permute.xlu0 %2137 }
0x115b   :  { %2142 = vst.msk [vmem:[#allocation2 + $0x8] sm:$0xff] %vm396_vm2, %v2138_v32  ;;  %v2136_v35 = vpop.permute.xlu1 %2135 }
0x115c   :  { %2141 = vst.msk [vmem:[#allocation2] sm:$0xff] %vm396_vm2, %v2136_v35  ;;  %v5918_v35 = vld [vmem:[%s7702_s6 + $0x1a] ss:$0 sm:$0xff] }
0x115d   :  { %2281 = vst.msk [vmem:[#allocation2] sm:$0xff] %vm537_vm3, %v2276_v40 }
0x1160   :  { %v2278_v41 = vpop.permute.xlu2 %2277 }
0x1161   :  { %2282 = vst.msk [vmem:[#allocation2 + $0x8] sm:$0xff] %vm537_vm3, %v2278_v41 }
0x1162   :  { %v5751_v1 = vpop.permute.xlu0 %5750 }
0x1163   :  { %v5753_v5 = vunpack.i.h.bf16 %v5751_v1  ;;  %v5752_v6 = vunpack.i.l.bf16 %v5751_v1  ;;  %v5919_v1 = vld [vmem:[%s7702_s6 + $0x14] ss:$0 sm:$0xff] }
0x1165   :  { %2601 = vmatpush.msrb.mxu3 %v5752_v6 }
0x1167   :  { %2602 = vmatpush.msrb.mxu3 %v5753_v5  ;;  %v6180_v5 = vld [vmem:[%s7698_s2 + $0x18] sm:$0xff] }
0x1178   :  { %v2416_v45 = vpop.permute.xlu1 %2415 }
0x1179   :  { %2421 = vst.msk [vmem:[#allocation2] sm:$0xff] %vm678_vm4, %v2416_v45 }
0x1180   :  { %v2423_v48 = vld [vmem:[#allocation2] sm:$0xff] }
0x1181   :  { %5412 = vmatmul.msk.f32.vlgmr.msrb.gmra.mxu1 %vm54_vm0, %v2423_v48 }
0x1186   :  { %v2418_v49 = vpop.permute.xlu1 %2417 }
0x1187   :  { %2422 = vst.msk [vmem:[#allocation2 + $0x8] sm:$0xff] %vm678_vm4, %v2418_v49 }
0x118e   :  { %v2424_v51 = vld [vmem:[#allocation2 + $0x8] sm:$0xff] }
0x118f   :  { %5413 = vmatmul.msk.f32.gmra.mxu1 %vm54_vm0, %v2424_v51 }
0x11fe   :  { %v2470_v50 = vpop.f32.mrf.mxu1 }
0x11ff   :  { %v2471_v55 = vadd.f32 %v5916_v28, %v2470_v50 }
0x1201   :  { %v2476_v25 = vadd.f32 %v2471_v55, %v6760_v4 }
0x1203   :  { %v2480_v56 = vsel %vm54_vm0, %v2476_v25, 0.0  ;;  %v2488_v58 = vmul.f32 %v2476_v25, %v2476_v25 }
0x1204   :  { %2481 = vadd.xlane.f32.xlu2 %v2480_v56 }
0x1205   :  { %v2490_v59 = vsel %vm54_vm0, %v2488_v58, 0.0 }
0x1206   :  { %2491 = vadd.xlane.f32.xlu1 %v2490_v59 }
0x120c   :  { %v2473_v10 = vpop.f32.mrf.mxu1 }
0x120d   :  { %v2474_v61 = vadd.f32 %v5916_v28, %v2473_v10 }
0x120f   :  { %v6914_v62 = vadd.f32 %v2474_v61, %v6772_v54 }
0x1211   :  { %v2483_v24 = vsel %vm54_vm0, %v6914_v62, 0.0  ;;  %v2489_v27 = vmul.f32 %v6914_v62, %v6914_v62 }
0x1212   :  { %2484 = vadd.xlane.f32.xlu0 %v2483_v24 }
0x1213   :  { %v2493_v63 = vsel %vm54_vm0, %v2489_v27, 0.0 }
0x1214   :  { %2494 = vadd.xlane.f32.xlu1 %v2493_v63  ;;  %v6178_v63 = vld [vmem:[%s7698_s2 + $0x8] sm:$0xff] }
0x121c   :  { %5755 = vrot.lane.b32.xlu2 %v6921_v0, %s6216_s25 }
0x1226   :  { %5765 = vrot.lane.b32.xlu0 %v6921_v0, %s6213_s17 }
0x122d   :  { %5760 = vrot.lane.b32.xlu1 %v6893_v44, %s6213_s17 }
0x1277   :  { %v2482_v7 = vpop.xlane.xlu2 %2481 }
0x1278   :  { %v2486_v11 = vmul.f32 %v2482_v7, %v6460_v60 }
0x1279   :  { %v2492_v33 = vpop.xlane.xlu1 %2491 }
0x127a   :  { %v2500_v2 = vmul.f32 %v2486_v11, %v2486_v11  ;;  %v2496_v12 = vmul.f32 %v2492_v33, %v6460_v60  ;;  %v2498_v16 = vsub.f32 %v2476_v25, %v2486_v11 }
0x127c   :  { %v2502_v9 = vsub.f32 %v2496_v12, %v2500_v2  ;;  %v5920_v12 = vld [vmem:[%s7702_s6 + $0x13] ss:$0 sm:$0xff] }
0x127e   :  { %v2504_v14 = vadd.f32 1e-05, %v2502_v9 }
0x127f   :  { %v5756_v17 = vpop.permute.xlu2 %5755 }
0x1280   :  { %6055 = vrsqrt.f32 %v2504_v14  ;;  %v5758_v18 = vunpack.i.h.bf16 %v5756_v17  ;;  %v5757_v19 = vunpack.i.l.bf16 %v5756_v17  ;;  %vm2512_vm6 = vweird.f32 %v2504_v14 }
0x1282   :  { %2603 = vmatpush.msrb.mxu3 %v5757_v19 }
0x1284   :  { %2604 = vmatpush.msrb.mxu3 %v5758_v18 }
0x1285   :  { %v2485_v53 = vpop.xlane.xlu0 %2484  ;;  %5424 = vmatmul.msk.f32.vlgmr.msrb.gmra.mxu3 %vm54_vm0, %v6485_v47 }
0x1286   :  { %v6056_v20 = vpop.eup %6055  ;;  %v2487_v21 = vmul.f32 %v2485_v53, %v6460_v60 }
0x1287   :  { %v2507_v22 = vmul.f32 %v6056_v20, %v2504_v14  ;;  %v2495_v23 = vpop.xlane.xlu1 %2494  ;;  %vm2513_vm5 = vweird.f32 %v6056_v20 }
0x1288   :  { %v2501_v8 = vmul.f32 %v2487_v21, %v2487_v21  ;;  %v2497_v29 = vmul.f32 %v2495_v23, %v6460_v60  ;;  %vm2514_vm7 = vmor %vm2512_vm6, %vm2513_vm5  ;;  %v2499_v28 = vsub.f32 %v6914_v62, %v2487_v21  ;;  %v6177_v62 = vld [vmem:[%s7698_s2] sm:$0xff] }
0x1289   :  { %v2508_v30 = vmul.f32 %v6056_v20, %v2507_v22  ;;  %v5921_v22 = vld [vmem:[%s7702_s6 + $0x15] ss:$0 sm:$0xff] }
0x128a   :  { %v2503_v31 = vsub.f32 %v2497_v29, %v2501_v8 }
0x128b   :  { %v2509_v36 = vmul.f32 0.5, %v2508_v30 }
0x128c   :  { %v2505_v37 = vadd.f32 1e-05, %v2503_v31 }
0x128d   :  { %v2510_v38 = vsub.f32 1.5, %v2509_v36  ;;  %5425 = vmatmul.msk.f32.gmra.mxu3 %vm54_vm0, %v6500_v57 }
0x128e   :  { %6057 = vrsqrt.f32 %v2505_v37  ;;  %vm2522_vm10 = vweird.f32 %v2505_v37 }
0x128f   :  { %v2511_v15 = vmul.f32 %v6056_v20, %v2510_v38 }
0x1291   :  { %v2515_v40 = vsel %vm2514_vm7, %v6056_v20, %v2511_v15 }
0x1292   :  { %v2526_v32 = vmul.f32 %v2515_v40, %v2498_v16 }
0x1294   :  { %v6058_v41 = vpop.eup %6057  ;;  %v2529_v42 = vmul.f32 %v5917_v39, %v2526_v32 }
0x1295   :  { %v2517_v43 = vmul.f32 %v6058_v41, %v2505_v37  ;;  %5426 = vmatmul.msk.f32.gmra.mxu3 %vm54_vm0, %v6512_v34  ;;  %vm2523_vm9 = vweird.f32 %v6058_v41 }
0x1296   :  { %v6945_v45 = vadd.f32 %v5918_v35, %v2529_v42  ;;  %vm2524_vm11 = vmor %vm2522_vm10, %vm2523_vm9 }
0x1297   :  { %v2518_v48 = vmul.f32 %v6058_v41, %v2517_v43 }
0x1298   :  { %v2534_v49 = vadd.f32 %v6765_v46, %v6945_v45  ;;  %v5766_v61 = vpop.permute.xlu0 %5765 }
0x1299   :  { %v2519_v51 = vmul.f32 0.5, %v2518_v48  ;;  %v5768_v24 = vunpack.i.h.bf16 %v5766_v61  ;;  %v5767_v27 = vunpack.i.l.bf16 %v5766_v61 }
0x129a   :  { %5421 = vmatmul.msk.f32.vlgmr.msra.gmra.mxu2 %vm54_vm0, %v2534_v49 }
0x129b   :  { %v2520_v3 = vsub.f32 1.5, %v2519_v51 }
0x129d   :  { %v2521_v52 = vmul.f32 %v6058_v41, %v2520_v3  ;;  %5427 = vmatmul.msk.f32.gmra.mxu3 %vm54_vm0, %v6523_v26 }
0x129f   :  { %v2525_v50 = vsel %vm2524_vm11, %v6058_v41, %v2521_v52  ;;  %v5761_v55 = vpop.permute.xlu1 %5760 }
0x12a0   :  { %v2527_v25 = vmul.f32 %v2525_v50, %v2499_v28  ;;  %v5763_v56 = vunpack.i.h.bf16 %v5761_v55  ;;  %v5762_v58 = vunpack.i.l.bf16 %v5761_v55 }
0x12a2   :  { %v2530_v59 = vmul.f32 %v5917_v39, %v2527_v25  ;;  %2644 = vmatpush.msrb.mxu0 %v5762_v58 }
0x12a4   :  { %v6953_v46 = vadd.f32 %v5918_v35, %v2530_v59  ;;  %2645 = vmatpush.msrb.mxu0 %v5763_v56 }
0x12a6   :  { %v2535_v10 = vadd.f32 %v6777_v13, %v6953_v46  ;;  %2646 = vmatpush.msrb.mxu0 %v5767_v27  ;;  %v6179_v13 = vld [vmem:[%s7698_s2 + $0x10] sm:$0xff] }
0x12a8   :  { %5422 = vmatmul.msk.f32.gmra.mxu2 %vm54_vm0, %v2535_v10  ;;  %2647 = vmatpush.msrb.mxu0 %v5768_v24 }
0x12a9   :  { %5429 = vmatmul.msk.f32.vlgmr.msrb.gmra.mxu0 %vm54_vm0, %v6177_v62 }
0x12b1   :  { %5430 = vmatmul.msk.f32.gmra.mxu0 %vm54_vm0, %v6178_v63 }
0x12b9   :  { %5431 = vmatmul.msk.f32.gmra.mxu0 %vm54_vm0, %v6179_v13 }
0x12c1   :  { %5432 = vmatmul.msk.f32.gmra.mxu0 %vm54_vm0, %v6180_v5 }
0x1308   :  { %v2606_v6 = vpop.f32.mrf.mxu3 }
0x1309   :  { %v2607_v7 = vadd.f32 %v5919_v1, %v2606_v6 }
0x130b   :  { %2791 = vrot.lane.b32.xlu0 %v2607_v7, %s6217_s26 }
0x1310   :  { %v2609_v11 = vpop.f32.mrf.mxu3 }
0x1311   :  { %v2610_v33 = vadd.f32 %v5919_v1, %v2609_v11 }
0x1313   :  { %5433 = vmatpush.xpose.msk.msra.mxu1 %vm134_vm1, %v2610_v33 }
0x1317   :  { %5434 = vmatpush.xpose.msk.msra.mxu1 %vm134_vm1, %v2607_v7 }
0x1318   :  { %v2612_v2 = vpop.f32.mrf.mxu3 }
0x1319   :  { %v2613_v19 = vadd.f32 %v5919_v1, %v2612_v2 }
0x131d   :  { %v2565_v9 = vpop.f32.mrf.mxu2 }
0x131e   :  { %v2566_v14 = vadd.f32 %v5920_v12, %v2565_v9 }
0x1320   :  { %2789 = vrot.lane.b32.xlu1 %v2566_v14, %s6217_s26  ;;  %v2615_v17 = vpop.f32.mrf.mxu3  ;;  %5435 = vmatmul.msk.f32.vlgmr.msra.gmra.mxu1 %vm134_vm1, %v2566_v14 }
0x1321   :  { %v2616_v18 = vadd.f32 %v5919_v1, %v2615_v17 }
0x1323   :  { %2825 = vrot.lane.b32.xlu0 %v2616_v18, %s6217_s26  ;;  %5436 = vmatpush.xpose.msk.msrb.mxu2 %vm134_vm1, %v2616_v18 }
0x1326   :  { %v2649_v21 = vpop.f32.mrf.mxu0 }
0x1327   :  { %5437 = vmatpush.xpose.msk.msrb.mxu2 %vm134_vm1, %v2613_v19  ;;  %v6996_v8 = vadd.f32 %v5921_v22, %v2649_v21 }
0x1328   :  { %2823 = vrot.lane.b32.xlu1 %v2613_v19, %s6217_s26 }
0x132b   :  { %v2568_v53 = vpop.f32.mrf.mxu2  ;;  %3105 = vrot.lane.b32.xlu0 %v2610_v33, %s6220_s9 }
0x132c   :  { %v2569_v20 = vadd.f32 %v5920_v12, %v2568_v53 }
0x132e   :  { %5438 = vmatmul.msk.f32.vlgmr.msrb.gmra.mxu2 %vm134_vm1, %v2569_v20  ;;  %v2652_v23 = vpop.f32.mrf.mxu0 }
0x132f   :  { %v6998_v29 = vadd.f32 %v5921_v22, %v2652_v23 }
0x1330   :  { %2983 = vrot.lane.b32.xlu1 %v2616_v18, %s6214_s23 }
0x1331   :  { %2758 = vmatpush.msrb.mxu1 %v6998_v29 }
0x1333   :  { %2821 = vrot.lane.b32.xlu0 %v2569_v20, %s6217_s26  ;;  %2759 = vmatpush.msrb.mxu1 %v6996_v8 }
0x1336   :  { %v2655_v30 = vpop.f32.mrf.mxu0 }
0x1337   :  { %v7002_v36 = vadd.f32 %v5921_v22, %v2655_v30 }
0x133e   :  { %v2658_v31 = vpop.f32.mrf.mxu0 }
0x133f   :  { %v7004_v37 = vadd.f32 %v5921_v22, %v2658_v31 }
0x1341   :  { %2781 = vmatpush.msra.mxu2 %v7004_v37 }
0x1343   :  { %2782 = vmatpush.msra.mxu2 %v7002_v36 }
0x137d   :  { %v2792_v38 = vpop.permute.xlu0 %2791 }
0x1392   :  { %v2790_v15 = vpop.permute.xlu1 %2789 }
0x1395   :  { %v2826_v16 = vpop.permute.xlu0 %2825 }
0x1396   :  { %5444 = vmatpush.xpose.msk.msrb.mxu2 %vm134_vm1, %v2826_v16 }
0x139a   :  { %v2824_v39 = vpop.permute.xlu1 %2823 }
0x139b   :  { %5445 = vmatpush.xpose.msk.msrb.mxu2 %vm134_vm1, %v2824_v39 }
0x139d   :  { %v2687_v40 = vpop.f32.mrf.mxu1  ;;  %v3106_v58 = vpop.permute.xlu0 %3105 }
0x139e   :  { %v2719_v32 = vsel %vm1008_vm12, %v2687_v40, -inf }
0x139f   :  { %2720 = vmax.xlane.f32.xlu2 %v2719_v32 }
0x13a2   :  { %v2984_v3 = vpop.permute.xlu1 %2983 }
0x13a5   :  { %v2822_v10 = vpop.permute.xlu0 %2821 }
0x13b1   :  { %v2716_v35 = vpop.f32.mrf.mxu2 }
0x13b2   :  { %v2722_v41 = vsel %vm1008_vm12, %v2716_v35, -inf }
0x13b3   :  { %2723 = vmax.xlane.f32.xlu1 %v2722_v41 }
0x13b7   :  { %2793 = vrot.lane.b32.xlu2 %v2610_v33, %s6217_s26 }
0x13bf   :  { %2951 = vrot.lane.b32.xlu2 %v2610_v33, %s6214_s23 }
0x13c7   :  { %2949 = vrot.lane.b32.xlu2 %v2607_v7, %s6214_s23 }
0x13cc   :  { %2979 = vrot.lane.b32.xlu1 %v2569_v20, %s6214_s23 }
0x13cf   :  { %2947 = vrot.lane.b32.xlu2 %v2566_v14, %s6214_s23 }
0x13d7   :  { %3103 = vrot.lane.b32.xlu2 %v2607_v7, %s6220_s9 }
0x13df   :  { %3101 = vrot.lane.b32.xlu2 %v2566_v14, %s6220_s9 }
0x13e7   :  { %3137 = vrot.lane.b32.xlu2 %v2616_v18, %s6220_s9 }
0x1412   :  { %v2721_v42 = vpop.xlane.xlu2 %2720 }
0x1413   :  { %v2725_v43 = vsub.f32 %v2687_v40, %v2721_v42 }
0x1415   :  { %v2727_v48 = vmul.f32 1.442695, %v2725_v43 }
0x1417   :  { %6059 = vpow2.f32 %v2727_v48 }
0x141a   :  { %v2794_v49 = vpop.permute.xlu2 %2793 }
0x141b   :  { %5441 = vmatpush.xpose.msk.msra.mxu1 %vm134_vm1, %v2794_v49 }
0x141d   :  { %v6060_v51 = vpop.eup %6059 }
0x141e   :  { %v2731_v52 = vsel %vm1008_vm12, %v6060_v51, 0.0 }
0x141f   :  { %2732 = vadd.xlane.f32.xlu0 %v2731_v52  ;;  %5442 = vmatpush.xpose.msk.msra.mxu1 %vm134_vm1, %v2792_v38 }
0x1422   :  { %v2952_v59 = vpop.permute.xlu2 %2951 }
0x1426   :  { %v2724_v28 = vpop.xlane.xlu1 %2723 }
0x1427   :  { %v2726_v50 = vsub.f32 %v2716_v35, %v2724_v28 }
0x1429   :  { %v2729_v55 = vmul.f32 1.442695, %v2726_v50 }
0x142a   :  { %v2950_v61 = vpop.permute.xlu2 %2949 }
0x142b   :  { %6061 = vpow2.f32 %v2729_v55 }
0x1431   :  { %v6062_v25 = vpop.eup %6061 }
0x1432   :  { %v2734_v56 = vsel %vm1008_vm12, %v6062_v25, 0.0  ;;  %v2948_v62 = vpop.permute.xlu2 %2947 }
0x1433   :  { %2735 = vadd.xlane.f32.xlu1 %v2734_v56  ;;  %2981 = vrot.lane.b32.xlu0 %v2613_v19, %s6214_s23 }
0x143a   :  { %v3104_v1 = vpop.permute.xlu2 %3103 }
0x143b   :  { %3135 = vrot.lane.b32.xlu0 %v2613_v19, %s6220_s9 }
0x143e   :  { %v2980_v13 = vpop.permute.xlu1 %2979 }
0x1442   :  { %v3102_v7 = vpop.permute.xlu2 %3101 }
0x144a   :  { %v3138_v2 = vpop.permute.xlu2 %3137 }
0x144c   :  { %3133 = vrot.lane.b32.xlu1 %v2569_v20, %s6220_s9 }
0x1492   :  { %v2733_v24 = vpop.xlane.xlu0 %2732 }
0x1493   :  { %6063 = vrcp.f32 %v2733_v24 }
0x1499   :  { %v6064_v27 = vpop.eup %6063 }
0x149a   :  { %v2739_v63 = vmul.f32 %v6064_v27, %v6060_v51 }
0x149c   :  { %5439 = vmatmul.msk.f32.vlgmr.msrb.gmra.mxu1 %vm1008_vm12, %v2739_v63 }
0x149d   :  { %5449 = vmatpush.xpose.msk.msrb.mxu1 %vm134_vm1, %v2952_v59 }
0x14a1   :  { %5450 = vmatpush.xpose.msk.msrb.mxu1 %vm134_vm1, %v2950_v61 }
0x14a4   :  { %5443 = vmatmul.msk.f32.vlgmr.msra.gmra.mxu1 %vm134_vm1, %v2790_v15  ;;  %v5779_v15 = vpack.i.bf16 %v6996_v8, %v6998_v29 }
0x14a5   :  { %5457 = vmatpush.xpose.msk.msra.mxu1 %vm134_vm1, %v3106_v58  ;;  %v2982_v33 = vpop.permute.xlu0 %2981  ;;  %v5784_v58 = vpack.i.bf16 %v7002_v36, %v7004_v37 }
0x14a6   :  { %v2736_v5 = vpop.xlane.xlu1 %2735 }
0x14a7   :  { %6065 = vrcp.f32 %v2736_v5 }
0x14a9   :  { %5458 = vmatpush.xpose.msk.msra.mxu1 %vm134_vm1, %v3104_v1 }
0x14ac   :  { %5451 = vmatmul.msk.f32.vlgmr.msrb.gmra.mxu1 %vm134_vm1, %v2948_v62 }
0x14ad   :  { %v6066_v6 = vpop.eup %6065  ;;  %v3136_v12 = vpop.permute.xlu0 %3135 }
0x14ae   :  { %v2740_v11 = vmul.f32 %v6066_v6, %v6062_v25 }
0x14b0   :  { %5440 = vmatmul.msk.f32.vlgmr.msra.gmra.mxu2 %vm1008_vm12, %v2740_v11 }
0x14b1   :  { %5452 = vmatpush.xpose.msk.msra.mxu2 %vm134_vm1, %v2984_v3 }
0x14b4   :  { %5459 = vmatmul.msk.f32.vlgmr.msra.gmra.mxu1 %vm134_vm1, %v3102_v7 }
0x14b5   :  { %5453 = vmatpush.xpose.msk.msra.mxu2 %vm134_vm1, %v2982_v33 }
0x14b8   :  { %5446 = vmatmul.msk.f32.vlgmr.msrb.gmra.mxu2 %vm134_vm1, %v2822_v10 }
0x14b9   :  { %5460 = vmatpush.xpose.msk.msrb.mxu2 %vm134_vm1, %v3138_v2 }
0x14bd   :  { %5461 = vmatpush.xpose.msk.msrb.mxu2 %vm134_vm1, %v3136_v12 }
0x14be   :  { %v3134_v9 = vpop.permute.xlu1 %3133 }
0x14c0   :  { %5454 = vmatmul.msk.f32.vlgmr.msra.gmra.mxu2 %vm134_vm1, %v2980_v13 }
0x14c8   :  { %5462 = vmatmul.msk.f32.vlgmr.msrb.gmra.mxu2 %vm134_vm1, %v3134_v9 }
0x1519   :  { %v2761_v14 = vpop.f32.mrf.mxu1 }
0x151a   :  { %2787 = vst.msk [vmem:[#allocation2] sm:$0xff] %vm134_vm1, %v2761_v14 }
0x1521   :  { %v2818_v17 = vpop.f32.mrf.mxu1 }
0x1522   :  { %v2853_v18 = vsel %vm1008_vm12, %v2818_v17, -inf }
0x1523   :  { %2854 = vmax.xlane.f32.xlu2 %v2853_v18 }
0x1529   :  { %v2976_v19 = vpop.f32.mrf.mxu1 }
0x152a   :  { %v3011_v53 = vsel %vm1008_vm12, %v2976_v19, -inf }
0x152b   :  { %3012 = vmax.xlane.f32.xlu0 %v3011_v53 }
0x1531   :  { %v3130_v20 = vpop.f32.mrf.mxu1 }
0x1532   :  { %v3165_v21 = vsel %vm1008_vm12, %v3130_v20, -inf }
0x1533   :  { %v2784_v22 = vpop.f32.mrf.mxu2  ;;  %3166 = vmax.xlane.f32.xlu1 %v3165_v21 }
0x1534   :  { %2788 = vst.msk [vmem:[#allocation2 + $0x8] sm:$0xff] %vm134_vm1, %v2784_v22 }
0x153b   :  { %v2850_v23 = vpop.f32.mrf.mxu2 }
0x153c   :  { %v2856_v30 = vsel %vm1008_vm12, %v2850_v23, -inf }
0x153d   :  { %2857 = vmax.xlane.f32.xlu2 %v2856_v30 }
0x1543   :  { %v3008_v31 = vpop.f32.mrf.mxu2 }
0x1544   :  { %v3014_v38 = vsel %vm1008_vm12, %v3008_v31, -inf }
0x1545   :  { %3015 = vmax.xlane.f32.xlu0 %v3014_v38 }
0x154b   :  { %v3162_v16 = vpop.f32.mrf.mxu2 }
0x154c   :  { %5780 = vrot.lane.b32.xlu1 %v5779_v15, %s6220_s9  ;;  %v3168_v39 = vsel %vm1008_vm12, %v3162_v16, -inf }
0x1555   :  { %5775 = vrot.lane.b32.xlu2 %v5779_v15, %s6214_s23 }
0x1559   :  { %5770 = vrot.lane.b32.xlu0 %v5779_v15, %s6217_s26 }
0x1576   :  { %3169 = vmax.xlane.f32.xlu1 %v3168_v39 }
0x1596   :  { %v2855_v40 = vpop.xlane.xlu2 %2854 }
0x1597   :  { %v2859_v32 = vsub.f32 %v2818_v17, %v2855_v40 }
0x1599   :  { %v2861_v35 = vmul.f32 1.442695, %v2859_v32 }
0x159b   :  { %6067 = vpow2.f32 %v2861_v35 }
0x159e   :  { %v3013_v41 = vpop.xlane.xlu0 %3012 }
0x159f   :  { %v3017_v42 = vsub.f32 %v2976_v19, %v3013_v41 }
0x15a1   :  { %v6068_v43 = vpop.eup %6067  ;;  %v3019_v48 = vmul.f32 1.442695, %v3017_v42 }
0x15a2   :  { %v2865_v8 = vsel %vm1008_vm12, %v6068_v43, 0.0 }
0x15a3   :  { %6069 = vpow2.f32 %v3019_v48  ;;  %2866 = vadd.xlane.f32.xlu2 %v2865_v8 }
0x15a6   :  { %v3167_v29 = vpop.xlane.xlu1 %3166 }
0x15a7   :  { %v3171_v49 = vsub.f32 %v3130_v20, %v3167_v29 }
0x15a9   :  { %v6070_v51 = vpop.eup %6069  ;;  %v3173_v3 = vmul.f32 1.442695, %v3171_v49 }
0x15aa   :  { %v3023_v52 = vsel %vm1008_vm12, %v6070_v51, 0.0 }
0x15ab   :  { %6071 = vpow2.f32 %v3173_v3  ;;  %3024 = vadd.xlane.f32.xlu1 %v3023_v52  ;;  %v3507_v3 = vld [vmem:[%s7703_s7 + $0x30] sm:$0xff]  ;;  %v3506_v52 = vld [vmem:[%s7703_s7 + $0x28] sm:$0xff] }
0x15b0   :  { %v2858_v28 = vpop.xlane.xlu2 %2857 }
0x15b1   :  { %v6072_v50 = vpop.eup %6071  ;;  %v2860_v55 = vsub.f32 %v2850_v23, %v2858_v28  ;;  %v3505_v28 = vld [vmem:[%s7703_s7 + $0x20] sm:$0xff] }
0x15b2   :  { %v3177_v25 = vsel %vm1008_vm12, %v6072_v50, 0.0 }
0x15b3   :  { %v2863_v56 = vmul.f32 1.442695, %v2860_v55  ;;  %3178 = vadd.xlane.f32.xlu1 %v3177_v25 }
0x15b5   :  { %6073 = vpow2.f32 %v2863_v56 }
0x15b8   :  { %v3016_v61 = vpop.xlane.xlu0 %3015  ;;  %v5776_v27 = vpop.permute.xlu2 %5775 }
0x15b9   :  { %v5777_v13 = vunpack.i.l.bf16 %v5776_v27  ;;  %v5778_v1 = vunpack.i.h.bf16 %v5776_v27  ;;  %v3018_v36 = vsub.f32 %v3008_v31, %v3016_v61 }
0x15bb   :  { %v6074_v59 = vpop.eup %6073  ;;  %5785 = vrot.lane.b32.xlu2 %v5784_v58, %s6217_s26  ;;  %v3021_v37 = vmul.f32 1.442695, %v3018_v36 }
0x15bc   :  { %v2868_v10 = vsel %vm1008_vm12, %v6074_v59, 0.0 }
0x15bd   :  { %2869 = vadd.xlane.f32.xlu0 %v2868_v10  ;;  %6075 = vpow2.f32 %v3021_v37 }
0x15be   :  { %v5781_v6 = vpop.permute.xlu1 %5780 }
0x15bf   :  { %v5782_v20 = vunpack.i.l.bf16 %v5781_v6  ;;  %v5783_v22 = vunpack.i.h.bf16 %v5781_v6 }
0x15c3   :  { %v6076_v5 = vpop.eup %6075 }
0x15c4   :  { %v3026_v7 = vsel %vm1008_vm12, %v6076_v5, 0.0 }
0x15cb   :  { %v5771_v24 = vpop.permute.xlu0 %5770 }
0x15cc   :  { %v5772_v62 = vunpack.i.l.bf16 %v5771_v24  ;;  %5790 = vrot.lane.b32.xlu1 %v5784_v58, %s6214_s23  ;;  %v5773_v63 = vunpack.i.h.bf16 %v5771_v24 }
0x15ce   :  { %2900 = vmatpush.msra.mxu3 %v5772_v62 }
0x15d0   :  { %2901 = vmatpush.msra.mxu3 %v5773_v63 }
0x15d1   :  { %5795 = vrot.lane.b32.xlu0 %v5784_v58, %s6220_s9 }
0x15d2   :  { %3056 = vmatpush.msrb.mxu3 %v5777_v13 }
0x15d4   :  { %3057 = vmatpush.msrb.mxu3 %v5778_v1 }
0x15e4   :  { %3027 = vadd.xlane.f32.xlu2 %v3026_v7 }
0x15e9   :  { %v3170_v11 = vpop.xlane.xlu1 %3169 }
0x15ea   :  { %v3172_v33 = vsub.f32 %v3162_v16, %v3170_v11 }
0x15ec   :  { %v3175_v2 = vmul.f32 1.442695, %v3172_v33  ;;  %v5922_v33 = vld [vmem:[%s7702_s6 + $0x16] ss:$0 sm:$0xff] }
0x15ee   :  { %6077 = vpow2.f32 %v3175_v2 }
0x15f4   :  { %v6078_v12 = vpop.eup %6077 }
0x15f5   :  { %v3180_v9 = vsel %vm1008_vm12, %v6078_v12, 0.0 }
0x15f6   :  { %3181 = vadd.xlane.f32.xlu1 %v3180_v9 }
0x160f   :  { %5800 = vrot.lane.b32.xlu1 %v6893_v44, %s6221_s10 }
0x1616   :  { %v2867_v14 = vpop.xlane.xlu2 %2866 }
0x1617   :  { %6079 = vrcp.f32 %v2867_v14 }
0x161d   :  { %v6080_v17 = vpop.eup %6079 }
0x161e   :  { %v2873_v18 = vmul.f32 %v6080_v17, %v6068_v43  ;;  %v3025_v19 = vpop.xlane.xlu1 %3024  ;;  %v5786_v53 = vpop.permute.xlu2 %5785 }
0x161f   :  { %6081 = vrcp.f32 %v3025_v19  ;;  %v5787_v21 = vunpack.i.l.bf16 %v5786_v53  ;;  %v5788_v23 = vunpack.i.h.bf16 %v5786_v53 }
0x1620   :  { %5447 = vmatmul.msk.f32.vlgmr.msra.gmra.mxu3 %vm1008_vm12, %v2873_v18 }
0x1621   :  { %3210 = vmatpush.msra.mxu3 %v5782_v20  ;;  %2931 = vmatpush.msra.mxu0 %v5787_v21 }
0x1623   :  { %3211 = vmatpush.msra.mxu3 %v5783_v22  ;;  %2932 = vmatpush.msra.mxu0 %v5788_v23  ;;  %v5477_v23 = vld [vmem:[%s7701_s5 + $0x78] sm:$0xff] }
0x1625   :  { %v6082_v30 = vpop.eup %6081 }
0x1626   :  { %v3031_v31 = vmul.f32 %v6082_v30, %v6070_v51  ;;  %v3179_v44 = vpop.xlane.xlu1 %3178  ;;  %v3508_v51 = vld [vmem:[%s7703_s7 + $0x38] sm:$0xff]  ;;  %v5475_v30 = vld [vmem:[%s7701_s5 + $0x68] sm:$0xff] }
0x1627   :  { %6083 = vrcp.f32 %v3179_v44 }
0x1628   :  { %5455 = vmatmul.msk.f32.vlgmr.msrb.gmra.mxu3 %vm1008_vm12, %v3031_v31  ;;  %v5474_v31 = vld [vmem:[%s7701_s5 + $0x60] sm:$0xff] }
0x1629   :  { %3391 = vmatpush.msrb.mxu3 %v5477_v23 }
0x162d   :  { %v6084_v38 = vpop.eup %6083 }
0x162e   :  { %v3185_v15 = vmul.f32 %v6084_v38, %v6072_v50 }
0x1630   :  { %v2870_v16 = vpop.xlane.xlu0 %2869  ;;  %5463 = vmatmul.msk.f32.vlgmr.msra.gmra.mxu3 %vm1008_vm12, %v3185_v15 }
0x1631   :  { %6085 = vrcp.f32 %v2870_v16 }
0x1637   :  { %v6086_v39 = vpop.eup %6085 }
0x1638   :  { %v2874_v40 = vmul.f32 %v6086_v39, %v6074_v59 }
0x163a   :  { %5448 = vmatmul.msk.f32.vlgmr.msra.gmra.mxu0 %vm1008_vm12, %v2874_v40 }
0x163e   :  { %v5791_v32 = vpop.permute.xlu1 %5790 }
0x163f   :  { %v5792_v35 = vunpack.i.l.bf16 %v5791_v32  ;;  %v5793_v41 = vunpack.i.h.bf16 %v5791_v32 }
0x1641   :  { %3085 = vmatpush.msrb.mxu0 %v5792_v35 }
0x1643   :  { %v5796_v42 = vpop.permute.xlu0 %5795  ;;  %3086 = vmatpush.msrb.mxu0 %v5793_v41 }
0x1644   :  { %v5797_v43 = vunpack.i.l.bf16 %v5796_v42  ;;  %v5798_v48 = vunpack.i.h.bf16 %v5796_v42 }
0x1646   :  { %3239 = vmatpush.msra.mxu0 %v5797_v43 }
0x1648   :  { %3240 = vmatpush.msra.mxu0 %v5798_v48 }
0x1657   :  { %v3028_v8 = vpop.xlane.xlu2 %3027 }
0x1658   :  { %6087 = vrcp.f32 %v3028_v8 }
0x165e   :  { %v6088_v29 = vpop.eup %6087 }
0x165f   :  { %v3032_v49 = vmul.f32 %v6088_v29, %v6076_v5 }
0x1661   :  { %5456 = vmatmul.msk.f32.vlgmr.msrb.gmra.mxu0 %vm1008_vm12, %v3032_v49  ;;  %v5923_v49 = vld [vmem:[%s7702_s6 + $0x1b] ss:$0 sm:$0xff] }
0x1662   :  { %3521 = vmatpush.msrb.mxu0 %v3508_v51 }
0x1664   :  { %3522 = vmatpush.msrb.mxu0 %v3507_v3  ;;  %v5924_v3 = vld [vmem:[%s7702_s6 + $0x1c] ss:$0 sm:$0xff] }
0x1666   :  { %3523 = vmatpush.msrb.mxu0 %v3506_v52 }
0x1668   :  { %3524 = vmatpush.msrb.mxu0 %v3505_v28 }
0x1669   :  { %v3182_v50 = vpop.xlane.xlu1 %3181 }
0x166a   :  { %6089 = vrcp.f32 %v3182_v50 }
0x1670   :  { %v6090_v55 = vpop.eup %6089 }
0x1671   :  { %v3186_v25 = vmul.f32 %v6090_v55, %v6078_v12 }
0x1673   :  { %5464 = vmatmul.msk.f32.vlgmr.msra.gmra.mxu0 %vm1008_vm12, %v3186_v25 }
0x167b   :  { %5494 = vmatmul.msk.f32.vlgmr.msrb.gmra.mxu0 %vm54_vm0, %v6760_v4 }
0x1681   :  { %v5801_v24 = vpop.permute.xlu1 %5800 }
0x1682   :  { %v5803_v27 = vunpack.i.h.bf16 %v5801_v24  ;;  %v5802_v62 = vunpack.i.l.bf16 %v5801_v24  ;;  %v5485_v24 = vld [vmem:[%s7701_s5 + $0xa0] sm:$0xff] }
0x1683   :  { %5495 = vmatmul.msk.f32.gmra.mxu0 %vm54_vm0, %v6772_v54 }
0x1684   :  { %3297 = vmatpush.msrb.mxu1 %v5802_v62  ;;  %v5484_v62 = vld [vmem:[%s7701_s5 + $0x98] sm:$0xff] }
0x1686   :  { %3298 = vmatpush.msrb.mxu1 %v5803_v27 }
0x16a3   :  { %v2903_v56 = vpop.f32.mrf.mxu3 }
0x16a4   :  { %2939 = vrot.lane.b32.xlu2 %v2903_v56, %s6222_s11  ;;  %v5488_v56 = vld [vmem:[%s7701_s5 + $0xb8] sm:$0xff] }
0x16ab   :  { %v3059_v58 = vpop.f32.mrf.mxu3 }
0x16ac   :  { %3093 = vrot.lane.b32.xlu0 %v3059_v58, %s6223_s12  ;;  %v5487_v58 = vld [vmem:[%s7701_s5 + $0xb0] sm:$0xff] }
0x16b3   :  { %v3213_v59 = vpop.f32.mrf.mxu3 }
0x16b4   :  { %3247 = vrot.lane.b32.xlu0 %v3213_v59, %s6224_s13 }
0x16b7   :  { %v2934_v10 = vpop.f32.mrf.mxu0 }
0x16b8   :  { %2941 = vrot.lane.b32.xlu2 %v2934_v10, %s6222_s11 }
0x16bc   :  { %5805 = vrot.lane.b32.xlu0 %v6921_v0, %s6221_s10 }
0x16de   :  { %v3088_v61 = vpop.f32.mrf.mxu0 }
0x16df   :  { %3095 = vrot.lane.b32.xlu0 %v3088_v61, %s6223_s12 }
0x16f0   :  { %v3242_v4 = vpop.f32.mrf.mxu0 }
0x16f1   :  { %3249 = vrot.lane.b32.xlu2 %v3242_v4, %s6224_s13  ;;  %v5486_v4 = vld [vmem:[%s7701_s5 + $0xa8] sm:$0xff] }
0x16fe   :  { %v2940_v54 = vpop.permute.xlu2 %2939 }
0x16ff   :  { %2945 = vst.msk [vmem:[#allocation2] sm:$0xff] %vm396_vm2, %v2940_v54 }
0x1712   :  { %v2942_v63 = vpop.permute.xlu2 %2941 }
0x1713   :  { %2946 = vst.msk [vmem:[#allocation2 + $0x8] sm:$0xff] %vm396_vm2, %v2942_v63 }
0x171e   :  { %v3094_v13 = vpop.permute.xlu0 %3093 }
0x171f   :  { %3099 = vst.msk [vmem:[#allocation2] sm:$0xff] %vm537_vm3, %v3094_v13 }
0x1726   :  { %v3248_v0 = vpop.permute.xlu0 %3247 }
0x1727   :  { %3253 = vst.msk [vmem:[#allocation2] sm:$0xff] %vm678_vm4, %v3248_v0 }
0x172e   :  { %v5806_v1 = vpop.permute.xlu0 %5805  ;;  %v3255_v5 = vld [vmem:[#allocation2] sm:$0xff] }
0x172f   :  { %v5808_v36 = vunpack.i.h.bf16 %v5806_v1  ;;  %v5807_v37 = vunpack.i.l.bf16 %v5806_v1 }
0x1731   :  { %3299 = vmatpush.msrb.mxu1 %v5807_v37 }
0x1733   :  { %3300 = vmatpush.msrb.mxu1 %v5808_v36 }
0x1734   :  { %5470 = vmatmul.msk.f32.vlgmr.msrb.gmra.mxu1 %vm54_vm0, %v3255_v5 }
0x174b   :  { %v3250_v7 = vpop.permute.xlu2 %3249 }
0x1751   :  { %v3096_v6 = vpop.permute.xlu0 %3095 }
0x1752   :  { %3100 = vst.msk [vmem:[#allocation2 + $0x8] sm:$0xff] %vm537_vm3, %v3096_v6 }
0x1753   :  { %3254 = vst.msk [vmem:[#allocation2 + $0x8] sm:$0xff] %vm678_vm4, %v3250_v7 }
0x175a   :  { %v3256_v11 = vld [vmem:[#allocation2 + $0x8] sm:$0xff] }
0x175b   :  { %5471 = vmatmul.msk.f32.gmra.mxu1 %vm54_vm0, %v3256_v11 }
0x17b1   :  { %v3302_v2 = vpop.f32.mrf.mxu1 }
0x17b2   :  { %v3303_v12 = vadd.f32 %v5922_v33, %v3302_v2  ;;  %v5483_v2 = vld [vmem:[%s7701_s5 + $0x90] sm:$0xff] }
0x17b4   :  { %v3308_v9 = vadd.f32 %v3303_v12, %v6945_v45  ;;  %v5482_v12 = vld [vmem:[%s7701_s5 + $0x88] sm:$0xff] }
0x17b6   :  { %v3312_v14 = vsel %vm54_vm0, %v3308_v9, 0.0  ;;  %v3320_v17 = vmul.f32 %v3308_v9, %v3308_v9 }
0x17b7   :  { %3313 = vadd.xlane.f32.xlu0 %v3312_v14  ;;  %v5925_v14 = vld [vmem:[%s7702_s6 + $0x17] ss:$0 sm:$0xff] }
0x17b8   :  { %v3322_v18 = vsel %vm54_vm0, %v3320_v17, 0.0 }
0x17b9   :  { %3323 = vadd.xlane.f32.xlu2 %v3322_v18 }
0x17d8   :  { %v3305_v19 = vpop.f32.mrf.mxu1 }
0x17d9   :  { %v3306_v53 = vadd.f32 %v5922_v33, %v3305_v19 }
0x17db   :  { %v7114_v20 = vadd.f32 %v3306_v53, %v6953_v46  ;;  %v5476_v46 = vld [vmem:[%s7701_s5 + $0x70] sm:$0xff] }
0x17dc   :  { %3392 = vmatpush.msrb.mxu3 %v5476_v46 }
0x17dd   :  { %v3315_v21 = vsel %vm54_vm0, %v7114_v20, 0.0  ;;  %v3321_v22 = vmul.f32 %v7114_v20, %v7114_v20 }
0x17de   :  { %3316 = vadd.xlane.f32.xlu1 %v3315_v21  ;;  %3393 = vmatpush.msrb.mxu3 %v5475_v30 }
0x17df   :  { %v3325_v45 = vsel %vm54_vm0, %v3321_v22, 0.0  ;;  %v5926_v22 = vld [vmem:[%s7702_s6 + $0x18] ss:$0 sm:$0xff] }
0x17e0   :  { %3326 = vadd.xlane.f32.xlu0 %v3325_v45  ;;  %3394 = vmatpush.msrb.mxu3 %v5474_v31 }
0x17e2   :  { %3428 = vmatpush.msra.mxu3 %v5488_v56  ;;  %v5499_v56 = vld [vmem:[%s7700_s4 + $0x90] sm:$0xff] }
0x17e4   :  { %3429 = vmatpush.msra.mxu3 %v5487_v58 }
0x17e6   :  { %3430 = vmatpush.msra.mxu3 %v5486_v4 }
0x17e8   :  { %3431 = vmatpush.msra.mxu3 %v5485_v24 }
0x17ea   :  { %3432 = vmatpush.msra.mxu3 %v5484_v62  ;;  %v5927_v62 = vld [vmem:[%s7702_s6 + $0x1d] ss:$0 sm:$0xff] }
0x17ec   :  { %3433 = vmatpush.msra.mxu3 %v5483_v2 }
0x17ee   :  { %3434 = vmatpush.msra.mxu3 %v5482_v12 }
0x182a   :  { %v3314_v44 = vpop.xlane.xlu0 %3313 }
0x182b   :  { %v3318_v38 = vmul.f32 %v3314_v44, %v6460_v60 }
0x182c   :  { %v3324_v15 = vpop.xlane.xlu2 %3323 }
0x182d   :  { %v3332_v16 = vmul.f32 %v3318_v38, %v3318_v38  ;;  %v3328_v39 = vmul.f32 %v3324_v15, %v6460_v60  ;;  %v3330_v29 = vsub.f32 %v3308_v9, %v3318_v38  ;;  %v5481_v9 = vld [vmem:[%s7701_s5 + $0x80] sm:$0xff] }
0x182e   :  { %3435 = vmatpush.msra.mxu3 %v5481_v9 }
0x182f   :  { %v3334_v40 = vsub.f32 %v3328_v39, %v3332_v16 }
0x1831   :  { %v3336_v32 = vadd.f32 1e-05, %v3334_v40 }
0x1833   :  { %6091 = vrsqrt.f32 %v3336_v32  ;;  %vm3344_vm14 = vweird.f32 %v3336_v32 }
0x1839   :  { %v6092_v35 = vpop.eup %6091 }
0x183a   :  { %v3339_v41 = vmul.f32 %v6092_v35, %v3336_v32  ;;  %vm3345_vm13 = vweird.f32 %v6092_v35 }
0x183b   :  { %vm3346_vm15 = vmor %vm3344_vm14, %vm3345_vm13 }
0x183c   :  { %v3340_v42 = vmul.f32 %v6092_v35, %v3339_v41  ;;  %v3503_v41 = vld [vmem:[%s7703_s7 + $0x10] sm:$0xff] }
0x183e   :  { %v3341_v43 = vmul.f32 0.5, %v3340_v42  ;;  %v3502_v42 = vld [vmem:[%s7703_s7 + $0x8] sm:$0xff] }
0x1840   :  { %v3342_v48 = vsub.f32 1.5, %v3341_v43  ;;  %v3501_v43 = vld [vmem:[%s7703_s7] sm:$0xff] }
0x1842   :  { %v3343_v8 = vmul.f32 %v6092_v35, %v3342_v48 }
0x1844   :  { %v3347_v51 = vsel %vm3346_vm15, %v6092_v35, %v3343_v8  ;;  %v3504_v35 = vld [vmem:[%s7703_s7 + $0x18] sm:$0xff] }
0x1845   :  { %v3358_v52 = vmul.f32 %v3347_v51, %v3330_v29  ;;  %3550 = vmatpush.msra.mxu1 %v3504_v35  ;;  %v5500_v29 = vld [vmem:[%s7700_s4 + $0xa0] sm:$0xff] }
0x1846   :  { %v7240_v35 = vld [vmem:[%s7697_s1] sm:$0xff] }
0x1847   :  { %v3361_v28 = vmul.f32 %v5923_v49, %v3358_v52  ;;  %3551 = vmatpush.msra.mxu1 %v3503_v41 }
0x1849   :  { %v3364_v50 = vadd.f32 %v5924_v3, %v3361_v28  ;;  %3552 = vmatpush.msra.mxu1 %v3502_v42 }
0x184b   :  { %5479 = vmatmul.msk.f32.vlgmr.msrb.gmra.mxu3 %vm54_vm0, %v3364_v50  ;;  %3553 = vmatpush.msra.mxu1 %v3501_v43 }
0x1851   :  { %v3317_v55 = vpop.xlane.xlu1 %3316 }
0x1852   :  { %v3319_v25 = vmul.f32 %v3317_v55, %v6460_v60 }
0x1853   :  { %v3327_v59 = vpop.xlane.xlu0 %3326 }
0x1854   :  { %v3333_v10 = vmul.f32 %v3319_v25, %v3319_v25  ;;  %v3329_v61 = vmul.f32 %v3327_v59, %v6460_v60  ;;  %v3331_v5 = vsub.f32 %v7114_v20, %v3319_v25  ;;  %v5498_v25 = vld [vmem:[%s7700_s4 + $0x80] sm:$0xff] }
0x1855   :  { %v7217_v58 = vpack.i.bf16 %v5498_v25, %v5499_v56 }
0x1856   :  { %v3335_v54 = vsub.f32 %v3329_v61, %v3333_v10 }
0x1858   :  { %v3337_v27 = vadd.f32 1e-05, %v3335_v54 }
0x185a   :  { %6093 = vrsqrt.f32 %v3337_v27  ;;  %vm3354_vm6 = vweird.f32 %v3337_v27 }
0x1860   :  { %v6094_v63 = vpop.eup %6093 }
0x1861   :  { %v3349_v13 = vmul.f32 %v6094_v63, %v3337_v27  ;;  %vm3355_vm5 = vweird.f32 %v6094_v63 }
0x1862   :  { %vm3356_vm7 = vmor %vm3354_vm6, %vm3355_vm5 }
0x1863   :  { %v3350_v0 = vmul.f32 %v6094_v63, %v3349_v13  ;;  %v5928_v13 = vld [vmem:[%s7702_s6 + $0x1e] ss:$0 sm:$0xff] }
0x1865   :  { %v3351_v1 = vmul.f32 0.5, %v3350_v0 }
0x1867   :  { %v3352_v36 = vsub.f32 1.5, %v3351_v1 }
0x1869   :  { %v3353_v37 = vmul.f32 %v6094_v63, %v3352_v36 }
0x186b   :  { %v3357_v6 = vsel %vm3356_vm7, %v6094_v63, %v3353_v37 }
0x186c   :  { %v3359_v7 = vmul.f32 %v3357_v6, %v3331_v5 }
0x186e   :  { %v3362_v11 = vmul.f32 %v5923_v49, %v3359_v7  ;;  %v5501_v49 = vld [vmem:[%s7700_s4 + $0xb0] sm:$0xff] }
0x186f   :  { %3593 = vmatpush.msra.mxu2 %v5501_v49 }
0x1870   :  { %v3365_v33 = vadd.f32 %v5924_v3, %v3362_v11  ;;  %v7206_v3 = vpack.i.bf16 %v5500_v29, %v5501_v49 }
0x1871   :  { %3594 = vmatpush.msra.mxu2 %v5500_v29  ;;  %v7252_v29 = vld [vmem:[%s7697_s1 + $0x8] sm:$0xff] }
0x1872   :  { %5480 = vmatmul.msk.f32.gmra.mxu3 %vm54_vm0, %v3365_v33 }
0x1873   :  { %3595 = vmatpush.msra.mxu2 %v5499_v56 }
0x1875   :  { %3596 = vmatpush.msra.mxu2 %v5498_v25 }
0x18ce   :  { %v3396_v17 = vpop.f32.mrf.mxu3 }
0x18cf   :  { %v3397_v18 = vadd.f32 %v5925_v14, %v3396_v17 }
0x18d1   :  { %v3402_v19 = vmax.f32 %v3397_v18, 0.0 }
0x18d3   :  { %5490 = vmatmul.msk.f32.vlgmr.msra.gmra.mxu3 %vm1703_vm8, %v3402_v19 }
0x18f5   :  { %v3399_v53 = vpop.f32.mrf.mxu3 }
0x18f6   :  { %v3400_v20 = vadd.f32 %v5925_v14, %v3399_v53 }
0x18f8   :  { %v3403_v21 = vmax.f32 %v3400_v20, 0.0 }
0x18fa   :  { %5491 = vmatmul.msk.f32.gmra.mxu3 %vm1703_vm8, %v3403_v21 }
0x1956   :  { %v3437_v45 = vpop.f32.mrf.mxu3 }
0x1957   :  { %v3438_v23 = vadd.f32 %v5926_v22, %v3437_v45 }
0x1959   :  { %v3443_v46 = vadd.f32 %v3438_v23, %v3364_v50 }
0x195b   :  { %v3447_v30 = vsel %vm54_vm0, %v3443_v46, 0.0  ;;  %v3455_v31 = vmul.f32 %v3443_v46, %v3443_v46 }
0x195c   :  { %3448 = vadd.xlane.f32.xlu2 %v3447_v30 }
0x195d   :  { %v3457_v44 = vsel %vm54_vm0, %v3455_v31, 0.0 }
0x195e   :  { %3458 = vadd.xlane.f32.xlu1 %v3457_v44 }
0x1977   :  { %5810 = vrot.lane.b32.xlu1 %v7206_v3, %s6213_s17 }
0x197d   :  { %v3440_v38 = vpop.f32.mrf.mxu3 }
0x197e   :  { %v3441_v15 = vadd.f32 %v5926_v22, %v3440_v38 }
0x1980   :  { %v7180_v16 = vadd.f32 %v3441_v15, %v3365_v33  ;;  %v5929_v15 = vld [vmem:[%s7703_s7 + $0x40] ss:$0 sm:$0xff]  ;;  %s5283_s7 = sshll.u32 %s7704_s8, 4  ;;  %s5284_s7 = int_to_ptr.hbm [resolvable:$true] %s5283_s7 }
0x1982   :  { %v3450_v39 = vsel %vm54_vm0, %v7180_v16, 0.0  ;;  %v3456_v40 = vmul.f32 %v7180_v16, %v7180_v16 }
0x1983   :  { %3451 = vadd.xlane.f32.xlu0 %v3450_v39 }
0x1984   :  { %v3460_v32 = vsel %vm54_vm0, %v3456_v40, 0.0 }
0x1985   :  { %3461 = vadd.xlane.f32.xlu2 %v3460_v32 }
0x1997   :  { %5815 = vrot.lane.b32.xlu0 %v7217_v58, %s6213_s17 }
0x19cf   :  { %v3449_v48 = vpop.xlane.xlu2 %3448 }
0x19d0   :  { %v3453_v8 = vmul.f32 %v3449_v48, %v6460_v60 }
0x19d1   :  { %v3459_v51 = vpop.xlane.xlu1 %3458 }
0x19d2   :  { %v3467_v52 = vmul.f32 %v3453_v8, %v3453_v8  ;;  %v3463_v28 = vmul.f32 %v3459_v51, %v6460_v60  ;;  %v3465_v27 = vsub.f32 %v3443_v46, %v3453_v8  ;;  %v5930_v51 = vld [vmem:[%s7702_s6 + $0x21] ss:$0 sm:$0xff] }
0x19d4   :  { %v3469_v50 = vsub.f32 %v3463_v28, %v3467_v52 }
0x19d6   :  { %v3471_v55 = vadd.f32 1e-05, %v3469_v50  ;;  %v5931_v50 = vld [vmem:[%s7702_s6 + $0x20] ss:$0 sm:$0xff] }
0x19d8   :  { %6095 = vrsqrt.f32 %v3471_v55  ;;  %vm3479_vm10 = vweird.f32 %v3471_v55 }
0x19de   :  { %v6096_v59 = vpop.eup %6095 }
0x19df   :  { %v3474_v10 = vmul.f32 %v6096_v59, %v3471_v55  ;;  %vm3480_vm9 = vweird.f32 %v6096_v59 }
0x19e0   :  { %vm3481_vm11 = vmor %vm3479_vm10, %vm3480_vm9 }
0x19e1   :  { %v3475_v61 = vmul.f32 %v6096_v59, %v3474_v10 }
0x19e3   :  { %v3476_v4 = vmul.f32 0.5, %v3475_v61 }
0x19e5   :  { %v3477_v54 = vsub.f32 1.5, %v3476_v4 }
0x19e7   :  { %v3478_v24 = vmul.f32 %v6096_v59, %v3477_v54 }
0x19e9   :  { %v3482_v63 = vsel %vm3481_vm11, %v6096_v59, %v3478_v24  ;;  %v5811_v23 = vpop.permute.xlu1 %5810 }
0x19ea   :  { %v3493_v0 = vmul.f32 %v3482_v63, %v3465_v27  ;;  %v5813_v46 = vunpack.i.h.bf16 %v5811_v23  ;;  %v5812_v30 = vunpack.i.l.bf16 %v5811_v23 }
0x19ec   :  { %v3496_v1 = vmul.f32 %v5927_v62, %v3493_v0  ;;  %3640 = vmatpush.msra.mxu0 %v5812_v30 }
0x19ee   :  { %v3499_v36 = vadd.f32 %v5928_v13, %v3496_v1  ;;  %3641 = vmatpush.msra.mxu0 %v5813_v46 }
0x19f0   :  { %5496 = vmatmul.msk.f32.vlgmr.msra.gmra.mxu1 %vm54_vm0, %v3499_v36 }
0x19f6   :  { %v3452_v37 = vpop.xlane.xlu0 %3451 }
0x19f7   :  { %v3454_v5 = vmul.f32 %v3452_v37, %v6460_v60 }
0x19f8   :  { %v3462_v6 = vpop.xlane.xlu2 %3461 }
0x19f9   :  { %v3468_v7 = vmul.f32 %v3454_v5, %v3454_v5  ;;  %v3464_v11 = vmul.f32 %v3462_v6, %v6460_v60  ;;  %v3466_v53 = vsub.f32 %v7180_v16, %v3454_v5  ;;  %v3526_v16 = vpop.f32.mrf.mxu0 }
0x19fb   :  { %v3470_v33 = vsub.f32 %v3464_v11, %v3468_v7 }
0x19fd   :  { %v3472_v2 = vadd.f32 1e-05, %v3470_v33 }
0x19ff   :  { %6097 = vrsqrt.f32 %v3472_v2  ;;  %vm3489_vm14 = vweird.f32 %v3472_v2 }
0x1a01   :  { %v3529_v42 = vpop.f32.mrf.mxu0 }
0x1a05   :  { %v6098_v12 = vpop.eup %6097 }
0x1a06   :  { %v3484_v9 = vmul.f32 %v6098_v12, %v3472_v2  ;;  %vm3490_vm13 = vweird.f32 %v6098_v12 }
0x1a07   :  { %vm3491_vm15 = vmor %vm3489_vm14, %vm3490_vm13 }
0x1a08   :  { %v3485_v14 = vmul.f32 %v6098_v12, %v3484_v9 }
0x1a09   :  { %v5816_v31 = vpop.permute.xlu0 %5815 }
0x1a0a   :  { %v3486_v17 = vmul.f32 0.5, %v3485_v14  ;;  %v5818_v44 = vunpack.i.h.bf16 %v5816_v31  ;;  %v5817_v38 = vunpack.i.l.bf16 %v5816_v31 }
0x1a0c   :  { %v3487_v18 = vsub.f32 1.5, %v3486_v17  ;;  %3642 = vmatpush.msra.mxu0 %v5817_v38 }
0x1a0e   :  { %v3488_v19 = vmul.f32 %v6098_v12, %v3487_v18  ;;  %3643 = vmatpush.msra.mxu0 %v5818_v44 }
0x1a10   :  { %v3492_v20 = vsel %vm3491_vm15, %v6098_v12, %v3488_v19 }
0x1a11   :  { %v3494_v21 = vmul.f32 %v3492_v20, %v3466_v53 }
0x1a13   :  { %v3497_v22 = vmul.f32 %v5927_v62, %v3494_v21 }
0x1a15   :  { %v3500_v45 = vadd.f32 %v5928_v13, %v3497_v22 }
0x1a17   :  { %5497 = vmatmul.msk.f32.gmra.mxu1 %vm54_vm0, %v3500_v45 }
0x1a6d   :  { %v3555_v39 = vpop.f32.mrf.mxu1 }
0x1a6e   :  { %v3556_v40 = vadd.f32 %v3555_v39, %v3526_v16 }
0x1a70   :  { %v7235_v32 = vadd.f32 %v5929_v15, %v3556_v40 }
0x1a72   :  { %v3565_v41 = vadd.f32 %v7240_v35, %v7235_v32  ;;  %5506 = vmatmul.msk.f32.vlgmr.msra.gmra.mxu0 %vm54_vm0, %v7235_v32 }
0x1a74   :  { %5503 = vmatmul.msk.f32.vlgmr.msra.gmra.mxu2 %vm54_vm0, %v3565_v41 }
0x1a94   :  { %v3558_v43 = vpop.f32.mrf.mxu1 }
0x1a95   :  { %v3559_v48 = vadd.f32 %v3558_v43, %v3529_v42 }
0x1a97   :  { %v7247_v8 = vadd.f32 %v5929_v15, %v3559_v48 }
0x1a99   :  { %v3566_v49 = vadd.f32 %v7252_v29, %v7247_v8  ;;  %5507 = vmatmul.msk.f32.gmra.mxu0 %vm54_vm0, %v7247_v8 }
0x1a9b   :  { %5504 = vmatmul.msk.f32.gmra.mxu2 %vm54_vm0, %v3566_v49 }
0x1aef   :  { %v3645_v52 = vpop.f32.mrf.mxu0 }
0x1af0   :  { %v7262_v28 = vadd.f32 %v5930_v51, %v3645_v52 }
0x1af2   :  { %3745 = vmatpush.msrb.mxu2 %v7262_v28 }
0x1af7   :  { %v3598_v55 = vpop.f32.mrf.mxu2 }
0x1af8   :  { %v3599_v25 = vadd.f32 %v5931_v50, %v3598_v55 }
0x1afa   :  { %3777 = vrot.lane.b32.xlu1 %v3599_v25, %s6215_s24  ;;  %3652 = vrot.lane.b32.xlu2 %v3599_v25, %s6216_s25 }
0x1afb   :  { %3775 = vrot.lane.b32.xlu0 %v3599_v25, %s6217_s26 }
0x1b02   :  { %3919 = vrot.lane.b32.xlu1 %v3599_v25, %s6218_s29 }
0x1b16   :  { %v3648_v10 = vpop.f32.mrf.mxu0 }
0x1b17   :  { %v7282_v61 = vadd.f32 %v5930_v51, %v3648_v10 }
0x1b19   :  { %v7311_v30 = vpack.i.bf16 %v7282_v61, %v7262_v28 }
0x1b1e   :  { %v3601_v56 = vpop.f32.mrf.mxu2 }
0x1b1f   :  { %v3602_v59 = vadd.f32 %v5931_v50, %v3601_v56 }
0x1b21   :  { %3947 = vrot.lane.b32.xlu1 %v3602_v59, %s6218_s29  ;;  %3805 = vrot.lane.b32.xlu2 %v3602_v59, %s6215_s24 }
0x1b22   :  { %3679 = vrot.lane.b32.xlu0 %v3602_v59, %s6216_s25 }
0x1b29   :  { %4057 = vrot.lane.b32.xlu1 %v3599_v25, %s6220_s9  ;;  %3917 = vrot.lane.b32.xlu2 %v3599_v25, %s6214_s23 }
0x1b2a   :  { %3803 = vrot.lane.b32.xlu0 %v3602_v59, %s6217_s26 }
0x1b31   :  { %3945 = vrot.lane.b32.xlu2 %v3602_v59, %s6214_s23 }
0x1b32   :  { %4059 = vrot.lane.b32.xlu0 %v3599_v25, %s6219_s30 }
0x1b39   :  { %4085 = vrot.lane.b32.xlu2 %v3602_v59, %s6220_s9 }
0x1b3a   :  { %4087 = vrot.lane.b32.xlu0 %v3602_v59, %s6219_s30 }
0x1b54   :  { %v3653_v4 = vpop.permute.xlu2 %3652 }
0x1b55   :  { %5508 = vmatpush.xpose.msk.msrb.mxu3 %vm134_vm1, %v3653_v4 }
0x1b58   :  { %5509 = vmatmul.msk.f32.vlgmr.msrb.gmra.mxu3 %vm134_vm1, %v3599_v25 }
0x1b59   :  { %3768 = vmatpush.msra.mxu3 %v7282_v61 }
0x1b6c   :  { %v3778_v54 = vpop.permute.xlu1 %3777 }
0x1b6d   :  { %5514 = vmatpush.xpose.msk.msrb.mxu0 %vm134_vm1, %v3778_v54  ;;  %v3776_v24 = vpop.permute.xlu0 %3775 }
0x1b70   :  { %5515 = vmatmul.msk.f32.vlgmr.msrb.gmra.mxu0 %vm134_vm1, %v3776_v24 }
0x1b74   :  { %v3920_v27 = vpop.permute.xlu1 %3919 }
0x1b75   :  { %5520 = vmatpush.xpose.msk.msra.mxu0 %vm134_vm1, %v3920_v27 }
0x1b7b   :  { %v3806_v62 = vpop.permute.xlu2 %3805 }
0x1b83   :  { %v3918_v63 = vpop.permute.xlu2 %3917 }
0x1b84   :  { %5521 = vmatmul.msk.f32.vlgmr.msra.gmra.mxu0 %vm134_vm1, %v3918_v63 }
0x1b8b   :  { %v3946_v37 = vpop.permute.xlu2 %3945 }
0x1b93   :  { %v3948_v0 = vpop.permute.xlu1 %3947  ;;  %v4086_v7 = vpop.permute.xlu2 %4085 }
0x1b94   :  { %v3680_v13 = vpop.permute.xlu0 %3679 }
0x1b95   :  { %5510 = vmatpush.xpose.msk.msrb.mxu1 %vm134_vm1, %v3680_v13 }
0x1b98   :  { %5511 = vmatmul.msk.f32.vlgmr.msrb.gmra.mxu1 %vm134_vm1, %v3602_v59 }
0x1b99   :  { %5516 = vmatpush.xpose.msk.msra.mxu1 %vm134_vm1, %v3806_v62 }
0x1b9b   :  { %v4058_v5 = vpop.permute.xlu1 %4057 }
0x1b9c   :  { %v3804_v1 = vpop.permute.xlu0 %3803 }
0x1b9d   :  { %5522 = vmatpush.xpose.msk.msrb.mxu1 %vm134_vm1, %v3948_v0 }
0x1ba0   :  { %5517 = vmatmul.msk.f32.vlgmr.msra.gmra.mxu1 %vm134_vm1, %v3804_v1 }
0x1ba4   :  { %v4060_v36 = vpop.permute.xlu0 %4059 }
0x1ba5   :  { %5526 = vmatpush.xpose.msk.msrb.mxu0 %vm134_vm1, %v4060_v36 }
0x1ba8   :  { %5523 = vmatmul.msk.f32.vlgmr.msrb.gmra.mxu1 %vm134_vm1, %v3946_v37  ;;  %5527 = vmatmul.msk.f32.vlgmr.msrb.gmra.mxu0 %vm134_vm1, %v4058_v5 }
0x1bac   :  { %v4088_v6 = vpop.permute.xlu0 %4087 }
0x1bad   :  { %5528 = vmatpush.xpose.msk.msra.mxu1 %vm134_vm1, %v4088_v6 }
0x1bb0   :  { %5529 = vmatmul.msk.f32.vlgmr.msra.gmra.mxu1 %vm134_vm1, %v4086_v7 }
0x1bdb   :  { %v3675_v11 = vpop.f32.mrf.mxu3 }
0x1bdc   :  { %v3705_v33 = vsel %vm134_vm1, %v3675_v11, -inf }
0x1bdd   :  { %3706 = vmax.xlane.f32.xlu1 %v3705_v33 }
0x1bed   :  { %v3800_v2 = vpop.f32.mrf.mxu0 }
0x1bee   :  { %v3831_v12 = vsel %vm134_vm1, %v3800_v2, -inf }
0x1bef   :  { %3832 = vmax.xlane.f32.xlu2 %v3831_v12 }
0x1c01   :  { %v3942_v9 = vpop.f32.mrf.mxu0 }
0x1c02   :  { %v3973_v14 = vsel %vm134_vm1, %v3942_v9, -inf }
0x1c03   :  { %3974 = vmax.xlane.f32.xlu2 %v3973_v14 }
0x1c15   :  { %v3702_v17 = vpop.f32.mrf.mxu1 }
0x1c16   :  { %v3708_v18 = vsel %vm134_vm1, %v3702_v17, -inf }
0x1c17   :  { %3709 = vmax.xlane.f32.xlu0 %v3708_v18 }
0x1c1d   :  { %v3828_v19 = vpop.f32.mrf.mxu1 }
0x1c1e   :  { %v3834_v23 = vsel %vm134_vm1, %v3828_v19, -inf }
0x1c25   :  { %v3970_v53 = vpop.f32.mrf.mxu1  ;;  %v4082_v20 = vpop.f32.mrf.mxu0 }
0x1c26   :  { %v3976_v21 = vsel %vm134_vm1, %v3970_v53, -inf  ;;  %v4113_v22 = vsel %vm134_vm1, %v4082_v20, -inf }
0x1c27   :  { %3977 = vmax.xlane.f32.xlu0 %v3976_v21  ;;  %4114 = vmax.xlane.f32.xlu1 %v4113_v22 }
0x1c2d   :  { %v4110_v45 = vpop.f32.mrf.mxu1 }
0x1c2e   :  { %v4116_v46 = vsel %vm134_vm1, %v4110_v45, -inf }
0x1c2f   :  { %3835 = vmax.xlane.f32.xlu1 %v3834_v23  ;;  %4117 = vmax.xlane.f32.xlu2 %v4116_v46 }
0x1c47   :  { %5820 = vrot.lane.b32.xlu2 %v7311_v30, %s6217_s26 }
0x1c50   :  { %v3707_v31 = vpop.xlane.xlu1 %3706 }
0x1c51   :  { %v3711_v44 = vsub.f32 %v3675_v11, %v3707_v31 }
0x1c53   :  { %v3713_v38 = vmul.f32 1.442695, %v3711_v44 }
0x1c55   :  { %6099 = vpow2.f32 %v3713_v38 }
0x1c5b   :  { %v7315_v15 = vpop.eup %6099 }
0x1c5c   :  { %v3717_v16 = vsel %vm134_vm1, %v7315_v15, 0.0 }
0x1c5d   :  { %3718 = vadd.xlane.f32.xlu0 %v3717_v16 }
0x1c62   :  { %v3833_v39 = vpop.xlane.xlu2 %3832 }
0x1c63   :  { %v3837_v40 = vsub.f32 %v3800_v2, %v3833_v39 }
0x1c65   :  { %v3839_v41 = vmul.f32 1.442695, %v3837_v40 }
0x1c67   :  { %6101 = vpow2.f32 %v3839_v41 }
0x1c6d   :  { %v7319_v42 = vpop.eup %6101 }
0x1c6e   :  { %v3843_v43 = vsel %vm134_vm1, %v7319_v42, 0.0 }
0x1c70   :  { %3844 = vadd.xlane.f32.xlu2 %v3843_v43 }
0x1c76   :  { %v3975_v48 = vpop.xlane.xlu2 %3974 }
0x1c77   :  { %v3979_v49 = vsub.f32 %v3942_v9, %v3975_v48 }
0x1c79   :  { %v3981_v51 = vmul.f32 1.442695, %v3979_v49 }
0x1c7b   :  { %6103 = vpow2.f32 %v3981_v51 }
0x1c81   :  { %v7323_v52 = vpop.eup %6103 }
0x1c82   :  { %v3985_v50 = vsel %vm134_vm1, %v7323_v52, 0.0 }
0x1c83   :  { %3986 = vadd.xlane.f32.xlu1 %v3985_v50 }
0x1c88   :  { %4161 = vrot.lane.b32.xlu2 %v7282_v61, %s6220_s9 }
0x1c8a   :  { %v3710_v55 = vpop.xlane.xlu0 %3709 }
0x1c8b   :  { %v3712_v25 = vsub.f32 %v3702_v17, %v3710_v55 }
0x1c8d   :  { %v3715_v56 = vmul.f32 1.442695, %v3712_v25 }
0x1c8f   :  { %6105 = vpow2.f32 %v3715_v56 }
0x1c90   :  { %5830 = vrot.lane.b32.xlu2 %v7206_v3, %s6221_s10 }
0x1c95   :  { %v6106_v59 = vpop.eup %6105 }
0x1c96   :  { %v3720_v10 = vsel %vm134_vm1, %v6106_v59, 0.0 }
0x1c97   :  { %3721 = vadd.xlane.f32.xlu1 %v3720_v10 }
0x1c9a   :  { %v4115_v4 = vpop.xlane.xlu1 %4114  ;;  %v3978_v27 = vpop.xlane.xlu0 %3977 }
0x1c9b   :  { %v4119_v54 = vsub.f32 %v4082_v20, %v4115_v4  ;;  %v3980_v0 = vsub.f32 %v3970_v53, %v3978_v27 }
0x1c9d   :  { %v4121_v24 = vmul.f32 1.442695, %v4119_v54  ;;  %v3983_v5 = vmul.f32 1.442695, %v3980_v0 }
0x1c9f   :  { %6107 = vpow2.f32 %v4121_v24 }
0x1ca2   :  { %v3836_v62 = vpop.xlane.xlu1 %3835  ;;  %v4118_v63 = vpop.xlane.xlu2 %4117 }
0x1ca3   :  { %v3838_v13 = vsub.f32 %v3828_v19, %v3836_v62  ;;  %v4120_v61 = vsub.f32 %v4110_v45, %v4118_v63 }
0x1ca5   :  { %v3841_v1 = vmul.f32 1.442695, %v3838_v13  ;;  %v4123_v36 = vmul.f32 1.442695, %v4120_v61  ;;  %v7332_v37 = vpop.eup %6107 }
0x1ca6   :  { %v4125_v3 = vsel %vm134_vm1, %v7332_v37, 0.0 }
0x1ca7   :  { %6109 = vpow2.f32 %v3841_v1  ;;  %4126 = vadd.xlane.f32.xlu1 %v4125_v3 }
0x1ca8   :  { %6111 = vpow2.f32 %v4123_v36 }
0x1ca9   :  { %6113 = vpow2.f32 %v3983_v5 }
0x1caa   :  { %v5821_v6 = vpop.permute.xlu2 %5820 }
0x1cab   :  { %v5823_v7 = vunpack.i.h.bf16 %v5821_v6  ;;  %v5822_v11 = vunpack.i.l.bf16 %v5821_v6 }
0x1cad   :  { %v6110_v33 = vpop.eup %6109  ;;  %3875 = vmatpush.msra.mxu2 %v5822_v11  ;;  %3902 = vmatpush.msrb.mxu3 %v5823_v7  ;;  %v5543_v7 = vld [vmem:[%s7700_s4 + $0xa8] sm:$0xff]  ;;  %v5544_v11 = vld [vmem:[%s7700_s4 + $0xb8] sm:$0xff] }
0x1cae   :  { %v6112_v2 = vpop.eup %6111  ;;  %v3846_v12 = vsel %vm134_vm1, %v6110_v33, 0.0  ;;  %4334 = vmatpush.msrb.mxu1 %v5544_v11 }
0x1caf   :  { %3847 = vadd.xlane.f32.xlu0 %v3846_v12  ;;  %v4128_v9 = vsel %vm134_vm1, %v6112_v2, 0.0  ;;  %v6114_v14 = vpop.eup %6113  ;;  %v5542_v12 = vld [vmem:[%s7700_s4 + $0x98] sm:$0xff] }
0x1cb0   :  { %4129 = vadd.xlane.f32.xlu1 %v4128_v9  ;;  %v3988_v17 = vsel %vm134_vm1, %v6114_v14, 0.0  ;;  %4335 = vmatpush.msrb.mxu1 %v5543_v7 }
0x1cb2   :  { %4336 = vmatpush.msrb.mxu1 %v5542_v12 }
0x1cb7   :  { %3989 = vadd.xlane.f32.xlu0 %v3988_v17 }
0x1cc9   :  { %4135 = vrot.lane.b32.xlu1 %v7262_v28, %s6220_s9 }
0x1ccb   :  { %5825 = vrot.lane.b32.xlu0 %v7311_v30, %s6214_s23 }
0x1cd0   :  { %v3719_v18 = vpop.xlane.xlu0 %3718 }
0x1cd1   :  { %6115 = vrcp.f32 %v3719_v18 }
0x1cd3   :  { %5835 = vrot.lane.b32.xlu0 %v7217_v58, %s6221_s10 }
0x1cd7   :  { %v6116_v19 = vpop.eup %6115 }
0x1cd8   :  { %v3725_v53 = vmul.f32 %v6116_v19, %v7315_v15 }
0x1cda   :  { %5512 = vmatmul.msk.f32.vlgmr.msrb.gmra.mxu2 %vm134_vm1, %v3725_v53 }
0x1ce3   :  { %v3845_v20 = vpop.xlane.xlu2 %3844 }
0x1ce4   :  { %6117 = vrcp.f32 %v3845_v20 }
0x1cea   :  { %v6118_v21 = vpop.eup %6117 }
0x1ceb   :  { %v3851_v22 = vmul.f32 %v6118_v21, %v7319_v42  ;;  %v4162_v49 = vpop.permute.xlu2 %4161 }
0x1ced   :  { %5518 = vmatmul.msk.f32.vlgmr.msra.gmra.mxu2 %vm134_vm1, %v3851_v22 }
0x1cf3   :  { %v5831_v24 = vpop.permute.xlu2 %5830 }
0x1cf4   :  { %v5833_v27 = vunpack.i.h.bf16 %v5831_v24  ;;  %v5832_v62 = vunpack.i.l.bf16 %v5831_v24 }
0x1cf6   :  { %v3987_v28 = vpop.xlane.xlu1 %3986  ;;  %4239 = vmatpush.msra.mxu0 %v5832_v62 }
0x1cf8   :  { %4240 = vmatpush.msra.mxu0 %v5833_v27 }
0x1d0a   :  { %v3722_v45 = vpop.xlane.xlu1 %3721 }
0x1d0b   :  { %6119 = vrcp.f32 %v3722_v45 }
0x1d11   :  { %v6120_v23 = vpop.eup %6119 }
0x1d12   :  { %v3726_v46 = vmul.f32 %v6120_v23, %v6106_v59  ;;  %v5932_v23 = vld [vmem:[%s7702_s6 + $0x22] ss:$0 sm:$0xff] }
0x1d14   :  { %5513 = vmatmul.msk.f32.vlgmr.msra.gmra.mxu3 %vm134_vm1, %v3726_v46 }
0x1d1a   :  { %v4127_v44 = vpop.xlane.xlu1 %4126 }
0x1d22   :  { %v3848_v58 = vpop.xlane.xlu0 %3847 }
0x1d23   :  { %6121 = vrcp.f32 %v3848_v58  ;;  %v4130_v15 = vpop.xlane.xlu1 %4129 }
0x1d24   :  { %6123 = vrcp.f32 %v3987_v28 }
0x1d29   :  { %v6122_v30 = vpop.eup %6121 }
0x1d2a   :  { %v3852_v31 = vmul.f32 %v6122_v30, %v6110_v33  ;;  %v3990_v38 = vpop.xlane.xlu0 %3989  ;;  %v6124_v16 = vpop.eup %6123  ;;  %v7375_v33 = vpack.i.bf16 %v5543_v7, %v5544_v11  ;;  %v5933_v11 = vld [vmem:[%s7702_s6 + $0x29] ss:$0 sm:$0xff] }
0x1d2b   :  { %6125 = vrcp.f32 %v3990_v38  ;;  %v3993_v43 = vmul.f32 %v6124_v16, %v7323_v52 }
0x1d2c   :  { %5519 = vmatmul.msk.f32.vlgmr.msrb.gmra.mxu3 %vm134_vm1, %v3852_v31  ;;  %6127 = vrcp.f32 %v4127_v44 }
0x1d2d   :  { %6129 = vrcp.f32 %v4130_v15 }
0x1d31   :  { %v6126_v39 = vpop.eup %6125 }
0x1d32   :  { %v3994_v48 = vmul.f32 %v6126_v39, %v6114_v14  ;;  %v6128_v50 = vpop.eup %6127 }
0x1d33   :  { %v6130_v55 = vpop.eup %6129  ;;  %v4133_v25 = vmul.f32 %v6128_v50, %v7332_v37 }
0x1d34   :  { %v4134_v56 = vmul.f32 %v6130_v55, %v6112_v2  ;;  %v5541_v2 = vld [vmem:[%s7700_s4 + $0x88] sm:$0xff] }
0x1d35   :  { %v7385_v9 = vpack.i.bf16 %v5541_v2, %v5542_v12  ;;  %4337 = vmatpush.msrb.mxu1 %v5541_v2 }
0x1d3b   :  { %v4136_v51 = vpop.permute.xlu1 %4135 }
0x1d3d   :  { %v5826_v40 = vpop.permute.xlu0 %5825 }
0x1d3e   :  { %v5828_v41 = vunpack.i.h.bf16 %v5826_v40  ;;  %v5827_v42 = vunpack.i.l.bf16 %v5826_v40 }
0x1d40   :  { %4016 = vmatpush.msrb.mxu2 %v5827_v42  ;;  %4042 = vmatpush.msra.mxu3 %v5828_v41 }
0x1d41   :  { %5524 = vmatmul.msk.f32.vlgmr.msrb.gmra.mxu2 %vm134_vm1, %v3993_v43  ;;  %5525 = vmatmul.msk.f32.vlgmr.msra.gmra.mxu3 %vm134_vm1, %v3994_v48 }
0x1d42   :  { %4156 = vmatpush.msra.mxu2 %v4136_v51  ;;  %4182 = vmatpush.msrb.mxu3 %v4162_v49 }
0x1d45   :  { %v5836_v63 = vpop.permute.xlu0 %5835 }
0x1d46   :  { %v5837_v13 = vunpack.i.l.bf16 %v5836_v63  ;;  %v5838_v0 = vunpack.i.h.bf16 %v5836_v63 }
0x1d48   :  { %4241 = vmatpush.msra.mxu0 %v5837_v13 }
0x1d49   :  { %5530 = vmatmul.msk.f32.vlgmr.msra.gmra.mxu2 %vm134_vm1, %v4133_v25  ;;  %5531 = vmatmul.msk.f32.vlgmr.msrb.gmra.mxu3 %vm134_vm1, %v4134_v56  ;;  %v5935_v25 = vld [vmem:[%s7702_s6 + $0x24] ss:$0 sm:$0xff] }
0x1d4a   :  { %4242 = vmatpush.msra.mxu0 %v5838_v0 }
0x1d5d   :  { %v3747_v52 = vpop.f32.mrf.mxu2 }
0x1d5e   :  { %3773 = vst.msk [vmem:[#allocation2] sm:$0xff] %vm134_vm1, %v3747_v52 }
0x1d70   :  { %v3877_v59 = vpop.f32.mrf.mxu2 }
0x1d71   :  { %3909 = vrot.lane.b32.xlu0 %v3877_v59, %s6222_s11 }
0x1d97   :  { %v3770_v10 = vpop.f32.mrf.mxu3 }
0x1d98   :  { %3774 = vst.msk [vmem:[#allocation2 + $0x8] sm:$0xff] %vm134_vm1, %v3770_v10 }
0x1daf   :  { %v3904_v4 = vpop.f32.mrf.mxu3 }
0x1db0   :  { %3911 = vrot.lane.b32.xlu1 %v3904_v4, %s6222_s11 }
0x1db8   :  { %5840 = vrot.lane.b32.xlu1 %v7375_v33, %s6216_s25 }
0x1dc0   :  { %5845 = vrot.lane.b32.xlu1 %v7385_v9, %s6216_s25 }
0x1dc4   :  { %v4018_v54 = vpop.f32.mrf.mxu2  ;;  %v4044_v61 = vpop.f32.mrf.mxu3 }
0x1dc5   :  { %4049 = vrot.lane.b32.xlu2 %v4018_v54, %s6223_s12 }
0x1dcc   :  { %v4158_v1 = vpop.f32.mrf.mxu2  ;;  %v4184_v36 = vpop.f32.mrf.mxu3 }
0x1dcd   :  { %4051 = vrot.lane.b32.xlu2 %v4044_v61, %s6223_s12  ;;  %4189 = vrot.lane.b32.xlu0 %v4158_v1, %s6224_s13 }
0x1dd5   :  { %4191 = vrot.lane.b32.xlu0 %v4184_v36, %s6224_s13 }
0x1de3   :  { %v3910_v37 = vpop.permute.xlu0 %3909 }
0x1de4   :  { %3915 = vst.msk [vmem:[#allocation2] sm:$0xff] %vm396_vm2, %v3910_v37 }
0x1e1f   :  { %v4050_v3 = vpop.permute.xlu2 %4049 }
0x1e20   :  { %4055 = vst.msk [vmem:[#allocation2] sm:$0xff] %vm537_vm3, %v4050_v3 }
0x1e22   :  { %v3912_v5 = vpop.permute.xlu1 %3911 }
0x1e23   :  { %3916 = vst.msk [vmem:[#allocation2 + $0x8] sm:$0xff] %vm396_vm2, %v3912_v5 }
0x1e27   :  { %v4052_v6 = vpop.permute.xlu2 %4051 }
0x1e28   :  { %4056 = vst.msk [vmem:[#allocation2 + $0x8] sm:$0xff] %vm537_vm3, %v4052_v6 }
0x1e2a   :  { %v5841_v53 = vpop.permute.xlu1 %5840 }
0x1e2b   :  { %v5843_v20 = vunpack.i.h.bf16 %v5841_v53  ;;  %v5842_v21 = vunpack.i.l.bf16 %v5841_v53 }
0x1e2d   :  { %4375 = vmatpush.msrb.mxu2 %v5842_v21 }
0x1e2f   :  { %4376 = vmatpush.msrb.mxu2 %v5843_v20 }
0x1e32   :  { %v5846_v22 = vpop.permute.xlu1 %5845 }
0x1e33   :  { %v5848_v28 = vunpack.i.h.bf16 %v5846_v22  ;;  %v5847_v45 = vunpack.i.l.bf16 %v5846_v22 }
0x1e35   :  { %4377 = vmatpush.msrb.mxu2 %v5847_v45  ;;  %v6183_v45 = vld [vmem:[%s7698_s2] sm:$0xff] }
0x1e37   :  { %4378 = vmatpush.msrb.mxu2 %v5848_v28 }
0x1e38   :  { %5549 = vmatmul.msk.f32.vlgmr.msrb.gmra.mxu2 %vm54_vm0, %v6485_v47 }
0x1e3f   :  { %v4190_v14 = vpop.permute.xlu0 %4189 }
0x1e40   :  { %4195 = vst.msk [vmem:[#allocation2] sm:$0xff] %vm678_vm4, %v4190_v14  ;;  %5550 = vmatmul.msk.f32.gmra.mxu2 %vm54_vm0, %v6500_v57 }
0x1e47   :  { %v4192_v17 = vpop.permute.xlu0 %4191  ;;  %v4197_v18 = vld [vmem:[#allocation2] sm:$0xff] }
0x1e48   :  { %4196 = vst.msk [vmem:[#allocation2 + $0x8] sm:$0xff] %vm678_vm4, %v4192_v17  ;;  %5537 = vmatmul.msk.f32.vlgmr.msra.gmra.mxu0 %vm54_vm0, %v4197_v18  ;;  %5551 = vmatmul.msk.f32.gmra.mxu2 %vm54_vm0, %v6512_v34  ;;  %v5934_v17 = vld [vmem:[%s7702_s6 + $0x2a] ss:$0 sm:$0xff] }
0x1e4f   :  { %v4198_v19 = vld [vmem:[#allocation2 + $0x8] sm:$0xff] }
0x1e50   :  { %5538 = vmatmul.msk.f32.gmra.mxu0 %vm54_vm0, %v4198_v19  ;;  %5552 = vmatmul.msk.f32.gmra.mxu2 %vm54_vm0, %v6523_v26 }
0x1ebb   :  { %v4380_v56 = vpop.f32.mrf.mxu2 }
0x1ebc   :  { %v7431_v59 = vadd.f32 %v5935_v25, %v4380_v56 }
0x1ec3   :  { %v4383_v27 = vpop.f32.mrf.mxu2 }
0x1ec4   :  { %v4384_v63 = vadd.f32 %v5935_v25, %v4383_v27 }
0x1ec5   :  { %v4244_v46 = vpop.f32.mrf.mxu0 }
0x1ec6   :  { %v4245_v58 = vadd.f32 %v5932_v23, %v4244_v46  ;;  %5558 = vmatpush.xpose.msk.msrb.mxu0 %vm134_vm1, %v4384_v63 }
0x1ec8   :  { %v7399_v30 = vadd.f32 %v4245_v58, %v7235_v32 }
0x1eca   :  { %v4254_v31 = vsel %vm54_vm0, %v7399_v30, 0.0  ;;  %v4262_v44 = vmul.f32 %v7399_v30, %v7399_v30  ;;  %5559 = vmatpush.xpose.msk.msrb.mxu0 %vm134_vm1, %v7431_v59 }
0x1ecb   :  { %4255 = vadd.xlane.f32.xlu2 %v4254_v31  ;;  %v4386_v19 = vpop.f32.mrf.mxu2 }
0x1ecc   :  { %v4264_v38 = vsel %vm54_vm0, %v4262_v44, 0.0  ;;  %v7446_v20 = vadd.f32 %v5935_v25, %v4386_v19 }
0x1ecd   :  { %v4247_v15 = vpop.f32.mrf.mxu0  ;;  %4265 = vadd.xlane.f32.xlu0 %v4264_v38 }
0x1ece   :  { %v4248_v47 = vadd.f32 %v5932_v23, %v4247_v15 }
0x1ed0   :  { %v7409_v16 = vadd.f32 %v4248_v47, %v7247_v8 }
0x1ed2   :  { %v4257_v32 = vsel %vm54_vm0, %v7409_v16, 0.0  ;;  %v4263_v39 = vmul.f32 %v7409_v16, %v7409_v16 }
0x1ed3   :  { %4258 = vadd.xlane.f32.xlu1 %v4257_v32  ;;  %v4389_v44 = vpop.f32.mrf.mxu2  ;;  %v6185_v32 = vld [vmem:[%s7698_s2 + $0x10] sm:$0xff] }
0x1ed4   :  { %v4267_v57 = vsel %vm54_vm0, %v4263_v39, 0.0  ;;  %v7460_v38 = vadd.f32 %v5935_v25, %v4389_v44  ;;  %v5936_v39 = vld [vmem:[%s7702_s6 + $0x23] ss:$0 sm:$0xff] }
0x1ed5   :  { %4268 = vadd.xlane.f32.xlu2 %v4267_v57 }
0x1ed6   :  { %5561 = vmatpush.xpose.msk.msra.mxu1 %vm134_vm1, %v7460_v38 }
0x1eda   :  { %5562 = vmatpush.xpose.msk.msra.mxu1 %vm134_vm1, %v7446_v20 }
0x1ee1   :  { %5850 = vrot.lane.b32.xlu0 %v7375_v33, %s6213_s17 }
0x1eec   :  { %4565 = vrot.lane.b32.xlu1 %v7431_v59, %s6217_s26 }
0x1eed   :  { %5855 = vrot.lane.b32.xlu2 %v7385_v9, %s6213_s17 }
0x1ef4   :  { %4597 = vrot.lane.b32.xlu1 %v7446_v20, %s6217_s26 }
0x1ef5   :  { %4567 = vrot.lane.b32.xlu2 %v4384_v63, %s6217_s26 }
0x1efc   :  { %4879 = vrot.lane.b32.xlu1 %v4384_v63, %s6220_s9 }
0x1efd   :  { %4599 = vrot.lane.b32.xlu2 %v7460_v38, %s6217_s26 }
0x1f05   :  { %4725 = vrot.lane.b32.xlu2 %v4384_v63, %s6214_s23 }
0x1f0d   :  { %4723 = vrot.lane.b32.xlu2 %v7431_v59, %s6214_s23 }
0x1f15   :  { %4757 = vrot.lane.b32.xlu2 %v7460_v38, %s6214_s23 }
0x1f3e   :  { %v4256_v8 = vpop.xlane.xlu2 %4255 }
0x1f3f   :  { %v4260_v40 = vmul.f32 %v4256_v8, %v6460_v60 }
0x1f40   :  { %v4266_v41 = vpop.xlane.xlu0 %4265 }
0x1f41   :  { %v4274_v42 = vmul.f32 %v4260_v40, %v4260_v40  ;;  %v4270_v43 = vmul.f32 %v4266_v41, %v6460_v60  ;;  %v4272_v7 = vsub.f32 %v7399_v30, %v4260_v40  ;;  %v5937_v41 = vld [vmem:[%s7702_s6 + $0x25] ss:$0 sm:$0xff] }
0x1f43   :  { %v4276_v34 = vsub.f32 %v4270_v43, %v4274_v42 }
0x1f45   :  { %v4278_v48 = vadd.f32 1e-05, %v4276_v34 }
0x1f46   :  { %v4259_v49 = vpop.xlane.xlu1 %4258 }
0x1f47   :  { %6131 = vrsqrt.f32 %v4278_v48  ;;  %v4261_v51 = vmul.f32 %v4259_v49, %v6460_v60  ;;  %vm4286_vm6 = vweird.f32 %v4278_v48 }
0x1f48   :  { %v4269_v26 = vpop.xlane.xlu2 %4268 }
0x1f49   :  { %v4275_v50 = vmul.f32 %v4261_v51, %v4261_v51  ;;  %v4271_v55 = vmul.f32 %v4269_v26, %v6460_v60  ;;  %v4273_v46 = vsub.f32 %v7409_v16, %v4261_v51  ;;  %v6184_v16 = vld [vmem:[%s7698_s2 + $0x8] sm:$0xff] }
0x1f4b   :  { %v4277_v52 = vsub.f32 %v4271_v55, %v4275_v50 }
0x1f4d   :  { %v6132_v10 = vpop.eup %6131  ;;  %v4279_v4 = vadd.f32 1e-05, %v4277_v52 }
0x1f4e   :  { %v4281_v54 = vmul.f32 %v6132_v10, %v4278_v48  ;;  %vm4287_vm5 = vweird.f32 %v6132_v10 }
0x1f4f   :  { %6133 = vrsqrt.f32 %v4279_v4  ;;  %vm4288_vm7 = vmor %vm4286_vm6, %vm4287_vm5  ;;  %vm4296_vm10 = vweird.f32 %v4279_v4 }
0x1f50   :  { %v4282_v24 = vmul.f32 %v6132_v10, %v4281_v54  ;;  %v5856_v61 = vpop.permute.xlu2 %5855 }
0x1f51   :  { %v5857_v6 = vunpack.i.l.bf16 %v5856_v61  ;;  %v5858_v14 = vunpack.i.h.bf16 %v5856_v61 }
0x1f52   :  { %v4283_v62 = vmul.f32 0.5, %v4282_v24 }
0x1f53   :  { %v5851_v13 = vpop.permute.xlu0 %5850 }
0x1f54   :  { %v4284_v0 = vsub.f32 1.5, %v4283_v62  ;;  %v5853_v1 = vunpack.i.h.bf16 %v5851_v13  ;;  %v5852_v36 = vunpack.i.l.bf16 %v5851_v13 }
0x1f55   :  { %v6134_v37 = vpop.eup %6133 }
0x1f56   :  { %v4285_v3 = vmul.f32 %v6132_v10, %v4284_v0  ;;  %v4291_v5 = vmul.f32 %v6134_v37, %v4279_v4  ;;  %4418 = vmatpush.msra.mxu3 %v5852_v36  ;;  %vm4297_vm9 = vweird.f32 %v6134_v37 }
0x1f57   :  { %vm4298_vm11 = vmor %vm4296_vm10, %vm4297_vm9 }
0x1f58   :  { %v4289_v2 = vsel %vm4288_vm7, %v6132_v10, %v4285_v3  ;;  %v4292_v12 = vmul.f32 %v6134_v37, %v4291_v5  ;;  %4419 = vmatpush.msra.mxu3 %v5853_v1  ;;  %v4568_v51 = vpop.permute.xlu2 %4567 }
0x1f59   :  { %v4300_v18 = vmul.f32 %v4289_v2, %v4272_v7 }
0x1f5a   :  { %v4293_v53 = vmul.f32 0.5, %v4292_v12  ;;  %4420 = vmatpush.msra.mxu3 %v5857_v6 }
0x1f5b   :  { %v4303_v21 = vmul.f32 %v5933_v11, %v4300_v18 }
0x1f5c   :  { %v4294_v22 = vsub.f32 1.5, %v4293_v53  ;;  %4421 = vmatpush.msra.mxu3 %v5858_v14 }
0x1f5d   :  { %v7450_v28 = vadd.f32 %v5934_v17, %v4303_v21  ;;  %5554 = vmatmul.msk.f32.vlgmr.msra.gmra.mxu3 %vm54_vm0, %v6183_v45 }
0x1f5e   :  { %v4295_v23 = vmul.f32 %v6134_v37, %v4294_v22  ;;  %v4566_v26 = vpop.permute.xlu1 %4565 }
0x1f5f   :  { %v4308_v58 = vadd.f32 %v7240_v35, %v7450_v28 }
0x1f60   :  { %v4299_v30 = vsel %vm4298_vm11, %v6134_v37, %v4295_v23  ;;  %v4600_v52 = vpop.permute.xlu2 %4599 }
0x1f61   :  { %v4301_v31 = vmul.f32 %v4299_v30, %v4273_v46  ;;  %5546 = vmatmul.msk.f32.vlgmr.msrb.gmra.mxu1 %vm54_vm0, %v4308_v58 }
0x1f63   :  { %v4304_v15 = vmul.f32 %v5933_v11, %v4301_v31 }
0x1f65   :  { %v7465_v47 = vadd.f32 %v5934_v17, %v4304_v15  ;;  %5555 = vmatmul.msk.f32.gmra.mxu3 %vm54_vm0, %v6184_v16 }
0x1f66   :  { %v4598_v10 = vpop.permute.xlu1 %4597 }
0x1f67   :  { %v4309_v35 = vadd.f32 %v7252_v29, %v7465_v47  ;;  %v6186_v29 = vld [vmem:[%s7698_s2 + $0x18] sm:$0xff] }
0x1f69   :  { %5547 = vmatmul.msk.f32.gmra.mxu1 %vm54_vm0, %v4309_v35 }
0x1f6d   :  { %5556 = vmatmul.msk.f32.gmra.mxu3 %vm54_vm0, %v6185_v32 }
0x1f6e   :  { %v4880_v62 = vpop.permute.xlu1 %4879 }
0x1f75   :  { %5557 = vmatmul.msk.f32.gmra.mxu3 %vm54_vm0, %v6186_v29 }
0x1fde   :  { %v4339_v57 = vpop.f32.mrf.mxu1 }
0x1fdf   :  { %v4340_v8 = vadd.f32 %v5936_v39, %v4339_v57 }
0x1fe0   :  { %v4423_v40 = vpop.f32.mrf.mxu3 }
0x1fe1   :  { %4721 = vrot.lane.b32.xlu1 %v4340_v8, %s6214_s23  ;;  %4563 = vrot.lane.b32.xlu2 %v4340_v8, %s6217_s26  ;;  %v7503_v48 = vadd.f32 %v5937_v41, %v4423_v40 }
0x1fe2   :  { %5560 = vmatmul.msk.f32.vlgmr.msrb.gmra.mxu0 %vm134_vm1, %v4340_v8 }
0x1fe6   :  { %v4342_v42 = vpop.f32.mrf.mxu1 }
0x1fe7   :  { %v4343_v43 = vadd.f32 %v5936_v39, %v4342_v42 }
0x1fe8   :  { %v4426_v34 = vpop.f32.mrf.mxu3 }
0x1fe9   :  { %4755 = vrot.lane.b32.xlu2 %v7446_v20, %s6214_s23  ;;  %4595 = vrot.lane.b32.xlu0 %v4343_v43, %s6217_s26  ;;  %v7505_v49 = vadd.f32 %v5937_v41, %v4426_v34 }
0x1fea   :  { %5563 = vmatmul.msk.f32.vlgmr.msra.gmra.mxu1 %vm134_vm1, %v4343_v43 }
0x1feb   :  { %4532 = vmatpush.msra.mxu0 %v7505_v49  ;;  %v5859_v34 = vpack.i.bf16 %v7503_v48, %v7505_v49 }
0x1fed   :  { %4533 = vmatpush.msra.mxu0 %v7503_v48 }
0x1fef   :  { %5566 = vmatpush.xpose.msk.msrb.mxu0 %vm134_vm1, %v4568_v51 }
0x1ff0   :  { %v4429_v50 = vpop.f32.mrf.mxu3 }
0x1ff1   :  { %4875 = vrot.lane.b32.xlu2 %v4340_v8, %s6220_s9  ;;  %4753 = vrot.lane.b32.xlu0 %v4343_v43, %s6214_s23  ;;  %v7515_v25 = vadd.f32 %v5937_v41, %v4429_v50 }
0x1ff3   :  { %5567 = vmatpush.xpose.msk.msrb.mxu0 %vm134_vm1, %v4566_v26 }
0x1ff8   :  { %v4432_v55 = vpop.f32.mrf.mxu3 }
0x1ff9   :  { %4907 = vrot.lane.b32.xlu2 %v4343_v43, %s6220_s9  ;;  %v7517_v56 = vadd.f32 %v5937_v41, %v4432_v55 }
0x1ffb   :  { %4555 = vmatpush.msrb.mxu1 %v7517_v56  ;;  %v5864_v51 = vpack.i.bf16 %v7515_v25, %v7517_v56 }
0x1ffd   :  { %4556 = vmatpush.msrb.mxu1 %v7515_v25 }
0x1fff   :  { %5569 = vmatpush.xpose.msk.msra.mxu1 %vm134_vm1, %v4600_v52 }
0x2003   :  { %5570 = vmatpush.xpose.msk.msra.mxu1 %vm134_vm1, %v4598_v10 }
0x2053   :  { %v4722_v63 = vpop.permute.xlu1 %4721 }
0x205b   :  { %v4596_v11 = vpop.permute.xlu0 %4595 }
0x205f   :  { %v4461_v4 = vpop.f32.mrf.mxu0 }
0x2060   :  { %v4493_v54 = vsel %vm1008_vm12, %v4461_v4, -inf }
0x2061   :  { %4494 = vmax.xlane.f32.xlu1 %v4493_v54 }
0x2063   :  { %v4754_v12 = vpop.permute.xlu0 %4753 }
0x2067   :  { %v4490_v24 = vpop.f32.mrf.mxu1 }
0x2068   :  { %v4496_v27 = vsel %vm1008_vm12, %v4490_v24, -inf }
0x2069   :  { %4497 = vmax.xlane.f32.xlu1 %v4496_v27 }
0x2082   :  { %4877 = vrot.lane.b32.xlu1 %v7431_v59, %s6220_s9  ;;  %v4726_v59 = vpop.permute.xlu2 %4725 }
0x208a   :  { %v4724_v2 = vpop.permute.xlu2 %4723 }
0x2092   :  { %v4758_v18 = vpop.permute.xlu2 %4757 }
0x209a   :  { %v4564_v22 = vpop.permute.xlu2 %4563 }
0x20a2   :  { %v4756_v23 = vpop.permute.xlu2 %4755 }
0x20aa   :  { %v4876_v46 = vpop.permute.xlu2 %4875 }
0x20b2   :  { %v4908_v31 = vpop.permute.xlu2 %4907 }
0x20d4   :  { %v4495_v13 = vpop.xlane.xlu1 %4494 }
0x20d5   :  { %v4499_v61 = vsub.f32 %v4461_v4, %v4495_v13 }
0x20d7   :  { %v4501_v0 = vmul.f32 1.442695, %v4499_v61 }
0x20d9   :  { %6135 = vpow2.f32 %v4501_v0 }
0x20dc   :  { %v4498_v1 = vpop.xlane.xlu1 %4497 }
0x20dd   :  { %v4500_v36 = vsub.f32 %v4490_v24, %v4498_v1 }
0x20df   :  { %v6136_v37 = vpop.eup %6135  ;;  %v4503_v3 = vmul.f32 1.442695, %v4500_v36 }
0x20e0   :  { %v4505_v5 = vsel %vm1008_vm12, %v6136_v37, 0.0 }
0x20e1   :  { %6137 = vpow2.f32 %v4503_v3  ;;  %4506 = vadd.xlane.f32.xlu0 %v4505_v5 }
0x20e7   :  { %v6138_v6 = vpop.eup %6137 }
0x20e8   :  { %v4508_v7 = vsel %vm1008_vm12, %v6138_v6, 0.0 }
0x20e9   :  { %4509 = vadd.xlane.f32.xlu1 %v4508_v7 }
0x20f4   :  { %v4878_v14 = vpop.permute.xlu1 %4877 }
0x20f5   :  { %4909 = vrot.lane.b32.xlu0 %v7446_v20, %s6220_s9 }
0x2102   :  { %4911 = vrot.lane.b32.xlu1 %v7460_v38, %s6220_s9 }
0x2154   :  { %v4507_v17 = vpop.xlane.xlu0 %4506 }
0x2155   :  { %6139 = vrcp.f32 %v4507_v17 }
0x215b   :  { %v6140_v19 = vpop.eup %6139 }
0x215c   :  { %v4513_v53 = vmul.f32 %v6140_v19, %v6136_v37  ;;  %v4510_v21 = vpop.xlane.xlu1 %4509 }
0x215d   :  { %6141 = vrcp.f32 %v4510_v21 }
0x215e   :  { %5564 = vmatmul.msk.f32.vlgmr.msra.gmra.mxu0 %vm1008_vm12, %v4513_v53 }
0x215f   :  { %5574 = vmatpush.xpose.msk.msra.mxu0 %vm134_vm1, %v4726_v59 }
0x2163   :  { %v6142_v20 = vpop.eup %6141  ;;  %5575 = vmatpush.xpose.msk.msra.mxu0 %vm134_vm1, %v4724_v2 }
0x2164   :  { %v4514_v45 = vmul.f32 %v6142_v20, %v6138_v6 }
0x2166   :  { %5565 = vmatmul.msk.f32.vlgmr.msrb.gmra.mxu1 %vm1008_vm12, %v4514_v45  ;;  %5568 = vmatmul.msk.f32.vlgmr.msrb.gmra.mxu0 %vm134_vm1, %v4564_v22 }
0x2167   :  { %5577 = vmatpush.xpose.msk.msrb.mxu1 %vm134_vm1, %v4758_v18  ;;  %5582 = vmatpush.xpose.msk.msrb.mxu0 %vm134_vm1, %v4880_v62  ;;  %v4910_v30 = vpop.permute.xlu0 %4909 }
0x216b   :  { %5578 = vmatpush.xpose.msk.msrb.mxu1 %vm134_vm1, %v4756_v23  ;;  %5583 = vmatpush.xpose.msk.msrb.mxu0 %vm134_vm1, %v4878_v14 }
0x216e   :  { %5571 = vmatmul.msk.f32.vlgmr.msra.gmra.mxu1 %vm134_vm1, %v4596_v11  ;;  %5576 = vmatmul.msk.f32.vlgmr.msra.gmra.mxu0 %vm134_vm1, %v4722_v63 }
0x2174   :  { %v4912_v58 = vpop.permute.xlu1 %4911 }
0x2175   :  { %5585 = vmatpush.xpose.msk.msra.mxu1 %vm134_vm1, %v4912_v58 }
0x2176   :  { %5579 = vmatmul.msk.f32.vlgmr.msrb.gmra.mxu1 %vm134_vm1, %v4754_v12  ;;  %5584 = vmatmul.msk.f32.vlgmr.msrb.gmra.mxu0 %vm134_vm1, %v4876_v46 }
0x2179   :  { %5586 = vmatpush.xpose.msk.msra.mxu1 %vm134_vm1, %v4910_v30 }
0x217e   :  { %5587 = vmatmul.msk.f32.vlgmr.msra.gmra.mxu1 %vm134_vm1, %v4908_v31 }
0x21db   :  { %v4535_v44 = vpop.f32.mrf.mxu0 }
0x21dc   :  { %4561 = vst.msk [vmem:[#allocation2] sm:$0xff] %vm134_vm1, %v4535_v44 }
0x21e3   :  { %v4558_v38 = vpop.f32.mrf.mxu1  ;;  %v4592_v15 = vpop.f32.mrf.mxu0 }
0x21e4   :  { %4562 = vst.msk [vmem:[#allocation2 + $0x8] sm:$0xff] %vm134_vm1, %v4558_v38  ;;  %v4627_v16 = vsel %vm1008_vm12, %v4592_v15, -inf }
0x21e5   :  { %4628 = vmax.xlane.f32.xlu1 %v4627_v16 }
0x21eb   :  { %v4624_v35 = vpop.f32.mrf.mxu1  ;;  %v4750_v32 = vpop.f32.mrf.mxu0 }
0x21ec   :  { %v4630_v29 = vsel %vm1008_vm12, %v4624_v35, -inf  ;;  %v4785_v39 = vsel %vm1008_vm12, %v4750_v32, -inf }
0x21ed   :  { %4631 = vmax.xlane.f32.xlu0 %v4630_v29  ;;  %4786 = vmax.xlane.f32.xlu2 %v4785_v39 }
0x21f3   :  { %v4782_v57 = vpop.f32.mrf.mxu1  ;;  %v4904_v8 = vpop.f32.mrf.mxu0 }
0x21f4   :  { %v4939_v40 = vsel %vm1008_vm12, %v4904_v8, -inf  ;;  %v4788_v41 = vsel %vm1008_vm12, %v4782_v57, -inf }
0x21f5   :  { %4940 = vmax.xlane.f32.xlu2 %v4939_v40  ;;  %4789 = vmax.xlane.f32.xlu1 %v4788_v41 }
0x21fb   :  { %v7556_v42 = vpop.f32.mrf.mxu1 }
0x21fc   :  { %v4942_v43 = vsel %vm1008_vm12, %v7556_v42, -inf }
0x21fd   :  { %4943 = vmax.xlane.f32.xlu0 %v4942_v43 }
0x220d   :  { %5860 = vrot.lane.b32.xlu2 %v5859_v34, %s6217_s26 }
0x220e   :  { %5870 = vrot.lane.b32.xlu1 %v5859_v34, %s6214_s23 }
0x2211   :  { %5865 = vrot.lane.b32.xlu0 %v5864_v51, %s6217_s26 }
0x2258   :  { %v4629_v26 = vpop.xlane.xlu1 %4628 }
0x2259   :  { %v4633_v50 = vsub.f32 %v4592_v15, %v4629_v26 }
0x225b   :  { %v4635_v55 = vmul.f32 1.442695, %v4633_v50 }
0x225d   :  { %6143 = vpow2.f32 %v4635_v55 }
0x2260   :  { %v4632_v52 = vpop.xlane.xlu0 %4631  ;;  %v4787_v10 = vpop.xlane.xlu2 %4786 }
0x2261   :  { %v4634_v4 = vsub.f32 %v4624_v35, %v4632_v52  ;;  %v4791_v54 = vsub.f32 %v4750_v32, %v4787_v10 }
0x2263   :  { %v6144_v24 = vpop.eup %6143  ;;  %v4637_v27 = vmul.f32 1.442695, %v4634_v4  ;;  %v4793_v48 = vmul.f32 1.442695, %v4791_v54 }
0x2264   :  { %v4639_v49 = vsel %vm1008_vm12, %v6144_v24, 0.0 }
0x2265   :  { %6145 = vpow2.f32 %v4637_v27  ;;  %4640 = vadd.xlane.f32.xlu1 %v4639_v49 }
0x2266   :  { %6147 = vpow2.f32 %v4793_v48 }
0x2268   :  { %v4941_v62 = vpop.xlane.xlu2 %4940  ;;  %v4790_v25 = vpop.xlane.xlu1 %4789 }
0x2269   :  { %v4945_v56 = vsub.f32 %v4904_v8, %v4941_v62  ;;  %v4792_v63 = vsub.f32 %v4782_v57, %v4790_v25 }
0x226b   :  { %v6146_v13 = vpop.eup %6145  ;;  %v4947_v61 = vmul.f32 1.442695, %v4945_v56  ;;  %v4795_v0 = vmul.f32 1.442695, %v4792_v63 }
0x226c   :  { %v6148_v1 = vpop.eup %6147  ;;  %v4642_v36 = vsel %vm1008_vm12, %v6146_v13, 0.0 }
0x226d   :  { %6149 = vpow2.f32 %v4947_v61  ;;  %4643 = vadd.xlane.f32.xlu0 %v4642_v36  ;;  %v4797_v37 = vsel %vm1008_vm12, %v6148_v1, 0.0 }
0x226e   :  { %6151 = vpow2.f32 %v4795_v0  ;;  %4798 = vadd.xlane.f32.xlu1 %v4797_v37 }
0x2270   :  { %v5861_v3 = vpop.permute.xlu2 %5860  ;;  %v4944_v12 = vpop.xlane.xlu0 %4943 }
0x2271   :  { %v5862_v5 = vunpack.i.l.bf16 %v5861_v3  ;;  %v5863_v7 = vunpack.i.h.bf16 %v5861_v3  ;;  %v4946_v22 = vsub.f32 %v7556_v42, %v4944_v12 }
0x2273   :  { %v7570_v6 = vpop.eup %6149  ;;  %4674 = vmatpush.msra.mxu2 %v5862_v5  ;;  %v4949_v20 = vmul.f32 1.442695, %v4946_v22 }
0x2274   :  { %v6152_v59 = vpop.eup %6151  ;;  %v4951_v11 = vsel %vm1008_vm12, %v7570_v6, 0.0 }
0x2275   :  { %4952 = vadd.xlane.f32.xlu0 %v4951_v11  ;;  %4675 = vmatpush.msra.mxu2 %v5863_v7  ;;  %v4800_v2 = vsel %vm1008_vm12, %v6152_v59, 0.0  ;;  %6153 = vpow2.f32 %v4949_v20 }
0x2276   :  { %4801 = vadd.xlane.f32.xlu2 %v4800_v2 }
0x227b   :  { %v6154_v45 = vpop.eup %6153 }
0x227c   :  { %v4954_v23 = vsel %vm1008_vm12, %v6154_v45, 0.0 }
0x2280   :  { %v5871_v14 = vpop.permute.xlu1 %5870 }
0x2281   :  { %v5872_v17 = vunpack.i.l.bf16 %v5871_v14  ;;  %v5873_v18 = vunpack.i.h.bf16 %v5871_v14 }
0x2283   :  { %v5866_v19 = vpop.permute.xlu0 %5865  ;;  %4830 = vmatpush.msrb.mxu2 %v5872_v17 }
0x2284   :  { %v5867_v53 = vunpack.i.l.bf16 %v5866_v19  ;;  %v5868_v21 = vunpack.i.h.bf16 %v5866_v19 }
0x2285   :  { %4831 = vmatpush.msrb.mxu2 %v5873_v18 }
0x2286   :  { %4705 = vmatpush.msrb.mxu3 %v5867_v53 }
0x2287   :  { %5875 = vrot.lane.b32.xlu1 %v5864_v51, %s6214_s23 }
0x2288   :  { %4706 = vmatpush.msrb.mxu3 %v5868_v21 }
0x2289   :  { %5895 = vrot.lane.b32.xlu0 %v7385_v9, %s6221_s10 }
0x228e   :  { %5885 = vrot.lane.b32.xlu2 %v5864_v51, %s6220_s9 }
0x228f   :  { %5880 = vrot.lane.b32.xlu1 %v5859_v34, %s6220_s9 }
0x2296   :  { %5890 = vrot.lane.b32.xlu2 %v7375_v33, %s6221_s10 }
0x22b9   :  { %4955 = vadd.xlane.f32.xlu1 %v4954_v23  ;;  %v5600_v23 = vld [vmem:[%s7701_s5 + $0xc8] sm:$0xff] }
0x22d8   :  { %v4641_v46 = vpop.xlane.xlu1 %4640 }
0x22d9   :  { %6155 = vrcp.f32 %v4641_v46  ;;  %v5599_v46 = vld [vmem:[%s7701_s5 + $0xc0] sm:$0xff] }
0x22df   :  { %v6156_v58 = vpop.eup %6155 }
0x22e0   :  { %v4647_v30 = vmul.f32 %v6156_v58, %v6144_v24  ;;  %v4644_v9 = vpop.xlane.xlu0 %4643 }
0x22e1   :  { %6157 = vrcp.f32 %v4644_v9  ;;  %v4799_v31 = vpop.xlane.xlu1 %4798 }
0x22e2   :  { %6159 = vrcp.f32 %v4799_v31  ;;  %5572 = vmatmul.msk.f32.vlgmr.msra.gmra.mxu2 %vm1008_vm12, %v4647_v30 }
0x22e7   :  { %v6158_v44 = vpop.eup %6157 }
0x22e8   :  { %v6160_v33 = vpop.eup %6159  ;;  %v4648_v38 = vmul.f32 %v6158_v44, %v6146_v13  ;;  %v4953_v35 = vpop.xlane.xlu0 %4952 }
0x22e9   :  { %v4805_v15 = vmul.f32 %v6160_v33, %v6148_v1  ;;  %v4802_v16 = vpop.xlane.xlu2 %4801 }
0x22ea   :  { %5573 = vmatmul.msk.f32.vlgmr.msrb.gmra.mxu3 %vm1008_vm12, %v4648_v38  ;;  %6161 = vrcp.f32 %v4802_v16 }
0x22eb   :  { %5580 = vmatmul.msk.f32.vlgmr.msrb.gmra.mxu2 %vm1008_vm12, %v4805_v15  ;;  %6163 = vrcp.f32 %v4953_v35 }
0x22f0   :  { %v6162_v29 = vpop.eup %6161 }
0x22f1   :  { %v5886_v57 = vpop.permute.xlu2 %5885  ;;  %v4806_v40 = vmul.f32 %v6162_v29, %v6152_v59  ;;  %v6164_v34 = vpop.eup %6163  ;;  %v5938_v59 = vld [vmem:[%s7702_s6 + $0x26] ss:$0 sm:$0xff] }
0x22f2   :  { %v5887_v41 = vunpack.i.l.bf16 %v5886_v57  ;;  %v5888_v42 = vunpack.i.h.bf16 %v5886_v57  ;;  %v4959_v50 = vmul.f32 %v6164_v34, %v7570_v6 }
0x22f9   :  { %v5876_v32 = vpop.permute.xlu1 %5875  ;;  %v5891_v49 = vpop.permute.xlu2 %5890 }
0x22fa   :  { %v5877_v39 = vunpack.i.l.bf16 %v5876_v32  ;;  %v5878_v8 = vunpack.i.h.bf16 %v5876_v32  ;;  %v5893_v62 = vunpack.i.h.bf16 %v5891_v49  ;;  %v5892_v25 = vunpack.i.l.bf16 %v5891_v49  ;;  %v5609_v49 = vld [vmem:[%s7701_s5 + $0xf8] sm:$0xff] }
0x22fb   :  { %v5896_v56 = vpop.permute.xlu0 %5895 }
0x22fc   :  { %4859 = vmatpush.msra.mxu3 %v5877_v39  ;;  %5071 = vmatpush.msra.mxu0 %v5892_v25  ;;  %v5898_v63 = vunpack.i.h.bf16 %v5896_v56  ;;  %v5897_v13 = vunpack.i.l.bf16 %v5896_v56 }
0x22fe   :  { %4860 = vmatpush.msra.mxu3 %v5878_v8  ;;  %5072 = vmatpush.msra.mxu0 %v5893_v62  ;;  %v5939_v8 = vld [vmem:[%s7702_s6 + $0x2b] ss:$0 sm:$0xff] }
0x22ff   :  { %5581 = vmatmul.msk.f32.vlgmr.msra.gmra.mxu3 %vm1008_vm12, %v4806_v40 }
0x2300   :  { %5013 = vmatpush.msrb.mxu3 %v5887_v41  ;;  %5073 = vmatpush.msra.mxu0 %v5897_v13  ;;  %v5940_v41 = vld [vmem:[%s7702_s6 + $0x2c] ss:$0 sm:$0xff] }
0x2301   :  { %v5881_v43 = vpop.permute.xlu1 %5880 }
0x2302   :  { %v5882_v51 = vunpack.i.l.bf16 %v5881_v43  ;;  %5014 = vmatpush.msrb.mxu3 %v5888_v42  ;;  %v5883_v26 = vunpack.i.h.bf16 %v5881_v43  ;;  %5074 = vmatpush.msra.mxu0 %v5898_v63 }
0x2304   :  { %4984 = vmatpush.msra.mxu2 %v5882_v51 }
0x2306   :  { %4985 = vmatpush.msra.mxu2 %v5883_v26 }
0x2307   :  { %5588 = vmatmul.msk.f32.vlgmr.msra.gmra.mxu2 %vm1008_vm12, %v4959_v50  ;;  %v5613_v50 = vld [vmem:[%s7701_s5 + $0x118] sm:$0xff] }
0x2308   :  { %5202 = vmatpush.msrb.mxu2 %v5613_v50 }
0x232c   :  { %v4956_v55 = vpop.xlane.xlu1 %4955 }
0x232d   :  { %6165 = vrcp.f32 %v4956_v55  ;;  %v5612_v55 = vld [vmem:[%s7701_s5 + $0x110] sm:$0xff] }
0x232e   :  { %5203 = vmatpush.msrb.mxu2 %v5612_v55 }
0x2333   :  { %v6166_v52 = vpop.eup %6165 }
0x2334   :  { %v4960_v10 = vmul.f32 %v6166_v52, %v6154_v45  ;;  %v5602_v45 = vld [vmem:[%s7701_s5 + $0xd8] sm:$0xff] }
0x2335   :  { %5165 = vmatpush.msrb.mxu1 %v5602_v45 }
0x2336   :  { %5589 = vmatmul.msk.f32.vlgmr.msrb.gmra.mxu3 %vm1008_vm12, %v4960_v10 }
0x2365   :  { %v4677_v4 = vpop.f32.mrf.mxu2 }
0x2366   :  { %4713 = vrot.lane.b32.xlu0 %v4677_v4, %s6222_s11 }
0x236d   :  { %v4708_v54 = vpop.f32.mrf.mxu3 }
0x236e   :  { %v4833_v24 = vpop.f32.mrf.mxu2  ;;  %4715 = vrot.lane.b32.xlu1 %v4708_v54, %s6222_s11  ;;  %v5611_v54 = vld [vmem:[%s7701_s5 + $0x108] sm:$0xff] }
0x236f   :  { %4867 = vrot.lane.b32.xlu2 %v4833_v24, %s6223_s12  ;;  %5204 = vmatpush.msrb.mxu2 %v5611_v54 }
0x2382   :  { %v4862_v27 = vpop.f32.mrf.mxu3 }
0x2383   :  { %4869 = vrot.lane.b32.xlu2 %v4862_v27, %s6223_s12  ;;  %v5610_v27 = vld [vmem:[%s7701_s5 + $0x100] sm:$0xff] }
0x2384   :  { %5205 = vmatpush.msrb.mxu2 %v5610_v27 }
0x2386   :  { %5206 = vmatpush.msrb.mxu2 %v5609_v49 }
0x238a   :  { %v4987_v48 = vpop.f32.mrf.mxu2 }
0x238b   :  { %5021 = vrot.lane.b32.xlu0 %v4987_v48, %s6224_s13 }
0x23b9   :  { %v5016_v61 = vpop.f32.mrf.mxu3 }
0x23ba   :  { %5023 = vrot.lane.b32.xlu0 %v5016_v61, %s6224_s13 }
0x23c9   :  { %v4868_v1 = vpop.permute.xlu2 %4867 }
0x23d8   :  { %v4714_v0 = vpop.permute.xlu0 %4713 }
0x23d9   :  { %4719 = vst.msk [vmem:[#allocation2] sm:$0xff] %vm396_vm2, %v4714_v0 }
0x23da   :  { %4873 = vst.msk [vmem:[#allocation2] sm:$0xff] %vm537_vm3, %v4868_v1 }
0x23dd   :  { %v4870_v37 = vpop.permute.xlu2 %4869 }
0x23e0   :  { %v4716_v36 = vpop.permute.xlu1 %4715 }
0x23e1   :  { %4720 = vst.msk [vmem:[#allocation2 + $0x8] sm:$0xff] %vm396_vm2, %v4716_v36 }
0x23e2   :  { %4874 = vst.msk [vmem:[#allocation2 + $0x8] sm:$0xff] %vm537_vm3, %v4870_v37 }
0x23fd   :  { %v5022_v3 = vpop.permute.xlu0 %5021 }
0x23fe   :  { %5027 = vst.msk [vmem:[#allocation2] sm:$0xff] %vm678_vm4, %v5022_v3 }
0x2405   :  { %v5029_v5 = vld [vmem:[#allocation2] sm:$0xff] }
0x2406   :  { %5595 = vmatmul.msk.f32.vlgmr.msra.gmra.mxu0 %vm54_vm0, %v5029_v5  ;;  %v5608_v5 = vld [vmem:[%s7701_s5 + $0xf0] sm:$0xff] }
0x2407   :  { %5207 = vmatpush.msrb.mxu2 %v5608_v5 }
0x242c   :  { %v5024_v6 = vpop.permute.xlu0 %5023 }
0x242d   :  { %5028 = vst.msk [vmem:[#allocation2 + $0x8] sm:$0xff] %vm678_vm4, %v5024_v6  ;;  %v5607_v6 = vld [vmem:[%s7701_s5 + $0xe8] sm:$0xff] }
0x242e   :  { %5208 = vmatpush.msrb.mxu2 %v5607_v6 }
0x2434   :  { %v5030_v7 = vld [vmem:[#allocation2 + $0x8] sm:$0xff] }
0x2435   :  { %5596 = vmatmul.msk.f32.gmra.mxu0 %vm54_vm0, %v5030_v7  ;;  %v5606_v7 = vld [vmem:[%s7701_s5 + $0xe0] sm:$0xff] }
0x2436   :  { %5209 = vmatpush.msrb.mxu2 %v5606_v7 }
0x2483   :  { %v5076_v11 = vpop.f32.mrf.mxu0 }
0x2484   :  { %v5077_v2 = vadd.f32 %v5938_v59, %v5076_v11 }
0x2486   :  { %v5082_v12 = vadd.f32 %v5077_v2, %v7450_v28 }
0x2488   :  { %v5086_v14 = vsel %vm54_vm0, %v5082_v12, 0.0  ;;  %v5094_v17 = vmul.f32 %v5082_v12, %v5082_v12 }
0x2489   :  { %5087 = vadd.xlane.f32.xlu2 %v5086_v14 }
0x248a   :  { %v5096_v18 = vsel %vm54_vm0, %v5094_v17, 0.0 }
0x248b   :  { %5097 = vadd.xlane.f32.xlu0 %v5096_v18 }
0x24b2   :  { %v5079_v19 = vpop.f32.mrf.mxu0 }
0x24b3   :  { %v5080_v53 = vadd.f32 %v5938_v59, %v5079_v19  ;;  %v5941_v59 = vld [vmem:[%s7702_s6 + $0x27] ss:$0 sm:$0xff]  ;;  %v5942_v19 = vld [vmem:[%s7702_s6 + $0x28] ss:$0 sm:$0xff] }
0x24b5   :  { %v7612_v21 = vadd.f32 %v5080_v53, %v7465_v47  ;;  %v5601_v47 = vld [vmem:[%s7701_s5 + $0xd0] sm:$0xff] }
0x24b6   :  { %5166 = vmatpush.msrb.mxu1 %v5601_v47 }
0x24b7   :  { %v5089_v22 = vsel %vm54_vm0, %v7612_v21, 0.0  ;;  %v5095_v20 = vmul.f32 %v7612_v21, %v7612_v21 }
0x24b8   :  { %5090 = vadd.xlane.f32.xlu1 %v5089_v22  ;;  %5167 = vmatpush.msrb.mxu1 %v5600_v23 }
0x24b9   :  { %v5099_v28 = vsel %vm54_vm0, %v5095_v20, 0.0 }
0x24ba   :  { %5100 = vadd.xlane.f32.xlu2 %v5099_v28  ;;  %5168 = vmatpush.msrb.mxu1 %v5599_v46 }
0x24fc   :  { %v5088_v58 = vpop.xlane.xlu2 %5087 }
0x24fd   :  { %v5092_v30 = vmul.f32 %v5088_v58, %v6460_v60 }
0x24fe   :  { %v5098_v9 = vpop.xlane.xlu0 %5097 }
0x24ff   :  { %v5106_v31 = vmul.f32 %v5092_v30, %v5092_v30  ;;  %v5102_v44 = vmul.f32 %v5098_v9, %v6460_v60  ;;  %v5104_v57 = vsub.f32 %v5082_v12, %v5092_v30 }
0x2501   :  { %v5108_v33 = vsub.f32 %v5102_v44, %v5106_v31 }
0x2503   :  { %v5110_v38 = vadd.f32 1e-05, %v5108_v33 }
0x2505   :  { %6167 = vrsqrt.f32 %v5110_v38  ;;  %vm5118_vm2 = vweird.f32 %v5110_v38 }
0x250b   :  { %v6168_v15 = vpop.eup %6167 }
0x250c   :  { %v5113_v16 = vmul.f32 %v6168_v15, %v5110_v38  ;;  %vm5119_vm1 = vweird.f32 %v6168_v15 }
0x250d   :  { %vm5120_vm3 = vmor %vm5118_vm2, %vm5119_vm1 }
0x250e   :  { %v5114_v35 = vmul.f32 %v6168_v15, %v5113_v16 }
0x2510   :  { %v5115_v32 = vmul.f32 0.5, %v5114_v35 }
0x2512   :  { %v5116_v29 = vsub.f32 1.5, %v5115_v32 }
0x2514   :  { %v5117_v39 = vmul.f32 %v6168_v15, %v5116_v29 }
0x2516   :  { %v5121_v40 = vsel %vm5120_vm3, %v6168_v15, %v5117_v39 }
0x2517   :  { %v5132_v42 = vmul.f32 %v5121_v40, %v5104_v57 }
0x2519   :  { %v5135_v43 = vmul.f32 %v5939_v8, %v5132_v42  ;;  %v5943_v42 = vld [vmem:[%s7702_s6 + $0x2d] ss:$0 sm:$0xff] }
0x251b   :  { %v5138_v34 = vadd.f32 %v5940_v41, %v5135_v43 }
0x251d   :  { %5604 = vmatmul.msk.f32.vlgmr.msrb.gmra.mxu1 %vm54_vm0, %v5138_v34 }
0x252b   :  { %v5091_v51 = vpop.xlane.xlu1 %5090 }
0x252c   :  { %v5093_v26 = vmul.f32 %v5091_v51, %v6460_v60  ;;  %v5944_v51 = vld [vmem:[%s7702_s6 + $0x2e] ss:$0 sm:$0xff]  ;;  %s6226_s6 = smov [#allocation3]  }
0x252d   :  { %v5101_v52 = vpop.xlane.xlu2 %5100  ;;  %s5281_s19 = sshll.u32 %s6226_s6, 4  ;;  %s5282_s19 = int_to_ptr.vmem [resolvable:$true] %s5281_s19 }
0x252e   :  { %v5107_v10 = vmul.f32 %v5093_v26, %v5093_v26  ;;  %v5103_v4 = vmul.f32 %v5101_v52, %v6460_v60  ;;  %v5105_v0 = vsub.f32 %v7612_v21, %v5093_v26 }
0x2530   :  { %v5109_v24 = vsub.f32 %v5103_v4, %v5107_v10 }
0x2532   :  { %v5111_v48 = vadd.f32 1e-05, %v5109_v24 }
0x2534   :  { %6169 = vrsqrt.f32 %v5111_v48  ;;  %vm5128_vm12 = vweird.f32 %v5111_v48 }
0x253a   :  { %v6170_v62 = vpop.eup %6169 }
0x253b   :  { %v5123_v25 = vmul.f32 %v6170_v62, %v5111_v48  ;;  %vm5129_vm4 = vweird.f32 %v6170_v62 }
0x253c   :  { %vm5130_vm13 = vmor %vm5128_vm12, %vm5129_vm4 }
0x253d   :  { %v5124_v56 = vmul.f32 %v6170_v62, %v5123_v25 }
0x253f   :  { %v5125_v63 = vmul.f32 0.5, %v5124_v56 }
0x2541   :  { %v5126_v13 = vsub.f32 1.5, %v5125_v63 }
0x2543   :  { %v5127_v61 = vmul.f32 %v6170_v62, %v5126_v13 }
0x2545   :  { %v5131_v1 = vsel %vm5130_vm13, %v6170_v62, %v5127_v61 }
0x2546   :  { %v5133_v36 = vmul.f32 %v5131_v1, %v5105_v0 }
0x2548   :  { %v5136_v37 = vmul.f32 %v5939_v8, %v5133_v36 }
0x254a   :  { %v5139_v3 = vadd.f32 %v5940_v41, %v5136_v37 }
0x254c   :  { %5605 = vmatmul.msk.f32.gmra.mxu1 %vm54_vm0, %v5139_v3 }
0x259a   :  { %v5170_v11 = vpop.f32.mrf.mxu1 }
0x259b   :  { %v5171_v2 = vadd.f32 %v5941_v59, %v5170_v11 }
0x259d   :  { %v5176_v12 = vmax.f32 %v5171_v2, 0.0 }
0x259f   :  { %5615 = vmatmul.msk.f32.vlgmr.msrb.gmra.mxu2 %vm1703_vm8, %v5176_v12 }
0x25c9   :  { %v5173_v14 = vpop.f32.mrf.mxu1 }
0x25ca   :  { %v5174_v17 = vadd.f32 %v5941_v59, %v5173_v14 }
0x25cc   :  { %v5177_v18 = vmax.f32 %v5174_v17, 0.0 }
0x25ce   :  { %5616 = vmatmul.msk.f32.gmra.mxu2 %vm1703_vm8, %v5177_v18 }
0x2622   :  { %v5211_v53 = vpop.f32.mrf.mxu2 }
0x2623   :  { %v5212_v21 = vadd.f32 %v5942_v19, %v5211_v53 }
0x2625   :  { %v5217_v22 = vadd.f32 %v5212_v21, %v5138_v34 }
0x2627   :  { %v5221_v20 = vsel %vm54_vm0, %v5217_v22, 0.0  ;;  %v5229_v28 = vmul.f32 %v5217_v22, %v5217_v22 }
0x2628   :  { %5222 = vadd.xlane.f32.xlu0 %v5221_v20 }
0x2629   :  { %v5231_v45 = vsel %vm54_vm0, %v5229_v28, 0.0 }
0x2630   :  { %5232 = vadd.xlane.f32.xlu0 %v5231_v45 }
0x2651   :  { %v5214_v47 = vpop.f32.mrf.mxu2 }
0x2652   :  { %v5215_v23 = vadd.f32 %v5942_v19, %v5214_v47 }
0x2654   :  { %v5218_v46 = vadd.f32 %v5215_v23, %v5139_v3 }
0x2656   :  { %v5224_v58 = vsel %vm54_vm0, %v5218_v46, 0.0  ;;  %v5230_v30 = vmul.f32 %v5218_v46, %v5218_v46 }
0x2657   :  { %5225 = vadd.xlane.f32.xlu2 %v5224_v58 }
0x2658   :  { %v5234_v9 = vsel %vm54_vm0, %v5230_v30, 0.0 }
0x2659   :  { %5235 = vadd.xlane.f32.xlu1 %v5234_v9 }
0x269b   :  { %v5223_v31 = vpop.xlane.xlu0 %5222 }
0x269c   :  { %v5227_v44 = vmul.f32 %v5223_v31, %v6460_v60 }
0x269e   :  { %v5241_v38 = vmul.f32 %v5227_v44, %v5227_v44  ;;  %v5239_v41 = vsub.f32 %v5217_v22, %v5227_v44 }
0x26a3   :  { %v5233_v33 = vpop.xlane.xlu0 %5232 }
0x26a4   :  { %v5237_v15 = vmul.f32 %v5233_v33, %v6460_v60 }
0x26a6   :  { %v5243_v16 = vsub.f32 %v5237_v15, %v5241_v38 }
0x26a8   :  { %v5245_v35 = vadd.f32 1e-05, %v5243_v16 }
0x26aa   :  { %6171 = vrsqrt.f32 %v5245_v35  ;;  %vm5253_vm14 = vweird.f32 %v5245_v35 }
0x26b0   :  { %v6172_v32 = vpop.eup %6171 }
0x26b1   :  { %v5248_v29 = vmul.f32 %v6172_v32, %v5245_v35  ;;  %vm5254_vm8 = vweird.f32 %v6172_v32 }
0x26b2   :  { %vm5255_vm15 = vmor %vm5253_vm14, %vm5254_vm8 }
0x26b3   :  { %v5249_v39 = vmul.f32 %v6172_v32, %v5248_v29 }
0x26b5   :  { %v5250_v57 = vmul.f32 0.5, %v5249_v39 }
0x26b7   :  { %v5251_v8 = vsub.f32 1.5, %v5250_v57 }
0x26b9   :  { %v5252_v40 = vmul.f32 %v6172_v32, %v5251_v8 }
0x26bb   :  { %v5256_v43 = vsel %vm5255_vm15, %v6172_v32, %v5252_v40 }
0x26bc   :  { %v5267_v34 = vmul.f32 %v5256_v43, %v5239_v41 }
0x26be   :  { %v5270_v26 = vmul.f32 %v5943_v42, %v5267_v34 }
0x26c0   :  { %v5273_v50 = vadd.f32 %v5944_v51, %v5270_v26 }
0x26c2   :  { %5275 = vst.msk [vmem:[#allocation3] sm:$0xff] %vm54_vm0, %v5273_v50 }
0x26ca   :  { %v5226_v55 = vpop.xlane.xlu2 %5225 }
0x26cb   :  { %v5228_v52 = vmul.f32 %v5226_v55, %v6460_v60 }
0x26cc   :  { %v5236_v10 = vpop.xlane.xlu1 %5235 }
0x26cd   :  { %v5242_v4 = vmul.f32 %v5228_v52, %v5228_v52  ;;  %v5238_v54 = vmul.f32 %v5236_v10, %v6460_v60  ;;  %v5240_v13 = vsub.f32 %v5218_v46, %v5228_v52 }
0x26cf   :  { %v5244_v24 = vsub.f32 %v5238_v54, %v5242_v4 }
0x26d1   :  { %v5246_v27 = vadd.f32 1e-05, %v5244_v24 }
0x26d3   :  { %6173 = vrsqrt.f32 %v5246_v27  ;;  %vm5263_vm6 = vweird.f32 %v5246_v27 }
0x26d9   :  { %v6174_v48 = vpop.eup %6173 }
0x26da   :  { %v5258_v49 = vmul.f32 %v6174_v48, %v5246_v27  ;;  %vm5264_vm5 = vweird.f32 %v6174_v48 }
0x26db   :  { %vm5265_vm7 = vmor %vm5263_vm6, %vm5264_vm5 }
0x26dc   :  { %v5259_v62 = vmul.f32 %v6174_v48, %v5258_v49 }
0x26de   :  { %v5260_v25 = vmul.f32 0.5, %v5259_v62 }
0x26e0   :  { %v5261_v56 = vsub.f32 1.5, %v5260_v25 }
0x26e2   :  { %v5262_v63 = vmul.f32 %v6174_v48, %v5261_v56 }
0x26e4   :  { %v5266_v61 = vsel %vm5265_vm7, %v6174_v48, %v5262_v63 }
0x26e5   :  { %v5268_v0 = vmul.f32 %v5266_v61, %v5240_v13 }
0x26e7   :  { %v5271_v60 = vmul.f32 %v5943_v42, %v5268_v0 }
0x26e9   :  { %v5274_v1 = vadd.f32 %v5944_v51, %v5271_v60 }
0x26eb   :  { %5276 = vst.msk [vmem:[#allocation3 + $0x8] sm:$0xff] %vm54_vm0, %v5274_v1 }
0x26ec   :  { %5289 = dma.vmem_to_hbm [thread:$0]  %s5282_s19, 256, %s5284_s7, [#allocation4], %s6227_s21, %s6227_s21, %s6222_s11  }
0x26ed   :  { %6211 = dma.done.wait [#allocation4], 256  }
0x26ee   :  { %6212 = vsyncadd [#allocation4], 4294967040 }
0x26ef   :  { %5294 = vsyncpa [#allocation4], 1 }

</bundles_post_ra>
